<compile_context>
chip_gen: v7x
topology: tpu7x:2x2x1
jax: 0.10.0
libtpu: 0.0.40
codegen_flags: <defaults>
</compile_context>

<pallas_src>
import jax
import jax.numpy as jnp
from jax.experimental import pallas as pl
from jax.experimental.pallas import tpu as pltpu  # noqa: F401  (TPU backend)

# ----------------------------- config (small shapes) -----------------------------
B = 2        # batch
S_SRC = 8    # padded source length
T_TGT = 8    # padded target length
VOCAB = 16   # shared src/tgt vocab == decoder.output_dim
EMB = 8      # embedding dim
HID = 32     # enc_hidden_dim == dec_hidden_dim == enc_outstate_dim (1 direction)


def _spec(shape):
    nd = len(shape)
    return pl.BlockSpec(shape, lambda i, nd=nd: (0,) * nd)


# ----------------------------- fused Pallas kernel -----------------------------
def seq2seq_kernel(src_ref, src_sz_ref, tok0_ref,
                   enc_emb_ref, enc_wih_ref, enc_whh_ref, enc_bih_ref, enc_bhh_ref,
                   dec_emb_ref, w1_ref, w2_ref, v_ref,
                   dec_wih_ref, dec_whh_ref, dec_bih_ref, dec_bhh_ref,
                   fc_w_ref, fc_b_ref,
                   out_ref):
    """Whole Seq2Seq forward (teacher_forcing_ratio == 0, pass_enc2dec_hid=True).

    src:(B,S) int32  src_sz:(B,1) int32  tok0:(B,1) int32 (= tgt[:,0])
    enc_emb/dec_emb:(V,E)   enc_wih:(3,E,H) enc_whh:(3,H,H) enc_b*:(3,1,H)
    w1,w2:(H,H) v:(H,1)     dec_wih:(3,H+E,H) dec_whh:(3,H,H) dec_b*:(3,1,H)
    fc_w:(E+2H,V) fc_b:(1,V)          out:(B,T,V) logits (t=0 row is the BOS one-hot)."""
    Bk, S = src_ref.shape
    V, E = enc_emb_ref.shape
    H = w2_ref.shape[0]
    T = out_ref.shape[1]
    f32 = jnp.float32

    def dot(a, b):
        return jnp.dot(a, b, preferred_element_type=f32)

    # ---- load all weights once (tiny: stay resident in vregs/VMEM) ----
    enc_emb = enc_emb_ref[...]
    e_wih, e_whh = enc_wih_ref[...], enc_whh_ref[...]
    e_bih, e_bhh = enc_bih_ref[...], enc_bhh_ref[...]
    dec_emb = dec_emb_ref[...]
    w1, w2, v_col = w1_ref[...], w2_ref[...], v_ref[...]
    d_wih, d_whh = dec_wih_ref[...], dec_whh_ref[...]
    d_bih, d_bhh = dec_bih_ref[...], dec_bhh_ref[...]
    fc_w, fc_b = fc_w_ref[...], fc_b_ref[...]

    src_f = src_ref[...].astype(f32)      # (B,S)
    src_sz = src_sz_ref[...]              # (B,1) int32

    def gru_cell(x, h, wih, whh, bih, bhh):
        # gate-major weights: leading-dim index selects r/z/n (no lane slicing).
        gi_r = dot(x, wih[0]) + bih[0]
        gi_z = dot(x, wih[1]) + bih[1]
        gi_n = dot(x, wih[2]) + bih[2]
        gh_r = dot(h, whh[0]) + bhh[0]
        gh_z = dot(h, whh[1]) + bhh[1]
        gh_n = dot(h, whh[2]) + bhh[2]
        r = jax.nn.sigmoid(gi_r + gh_r)
        z = jax.nn.sigmoid(gi_z + gh_z)
        n = jnp.tanh(gi_n + r * gh_n)
        return (1.0 - z) * n + z * h

    # ---- encoder: all source embeddings via one one-hot MXU matmul ----
    iota_sv = jax.lax.broadcasted_iota(jnp.int32, (Bk, S, V), 2).astype(f32)
    onehot_src = (iota_sv == src_f[:, :, None]).astype(f32)                 # (B,S,V)
    emb_src = dot(onehot_src.reshape(Bk * S, V), enc_emb).reshape(Bk, S, E)  # (B,S,E)

    h = jnp.zeros((Bk, H), f32)
    enc_steps = []
    for s in range(S):                             # static unroll (S small & fixed)
        x = emb_src[:, s]                          # (B,E)
        m = (src_sz > s).astype(f32)               # (B,1) length mask
        h_cand = gru_cell(x, h, e_wih, e_whh, e_bih, e_bhh)
        h = m * h_cand + (1.0 - m) * h             # freeze state past src_sz (pack semantics)
        enc_steps.append(h_cand * m)               # pad_packed: zeros after length
    enc_out = jnp.stack(enc_steps, axis=1)         # (B,S,He)
    # fused attention W1 projection on the resident encoder output
    enc_proj = dot(enc_out.reshape(Bk * S, H), w1).reshape(Bk, S, H)

    # ---- decoder: attention + GRU cell + FC, greedy feedback, fully unrolled ----
    iota_v = jax.lax.broadcasted_iota(jnp.int32, (Bk, V), 1).astype(f32)    # (B,V)
    tok = tok0_ref[...].astype(f32)                # (B,1) current input token (tgt[:,0])
    logits_steps = [(iota_v == 1.0).astype(f32)]   # pred_vecs[:, 1, 0] = 1
    for _t in range(1, T):                         # static unroll (T small & fixed)
        emb = dot((iota_v == tok).astype(f32), dec_emb)                     # (B,E)

        # Bahdanau attention; score reduction as an MXU matmul with v (H,1).
        # NOTE: attention is NOT masked by src_sz (matches the reference decoder behaviour:
        # padded positions contribute via v.tanh(W2 h) with zero enc_out).
        energy = jnp.tanh(enc_proj + dot(h, w2)[:, None, :])                # (B,S,H)
        score = dot(energy.reshape(Bk * S, H), v_col).reshape(Bk, S, 1)     # (B,S,1)
        score = score - jnp.max(score, axis=1, keepdims=True)
        p = jnp.exp(score)
        attn = p / jnp.sum(p, axis=1, keepdims=True)                        # softmax over S
        context = jnp.sum(attn * enc_out, axis=1)                           # (B,He)

        # GRU cell on concat(context, emb) with the fused (H+E,H) per-gate weights
        xin = jnp.concatenate([context, emb], axis=-1)                      # (B,H+E)
        h = gru_cell(xin, h, d_wih, d_whh, d_bih, d_bhh)

        # single fused output projection on concat(emb, h_new, context)
        fc_in = jnp.concatenate([emb, h, context], axis=-1)                 # (B,E+2H)
        logits = dot(fc_in, fc_w) + fc_b                                    # (B,V)
        logits_steps.append(logits)

        # greedy argmax feedback (teacher_forcing_ratio == 0): first maximal index
        mx = jnp.max(logits, axis=1, keepdims=True)
        tok = jnp.min(jnp.where(logits >= mx, iota_v, float(V)),
                      axis=1, keepdims=True)                                # (B,1)

    out_ref[...] = jnp.stack(logits_steps, axis=1)                          # one (B,T,V) store


# ----------------------------- wrapper (jitted) -----------------------------
def _seq2seq_impl(params, src, tgt, src_sz):
    Bk, T = tgt.shape
    args = (src, src_sz, tgt[:, :1],
            params['enc_embed'], params['enc_wih'], params['enc_whh'],
            params['enc_bih'], params['enc_bhh'],
            params['dec_embed'], params['attn_w1'], params['attn_w2'], params['attn_v'],
            params['dec_wih'], params['dec_whh'], params['dec_bih'], params['dec_bhh'],
            params['fc_w'], params['fc_b'])
    out = pl.pallas_call(
        seq2seq_kernel,
        grid=(1,),
        in_specs=[_spec(a.shape) for a in args],
        out_specs=_spec((Bk, T, VOCAB)),
        out_shape=jax.ShapeDtypeStruct((Bk, T, VOCAB), jnp.float32),
    )(*args)
    return jnp.transpose(out, (0, 2, 1))           # (B, output_dim, T) == pred_vecs layout


_seq2seq_jit = jax.jit(_seq2seq_impl)


def seq2seq_forward(params, src, tgt, src_sz, teacher_forcing_ratio=0.0):
    """src:(B,S) tgt:(B,T) src_sz:(B,1) -> pred_vecs:(B, output_dim, T)."""
    # TODO(synk): stochastic teacher forcing (python random.random() < ratio) not modelled
    # for ratio > 0; greedy feedback only (matches ratio == 0 path of the reference).
    return _seq2seq_jit(params, src, tgt, src_sz)


# ----------------------------- deterministic params -----------------------------
def init_params(key):
    ks = jax.random.split(key, 15)
    bound = 1.0 / jnp.sqrt(jnp.float32(HID))
    u = lambda k, shape: jax.random.uniform(k, shape, jnp.float32, -bound, bound)
    n = lambda k, shape: jax.random.normal(k, shape, jnp.float32)
    return dict(
        enc_embed=n(ks[0], (VOCAB, EMB)),
        enc_wih=u(ks[1], (3, EMB, HID)),         # gate-major: [r, z, n]
        enc_whh=u(ks[2], (3, HID, HID)),
        enc_bih=u(ks[3], (3, 1, HID)),
        enc_bhh=u(ks[4], (3, 1, HID)),
        dec_embed=n(ks[5], (VOCAB, EMB)),
        attn_w1=u(ks[6], (HID, HID)),
        attn_w2=u(ks[7], (HID, HID)),
        attn_v=u(ks[8], (HID, 1)),
        dec_wih=u(ks[9], (3, HID + EMB, HID)),   # fused [context ; emb] input weights
        dec_whh=u(ks[10], (3, HID, HID)),
        dec_bih=u(ks[11], (3, 1, HID)),
        dec_bhh=u(ks[12], (3, 1, HID)),
        fc_w=u(ks[13], (EMB + 2 * HID, VOCAB)),  # fused [emb ; h_new ; context] -> vocab
        fc_b=u(ks[14], (1, VOCAB)),
    )


if __name__ == "__main__":
    key = jax.random.PRNGKey(0)
    pkey, skey, tkey = jax.random.split(key, 3)
    params = init_params(pkey)

    src = jax.random.randint(skey, (B, S_SRC), 0, VOCAB, dtype=jnp.int32)
    tgt = jax.random.randint(tkey, (B, T_TGT), 0, VOCAB, dtype=jnp.int32)
    src_sz = jnp.array([[S_SRC], [S_SRC - 3]], dtype=jnp.int32)   # (B, 1) unpadded lengths

    pred_vecs = seq2seq_forward(params, src, tgt, src_sz, teacher_forcing_ratio=0.0)
    pred_vecs = jax.block_until_ready(pred_vecs)

    assert pred_vecs.shape == (B, VOCAB, T_TGT)
    assert bool(jnp.all(jnp.isfinite(pred_vecs)))
    assert float(pred_vecs[0, 1, 0]) == 1.0 and float(pred_vecs[1, 1, 0]) == 1.0
    print("KERNEL_OK")
</pallas_src>

<mosaic_0001>
module attributes {stable_mosaic.version = 11 : i64} {
  func.func @seq2seq_kernel(%arg0: i32, %arg1: memref<2x8xi32, #tpu.memory_space<vmem>>, %arg2: memref<2x1xi32, #tpu.memory_space<vmem>>, %arg3: memref<2x1xi32, #tpu.memory_space<vmem>>, %arg4: memref<16x8xf32, #tpu.memory_space<vmem>>, %arg5: memref<3x8x32xf32, #tpu.memory_space<vmem>>, %arg6: memref<3x32x32xf32, #tpu.memory_space<vmem>>, %arg7: memref<3x1x32xf32, #tpu.memory_space<vmem>>, %arg8: memref<3x1x32xf32, #tpu.memory_space<vmem>>, %arg9: memref<16x8xf32, #tpu.memory_space<vmem>>, %arg10: memref<32x32xf32, #tpu.memory_space<vmem>>, %arg11: memref<32x32xf32, #tpu.memory_space<vmem>>, %arg12: memref<32x1xf32, #tpu.memory_space<vmem>>, %arg13: memref<3x40x32xf32, #tpu.memory_space<vmem>>, %arg14: memref<3x32x32xf32, #tpu.memory_space<vmem>>, %arg15: memref<3x1x32xf32, #tpu.memory_space<vmem>>, %arg16: memref<3x1x32xf32, #tpu.memory_space<vmem>>, %arg17: memref<72x16xf32, #tpu.memory_space<vmem>>, %arg18: memref<1x16xf32, #tpu.memory_space<vmem>>, %arg19: memref<2x8x16xf32, #tpu.memory_space<vmem>>) attributes {dimension_semantics = [#tpu.dimension_semantics<arbitrary>], iteration_bounds = array<i64: 1>, scalar_prefetch = 0 : i64, scratch_operands = 0 : i64, tpu.core_type = #tpu.core_type<tc>, window_params = [{pipeline_mode = #tpu.pipeline_mode<synchronous>, transform_indices = @transform_0, window_bounds = array<i64: 2, 8>}, {pipeline_mode = #tpu.pipeline_mode<synchronous>, transform_indices = @transform_1, window_bounds = array<i64: 2, 1>}, {pipeline_mode = #tpu.pipeline_mode<synchronous>, transform_indices = @transform_2, window_bounds = array<i64: 2, 1>}, {pipeline_mode = #tpu.pipeline_mode<synchronous>, transform_indices = @transform_3, window_bounds = array<i64: 16, 8>}, {pipeline_mode = #tpu.pipeline_mode<synchronous>, transform_indices = @transform_4, window_bounds = array<i64: 3, 8, 32>}, {pipeline_mode = #tpu.pipeline_mode<synchronous>, transform_indices = @transform_5, window_bounds = array<i64: 3, 32, 32>}, {pipeline_mode = #tpu.pipeline_mode<synchronous>, transform_indices = @transform_6, window_bounds = array<i64: 3, 1, 32>}, {pipeline_mode = #tpu.pipeline_mode<synchronous>, transform_indices = @transform_7, window_bounds = array<i64: 3, 1, 32>}, {pipeline_mode = #tpu.pipeline_mode<synchronous>, transform_indices = @transform_8, window_bounds = array<i64: 16, 8>}, {pipeline_mode = #tpu.pipeline_mode<synchronous>, transform_indices = @transform_9, window_bounds = array<i64: 32, 32>}, {pipeline_mode = #tpu.pipeline_mode<synchronous>, transform_indices = @transform_10, window_bounds = array<i64: 32, 32>}, {pipeline_mode = #tpu.pipeline_mode<synchronous>, transform_indices = @transform_11, window_bounds = array<i64: 32, 1>}, {pipeline_mode = #tpu.pipeline_mode<synchronous>, transform_indices = @transform_12, window_bounds = array<i64: 3, 40, 32>}, {pipeline_mode = #tpu.pipeline_mode<synchronous>, transform_indices = @transform_13, window_bounds = array<i64: 3, 32, 32>}, {pipeline_mode = #tpu.pipeline_mode<synchronous>, transform_indices = @transform_14, window_bounds = array<i64: 3, 1, 32>}, {pipeline_mode = #tpu.pipeline_mode<synchronous>, transform_indices = @transform_15, window_bounds = array<i64: 3, 1, 32>}, {pipeline_mode = #tpu.pipeline_mode<synchronous>, transform_indices = @transform_16, window_bounds = array<i64: 72, 16>}, {pipeline_mode = #tpu.pipeline_mode<synchronous>, transform_indices = @transform_17, window_bounds = array<i64: 1, 16>}, {pipeline_mode = #tpu.pipeline_mode<synchronous>, transform_indices = @transform_18, window_bounds = array<i64: 2, 8, 16>}]} {
    %c0 = arith.constant 0 : index
    %c0_0 = arith.constant 0 : index
    %0 = vector.load %arg4[%c0, %c0_0] : memref<16x8xf32, #tpu.memory_space<vmem>>, vector<16x8xf32>
    %c0_1 = arith.constant 0 : index
    %c0_2 = arith.constant 0 : index
    %c0_3 = arith.constant 0 : index
    %1 = vector.load %arg5[%c0_1, %c0_2, %c0_3] : memref<3x8x32xf32, #tpu.memory_space<vmem>>, vector<3x8x32xf32>
    %c0_4 = arith.constant 0 : index
    %c0_5 = arith.constant 0 : index
    %c0_6 = arith.constant 0 : index
    %2 = vector.load %arg6[%c0_4, %c0_5, %c0_6] : memref<3x32x32xf32, #tpu.memory_space<vmem>>, vector<3x32x32xf32>
    %c0_7 = arith.constant 0 : index
    %c0_8 = arith.constant 0 : index
    %c0_9 = arith.constant 0 : index
    %3 = vector.load %arg7[%c0_7, %c0_8, %c0_9] : memref<3x1x32xf32, #tpu.memory_space<vmem>>, vector<3x1x32xf32>
    %c0_10 = arith.constant 0 : index
    %c0_11 = arith.constant 0 : index
    %c0_12 = arith.constant 0 : index
    %4 = vector.load %arg8[%c0_10, %c0_11, %c0_12] : memref<3x1x32xf32, #tpu.memory_space<vmem>>, vector<3x1x32xf32>
    %c0_13 = arith.constant 0 : index
    %c0_14 = arith.constant 0 : index
    %5 = vector.load %arg9[%c0_13, %c0_14] : memref<16x8xf32, #tpu.memory_space<vmem>>, vector<16x8xf32>
    %c0_15 = arith.constant 0 : index
    %c0_16 = arith.constant 0 : index
    %6 = vector.load %arg10[%c0_15, %c0_16] : memref<32x32xf32, #tpu.memory_space<vmem>>, vector<32x32xf32>
    %c0_17 = arith.constant 0 : index
    %c0_18 = arith.constant 0 : index
    %7 = vector.load %arg11[%c0_17, %c0_18] : memref<32x32xf32, #tpu.memory_space<vmem>>, vector<32x32xf32>
    %c0_19 = arith.constant 0 : index
    %c0_20 = arith.constant 0 : index
    %8 = vector.load %arg12[%c0_19, %c0_20] : memref<32x1xf32, #tpu.memory_space<vmem>>, vector<32x1xf32>
    %c0_21 = arith.constant 0 : index
    %c0_22 = arith.constant 0 : index
    %c0_23 = arith.constant 0 : index
    %9 = vector.load %arg13[%c0_21, %c0_22, %c0_23] : memref<3x40x32xf32, #tpu.memory_space<vmem>>, vector<3x40x32xf32>
    %c0_24 = arith.constant 0 : index
    %c0_25 = arith.constant 0 : index
    %c0_26 = arith.constant 0 : index
    %10 = vector.load %arg14[%c0_24, %c0_25, %c0_26] : memref<3x32x32xf32, #tpu.memory_space<vmem>>, vector<3x32x32xf32>
    %c0_27 = arith.constant 0 : index
    %c0_28 = arith.constant 0 : index
    %c0_29 = arith.constant 0 : index
    %11 = vector.load %arg15[%c0_27, %c0_28, %c0_29] : memref<3x1x32xf32, #tpu.memory_space<vmem>>, vector<3x1x32xf32>
    %c0_30 = arith.constant 0 : index
    %c0_31 = arith.constant 0 : index
    %c0_32 = arith.constant 0 : index
    %12 = vector.load %arg16[%c0_30, %c0_31, %c0_32] : memref<3x1x32xf32, #tpu.memory_space<vmem>>, vector<3x1x32xf32>
    %c0_33 = arith.constant 0 : index
    %c0_34 = arith.constant 0 : index
    %13 = vector.load %arg17[%c0_33, %c0_34] : memref<72x16xf32, #tpu.memory_space<vmem>>, vector<72x16xf32>
    %c0_35 = arith.constant 0 : index
    %c0_36 = arith.constant 0 : index
    %14 = vector.load %arg18[%c0_35, %c0_36] : memref<1x16xf32, #tpu.memory_space<vmem>>, vector<1x16xf32>
    %c0_37 = arith.constant 0 : index
    %c0_38 = arith.constant 0 : index
    %15 = vector.load %arg1[%c0_37, %c0_38] : memref<2x8xi32, #tpu.memory_space<vmem>>, vector<2x8xi32>
    %16 = arith.sitofp %15 : vector<2x8xi32> to vector<2x8xf32>
    %c0_39 = arith.constant 0 : index
    %c0_40 = arith.constant 0 : index
    %17 = vector.load %arg2[%c0_39, %c0_40] : memref<2x1xi32, #tpu.memory_space<vmem>>, vector<2x1xi32>
    %18 = tpu.iota {dimensions = array<i32: 2>} : vector<2x8x16xi32>
    %19 = arith.sitofp %18 : vector<2x8x16xi32> to vector<2x8x16xf32>
    %20 = vector.shape_cast %16 : vector<2x8xf32> to vector<2x8x1xf32>
    %21 = vector.broadcast %20 : vector<2x8x1xf32> to vector<2x8x16xf32>
    %22 = arith.cmpf oeq, %19, %21 : vector<2x8x16xf32>
    %23 = arith.extui %22 : vector<2x8x16xi1> to vector<2x8x16xi32>
    %24 = arith.sitofp %23 : vector<2x8x16xi32> to vector<2x8x16xf32>
    %25 = vector.shape_cast %24 : vector<2x8x16xf32> to vector<16x16xf32>
    %cst = arith.constant dense<0.000000e+00> : vector<16x8xf32>
    %26 = tpu.matmul %25, %0, %cst {dimension_numbers = #tpu.dot_dimension_numbers<[1], [0], [0], [1], [0, 0, 1, 1], [], []>} : vector<16x16xf32>, vector<16x8xf32>, vector<16x8xf32> -> vector<16x8xf32>
    %27 = vector.shape_cast %26 : vector<16x8xf32> to vector<2x8x8xf32>
    %cst_41 = arith.constant 0.000000e+00 : f32
    %28 = vector.broadcast %cst_41 : f32 to vector<2x32xf32>
    %29 = vector.extract_strided_slice %27 {offsets = [0, 0, 0], sizes = [2, 1, 8], strides = [1, 1, 1]} : vector<2x8x8xf32> to vector<2x1x8xf32>
    %30 = vector.shape_cast %29 : vector<2x1x8xf32> to vector<2x8xf32>
    %c0_i32 = arith.constant 0 : i32
    %31 = vector.broadcast %c0_i32 : i32 to vector<2x1xi32>
    %32 = arith.cmpi sgt, %17, %31 : vector<2x1xi32>
    %33 = arith.extui %32 : vector<2x1xi1> to vector<2x1xi32>
    %34 = arith.sitofp %33 : vector<2x1xi32> to vector<2x1xf32>
    %35 = vector.extract_strided_slice %1 {offsets = [0, 0, 0], sizes = [1, 8, 32], strides = [1, 1, 1]} : vector<3x8x32xf32> to vector<1x8x32xf32>
    %36 = vector.shape_cast %35 : vector<1x8x32xf32> to vector<8x32xf32>
    %cst_42 = arith.constant dense<0.000000e+00> : vector<2x32xf32>
    %37 = tpu.matmul %30, %36, %cst_42 {dimension_numbers = #tpu.dot_dimension_numbers<[1], [0], [0], [1], [0, 0, 1, 1], [], []>} : vector<2x8xf32>, vector<8x32xf32>, vector<2x32xf32> -> vector<2x32xf32>
    %38 = vector.extract_strided_slice %3 {offsets = [0, 0, 0], sizes = [1, 1, 32], strides = [1, 1, 1]} : vector<3x1x32xf32> to vector<1x1x32xf32>
    %39 = vector.shape_cast %38 : vector<1x1x32xf32> to vector<1x32xf32>
    %40 = vector.broadcast %39 : vector<1x32xf32> to vector<2x32xf32>
    %41 = arith.addf %37, %40 : vector<2x32xf32>
    %42 = vector.extract_strided_slice %1 {offsets = [1, 0, 0], sizes = [1, 8, 32], strides = [1, 1, 1]} : vector<3x8x32xf32> to vector<1x8x32xf32>
    %43 = vector.shape_cast %42 : vector<1x8x32xf32> to vector<8x32xf32>
    %cst_43 = arith.constant dense<0.000000e+00> : vector<2x32xf32>
    %44 = tpu.matmul %30, %43, %cst_43 {dimension_numbers = #tpu.dot_dimension_numbers<[1], [0], [0], [1], [0, 0, 1, 1], [], []>} : vector<2x8xf32>, vector<8x32xf32>, vector<2x32xf32> -> vector<2x32xf32>
    %45 = vector.extract_strided_slice %3 {offsets = [1, 0, 0], sizes = [1, 1, 32], strides = [1, 1, 1]} : vector<3x1x32xf32> to vector<1x1x32xf32>
    %46 = vector.shape_cast %45 : vector<1x1x32xf32> to vector<1x32xf32>
    %47 = vector.broadcast %46 : vector<1x32xf32> to vector<2x32xf32>
    %48 = arith.addf %44, %47 : vector<2x32xf32>
    %49 = vector.extract_strided_slice %1 {offsets = [2, 0, 0], sizes = [1, 8, 32], strides = [1, 1, 1]} : vector<3x8x32xf32> to vector<1x8x32xf32>
    %50 = vector.shape_cast %49 : vector<1x8x32xf32> to vector<8x32xf32>
    %cst_44 = arith.constant dense<0.000000e+00> : vector<2x32xf32>
    %51 = tpu.matmul %30, %50, %cst_44 {dimension_numbers = #tpu.dot_dimension_numbers<[1], [0], [0], [1], [0, 0, 1, 1], [], []>} : vector<2x8xf32>, vector<8x32xf32>, vector<2x32xf32> -> vector<2x32xf32>
    %52 = vector.extract_strided_slice %3 {offsets = [2, 0, 0], sizes = [1, 1, 32], strides = [1, 1, 1]} : vector<3x1x32xf32> to vector<1x1x32xf32>
    %53 = vector.shape_cast %52 : vector<1x1x32xf32> to vector<1x32xf32>
    %54 = vector.broadcast %53 : vector<1x32xf32> to vector<2x32xf32>
    %55 = arith.addf %51, %54 : vector<2x32xf32>
    %56 = vector.extract_strided_slice %2 {offsets = [0, 0, 0], sizes = [1, 32, 32], strides = [1, 1, 1]} : vector<3x32x32xf32> to vector<1x32x32xf32>
    %57 = vector.shape_cast %56 : vector<1x32x32xf32> to vector<32x32xf32>
    %cst_45 = arith.constant dense<0.000000e+00> : vector<2x32xf32>
    %58 = tpu.matmul %28, %57, %cst_45 {dimension_numbers = #tpu.dot_dimension_numbers<[1], [0], [0], [1], [0, 0, 1, 1], [], []>} : vector<2x32xf32>, vector<32x32xf32>, vector<2x32xf32> -> vector<2x32xf32>
    %59 = vector.extract_strided_slice %4 {offsets = [0, 0, 0], sizes = [1, 1, 32], strides = [1, 1, 1]} : vector<3x1x32xf32> to vector<1x1x32xf32>
    %60 = vector.shape_cast %59 : vector<1x1x32xf32> to vector<1x32xf32>
    %61 = vector.broadcast %60 : vector<1x32xf32> to vector<2x32xf32>
    %62 = arith.addf %58, %61 : vector<2x32xf32>
    %63 = vector.extract_strided_slice %2 {offsets = [1, 0, 0], sizes = [1, 32, 32], strides = [1, 1, 1]} : vector<3x32x32xf32> to vector<1x32x32xf32>
    %64 = vector.shape_cast %63 : vector<1x32x32xf32> to vector<32x32xf32>
    %cst_46 = arith.constant dense<0.000000e+00> : vector<2x32xf32>
    %65 = tpu.matmul %28, %64, %cst_46 {dimension_numbers = #tpu.dot_dimension_numbers<[1], [0], [0], [1], [0, 0, 1, 1], [], []>} : vector<2x32xf32>, vector<32x32xf32>, vector<2x32xf32> -> vector<2x32xf32>
    %66 = vector.extract_strided_slice %4 {offsets = [1, 0, 0], sizes = [1, 1, 32], strides = [1, 1, 1]} : vector<3x1x32xf32> to vector<1x1x32xf32>
    %67 = vector.shape_cast %66 : vector<1x1x32xf32> to vector<1x32xf32>
    %68 = vector.broadcast %67 : vector<1x32xf32> to vector<2x32xf32>
    %69 = arith.addf %65, %68 : vector<2x32xf32>
    %70 = vector.extract_strided_slice %2 {offsets = [2, 0, 0], sizes = [1, 32, 32], strides = [1, 1, 1]} : vector<3x32x32xf32> to vector<1x32x32xf32>
    %71 = vector.shape_cast %70 : vector<1x32x32xf32> to vector<32x32xf32>
    %cst_47 = arith.constant dense<0.000000e+00> : vector<2x32xf32>
    %72 = tpu.matmul %28, %71, %cst_47 {dimension_numbers = #tpu.dot_dimension_numbers<[1], [0], [0], [1], [0, 0, 1, 1], [], []>} : vector<2x32xf32>, vector<32x32xf32>, vector<2x32xf32> -> vector<2x32xf32>
    %73 = vector.extract_strided_slice %4 {offsets = [2, 0, 0], sizes = [1, 1, 32], strides = [1, 1, 1]} : vector<3x1x32xf32> to vector<1x1x32xf32>
    %74 = vector.shape_cast %73 : vector<1x1x32xf32> to vector<1x32xf32>
    %75 = vector.broadcast %74 : vector<1x32xf32> to vector<2x32xf32>
    %76 = arith.addf %72, %75 : vector<2x32xf32>
    %77 = arith.addf %41, %62 : vector<2x32xf32>
    %78 = arith.negf %77 : vector<2x32xf32>
    %79 = math.exp %78 : vector<2x32xf32>
    %cst_48 = arith.constant 1.000000e+00 : f32
    %80 = vector.broadcast %cst_48 : f32 to vector<2x32xf32>
    %81 = arith.addf %80, %79 : vector<2x32xf32>
    %82 = arith.divf %80, %81 : vector<2x32xf32>
    %83 = arith.addf %48, %69 : vector<2x32xf32>
    %84 = arith.negf %83 : vector<2x32xf32>
    %85 = math.exp %84 : vector<2x32xf32>
    %cst_49 = arith.constant 1.000000e+00 : f32
    %86 = vector.broadcast %cst_49 : f32 to vector<2x32xf32>
    %87 = arith.addf %86, %85 : vector<2x32xf32>
    %88 = arith.divf %86, %87 : vector<2x32xf32>
    %89 = arith.mulf %82, %76 : vector<2x32xf32>
    %90 = arith.addf %55, %89 : vector<2x32xf32>
    %91 = math.tanh %90 : vector<2x32xf32>
    %cst_50 = arith.constant 1.000000e+00 : f32
    %92 = vector.broadcast %cst_50 : f32 to vector<2x32xf32>
    %93 = arith.subf %92, %88 : vector<2x32xf32>
    %94 = arith.mulf %93, %91 : vector<2x32xf32>
    %95 = arith.mulf %88, %28 : vector<2x32xf32>
    %96 = arith.addf %94, %95 : vector<2x32xf32>
    %97 = vector.broadcast %34 : vector<2x1xf32> to vector<2x32xf32>
    %98 = arith.mulf %97, %96 : vector<2x32xf32>
    %cst_51 = arith.constant 1.000000e+00 : f32
    %99 = vector.broadcast %cst_51 : f32 to vector<2x1xf32>
    %100 = arith.subf %99, %34 : vector<2x1xf32>
    %101 = vector.broadcast %100 : vector<2x1xf32> to vector<2x32xf32>
    %102 = arith.mulf %101, %28 : vector<2x32xf32>
    %103 = arith.addf %98, %102 : vector<2x32xf32>
    %104 = vector.broadcast %34 : vector<2x1xf32> to vector<2x32xf32>
    %105 = arith.mulf %96, %104 : vector<2x32xf32>
    %106 = vector.extract_strided_slice %27 {offsets = [0, 1, 0], sizes = [2, 1, 8], strides = [1, 1, 1]} : vector<2x8x8xf32> to vector<2x1x8xf32>
    %107 = vector.shape_cast %106 : vector<2x1x8xf32> to vector<2x8xf32>
    %c1_i32 = arith.constant 1 : i32
    %108 = vector.broadcast %c1_i32 : i32 to vector<2x1xi32>
    %109 = arith.cmpi sgt, %17, %108 : vector<2x1xi32>
    %110 = arith.extui %109 : vector<2x1xi1> to vector<2x1xi32>
    %111 = arith.sitofp %110 : vector<2x1xi32> to vector<2x1xf32>
    %112 = vector.extract_strided_slice %1 {offsets = [0, 0, 0], sizes = [1, 8, 32], strides = [1, 1, 1]} : vector<3x8x32xf32> to vector<1x8x32xf32>
    %113 = vector.shape_cast %112 : vector<1x8x32xf32> to vector<8x32xf32>
    %cst_52 = arith.constant dense<0.000000e+00> : vector<2x32xf32>
    %114 = tpu.matmul %107, %113, %cst_52 {dimension_numbers = #tpu.dot_dimension_numbers<[1], [0], [0], [1], [0, 0, 1, 1], [], []>} : vector<2x8xf32>, vector<8x32xf32>, vector<2x32xf32> -> vector<2x32xf32>
    %115 = vector.extract_strided_slice %3 {offsets = [0, 0, 0], sizes = [1, 1, 32], strides = [1, 1, 1]} : vector<3x1x32xf32> to vector<1x1x32xf32>
    %116 = vector.shape_cast %115 : vector<1x1x32xf32> to vector<1x32xf32>
    %117 = vector.broadcast %116 : vector<1x32xf32> to vector<2x32xf32>
    %118 = arith.addf %114, %117 : vector<2x32xf32>
    %119 = vector.extract_strided_slice %1 {offsets = [1, 0, 0], sizes = [1, 8, 32], strides = [1, 1, 1]} : vector<3x8x32xf32> to vector<1x8x32xf32>
    %120 = vector.shape_cast %119 : vector<1x8x32xf32> to vector<8x32xf32>
    %cst_53 = arith.constant dense<0.000000e+00> : vector<2x32xf32>
    %121 = tpu.matmul %107, %120, %cst_53 {dimension_numbers = #tpu.dot_dimension_numbers<[1], [0], [0], [1], [0, 0, 1, 1], [], []>} : vector<2x8xf32>, vector<8x32xf32>, vector<2x32xf32> -> vector<2x32xf32>
    %122 = vector.extract_strided_slice %3 {offsets = [1, 0, 0], sizes = [1, 1, 32], strides = [1, 1, 1]} : vector<3x1x32xf32> to vector<1x1x32xf32>
    %123 = vector.shape_cast %122 : vector<1x1x32xf32> to vector<1x32xf32>
    %124 = vector.broadcast %123 : vector<1x32xf32> to vector<2x32xf32>
    %125 = arith.addf %121, %124 : vector<2x32xf32>
    %126 = vector.extract_strided_slice %1 {offsets = [2, 0, 0], sizes = [1, 8, 32], strides = [1, 1, 1]} : vector<3x8x32xf32> to vector<1x8x32xf32>
    %127 = vector.shape_cast %126 : vector<1x8x32xf32> to vector<8x32xf32>
    %cst_54 = arith.constant dense<0.000000e+00> : vector<2x32xf32>
    %128 = tpu.matmul %107, %127, %cst_54 {dimension_numbers = #tpu.dot_dimension_numbers<[1], [0], [0], [1], [0, 0, 1, 1], [], []>} : vector<2x8xf32>, vector<8x32xf32>, vector<2x32xf32> -> vector<2x32xf32>
    %129 = vector.extract_strided_slice %3 {offsets = [2, 0, 0], sizes = [1, 1, 32], strides = [1, 1, 1]} : vector<3x1x32xf32> to vector<1x1x32xf32>
    %130 = vector.shape_cast %129 : vector<1x1x32xf32> to vector<1x32xf32>
    %131 = vector.broadcast %130 : vector<1x32xf32> to vector<2x32xf32>
    %132 = arith.addf %128, %131 : vector<2x32xf32>
    %133 = vector.extract_strided_slice %2 {offsets = [0, 0, 0], sizes = [1, 32, 32], strides = [1, 1, 1]} : vector<3x32x32xf32> to vector<1x32x32xf32>
    %134 = vector.shape_cast %133 : vector<1x32x32xf32> to vector<32x32xf32>
    %cst_55 = arith.constant dense<0.000000e+00> : vector<2x32xf32>
    %135 = tpu.matmul %103, %134, %cst_55 {dimension_numbers = #tpu.dot_dimension_numbers<[1], [0], [0], [1], [0, 0, 1, 1], [], []>} : vector<2x32xf32>, vector<32x32xf32>, vector<2x32xf32> -> vector<2x32xf32>
    %136 = vector.extract_strided_slice %4 {offsets = [0, 0, 0], sizes = [1, 1, 32], strides = [1, 1, 1]} : vector<3x1x32xf32> to vector<1x1x32xf32>
    %137 = vector.shape_cast %136 : vector<1x1x32xf32> to vector<1x32xf32>
    %138 = vector.broadcast %137 : vector<1x32xf32> to vector<2x32xf32>
    %139 = arith.addf %135, %138 : vector<2x32xf32>
    %140 = vector.extract_strided_slice %2 {offsets = [1, 0, 0], sizes = [1, 32, 32], strides = [1, 1, 1]} : vector<3x32x32xf32> to vector<1x32x32xf32>
    %141 = vector.shape_cast %140 : vector<1x32x32xf32> to vector<32x32xf32>
    %cst_56 = arith.constant dense<0.000000e+00> : vector<2x32xf32>
    %142 = tpu.matmul %103, %141, %cst_56 {dimension_numbers = #tpu.dot_dimension_numbers<[1], [0], [0], [1], [0, 0, 1, 1], [], []>} : vector<2x32xf32>, vector<32x32xf32>, vector<2x32xf32> -> vector<2x32xf32>
    %143 = vector.extract_strided_slice %4 {offsets = [1, 0, 0], sizes = [1, 1, 32], strides = [1, 1, 1]} : vector<3x1x32xf32> to vector<1x1x32xf32>
    %144 = vector.shape_cast %143 : vector<1x1x32xf32> to vector<1x32xf32>
    %145 = vector.broadcast %144 : vector<1x32xf32> to vector<2x32xf32>
    %146 = arith.addf %142, %145 : vector<2x32xf32>
    %147 = vector.extract_strided_slice %2 {offsets = [2, 0, 0], sizes = [1, 32, 32], strides = [1, 1, 1]} : vector<3x32x32xf32> to vector<1x32x32xf32>
    %148 = vector.shape_cast %147 : vector<1x32x32xf32> to vector<32x32xf32>
    %cst_57 = arith.constant dense<0.000000e+00> : vector<2x32xf32>
    %149 = tpu.matmul %103, %148, %cst_57 {dimension_numbers = #tpu.dot_dimension_numbers<[1], [0], [0], [1], [0, 0, 1, 1], [], []>} : vector<2x32xf32>, vector<32x32xf32>, vector<2x32xf32> -> vector<2x32xf32>
    %150 = vector.extract_strided_slice %4 {offsets = [2, 0, 0], sizes = [1, 1, 32], strides = [1, 1, 1]} : vector<3x1x32xf32> to vector<1x1x32xf32>
    %151 = vector.shape_cast %150 : vector<1x1x32xf32> to vector<1x32xf32>
    %152 = vector.broadcast %151 : vector<1x32xf32> to vector<2x32xf32>
    %153 = arith.addf %149, %152 : vector<2x32xf32>
    %154 = arith.addf %118, %139 : vector<2x32xf32>
    %155 = arith.negf %154 : vector<2x32xf32>
    %156 = math.exp %155 : vector<2x32xf32>
    %cst_58 = arith.constant 1.000000e+00 : f32
    %157 = vector.broadcast %cst_58 : f32 to vector<2x32xf32>
    %158 = arith.addf %157, %156 : vector<2x32xf32>
    %159 = arith.divf %157, %158 : vector<2x32xf32>
    %160 = arith.addf %125, %146 : vector<2x32xf32>
    %161 = arith.negf %160 : vector<2x32xf32>
    %162 = math.exp %161 : vector<2x32xf32>
    %cst_59 = arith.constant 1.000000e+00 : f32
    %163 = vector.broadcast %cst_59 : f32 to vector<2x32xf32>
    %164 = arith.addf %163, %162 : vector<2x32xf32>
    %165 = arith.divf %163, %164 : vector<2x32xf32>
    %166 = arith.mulf %159, %153 : vector<2x32xf32>
    %167 = arith.addf %132, %166 : vector<2x32xf32>
    %168 = math.tanh %167 : vector<2x32xf32>
    %cst_60 = arith.constant 1.000000e+00 : f32
    %169 = vector.broadcast %cst_60 : f32 to vector<2x32xf32>
    %170 = arith.subf %169, %165 : vector<2x32xf32>
    %171 = arith.mulf %170, %168 : vector<2x32xf32>
    %172 = arith.mulf %165, %103 : vector<2x32xf32>
    %173 = arith.addf %171, %172 : vector<2x32xf32>
    %174 = vector.broadcast %111 : vector<2x1xf32> to vector<2x32xf32>
    %175 = arith.mulf %174, %173 : vector<2x32xf32>
    %cst_61 = arith.constant 1.000000e+00 : f32
    %176 = vector.broadcast %cst_61 : f32 to vector<2x1xf32>
    %177 = arith.subf %176, %111 : vector<2x1xf32>
    %178 = vector.broadcast %177 : vector<2x1xf32> to vector<2x32xf32>
    %179 = arith.mulf %178, %103 : vector<2x32xf32>
    %180 = arith.addf %175, %179 : vector<2x32xf32>
    %181 = vector.broadcast %111 : vector<2x1xf32> to vector<2x32xf32>
    %182 = arith.mulf %173, %181 : vector<2x32xf32>
    %183 = vector.extract_strided_slice %27 {offsets = [0, 2, 0], sizes = [2, 1, 8], strides = [1, 1, 1]} : vector<2x8x8xf32> to vector<2x1x8xf32>
    %184 = vector.shape_cast %183 : vector<2x1x8xf32> to vector<2x8xf32>
    %c2_i32 = arith.constant 2 : i32
    %185 = vector.broadcast %c2_i32 : i32 to vector<2x1xi32>
    %186 = arith.cmpi sgt, %17, %185 : vector<2x1xi32>
    %187 = arith.extui %186 : vector<2x1xi1> to vector<2x1xi32>
    %188 = arith.sitofp %187 : vector<2x1xi32> to vector<2x1xf32>
    %189 = vector.extract_strided_slice %1 {offsets = [0, 0, 0], sizes = [1, 8, 32], strides = [1, 1, 1]} : vector<3x8x32xf32> to vector<1x8x32xf32>
    %190 = vector.shape_cast %189 : vector<1x8x32xf32> to vector<8x32xf32>
    %cst_62 = arith.constant dense<0.000000e+00> : vector<2x32xf32>
    %191 = tpu.matmul %184, %190, %cst_62 {dimension_numbers = #tpu.dot_dimension_numbers<[1], [0], [0], [1], [0, 0, 1, 1], [], []>} : vector<2x8xf32>, vector<8x32xf32>, vector<2x32xf32> -> vector<2x32xf32>
    %192 = vector.extract_strided_slice %3 {offsets = [0, 0, 0], sizes = [1, 1, 32], strides = [1, 1, 1]} : vector<3x1x32xf32> to vector<1x1x32xf32>
    %193 = vector.shape_cast %192 : vector<1x1x32xf32> to vector<1x32xf32>
    %194 = vector.broadcast %193 : vector<1x32xf32> to vector<2x32xf32>
    %195 = arith.addf %191, %194 : vector<2x32xf32>
    %196 = vector.extract_strided_slice %1 {offsets = [1, 0, 0], sizes = [1, 8, 32], strides = [1, 1, 1]} : vector<3x8x32xf32> to vector<1x8x32xf32>
    %197 = vector.shape_cast %196 : vector<1x8x32xf32> to vector<8x32xf32>
    %cst_63 = arith.constant dense<0.000000e+00> : vector<2x32xf32>
    %198 = tpu.matmul %184, %197, %cst_63 {dimension_numbers = #tpu.dot_dimension_numbers<[1], [0], [0], [1], [0, 0, 1, 1], [], []>} : vector<2x8xf32>, vector<8x32xf32>, vector<2x32xf32> -> vector<2x32xf32>
    %199 = vector.extract_strided_slice %3 {offsets = [1, 0, 0], sizes = [1, 1, 32], strides = [1, 1, 1]} : vector<3x1x32xf32> to vector<1x1x32xf32>
    %200 = vector.shape_cast %199 : vector<1x1x32xf32> to vector<1x32xf32>
    %201 = vector.broadcast %200 : vector<1x32xf32> to vector<2x32xf32>
    %202 = arith.addf %198, %201 : vector<2x32xf32>
    %203 = vector.extract_strided_slice %1 {offsets = [2, 0, 0], sizes = [1, 8, 32], strides = [1, 1, 1]} : vector<3x8x32xf32> to vector<1x8x32xf32>
    %204 = vector.shape_cast %203 : vector<1x8x32xf32> to vector<8x32xf32>
    %cst_64 = arith.constant dense<0.000000e+00> : vector<2x32xf32>
    %205 = tpu.matmul %184, %204, %cst_64 {dimension_numbers = #tpu.dot_dimension_numbers<[1], [0], [0], [1], [0, 0, 1, 1], [], []>} : vector<2x8xf32>, vector<8x32xf32>, vector<2x32xf32> -> vector<2x32xf32>
    %206 = vector.extract_strided_slice %3 {offsets = [2, 0, 0], sizes = [1, 1, 32], strides = [1, 1, 1]} : vector<3x1x32xf32> to vector<1x1x32xf32>
    %207 = vector.shape_cast %206 : vector<1x1x32xf32> to vector<1x32xf32>
    %208 = vector.broadcast %207 : vector<1x32xf32> to vector<2x32xf32>
    %209 = arith.addf %205, %208 : vector<2x32xf32>
    %210 = vector.extract_strided_slice %2 {offsets = [0, 0, 0], sizes = [1, 32, 32], strides = [1, 1, 1]} : vector<3x32x32xf32> to vector<1x32x32xf32>
    %211 = vector.shape_cast %210 : vector<1x32x32xf32> to vector<32x32xf32>
    %cst_65 = arith.constant dense<0.000000e+00> : vector<2x32xf32>
    %212 = tpu.matmul %180, %211, %cst_65 {dimension_numbers = #tpu.dot_dimension_numbers<[1], [0], [0], [1], [0, 0, 1, 1], [], []>} : vector<2x32xf32>, vector<32x32xf32>, vector<2x32xf32> -> vector<2x32xf32>
    %213 = vector.extract_strided_slice %4 {offsets = [0, 0, 0], sizes = [1, 1, 32], strides = [1, 1, 1]} : vector<3x1x32xf32> to vector<1x1x32xf32>
    %214 = vector.shape_cast %213 : vector<1x1x32xf32> to vector<1x32xf32>
    %215 = vector.broadcast %214 : vector<1x32xf32> to vector<2x32xf32>
    %216 = arith.addf %212, %215 : vector<2x32xf32>
    %217 = vector.extract_strided_slice %2 {offsets = [1, 0, 0], sizes = [1, 32, 32], strides = [1, 1, 1]} : vector<3x32x32xf32> to vector<1x32x32xf32>
    %218 = vector.shape_cast %217 : vector<1x32x32xf32> to vector<32x32xf32>
    %cst_66 = arith.constant dense<0.000000e+00> : vector<2x32xf32>
    %219 = tpu.matmul %180, %218, %cst_66 {dimension_numbers = #tpu.dot_dimension_numbers<[1], [0], [0], [1], [0, 0, 1, 1], [], []>} : vector<2x32xf32>, vector<32x32xf32>, vector<2x32xf32> -> vector<2x32xf32>
    %220 = vector.extract_strided_slice %4 {offsets = [1, 0, 0], sizes = [1, 1, 32], strides = [1, 1, 1]} : vector<3x1x32xf32> to vector<1x1x32xf32>
    %221 = vector.shape_cast %220 : vector<1x1x32xf32> to vector<1x32xf32>
    %222 = vector.broadcast %221 : vector<1x32xf32> to vector<2x32xf32>
    %223 = arith.addf %219, %222 : vector<2x32xf32>
    %224 = vector.extract_strided_slice %2 {offsets = [2, 0, 0], sizes = [1, 32, 32], strides = [1, 1, 1]} : vector<3x32x32xf32> to vector<1x32x32xf32>
    %225 = vector.shape_cast %224 : vector<1x32x32xf32> to vector<32x32xf32>
    %cst_67 = arith.constant dense<0.000000e+00> : vector<2x32xf32>
    %226 = tpu.matmul %180, %225, %cst_67 {dimension_numbers = #tpu.dot_dimension_numbers<[1], [0], [0], [1], [0, 0, 1, 1], [], []>} : vector<2x32xf32>, vector<32x32xf32>, vector<2x32xf32> -> vector<2x32xf32>
    %227 = vector.extract_strided_slice %4 {offsets = [2, 0, 0], sizes = [1, 1, 32], strides = [1, 1, 1]} : vector<3x1x32xf32> to vector<1x1x32xf32>
    %228 = vector.shape_cast %227 : vector<1x1x32xf32> to vector<1x32xf32>
    %229 = vector.broadcast %228 : vector<1x32xf32> to vector<2x32xf32>
    %230 = arith.addf %226, %229 : vector<2x32xf32>
    %231 = arith.addf %195, %216 : vector<2x32xf32>
    %232 = arith.negf %231 : vector<2x32xf32>
    %233 = math.exp %232 : vector<2x32xf32>
    %cst_68 = arith.constant 1.000000e+00 : f32
    %234 = vector.broadcast %cst_68 : f32 to vector<2x32xf32>
    %235 = arith.addf %234, %233 : vector<2x32xf32>
    %236 = arith.divf %234, %235 : vector<2x32xf32>
    %237 = arith.addf %202, %223 : vector<2x32xf32>
    %238 = arith.negf %237 : vector<2x32xf32>
    %239 = math.exp %238 : vector<2x32xf32>
    %cst_69 = arith.constant 1.000000e+00 : f32
    %240 = vector.broadcast %cst_69 : f32 to vector<2x32xf32>
    %241 = arith.addf %240, %239 : vector<2x32xf32>
    %242 = arith.divf %240, %241 : vector<2x32xf32>
    %243 = arith.mulf %236, %230 : vector<2x32xf32>
    %244 = arith.addf %209, %243 : vector<2x32xf32>
    %245 = math.tanh %244 : vector<2x32xf32>
    %cst_70 = arith.constant 1.000000e+00 : f32
    %246 = vector.broadcast %cst_70 : f32 to vector<2x32xf32>
    %247 = arith.subf %246, %242 : vector<2x32xf32>
    %248 = arith.mulf %247, %245 : vector<2x32xf32>
    %249 = arith.mulf %242, %180 : vector<2x32xf32>
    %250 = arith.addf %248, %249 : vector<2x32xf32>
    %251 = vector.broadcast %188 : vector<2x1xf32> to vector<2x32xf32>
    %252 = arith.mulf %251, %250 : vector<2x32xf32>
    %cst_71 = arith.constant 1.000000e+00 : f32
    %253 = vector.broadcast %cst_71 : f32 to vector<2x1xf32>
    %254 = arith.subf %253, %188 : vector<2x1xf32>
    %255 = vector.broadcast %254 : vector<2x1xf32> to vector<2x32xf32>
    %256 = arith.mulf %255, %180 : vector<2x32xf32>
    %257 = arith.addf %252, %256 : vector<2x32xf32>
    %258 = vector.broadcast %188 : vector<2x1xf32> to vector<2x32xf32>
    %259 = arith.mulf %250, %258 : vector<2x32xf32>
    %260 = vector.extract_strided_slice %27 {offsets = [0, 3, 0], sizes = [2, 1, 8], strides = [1, 1, 1]} : vector<2x8x8xf32> to vector<2x1x8xf32>
    %261 = vector.shape_cast %260 : vector<2x1x8xf32> to vector<2x8xf32>
    %c3_i32 = arith.constant 3 : i32
    %262 = vector.broadcast %c3_i32 : i32 to vector<2x1xi32>
    %263 = arith.cmpi sgt, %17, %262 : vector<2x1xi32>
    %264 = arith.extui %263 : vector<2x1xi1> to vector<2x1xi32>
    %265 = arith.sitofp %264 : vector<2x1xi32> to vector<2x1xf32>
    %266 = vector.extract_strided_slice %1 {offsets = [0, 0, 0], sizes = [1, 8, 32], strides = [1, 1, 1]} : vector<3x8x32xf32> to vector<1x8x32xf32>
    %267 = vector.shape_cast %266 : vector<1x8x32xf32> to vector<8x32xf32>
    %cst_72 = arith.constant dense<0.000000e+00> : vector<2x32xf32>
    %268 = tpu.matmul %261, %267, %cst_72 {dimension_numbers = #tpu.dot_dimension_numbers<[1], [0], [0], [1], [0, 0, 1, 1], [], []>} : vector<2x8xf32>, vector<8x32xf32>, vector<2x32xf32> -> vector<2x32xf32>
    %269 = vector.extract_strided_slice %3 {offsets = [0, 0, 0], sizes = [1, 1, 32], strides = [1, 1, 1]} : vector<3x1x32xf32> to vector<1x1x32xf32>
    %270 = vector.shape_cast %269 : vector<1x1x32xf32> to vector<1x32xf32>
    %271 = vector.broadcast %270 : vector<1x32xf32> to vector<2x32xf32>
    %272 = arith.addf %268, %271 : vector<2x32xf32>
    %273 = vector.extract_strided_slice %1 {offsets = [1, 0, 0], sizes = [1, 8, 32], strides = [1, 1, 1]} : vector<3x8x32xf32> to vector<1x8x32xf32>
    %274 = vector.shape_cast %273 : vector<1x8x32xf32> to vector<8x32xf32>
    %cst_73 = arith.constant dense<0.000000e+00> : vector<2x32xf32>
    %275 = tpu.matmul %261, %274, %cst_73 {dimension_numbers = #tpu.dot_dimension_numbers<[1], [0], [0], [1], [0, 0, 1, 1], [], []>} : vector<2x8xf32>, vector<8x32xf32>, vector<2x32xf32> -> vector<2x32xf32>
    %276 = vector.extract_strided_slice %3 {offsets = [1, 0, 0], sizes = [1, 1, 32], strides = [1, 1, 1]} : vector<3x1x32xf32> to vector<1x1x32xf32>
    %277 = vector.shape_cast %276 : vector<1x1x32xf32> to vector<1x32xf32>
    %278 = vector.broadcast %277 : vector<1x32xf32> to vector<2x32xf32>
    %279 = arith.addf %275, %278 : vector<2x32xf32>
    %280 = vector.extract_strided_slice %1 {offsets = [2, 0, 0], sizes = [1, 8, 32], strides = [1, 1, 1]} : vector<3x8x32xf32> to vector<1x8x32xf32>
    %281 = vector.shape_cast %280 : vector<1x8x32xf32> to vector<8x32xf32>
    %cst_74 = arith.constant dense<0.000000e+00> : vector<2x32xf32>
    %282 = tpu.matmul %261, %281, %cst_74 {dimension_numbers = #tpu.dot_dimension_numbers<[1], [0], [0], [1], [0, 0, 1, 1], [], []>} : vector<2x8xf32>, vector<8x32xf32>, vector<2x32xf32> -> vector<2x32xf32>
    %283 = vector.extract_strided_slice %3 {offsets = [2, 0, 0], sizes = [1, 1, 32], strides = [1, 1, 1]} : vector<3x1x32xf32> to vector<1x1x32xf32>
    %284 = vector.shape_cast %283 : vector<1x1x32xf32> to vector<1x32xf32>
    %285 = vector.broadcast %284 : vector<1x32xf32> to vector<2x32xf32>
    %286 = arith.addf %282, %285 : vector<2x32xf32>
    %287 = vector.extract_strided_slice %2 {offsets = [0, 0, 0], sizes = [1, 32, 32], strides = [1, 1, 1]} : vector<3x32x32xf32> to vector<1x32x32xf32>
    %288 = vector.shape_cast %287 : vector<1x32x32xf32> to vector<32x32xf32>
    %cst_75 = arith.constant dense<0.000000e+00> : vector<2x32xf32>
    %289 = tpu.matmul %257, %288, %cst_75 {dimension_numbers = #tpu.dot_dimension_numbers<[1], [0], [0], [1], [0, 0, 1, 1], [], []>} : vector<2x32xf32>, vector<32x32xf32>, vector<2x32xf32> -> vector<2x32xf32>
    %290 = vector.extract_strided_slice %4 {offsets = [0, 0, 0], sizes = [1, 1, 32], strides = [1, 1, 1]} : vector<3x1x32xf32> to vector<1x1x32xf32>
    %291 = vector.shape_cast %290 : vector<1x1x32xf32> to vector<1x32xf32>
    %292 = vector.broadcast %291 : vector<1x32xf32> to vector<2x32xf32>
    %293 = arith.addf %289, %292 : vector<2x32xf32>
    %294 = vector.extract_strided_slice %2 {offsets = [1, 0, 0], sizes = [1, 32, 32], strides = [1, 1, 1]} : vector<3x32x32xf32> to vector<1x32x32xf32>
    %295 = vector.shape_cast %294 : vector<1x32x32xf32> to vector<32x32xf32>
    %cst_76 = arith.constant dense<0.000000e+00> : vector<2x32xf32>
    %296 = tpu.matmul %257, %295, %cst_76 {dimension_numbers = #tpu.dot_dimension_numbers<[1], [0], [0], [1], [0, 0, 1, 1], [], []>} : vector<2x32xf32>, vector<32x32xf32>, vector<2x32xf32> -> vector<2x32xf32>
    %297 = vector.extract_strided_slice %4 {offsets = [1, 0, 0], sizes = [1, 1, 32], strides = [1, 1, 1]} : vector<3x1x32xf32> to vector<1x1x32xf32>
    %298 = vector.shape_cast %297 : vector<1x1x32xf32> to vector<1x32xf32>
    %299 = vector.broadcast %298 : vector<1x32xf32> to vector<2x32xf32>
    %300 = arith.addf %296, %299 : vector<2x32xf32>
    %301 = vector.extract_strided_slice %2 {offsets = [2, 0, 0], sizes = [1, 32, 32], strides = [1, 1, 1]} : vector<3x32x32xf32> to vector<1x32x32xf32>
    %302 = vector.shape_cast %301 : vector<1x32x32xf32> to vector<32x32xf32>
    %cst_77 = arith.constant dense<0.000000e+00> : vector<2x32xf32>
    %303 = tpu.matmul %257, %302, %cst_77 {dimension_numbers = #tpu.dot_dimension_numbers<[1], [0], [0], [1], [0, 0, 1, 1], [], []>} : vector<2x32xf32>, vector<32x32xf32>, vector<2x32xf32> -> vector<2x32xf32>
    %304 = vector.extract_strided_slice %4 {offsets = [2, 0, 0], sizes = [1, 1, 32], strides = [1, 1, 1]} : vector<3x1x32xf32> to vector<1x1x32xf32>
    %305 = vector.shape_cast %304 : vector<1x1x32xf32> to vector<1x32xf32>
    %306 = vector.broadcast %305 : vector<1x32xf32> to vector<2x32xf32>
    %307 = arith.addf %303, %306 : vector<2x32xf32>
    %308 = arith.addf %272, %293 : vector<2x32xf32>
    %309 = arith.negf %308 : vector<2x32xf32>
    %310 = math.exp %309 : vector<2x32xf32>
    %cst_78 = arith.constant 1.000000e+00 : f32
    %311 = vector.broadcast %cst_78 : f32 to vector<2x32xf32>
    %312 = arith.addf %311, %310 : vector<2x32xf32>
    %313 = arith.divf %311, %312 : vector<2x32xf32>
    %314 = arith.addf %279, %300 : vector<2x32xf32>
    %315 = arith.negf %314 : vector<2x32xf32>
    %316 = math.exp %315 : vector<2x32xf32>
    %cst_79 = arith.constant 1.000000e+00 : f32
    %317 = vector.broadcast %cst_79 : f32 to vector<2x32xf32>
    %318 = arith.addf %317, %316 : vector<2x32xf32>
    %319 = arith.divf %317, %318 : vector<2x32xf32>
    %320 = arith.mulf %313, %307 : vector<2x32xf32>
    %321 = arith.addf %286, %320 : vector<2x32xf32>
    %322 = math.tanh %321 : vector<2x32xf32>
    %cst_80 = arith.constant 1.000000e+00 : f32
    %323 = vector.broadcast %cst_80 : f32 to vector<2x32xf32>
    %324 = arith.subf %323, %319 : vector<2x32xf32>
    %325 = arith.mulf %324, %322 : vector<2x32xf32>
    %326 = arith.mulf %319, %257 : vector<2x32xf32>
    %327 = arith.addf %325, %326 : vector<2x32xf32>
    %328 = vector.broadcast %265 : vector<2x1xf32> to vector<2x32xf32>
    %329 = arith.mulf %328, %327 : vector<2x32xf32>
    %cst_81 = arith.constant 1.000000e+00 : f32
    %330 = vector.broadcast %cst_81 : f32 to vector<2x1xf32>
    %331 = arith.subf %330, %265 : vector<2x1xf32>
    %332 = vector.broadcast %331 : vector<2x1xf32> to vector<2x32xf32>
    %333 = arith.mulf %332, %257 : vector<2x32xf32>
    %334 = arith.addf %329, %333 : vector<2x32xf32>
    %335 = vector.broadcast %265 : vector<2x1xf32> to vector<2x32xf32>
    %336 = arith.mulf %327, %335 : vector<2x32xf32>
    %337 = vector.extract_strided_slice %27 {offsets = [0, 4, 0], sizes = [2, 1, 8], strides = [1, 1, 1]} : vector<2x8x8xf32> to vector<2x1x8xf32>
    %338 = vector.shape_cast %337 : vector<2x1x8xf32> to vector<2x8xf32>
    %c4_i32 = arith.constant 4 : i32
    %339 = vector.broadcast %c4_i32 : i32 to vector<2x1xi32>
    %340 = arith.cmpi sgt, %17, %339 : vector<2x1xi32>
    %341 = arith.extui %340 : vector<2x1xi1> to vector<2x1xi32>
    %342 = arith.sitofp %341 : vector<2x1xi32> to vector<2x1xf32>
    %343 = vector.extract_strided_slice %1 {offsets = [0, 0, 0], sizes = [1, 8, 32], strides = [1, 1, 1]} : vector<3x8x32xf32> to vector<1x8x32xf32>
    %344 = vector.shape_cast %343 : vector<1x8x32xf32> to vector<8x32xf32>
    %cst_82 = arith.constant dense<0.000000e+00> : vector<2x32xf32>
    %345 = tpu.matmul %338, %344, %cst_82 {dimension_numbers = #tpu.dot_dimension_numbers<[1], [0], [0], [1], [0, 0, 1, 1], [], []>} : vector<2x8xf32>, vector<8x32xf32>, vector<2x32xf32> -> vector<2x32xf32>
    %346 = vector.extract_strided_slice %3 {offsets = [0, 0, 0], sizes = [1, 1, 32], strides = [1, 1, 1]} : vector<3x1x32xf32> to vector<1x1x32xf32>
    %347 = vector.shape_cast %346 : vector<1x1x32xf32> to vector<1x32xf32>
    %348 = vector.broadcast %347 : vector<1x32xf32> to vector<2x32xf32>
    %349 = arith.addf %345, %348 : vector<2x32xf32>
    %350 = vector.extract_strided_slice %1 {offsets = [1, 0, 0], sizes = [1, 8, 32], strides = [1, 1, 1]} : vector<3x8x32xf32> to vector<1x8x32xf32>
    %351 = vector.shape_cast %350 : vector<1x8x32xf32> to vector<8x32xf32>
    %cst_83 = arith.constant dense<0.000000e+00> : vector<2x32xf32>
    %352 = tpu.matmul %338, %351, %cst_83 {dimension_numbers = #tpu.dot_dimension_numbers<[1], [0], [0], [1], [0, 0, 1, 1], [], []>} : vector<2x8xf32>, vector<8x32xf32>, vector<2x32xf32> -> vector<2x32xf32>
    %353 = vector.extract_strided_slice %3 {offsets = [1, 0, 0], sizes = [1, 1, 32], strides = [1, 1, 1]} : vector<3x1x32xf32> to vector<1x1x32xf32>
    %354 = vector.shape_cast %353 : vector<1x1x32xf32> to vector<1x32xf32>
    %355 = vector.broadcast %354 : vector<1x32xf32> to vector<2x32xf32>
    %356 = arith.addf %352, %355 : vector<2x32xf32>
    %357 = vector.extract_strided_slice %1 {offsets = [2, 0, 0], sizes = [1, 8, 32], strides = [1, 1, 1]} : vector<3x8x32xf32> to vector<1x8x32xf32>
    %358 = vector.shape_cast %357 : vector<1x8x32xf32> to vector<8x32xf32>
    %cst_84 = arith.constant dense<0.000000e+00> : vector<2x32xf32>
    %359 = tpu.matmul %338, %358, %cst_84 {dimension_numbers = #tpu.dot_dimension_numbers<[1], [0], [0], [1], [0, 0, 1, 1], [], []>} : vector<2x8xf32>, vector<8x32xf32>, vector<2x32xf32> -> vector<2x32xf32>
    %360 = vector.extract_strided_slice %3 {offsets = [2, 0, 0], sizes = [1, 1, 32], strides = [1, 1, 1]} : vector<3x1x32xf32> to vector<1x1x32xf32>
    %361 = vector.shape_cast %360 : vector<1x1x32xf32> to vector<1x32xf32>
    %362 = vector.broadcast %361 : vector<1x32xf32> to vector<2x32xf32>
    %363 = arith.addf %359, %362 : vector<2x32xf32>
    %364 = vector.extract_strided_slice %2 {offsets = [0, 0, 0], sizes = [1, 32, 32], strides = [1, 1, 1]} : vector<3x32x32xf32> to vector<1x32x32xf32>
    %365 = vector.shape_cast %364 : vector<1x32x32xf32> to vector<32x32xf32>
    %cst_85 = arith.constant dense<0.000000e+00> : vector<2x32xf32>
    %366 = tpu.matmul %334, %365, %cst_85 {dimension_numbers = #tpu.dot_dimension_numbers<[1], [0], [0], [1], [0, 0, 1, 1], [], []>} : vector<2x32xf32>, vector<32x32xf32>, vector<2x32xf32> -> vector<2x32xf32>
    %367 = vector.extract_strided_slice %4 {offsets = [0, 0, 0], sizes = [1, 1, 32], strides = [1, 1, 1]} : vector<3x1x32xf32> to vector<1x1x32xf32>
    %368 = vector.shape_cast %367 : vector<1x1x32xf32> to vector<1x32xf32>
    %369 = vector.broadcast %368 : vector<1x32xf32> to vector<2x32xf32>
    %370 = arith.addf %366, %369 : vector<2x32xf32>
    %371 = vector.extract_strided_slice %2 {offsets = [1, 0, 0], sizes = [1, 32, 32], strides = [1, 1, 1]} : vector<3x32x32xf32> to vector<1x32x32xf32>
    %372 = vector.shape_cast %371 : vector<1x32x32xf32> to vector<32x32xf32>
    %cst_86 = arith.constant dense<0.000000e+00> : vector<2x32xf32>
    %373 = tpu.matmul %334, %372, %cst_86 {dimension_numbers = #tpu.dot_dimension_numbers<[1], [0], [0], [1], [0, 0, 1, 1], [], []>} : vector<2x32xf32>, vector<32x32xf32>, vector<2x32xf32> -> vector<2x32xf32>
    %374 = vector.extract_strided_slice %4 {offsets = [1, 0, 0], sizes = [1, 1, 32], strides = [1, 1, 1]} : vector<3x1x32xf32> to vector<1x1x32xf32>
    %375 = vector.shape_cast %374 : vector<1x1x32xf32> to vector<1x32xf32>
    %376 = vector.broadcast %375 : vector<1x32xf32> to vector<2x32xf32>
    %377 = arith.addf %373, %376 : vector<2x32xf32>
    %378 = vector.extract_strided_slice %2 {offsets = [2, 0, 0], sizes = [1, 32, 32], strides = [1, 1, 1]} : vector<3x32x32xf32> to vector<1x32x32xf32>
    %379 = vector.shape_cast %378 : vector<1x32x32xf32> to vector<32x32xf32>
    %cst_87 = arith.constant dense<0.000000e+00> : vector<2x32xf32>
    %380 = tpu.matmul %334, %379, %cst_87 {dimension_numbers = #tpu.dot_dimension_numbers<[1], [0], [0], [1], [0, 0, 1, 1], [], []>} : vector<2x32xf32>, vector<32x32xf32>, vector<2x32xf32> -> vector<2x32xf32>
    %381 = vector.extract_strided_slice %4 {offsets = [2, 0, 0], sizes = [1, 1, 32], strides = [1, 1, 1]} : vector<3x1x32xf32> to vector<1x1x32xf32>
    %382 = vector.shape_cast %381 : vector<1x1x32xf32> to vector<1x32xf32>
    %383 = vector.broadcast %382 : vector<1x32xf32> to vector<2x32xf32>
    %384 = arith.addf %380, %383 : vector<2x32xf32>
    %385 = arith.addf %349, %370 : vector<2x32xf32>
    %386 = arith.negf %385 : vector<2x32xf32>
    %387 = math.exp %386 : vector<2x32xf32>
    %cst_88 = arith.constant 1.000000e+00 : f32
    %388 = vector.broadcast %cst_88 : f32 to vector<2x32xf32>
    %389 = arith.addf %388, %387 : vector<2x32xf32>
    %390 = arith.divf %388, %389 : vector<2x32xf32>
    %391 = arith.addf %356, %377 : vector<2x32xf32>
    %392 = arith.negf %391 : vector<2x32xf32>
    %393 = math.exp %392 : vector<2x32xf32>
    %cst_89 = arith.constant 1.000000e+00 : f32
    %394 = vector.broadcast %cst_89 : f32 to vector<2x32xf32>
    %395 = arith.addf %394, %393 : vector<2x32xf32>
    %396 = arith.divf %394, %395 : vector<2x32xf32>
    %397 = arith.mulf %390, %384 : vector<2x32xf32>
    %398 = arith.addf %363, %397 : vector<2x32xf32>
    %399 = math.tanh %398 : vector<2x32xf32>
    %cst_90 = arith.constant 1.000000e+00 : f32
    %400 = vector.broadcast %cst_90 : f32 to vector<2x32xf32>
    %401 = arith.subf %400, %396 : vector<2x32xf32>
    %402 = arith.mulf %401, %399 : vector<2x32xf32>
    %403 = arith.mulf %396, %334 : vector<2x32xf32>
    %404 = arith.addf %402, %403 : vector<2x32xf32>
    %405 = vector.broadcast %342 : vector<2x1xf32> to vector<2x32xf32>
    %406 = arith.mulf %405, %404 : vector<2x32xf32>
    %cst_91 = arith.constant 1.000000e+00 : f32
    %407 = vector.broadcast %cst_91 : f32 to vector<2x1xf32>
    %408 = arith.subf %407, %342 : vector<2x1xf32>
    %409 = vector.broadcast %408 : vector<2x1xf32> to vector<2x32xf32>
    %410 = arith.mulf %409, %334 : vector<2x32xf32>
    %411 = arith.addf %406, %410 : vector<2x32xf32>
    %412 = vector.broadcast %342 : vector<2x1xf32> to vector<2x32xf32>
    %413 = arith.mulf %404, %412 : vector<2x32xf32>
    %414 = vector.extract_strided_slice %27 {offsets = [0, 5, 0], sizes = [2, 1, 8], strides = [1, 1, 1]} : vector<2x8x8xf32> to vector<2x1x8xf32>
    %415 = vector.shape_cast %414 : vector<2x1x8xf32> to vector<2x8xf32>
    %c5_i32 = arith.constant 5 : i32
    %416 = vector.broadcast %c5_i32 : i32 to vector<2x1xi32>
    %417 = arith.cmpi sgt, %17, %416 : vector<2x1xi32>
    %418 = arith.extui %417 : vector<2x1xi1> to vector<2x1xi32>
    %419 = arith.sitofp %418 : vector<2x1xi32> to vector<2x1xf32>
    %420 = vector.extract_strided_slice %1 {offsets = [0, 0, 0], sizes = [1, 8, 32], strides = [1, 1, 1]} : vector<3x8x32xf32> to vector<1x8x32xf32>
    %421 = vector.shape_cast %420 : vector<1x8x32xf32> to vector<8x32xf32>
    %cst_92 = arith.constant dense<0.000000e+00> : vector<2x32xf32>
    %422 = tpu.matmul %415, %421, %cst_92 {dimension_numbers = #tpu.dot_dimension_numbers<[1], [0], [0], [1], [0, 0, 1, 1], [], []>} : vector<2x8xf32>, vector<8x32xf32>, vector<2x32xf32> -> vector<2x32xf32>
    %423 = vector.extract_strided_slice %3 {offsets = [0, 0, 0], sizes = [1, 1, 32], strides = [1, 1, 1]} : vector<3x1x32xf32> to vector<1x1x32xf32>
    %424 = vector.shape_cast %423 : vector<1x1x32xf32> to vector<1x32xf32>
    %425 = vector.broadcast %424 : vector<1x32xf32> to vector<2x32xf32>
    %426 = arith.addf %422, %425 : vector<2x32xf32>
    %427 = vector.extract_strided_slice %1 {offsets = [1, 0, 0], sizes = [1, 8, 32], strides = [1, 1, 1]} : vector<3x8x32xf32> to vector<1x8x32xf32>
    %428 = vector.shape_cast %427 : vector<1x8x32xf32> to vector<8x32xf32>
    %cst_93 = arith.constant dense<0.000000e+00> : vector<2x32xf32>
    %429 = tpu.matmul %415, %428, %cst_93 {dimension_numbers = #tpu.dot_dimension_numbers<[1], [0], [0], [1], [0, 0, 1, 1], [], []>} : vector<2x8xf32>, vector<8x32xf32>, vector<2x32xf32> -> vector<2x32xf32>
    %430 = vector.extract_strided_slice %3 {offsets = [1, 0, 0], sizes = [1, 1, 32], strides = [1, 1, 1]} : vector<3x1x32xf32> to vector<1x1x32xf32>
    %431 = vector.shape_cast %430 : vector<1x1x32xf32> to vector<1x32xf32>
    %432 = vector.broadcast %431 : vector<1x32xf32> to vector<2x32xf32>
    %433 = arith.addf %429, %432 : vector<2x32xf32>
    %434 = vector.extract_strided_slice %1 {offsets = [2, 0, 0], sizes = [1, 8, 32], strides = [1, 1, 1]} : vector<3x8x32xf32> to vector<1x8x32xf32>
    %435 = vector.shape_cast %434 : vector<1x8x32xf32> to vector<8x32xf32>
    %cst_94 = arith.constant dense<0.000000e+00> : vector<2x32xf32>
    %436 = tpu.matmul %415, %435, %cst_94 {dimension_numbers = #tpu.dot_dimension_numbers<[1], [0], [0], [1], [0, 0, 1, 1], [], []>} : vector<2x8xf32>, vector<8x32xf32>, vector<2x32xf32> -> vector<2x32xf32>
    %437 = vector.extract_strided_slice %3 {offsets = [2, 0, 0], sizes = [1, 1, 32], strides = [1, 1, 1]} : vector<3x1x32xf32> to vector<1x1x32xf32>
    %438 = vector.shape_cast %437 : vector<1x1x32xf32> to vector<1x32xf32>
    %439 = vector.broadcast %438 : vector<1x32xf32> to vector<2x32xf32>
    %440 = arith.addf %436, %439 : vector<2x32xf32>
    %441 = vector.extract_strided_slice %2 {offsets = [0, 0, 0], sizes = [1, 32, 32], strides = [1, 1, 1]} : vector<3x32x32xf32> to vector<1x32x32xf32>
    %442 = vector.shape_cast %441 : vector<1x32x32xf32> to vector<32x32xf32>
    %cst_95 = arith.constant dense<0.000000e+00> : vector<2x32xf32>
    %443 = tpu.matmul %411, %442, %cst_95 {dimension_numbers = #tpu.dot_dimension_numbers<[1], [0], [0], [1], [0, 0, 1, 1], [], []>} : vector<2x32xf32>, vector<32x32xf32>, vector<2x32xf32> -> vector<2x32xf32>
    %444 = vector.extract_strided_slice %4 {offsets = [0, 0, 0], sizes = [1, 1, 32], strides = [1, 1, 1]} : vector<3x1x32xf32> to vector<1x1x32xf32>
    %445 = vector.shape_cast %444 : vector<1x1x32xf32> to vector<1x32xf32>
    %446 = vector.broadcast %445 : vector<1x32xf32> to vector<2x32xf32>
    %447 = arith.addf %443, %446 : vector<2x32xf32>
    %448 = vector.extract_strided_slice %2 {offsets = [1, 0, 0], sizes = [1, 32, 32], strides = [1, 1, 1]} : vector<3x32x32xf32> to vector<1x32x32xf32>
    %449 = vector.shape_cast %448 : vector<1x32x32xf32> to vector<32x32xf32>
    %cst_96 = arith.constant dense<0.000000e+00> : vector<2x32xf32>
    %450 = tpu.matmul %411, %449, %cst_96 {dimension_numbers = #tpu.dot_dimension_numbers<[1], [0], [0], [1], [0, 0, 1, 1], [], []>} : vector<2x32xf32>, vector<32x32xf32>, vector<2x32xf32> -> vector<2x32xf32>
    %451 = vector.extract_strided_slice %4 {offsets = [1, 0, 0], sizes = [1, 1, 32], strides = [1, 1, 1]} : vector<3x1x32xf32> to vector<1x1x32xf32>
    %452 = vector.shape_cast %451 : vector<1x1x32xf32> to vector<1x32xf32>
    %453 = vector.broadcast %452 : vector<1x32xf32> to vector<2x32xf32>
    %454 = arith.addf %450, %453 : vector<2x32xf32>
    %455 = vector.extract_strided_slice %2 {offsets = [2, 0, 0], sizes = [1, 32, 32], strides = [1, 1, 1]} : vector<3x32x32xf32> to vector<1x32x32xf32>
    %456 = vector.shape_cast %455 : vector<1x32x32xf32> to vector<32x32xf32>
    %cst_97 = arith.constant dense<0.000000e+00> : vector<2x32xf32>
    %457 = tpu.matmul %411, %456, %cst_97 {dimension_numbers = #tpu.dot_dimension_numbers<[1], [0], [0], [1], [0, 0, 1, 1], [], []>} : vector<2x32xf32>, vector<32x32xf32>, vector<2x32xf32> -> vector<2x32xf32>
    %458 = vector.extract_strided_slice %4 {offsets = [2, 0, 0], sizes = [1, 1, 32], strides = [1, 1, 1]} : vector<3x1x32xf32> to vector<1x1x32xf32>
    %459 = vector.shape_cast %458 : vector<1x1x32xf32> to vector<1x32xf32>
    %460 = vector.broadcast %459 : vector<1x32xf32> to vector<2x32xf32>
    %461 = arith.addf %457, %460 : vector<2x32xf32>
    %462 = arith.addf %426, %447 : vector<2x32xf32>
    %463 = arith.negf %462 : vector<2x32xf32>
    %464 = math.exp %463 : vector<2x32xf32>
    %cst_98 = arith.constant 1.000000e+00 : f32
    %465 = vector.broadcast %cst_98 : f32 to vector<2x32xf32>
    %466 = arith.addf %465, %464 : vector<2x32xf32>
    %467 = arith.divf %465, %466 : vector<2x32xf32>
    %468 = arith.addf %433, %454 : vector<2x32xf32>
    %469 = arith.negf %468 : vector<2x32xf32>
    %470 = math.exp %469 : vector<2x32xf32>
    %cst_99 = arith.constant 1.000000e+00 : f32
    %471 = vector.broadcast %cst_99 : f32 to vector<2x32xf32>
    %472 = arith.addf %471, %470 : vector<2x32xf32>
    %473 = arith.divf %471, %472 : vector<2x32xf32>
    %474 = arith.mulf %467, %461 : vector<2x32xf32>
    %475 = arith.addf %440, %474 : vector<2x32xf32>
    %476 = math.tanh %475 : vector<2x32xf32>
    %cst_100 = arith.constant 1.000000e+00 : f32
    %477 = vector.broadcast %cst_100 : f32 to vector<2x32xf32>
    %478 = arith.subf %477, %473 : vector<2x32xf32>
    %479 = arith.mulf %478, %476 : vector<2x32xf32>
    %480 = arith.mulf %473, %411 : vector<2x32xf32>
    %481 = arith.addf %479, %480 : vector<2x32xf32>
    %482 = vector.broadcast %419 : vector<2x1xf32> to vector<2x32xf32>
    %483 = arith.mulf %482, %481 : vector<2x32xf32>
    %cst_101 = arith.constant 1.000000e+00 : f32
    %484 = vector.broadcast %cst_101 : f32 to vector<2x1xf32>
    %485 = arith.subf %484, %419 : vector<2x1xf32>
    %486 = vector.broadcast %485 : vector<2x1xf32> to vector<2x32xf32>
    %487 = arith.mulf %486, %411 : vector<2x32xf32>
    %488 = arith.addf %483, %487 : vector<2x32xf32>
    %489 = vector.broadcast %419 : vector<2x1xf32> to vector<2x32xf32>
    %490 = arith.mulf %481, %489 : vector<2x32xf32>
    %491 = vector.extract_strided_slice %27 {offsets = [0, 6, 0], sizes = [2, 1, 8], strides = [1, 1, 1]} : vector<2x8x8xf32> to vector<2x1x8xf32>
    %492 = vector.shape_cast %491 : vector<2x1x8xf32> to vector<2x8xf32>
    %c6_i32 = arith.constant 6 : i32
    %493 = vector.broadcast %c6_i32 : i32 to vector<2x1xi32>
    %494 = arith.cmpi sgt, %17, %493 : vector<2x1xi32>
    %495 = arith.extui %494 : vector<2x1xi1> to vector<2x1xi32>
    %496 = arith.sitofp %495 : vector<2x1xi32> to vector<2x1xf32>
    %497 = vector.extract_strided_slice %1 {offsets = [0, 0, 0], sizes = [1, 8, 32], strides = [1, 1, 1]} : vector<3x8x32xf32> to vector<1x8x32xf32>
    %498 = vector.shape_cast %497 : vector<1x8x32xf32> to vector<8x32xf32>
    %cst_102 = arith.constant dense<0.000000e+00> : vector<2x32xf32>
    %499 = tpu.matmul %492, %498, %cst_102 {dimension_numbers = #tpu.dot_dimension_numbers<[1], [0], [0], [1], [0, 0, 1, 1], [], []>} : vector<2x8xf32>, vector<8x32xf32>, vector<2x32xf32> -> vector<2x32xf32>
    %500 = vector.extract_strided_slice %3 {offsets = [0, 0, 0], sizes = [1, 1, 32], strides = [1, 1, 1]} : vector<3x1x32xf32> to vector<1x1x32xf32>
    %501 = vector.shape_cast %500 : vector<1x1x32xf32> to vector<1x32xf32>
    %502 = vector.broadcast %501 : vector<1x32xf32> to vector<2x32xf32>
    %503 = arith.addf %499, %502 : vector<2x32xf32>
    %504 = vector.extract_strided_slice %1 {offsets = [1, 0, 0], sizes = [1, 8, 32], strides = [1, 1, 1]} : vector<3x8x32xf32> to vector<1x8x32xf32>
    %505 = vector.shape_cast %504 : vector<1x8x32xf32> to vector<8x32xf32>
    %cst_103 = arith.constant dense<0.000000e+00> : vector<2x32xf32>
    %506 = tpu.matmul %492, %505, %cst_103 {dimension_numbers = #tpu.dot_dimension_numbers<[1], [0], [0], [1], [0, 0, 1, 1], [], []>} : vector<2x8xf32>, vector<8x32xf32>, vector<2x32xf32> -> vector<2x32xf32>
    %507 = vector.extract_strided_slice %3 {offsets = [1, 0, 0], sizes = [1, 1, 32], strides = [1, 1, 1]} : vector<3x1x32xf32> to vector<1x1x32xf32>
    %508 = vector.shape_cast %507 : vector<1x1x32xf32> to vector<1x32xf32>
    %509 = vector.broadcast %508 : vector<1x32xf32> to vector<2x32xf32>
    %510 = arith.addf %506, %509 : vector<2x32xf32>
    %511 = vector.extract_strided_slice %1 {offsets = [2, 0, 0], sizes = [1, 8, 32], strides = [1, 1, 1]} : vector<3x8x32xf32> to vector<1x8x32xf32>
    %512 = vector.shape_cast %511 : vector<1x8x32xf32> to vector<8x32xf32>
    %cst_104 = arith.constant dense<0.000000e+00> : vector<2x32xf32>
    %513 = tpu.matmul %492, %512, %cst_104 {dimension_numbers = #tpu.dot_dimension_numbers<[1], [0], [0], [1], [0, 0, 1, 1], [], []>} : vector<2x8xf32>, vector<8x32xf32>, vector<2x32xf32> -> vector<2x32xf32>
    %514 = vector.extract_strided_slice %3 {offsets = [2, 0, 0], sizes = [1, 1, 32], strides = [1, 1, 1]} : vector<3x1x32xf32> to vector<1x1x32xf32>
    %515 = vector.shape_cast %514 : vector<1x1x32xf32> to vector<1x32xf32>
    %516 = vector.broadcast %515 : vector<1x32xf32> to vector<2x32xf32>
    %517 = arith.addf %513, %516 : vector<2x32xf32>
    %518 = vector.extract_strided_slice %2 {offsets = [0, 0, 0], sizes = [1, 32, 32], strides = [1, 1, 1]} : vector<3x32x32xf32> to vector<1x32x32xf32>
    %519 = vector.shape_cast %518 : vector<1x32x32xf32> to vector<32x32xf32>
    %cst_105 = arith.constant dense<0.000000e+00> : vector<2x32xf32>
    %520 = tpu.matmul %488, %519, %cst_105 {dimension_numbers = #tpu.dot_dimension_numbers<[1], [0], [0], [1], [0, 0, 1, 1], [], []>} : vector<2x32xf32>, vector<32x32xf32>, vector<2x32xf32> -> vector<2x32xf32>
    %521 = vector.extract_strided_slice %4 {offsets = [0, 0, 0], sizes = [1, 1, 32], strides = [1, 1, 1]} : vector<3x1x32xf32> to vector<1x1x32xf32>
    %522 = vector.shape_cast %521 : vector<1x1x32xf32> to vector<1x32xf32>
    %523 = vector.broadcast %522 : vector<1x32xf32> to vector<2x32xf32>
    %524 = arith.addf %520, %523 : vector<2x32xf32>
    %525 = vector.extract_strided_slice %2 {offsets = [1, 0, 0], sizes = [1, 32, 32], strides = [1, 1, 1]} : vector<3x32x32xf32> to vector<1x32x32xf32>
    %526 = vector.shape_cast %525 : vector<1x32x32xf32> to vector<32x32xf32>
    %cst_106 = arith.constant dense<0.000000e+00> : vector<2x32xf32>
    %527 = tpu.matmul %488, %526, %cst_106 {dimension_numbers = #tpu.dot_dimension_numbers<[1], [0], [0], [1], [0, 0, 1, 1], [], []>} : vector<2x32xf32>, vector<32x32xf32>, vector<2x32xf32> -> vector<2x32xf32>
    %528 = vector.extract_strided_slice %4 {offsets = [1, 0, 0], sizes = [1, 1, 32], strides = [1, 1, 1]} : vector<3x1x32xf32> to vector<1x1x32xf32>
    %529 = vector.shape_cast %528 : vector<1x1x32xf32> to vector<1x32xf32>
    %530 = vector.broadcast %529 : vector<1x32xf32> to vector<2x32xf32>
    %531 = arith.addf %527, %530 : vector<2x32xf32>
    %532 = vector.extract_strided_slice %2 {offsets = [2, 0, 0], sizes = [1, 32, 32], strides = [1, 1, 1]} : vector<3x32x32xf32> to vector<1x32x32xf32>
    %533 = vector.shape_cast %532 : vector<1x32x32xf32> to vector<32x32xf32>
    %cst_107 = arith.constant dense<0.000000e+00> : vector<2x32xf32>
    %534 = tpu.matmul %488, %533, %cst_107 {dimension_numbers = #tpu.dot_dimension_numbers<[1], [0], [0], [1], [0, 0, 1, 1], [], []>} : vector<2x32xf32>, vector<32x32xf32>, vector<2x32xf32> -> vector<2x32xf32>
    %535 = vector.extract_strided_slice %4 {offsets = [2, 0, 0], sizes = [1, 1, 32], strides = [1, 1, 1]} : vector<3x1x32xf32> to vector<1x1x32xf32>
    %536 = vector.shape_cast %535 : vector<1x1x32xf32> to vector<1x32xf32>
    %537 = vector.broadcast %536 : vector<1x32xf32> to vector<2x32xf32>
    %538 = arith.addf %534, %537 : vector<2x32xf32>
    %539 = arith.addf %503, %524 : vector<2x32xf32>
    %540 = arith.negf %539 : vector<2x32xf32>
    %541 = math.exp %540 : vector<2x32xf32>
    %cst_108 = arith.constant 1.000000e+00 : f32
    %542 = vector.broadcast %cst_108 : f32 to vector<2x32xf32>
    %543 = arith.addf %542, %541 : vector<2x32xf32>
    %544 = arith.divf %542, %543 : vector<2x32xf32>
    %545 = arith.addf %510, %531 : vector<2x32xf32>
    %546 = arith.negf %545 : vector<2x32xf32>
    %547 = math.exp %546 : vector<2x32xf32>
    %cst_109 = arith.constant 1.000000e+00 : f32
    %548 = vector.broadcast %cst_109 : f32 to vector<2x32xf32>
    %549 = arith.addf %548, %547 : vector<2x32xf32>
    %550 = arith.divf %548, %549 : vector<2x32xf32>
    %551 = arith.mulf %544, %538 : vector<2x32xf32>
    %552 = arith.addf %517, %551 : vector<2x32xf32>
    %553 = math.tanh %552 : vector<2x32xf32>
    %cst_110 = arith.constant 1.000000e+00 : f32
    %554 = vector.broadcast %cst_110 : f32 to vector<2x32xf32>
    %555 = arith.subf %554, %550 : vector<2x32xf32>
    %556 = arith.mulf %555, %553 : vector<2x32xf32>
    %557 = arith.mulf %550, %488 : vector<2x32xf32>
    %558 = arith.addf %556, %557 : vector<2x32xf32>
    %559 = vector.broadcast %496 : vector<2x1xf32> to vector<2x32xf32>
    %560 = arith.mulf %559, %558 : vector<2x32xf32>
    %cst_111 = arith.constant 1.000000e+00 : f32
    %561 = vector.broadcast %cst_111 : f32 to vector<2x1xf32>
    %562 = arith.subf %561, %496 : vector<2x1xf32>
    %563 = vector.broadcast %562 : vector<2x1xf32> to vector<2x32xf32>
    %564 = arith.mulf %563, %488 : vector<2x32xf32>
    %565 = arith.addf %560, %564 : vector<2x32xf32>
    %566 = vector.broadcast %496 : vector<2x1xf32> to vector<2x32xf32>
    %567 = arith.mulf %558, %566 : vector<2x32xf32>
    %568 = vector.extract_strided_slice %27 {offsets = [0, 7, 0], sizes = [2, 1, 8], strides = [1, 1, 1]} : vector<2x8x8xf32> to vector<2x1x8xf32>
    %569 = vector.shape_cast %568 : vector<2x1x8xf32> to vector<2x8xf32>
    %c7_i32 = arith.constant 7 : i32
    %570 = vector.broadcast %c7_i32 : i32 to vector<2x1xi32>
    %571 = arith.cmpi sgt, %17, %570 : vector<2x1xi32>
    %572 = arith.extui %571 : vector<2x1xi1> to vector<2x1xi32>
    %573 = arith.sitofp %572 : vector<2x1xi32> to vector<2x1xf32>
    %574 = vector.extract_strided_slice %1 {offsets = [0, 0, 0], sizes = [1, 8, 32], strides = [1, 1, 1]} : vector<3x8x32xf32> to vector<1x8x32xf32>
    %575 = vector.shape_cast %574 : vector<1x8x32xf32> to vector<8x32xf32>
    %cst_112 = arith.constant dense<0.000000e+00> : vector<2x32xf32>
    %576 = tpu.matmul %569, %575, %cst_112 {dimension_numbers = #tpu.dot_dimension_numbers<[1], [0], [0], [1], [0, 0, 1, 1], [], []>} : vector<2x8xf32>, vector<8x32xf32>, vector<2x32xf32> -> vector<2x32xf32>
    %577 = vector.extract_strided_slice %3 {offsets = [0, 0, 0], sizes = [1, 1, 32], strides = [1, 1, 1]} : vector<3x1x32xf32> to vector<1x1x32xf32>
    %578 = vector.shape_cast %577 : vector<1x1x32xf32> to vector<1x32xf32>
    %579 = vector.broadcast %578 : vector<1x32xf32> to vector<2x32xf32>
    %580 = arith.addf %576, %579 : vector<2x32xf32>
    %581 = vector.extract_strided_slice %1 {offsets = [1, 0, 0], sizes = [1, 8, 32], strides = [1, 1, 1]} : vector<3x8x32xf32> to vector<1x8x32xf32>
    %582 = vector.shape_cast %581 : vector<1x8x32xf32> to vector<8x32xf32>
    %cst_113 = arith.constant dense<0.000000e+00> : vector<2x32xf32>
    %583 = tpu.matmul %569, %582, %cst_113 {dimension_numbers = #tpu.dot_dimension_numbers<[1], [0], [0], [1], [0, 0, 1, 1], [], []>} : vector<2x8xf32>, vector<8x32xf32>, vector<2x32xf32> -> vector<2x32xf32>
    %584 = vector.extract_strided_slice %3 {offsets = [1, 0, 0], sizes = [1, 1, 32], strides = [1, 1, 1]} : vector<3x1x32xf32> to vector<1x1x32xf32>
    %585 = vector.shape_cast %584 : vector<1x1x32xf32> to vector<1x32xf32>
    %586 = vector.broadcast %585 : vector<1x32xf32> to vector<2x32xf32>
    %587 = arith.addf %583, %586 : vector<2x32xf32>
    %588 = vector.extract_strided_slice %1 {offsets = [2, 0, 0], sizes = [1, 8, 32], strides = [1, 1, 1]} : vector<3x8x32xf32> to vector<1x8x32xf32>
    %589 = vector.shape_cast %588 : vector<1x8x32xf32> to vector<8x32xf32>
    %cst_114 = arith.constant dense<0.000000e+00> : vector<2x32xf32>
    %590 = tpu.matmul %569, %589, %cst_114 {dimension_numbers = #tpu.dot_dimension_numbers<[1], [0], [0], [1], [0, 0, 1, 1], [], []>} : vector<2x8xf32>, vector<8x32xf32>, vector<2x32xf32> -> vector<2x32xf32>
    %591 = vector.extract_strided_slice %3 {offsets = [2, 0, 0], sizes = [1, 1, 32], strides = [1, 1, 1]} : vector<3x1x32xf32> to vector<1x1x32xf32>
    %592 = vector.shape_cast %591 : vector<1x1x32xf32> to vector<1x32xf32>
    %593 = vector.broadcast %592 : vector<1x32xf32> to vector<2x32xf32>
    %594 = arith.addf %590, %593 : vector<2x32xf32>
    %595 = vector.extract_strided_slice %2 {offsets = [0, 0, 0], sizes = [1, 32, 32], strides = [1, 1, 1]} : vector<3x32x32xf32> to vector<1x32x32xf32>
    %596 = vector.shape_cast %595 : vector<1x32x32xf32> to vector<32x32xf32>
    %cst_115 = arith.constant dense<0.000000e+00> : vector<2x32xf32>
    %597 = tpu.matmul %565, %596, %cst_115 {dimension_numbers = #tpu.dot_dimension_numbers<[1], [0], [0], [1], [0, 0, 1, 1], [], []>} : vector<2x32xf32>, vector<32x32xf32>, vector<2x32xf32> -> vector<2x32xf32>
    %598 = vector.extract_strided_slice %4 {offsets = [0, 0, 0], sizes = [1, 1, 32], strides = [1, 1, 1]} : vector<3x1x32xf32> to vector<1x1x32xf32>
    %599 = vector.shape_cast %598 : vector<1x1x32xf32> to vector<1x32xf32>
    %600 = vector.broadcast %599 : vector<1x32xf32> to vector<2x32xf32>
    %601 = arith.addf %597, %600 : vector<2x32xf32>
    %602 = vector.extract_strided_slice %2 {offsets = [1, 0, 0], sizes = [1, 32, 32], strides = [1, 1, 1]} : vector<3x32x32xf32> to vector<1x32x32xf32>
    %603 = vector.shape_cast %602 : vector<1x32x32xf32> to vector<32x32xf32>
    %cst_116 = arith.constant dense<0.000000e+00> : vector<2x32xf32>
    %604 = tpu.matmul %565, %603, %cst_116 {dimension_numbers = #tpu.dot_dimension_numbers<[1], [0], [0], [1], [0, 0, 1, 1], [], []>} : vector<2x32xf32>, vector<32x32xf32>, vector<2x32xf32> -> vector<2x32xf32>
    %605 = vector.extract_strided_slice %4 {offsets = [1, 0, 0], sizes = [1, 1, 32], strides = [1, 1, 1]} : vector<3x1x32xf32> to vector<1x1x32xf32>
    %606 = vector.shape_cast %605 : vector<1x1x32xf32> to vector<1x32xf32>
    %607 = vector.broadcast %606 : vector<1x32xf32> to vector<2x32xf32>
    %608 = arith.addf %604, %607 : vector<2x32xf32>
    %609 = vector.extract_strided_slice %2 {offsets = [2, 0, 0], sizes = [1, 32, 32], strides = [1, 1, 1]} : vector<3x32x32xf32> to vector<1x32x32xf32>
    %610 = vector.shape_cast %609 : vector<1x32x32xf32> to vector<32x32xf32>
    %cst_117 = arith.constant dense<0.000000e+00> : vector<2x32xf32>
    %611 = tpu.matmul %565, %610, %cst_117 {dimension_numbers = #tpu.dot_dimension_numbers<[1], [0], [0], [1], [0, 0, 1, 1], [], []>} : vector<2x32xf32>, vector<32x32xf32>, vector<2x32xf32> -> vector<2x32xf32>
    %612 = vector.extract_strided_slice %4 {offsets = [2, 0, 0], sizes = [1, 1, 32], strides = [1, 1, 1]} : vector<3x1x32xf32> to vector<1x1x32xf32>
    %613 = vector.shape_cast %612 : vector<1x1x32xf32> to vector<1x32xf32>
    %614 = vector.broadcast %613 : vector<1x32xf32> to vector<2x32xf32>
    %615 = arith.addf %611, %614 : vector<2x32xf32>
    %616 = arith.addf %580, %601 : vector<2x32xf32>
    %617 = arith.negf %616 : vector<2x32xf32>
    %618 = math.exp %617 : vector<2x32xf32>
    %cst_118 = arith.constant 1.000000e+00 : f32
    %619 = vector.broadcast %cst_118 : f32 to vector<2x32xf32>
    %620 = arith.addf %619, %618 : vector<2x32xf32>
    %621 = arith.divf %619, %620 : vector<2x32xf32>
    %622 = arith.addf %587, %608 : vector<2x32xf32>
    %623 = arith.negf %622 : vector<2x32xf32>
    %624 = math.exp %623 : vector<2x32xf32>
    %cst_119 = arith.constant 1.000000e+00 : f32
    %625 = vector.broadcast %cst_119 : f32 to vector<2x32xf32>
    %626 = arith.addf %625, %624 : vector<2x32xf32>
    %627 = arith.divf %625, %626 : vector<2x32xf32>
    %628 = arith.mulf %621, %615 : vector<2x32xf32>
    %629 = arith.addf %594, %628 : vector<2x32xf32>
    %630 = math.tanh %629 : vector<2x32xf32>
    %cst_120 = arith.constant 1.000000e+00 : f32
    %631 = vector.broadcast %cst_120 : f32 to vector<2x32xf32>
    %632 = arith.subf %631, %627 : vector<2x32xf32>
    %633 = arith.mulf %632, %630 : vector<2x32xf32>
    %634 = arith.mulf %627, %565 : vector<2x32xf32>
    %635 = arith.addf %633, %634 : vector<2x32xf32>
    %636 = vector.broadcast %573 : vector<2x1xf32> to vector<2x32xf32>
    %637 = arith.mulf %636, %635 : vector<2x32xf32>
    %cst_121 = arith.constant 1.000000e+00 : f32
    %638 = vector.broadcast %cst_121 : f32 to vector<2x1xf32>
    %639 = arith.subf %638, %573 : vector<2x1xf32>
    %640 = vector.broadcast %639 : vector<2x1xf32> to vector<2x32xf32>
    %641 = arith.mulf %640, %565 : vector<2x32xf32>
    %642 = arith.addf %637, %641 : vector<2x32xf32>
    %643 = vector.broadcast %573 : vector<2x1xf32> to vector<2x32xf32>
    %644 = arith.mulf %635, %643 : vector<2x32xf32>
    %645 = vector.shape_cast %105 : vector<2x32xf32> to vector<2x1x32xf32>
    %646 = vector.shape_cast %182 : vector<2x32xf32> to vector<2x1x32xf32>
    %647 = vector.shape_cast %259 : vector<2x32xf32> to vector<2x1x32xf32>
    %648 = vector.shape_cast %336 : vector<2x32xf32> to vector<2x1x32xf32>
    %649 = vector.shape_cast %413 : vector<2x32xf32> to vector<2x1x32xf32>
    %650 = vector.shape_cast %490 : vector<2x32xf32> to vector<2x1x32xf32>
    %651 = vector.shape_cast %567 : vector<2x32xf32> to vector<2x1x32xf32>
    %652 = vector.shape_cast %644 : vector<2x32xf32> to vector<2x1x32xf32>
    %653 = tpu.concatenate %645, %646, %647, %648, %649, %650, %651, %652 in 1 : vector<2x1x32xf32>, vector<2x1x32xf32>, vector<2x1x32xf32>, vector<2x1x32xf32>, vector<2x1x32xf32>, vector<2x1x32xf32>, vector<2x1x32xf32>, vector<2x1x32xf32> -> vector<2x8x32xf32>
    %654 = vector.shape_cast %653 : vector<2x8x32xf32> to vector<16x32xf32>
    %cst_122 = arith.constant dense<0.000000e+00> : vector<16x32xf32>
    %655 = tpu.matmul %654, %6, %cst_122 {dimension_numbers = #tpu.dot_dimension_numbers<[1], [0], [0], [1], [0, 0, 1, 1], [], []>} : vector<16x32xf32>, vector<32x32xf32>, vector<16x32xf32> -> vector<16x32xf32>
    %656 = vector.shape_cast %655 : vector<16x32xf32> to vector<2x8x32xf32>
    %657 = tpu.iota {dimensions = array<i32: 1>} : vector<2x16xi32>
    %658 = arith.sitofp %657 : vector<2x16xi32> to vector<2x16xf32>
    %c0_123 = arith.constant 0 : index
    %c0_124 = arith.constant 0 : index
    %659 = vector.load %arg3[%c0_123, %c0_124] : memref<2x1xi32, #tpu.memory_space<vmem>>, vector<2x1xi32>
    %660 = arith.sitofp %659 : vector<2x1xi32> to vector<2x1xf32>
    %cst_125 = arith.constant 1.000000e+00 : f32
    %661 = vector.broadcast %cst_125 : f32 to vector<2x16xf32>
    %662 = arith.cmpf oeq, %658, %661 : vector<2x16xf32>
    %663 = arith.extui %662 : vector<2x16xi1> to vector<2x16xi32>
    %664 = arith.sitofp %663 : vector<2x16xi32> to vector<2x16xf32>
    %665 = vector.broadcast %660 : vector<2x1xf32> to vector<2x16xf32>
    %666 = arith.cmpf oeq, %658, %665 : vector<2x16xf32>
    %667 = arith.extui %666 : vector<2x16xi1> to vector<2x16xi32>
    %668 = arith.sitofp %667 : vector<2x16xi32> to vector<2x16xf32>
    %cst_126 = arith.constant dense<0.000000e+00> : vector<2x8xf32>
    %669 = tpu.matmul %668, %5, %cst_126 {dimension_numbers = #tpu.dot_dimension_numbers<[1], [0], [0], [1], [0, 0, 1, 1], [], []>} : vector<2x16xf32>, vector<16x8xf32>, vector<2x8xf32> -> vector<2x8xf32>
    %cst_127 = arith.constant dense<0.000000e+00> : vector<2x32xf32>
    %670 = tpu.matmul %642, %7, %cst_127 {dimension_numbers = #tpu.dot_dimension_numbers<[1], [0], [0], [1], [0, 0, 1, 1], [], []>} : vector<2x32xf32>, vector<32x32xf32>, vector<2x32xf32> -> vector<2x32xf32>
    %671 = vector.shape_cast %670 : vector<2x32xf32> to vector<2x1x32xf32>
    %672 = vector.broadcast %671 : vector<2x1x32xf32> to vector<2x8x32xf32>
    %673 = arith.addf %656, %672 : vector<2x8x32xf32>
    %674 = math.tanh %673 : vector<2x8x32xf32>
    %675 = vector.shape_cast %674 : vector<2x8x32xf32> to vector<16x32xf32>
    %cst_128 = arith.constant dense<0.000000e+00> : vector<16x1xf32>
    %676 = tpu.matmul %675, %8, %cst_128 {dimension_numbers = #tpu.dot_dimension_numbers<[1], [0], [0], [1], [0, 0, 1, 1], [], []>} : vector<16x32xf32>, vector<32x1xf32>, vector<16x1xf32> -> vector<16x1xf32>
    %677 = vector.shape_cast %676 : vector<16x1xf32> to vector<2x8x1xf32>
    %cst_129 = arith.constant dense<0xFF800000> : vector<2x1xf32>
    %678 = vector.multi_reduction <maximumf>, %677, %cst_129 [1] : vector<2x8x1xf32> to vector<2x1xf32>
    %679 = vector.shape_cast %678 : vector<2x1xf32> to vector<2x1x1xf32>
    %680 = vector.broadcast %679 : vector<2x1x1xf32> to vector<2x8x1xf32>
    %681 = arith.subf %677, %680 : vector<2x8x1xf32>
    %682 = math.exp %681 : vector<2x8x1xf32>
    %cst_130 = arith.constant dense<0.000000e+00> : vector<2x1xf32>
    %683 = vector.multi_reduction <add>, %682, %cst_130 [1] : vector<2x8x1xf32> to vector<2x1xf32>
    %684 = vector.shape_cast %683 : vector<2x1xf32> to vector<2x1x1xf32>
    %685 = vector.broadcast %684 : vector<2x1x1xf32> to vector<2x8x1xf32>
    %686 = arith.divf %682, %685 : vector<2x8x1xf32>
    %687 = vector.broadcast %686 : vector<2x8x1xf32> to vector<2x8x32xf32>
    %688 = arith.mulf %687, %653 : vector<2x8x32xf32>
    %cst_131 = arith.constant dense<0.000000e+00> : vector<2x32xf32>
    %689 = vector.multi_reduction <add>, %688, %cst_131 [1] : vector<2x8x32xf32> to vector<2x32xf32>
    %690 = tpu.concatenate %689, %669 in 1 : vector<2x32xf32>, vector<2x8xf32> -> vector<2x40xf32>
    %691 = vector.extract_strided_slice %9 {offsets = [0, 0, 0], sizes = [1, 40, 32], strides = [1, 1, 1]} : vector<3x40x32xf32> to vector<1x40x32xf32>
    %692 = vector.shape_cast %691 : vector<1x40x32xf32> to vector<40x32xf32>
    %cst_132 = arith.constant dense<0.000000e+00> : vector<2x32xf32>
    %693 = tpu.matmul %690, %692, %cst_132 {dimension_numbers = #tpu.dot_dimension_numbers<[1], [0], [0], [1], [0, 0, 1, 1], [], []>} : vector<2x40xf32>, vector<40x32xf32>, vector<2x32xf32> -> vector<2x32xf32>
    %694 = vector.extract_strided_slice %11 {offsets = [0, 0, 0], sizes = [1, 1, 32], strides = [1, 1, 1]} : vector<3x1x32xf32> to vector<1x1x32xf32>
    %695 = vector.shape_cast %694 : vector<1x1x32xf32> to vector<1x32xf32>
    %696 = vector.broadcast %695 : vector<1x32xf32> to vector<2x32xf32>
    %697 = arith.addf %693, %696 : vector<2x32xf32>
    %698 = vector.extract_strided_slice %9 {offsets = [1, 0, 0], sizes = [1, 40, 32], strides = [1, 1, 1]} : vector<3x40x32xf32> to vector<1x40x32xf32>
    %699 = vector.shape_cast %698 : vector<1x40x32xf32> to vector<40x32xf32>
    %cst_133 = arith.constant dense<0.000000e+00> : vector<2x32xf32>
    %700 = tpu.matmul %690, %699, %cst_133 {dimension_numbers = #tpu.dot_dimension_numbers<[1], [0], [0], [1], [0, 0, 1, 1], [], []>} : vector<2x40xf32>, vector<40x32xf32>, vector<2x32xf32> -> vector<2x32xf32>
    %701 = vector.extract_strided_slice %11 {offsets = [1, 0, 0], sizes = [1, 1, 32], strides = [1, 1, 1]} : vector<3x1x32xf32> to vector<1x1x32xf32>
    %702 = vector.shape_cast %701 : vector<1x1x32xf32> to vector<1x32xf32>
    %703 = vector.broadcast %702 : vector<1x32xf32> to vector<2x32xf32>
    %704 = arith.addf %700, %703 : vector<2x32xf32>
    %705 = vector.extract_strided_slice %9 {offsets = [2, 0, 0], sizes = [1, 40, 32], strides = [1, 1, 1]} : vector<3x40x32xf32> to vector<1x40x32xf32>
    %706 = vector.shape_cast %705 : vector<1x40x32xf32> to vector<40x32xf32>
    %cst_134 = arith.constant dense<0.000000e+00> : vector<2x32xf32>
    %707 = tpu.matmul %690, %706, %cst_134 {dimension_numbers = #tpu.dot_dimension_numbers<[1], [0], [0], [1], [0, 0, 1, 1], [], []>} : vector<2x40xf32>, vector<40x32xf32>, vector<2x32xf32> -> vector<2x32xf32>
    %708 = vector.extract_strided_slice %11 {offsets = [2, 0, 0], sizes = [1, 1, 32], strides = [1, 1, 1]} : vector<3x1x32xf32> to vector<1x1x32xf32>
    %709 = vector.shape_cast %708 : vector<1x1x32xf32> to vector<1x32xf32>
    %710 = vector.broadcast %709 : vector<1x32xf32> to vector<2x32xf32>
    %711 = arith.addf %707, %710 : vector<2x32xf32>
    %712 = vector.extract_strided_slice %10 {offsets = [0, 0, 0], sizes = [1, 32, 32], strides = [1, 1, 1]} : vector<3x32x32xf32> to vector<1x32x32xf32>
    %713 = vector.shape_cast %712 : vector<1x32x32xf32> to vector<32x32xf32>
    %cst_135 = arith.constant dense<0.000000e+00> : vector<2x32xf32>
    %714 = tpu.matmul %642, %713, %cst_135 {dimension_numbers = #tpu.dot_dimension_numbers<[1], [0], [0], [1], [0, 0, 1, 1], [], []>} : vector<2x32xf32>, vector<32x32xf32>, vector<2x32xf32> -> vector<2x32xf32>
    %715 = vector.extract_strided_slice %12 {offsets = [0, 0, 0], sizes = [1, 1, 32], strides = [1, 1, 1]} : vector<3x1x32xf32> to vector<1x1x32xf32>
    %716 = vector.shape_cast %715 : vector<1x1x32xf32> to vector<1x32xf32>
    %717 = vector.broadcast %716 : vector<1x32xf32> to vector<2x32xf32>
    %718 = arith.addf %714, %717 : vector<2x32xf32>
    %719 = vector.extract_strided_slice %10 {offsets = [1, 0, 0], sizes = [1, 32, 32], strides = [1, 1, 1]} : vector<3x32x32xf32> to vector<1x32x32xf32>
    %720 = vector.shape_cast %719 : vector<1x32x32xf32> to vector<32x32xf32>
    %cst_136 = arith.constant dense<0.000000e+00> : vector<2x32xf32>
    %721 = tpu.matmul %642, %720, %cst_136 {dimension_numbers = #tpu.dot_dimension_numbers<[1], [0], [0], [1], [0, 0, 1, 1], [], []>} : vector<2x32xf32>, vector<32x32xf32>, vector<2x32xf32> -> vector<2x32xf32>
    %722 = vector.extract_strided_slice %12 {offsets = [1, 0, 0], sizes = [1, 1, 32], strides = [1, 1, 1]} : vector<3x1x32xf32> to vector<1x1x32xf32>
    %723 = vector.shape_cast %722 : vector<1x1x32xf32> to vector<1x32xf32>
    %724 = vector.broadcast %723 : vector<1x32xf32> to vector<2x32xf32>
    %725 = arith.addf %721, %724 : vector<2x32xf32>
    %726 = vector.extract_strided_slice %10 {offsets = [2, 0, 0], sizes = [1, 32, 32], strides = [1, 1, 1]} : vector<3x32x32xf32> to vector<1x32x32xf32>
    %727 = vector.shape_cast %726 : vector<1x32x32xf32> to vector<32x32xf32>
    %cst_137 = arith.constant dense<0.000000e+00> : vector<2x32xf32>
    %728 = tpu.matmul %642, %727, %cst_137 {dimension_numbers = #tpu.dot_dimension_numbers<[1], [0], [0], [1], [0, 0, 1, 1], [], []>} : vector<2x32xf32>, vector<32x32xf32>, vector<2x32xf32> -> vector<2x32xf32>
    %729 = vector.extract_strided_slice %12 {offsets = [2, 0, 0], sizes = [1, 1, 32], strides = [1, 1, 1]} : vector<3x1x32xf32> to vector<1x1x32xf32>
    %730 = vector.shape_cast %729 : vector<1x1x32xf32> to vector<1x32xf32>
    %731 = vector.broadcast %730 : vector<1x32xf32> to vector<2x32xf32>
    %732 = arith.addf %728, %731 : vector<2x32xf32>
    %733 = arith.addf %697, %718 : vector<2x32xf32>
    %734 = arith.negf %733 : vector<2x32xf32>
    %735 = math.exp %734 : vector<2x32xf32>
    %cst_138 = arith.constant 1.000000e+00 : f32
    %736 = vector.broadcast %cst_138 : f32 to vector<2x32xf32>
    %737 = arith.addf %736, %735 : vector<2x32xf32>
    %738 = arith.divf %736, %737 : vector<2x32xf32>
    %739 = arith.addf %704, %725 : vector<2x32xf32>
    %740 = arith.negf %739 : vector<2x32xf32>
    %741 = math.exp %740 : vector<2x32xf32>
    %cst_139 = arith.constant 1.000000e+00 : f32
    %742 = vector.broadcast %cst_139 : f32 to vector<2x32xf32>
    %743 = arith.addf %742, %741 : vector<2x32xf32>
    %744 = arith.divf %742, %743 : vector<2x32xf32>
    %745 = arith.mulf %738, %732 : vector<2x32xf32>
    %746 = arith.addf %711, %745 : vector<2x32xf32>
    %747 = math.tanh %746 : vector<2x32xf32>
    %cst_140 = arith.constant 1.000000e+00 : f32
    %748 = vector.broadcast %cst_140 : f32 to vector<2x32xf32>
    %749 = arith.subf %748, %744 : vector<2x32xf32>
    %750 = arith.mulf %749, %747 : vector<2x32xf32>
    %751 = arith.mulf %744, %642 : vector<2x32xf32>
    %752 = arith.addf %750, %751 : vector<2x32xf32>
    %753 = tpu.concatenate %669, %752, %689 in 1 : vector<2x8xf32>, vector<2x32xf32>, vector<2x32xf32> -> vector<2x72xf32>
    %cst_141 = arith.constant dense<0.000000e+00> : vector<2x16xf32>
    %754 = tpu.matmul %753, %13, %cst_141 {dimension_numbers = #tpu.dot_dimension_numbers<[1], [0], [0], [1], [0, 0, 1, 1], [], []>} : vector<2x72xf32>, vector<72x16xf32>, vector<2x16xf32> -> vector<2x16xf32>
    %755 = vector.broadcast %14 : vector<1x16xf32> to vector<2x16xf32>
    %756 = arith.addf %754, %755 : vector<2x16xf32>
    %cst_142 = arith.constant dense<0xFF800000> : vector<2xf32>
    %757 = vector.multi_reduction <maximumf>, %756, %cst_142 [1] : vector<2x16xf32> to vector<2xf32>
    %758 = vector.shape_cast %757 : vector<2xf32> to vector<2x1xf32>
    %759 = vector.broadcast %758 : vector<2x1xf32> to vector<2x16xf32>
    %760 = arith.cmpf oge, %756, %759 : vector<2x16xf32>
    %cst_143 = arith.constant 1.600000e+01 : f32
    %761 = vector.broadcast %cst_143 : f32 to vector<2x16xf32>
    %762 = arith.select %760, %658, %761 : vector<2x16xi1>, vector<2x16xf32>
    %cst_144 = arith.constant dense<0x7F800000> : vector<2xf32>
    %763 = vector.multi_reduction <minimumf>, %762, %cst_144 [1] : vector<2x16xf32> to vector<2xf32>
    %764 = vector.shape_cast %763 : vector<2xf32> to vector<2x1xf32>
    %765 = vector.broadcast %764 : vector<2x1xf32> to vector<2x16xf32>
    %766 = arith.cmpf oeq, %658, %765 : vector<2x16xf32>
    %767 = arith.extui %766 : vector<2x16xi1> to vector<2x16xi32>
    %768 = arith.sitofp %767 : vector<2x16xi32> to vector<2x16xf32>
    %cst_145 = arith.constant dense<0.000000e+00> : vector<2x8xf32>
    %769 = tpu.matmul %768, %5, %cst_145 {dimension_numbers = #tpu.dot_dimension_numbers<[1], [0], [0], [1], [0, 0, 1, 1], [], []>} : vector<2x16xf32>, vector<16x8xf32>, vector<2x8xf32> -> vector<2x8xf32>
    %cst_146 = arith.constant dense<0.000000e+00> : vector<2x32xf32>
    %770 = tpu.matmul %752, %7, %cst_146 {dimension_numbers = #tpu.dot_dimension_numbers<[1], [0], [0], [1], [0, 0, 1, 1], [], []>} : vector<2x32xf32>, vector<32x32xf32>, vector<2x32xf32> -> vector<2x32xf32>
    %771 = vector.shape_cast %770 : vector<2x32xf32> to vector<2x1x32xf32>
    %772 = vector.broadcast %771 : vector<2x1x32xf32> to vector<2x8x32xf32>
    %773 = arith.addf %656, %772 : vector<2x8x32xf32>
    %774 = math.tanh %773 : vector<2x8x32xf32>
    %775 = vector.shape_cast %774 : vector<2x8x32xf32> to vector<16x32xf32>
    %cst_147 = arith.constant dense<0.000000e+00> : vector<16x1xf32>
    %776 = tpu.matmul %775, %8, %cst_147 {dimension_numbers = #tpu.dot_dimension_numbers<[1], [0], [0], [1], [0, 0, 1, 1], [], []>} : vector<16x32xf32>, vector<32x1xf32>, vector<16x1xf32> -> vector<16x1xf32>
    %777 = vector.shape_cast %776 : vector<16x1xf32> to vector<2x8x1xf32>
    %cst_148 = arith.constant dense<0xFF800000> : vector<2x1xf32>
    %778 = vector.multi_reduction <maximumf>, %777, %cst_148 [1] : vector<2x8x1xf32> to vector<2x1xf32>
    %779 = vector.shape_cast %778 : vector<2x1xf32> to vector<2x1x1xf32>
    %780 = vector.broadcast %779 : vector<2x1x1xf32> to vector<2x8x1xf32>
    %781 = arith.subf %777, %780 : vector<2x8x1xf32>
    %782 = math.exp %781 : vector<2x8x1xf32>
    %cst_149 = arith.constant dense<0.000000e+00> : vector<2x1xf32>
    %783 = vector.multi_reduction <add>, %782, %cst_149 [1] : vector<2x8x1xf32> to vector<2x1xf32>
    %784 = vector.shape_cast %783 : vector<2x1xf32> to vector<2x1x1xf32>
    %785 = vector.broadcast %784 : vector<2x1x1xf32> to vector<2x8x1xf32>
    %786 = arith.divf %782, %785 : vector<2x8x1xf32>
    %787 = vector.broadcast %786 : vector<2x8x1xf32> to vector<2x8x32xf32>
    %788 = arith.mulf %787, %653 : vector<2x8x32xf32>
    %cst_150 = arith.constant dense<0.000000e+00> : vector<2x32xf32>
    %789 = vector.multi_reduction <add>, %788, %cst_150 [1] : vector<2x8x32xf32> to vector<2x32xf32>
    %790 = tpu.concatenate %789, %769 in 1 : vector<2x32xf32>, vector<2x8xf32> -> vector<2x40xf32>
    %791 = vector.extract_strided_slice %9 {offsets = [0, 0, 0], sizes = [1, 40, 32], strides = [1, 1, 1]} : vector<3x40x32xf32> to vector<1x40x32xf32>
    %792 = vector.shape_cast %791 : vector<1x40x32xf32> to vector<40x32xf32>
    %cst_151 = arith.constant dense<0.000000e+00> : vector<2x32xf32>
    %793 = tpu.matmul %790, %792, %cst_151 {dimension_numbers = #tpu.dot_dimension_numbers<[1], [0], [0], [1], [0, 0, 1, 1], [], []>} : vector<2x40xf32>, vector<40x32xf32>, vector<2x32xf32> -> vector<2x32xf32>
    %794 = vector.extract_strided_slice %11 {offsets = [0, 0, 0], sizes = [1, 1, 32], strides = [1, 1, 1]} : vector<3x1x32xf32> to vector<1x1x32xf32>
    %795 = vector.shape_cast %794 : vector<1x1x32xf32> to vector<1x32xf32>
    %796 = vector.broadcast %795 : vector<1x32xf32> to vector<2x32xf32>
    %797 = arith.addf %793, %796 : vector<2x32xf32>
    %798 = vector.extract_strided_slice %9 {offsets = [1, 0, 0], sizes = [1, 40, 32], strides = [1, 1, 1]} : vector<3x40x32xf32> to vector<1x40x32xf32>
    %799 = vector.shape_cast %798 : vector<1x40x32xf32> to vector<40x32xf32>
    %cst_152 = arith.constant dense<0.000000e+00> : vector<2x32xf32>
    %800 = tpu.matmul %790, %799, %cst_152 {dimension_numbers = #tpu.dot_dimension_numbers<[1], [0], [0], [1], [0, 0, 1, 1], [], []>} : vector<2x40xf32>, vector<40x32xf32>, vector<2x32xf32> -> vector<2x32xf32>
    %801 = vector.extract_strided_slice %11 {offsets = [1, 0, 0], sizes = [1, 1, 32], strides = [1, 1, 1]} : vector<3x1x32xf32> to vector<1x1x32xf32>
    %802 = vector.shape_cast %801 : vector<1x1x32xf32> to vector<1x32xf32>
    %803 = vector.broadcast %802 : vector<1x32xf32> to vector<2x32xf32>
    %804 = arith.addf %800, %803 : vector<2x32xf32>
    %805 = vector.extract_strided_slice %9 {offsets = [2, 0, 0], sizes = [1, 40, 32], strides = [1, 1, 1]} : vector<3x40x32xf32> to vector<1x40x32xf32>
    %806 = vector.shape_cast %805 : vector<1x40x32xf32> to vector<40x32xf32>
    %cst_153 = arith.constant dense<0.000000e+00> : vector<2x32xf32>
    %807 = tpu.matmul %790, %806, %cst_153 {dimension_numbers = #tpu.dot_dimension_numbers<[1], [0], [0], [1], [0, 0, 1, 1], [], []>} : vector<2x40xf32>, vector<40x32xf32>, vector<2x32xf32> -> vector<2x32xf32>
    %808 = vector.extract_strided_slice %11 {offsets = [2, 0, 0], sizes = [1, 1, 32], strides = [1, 1, 1]} : vector<3x1x32xf32> to vector<1x1x32xf32>
    %809 = vector.shape_cast %808 : vector<1x1x32xf32> to vector<1x32xf32>
    %810 = vector.broadcast %809 : vector<1x32xf32> to vector<2x32xf32>
    %811 = arith.addf %807, %810 : vector<2x32xf32>
    %812 = vector.extract_strided_slice %10 {offsets = [0, 0, 0], sizes = [1, 32, 32], strides = [1, 1, 1]} : vector<3x32x32xf32> to vector<1x32x32xf32>
    %813 = vector.shape_cast %812 : vector<1x32x32xf32> to vector<32x32xf32>
    %cst_154 = arith.constant dense<0.000000e+00> : vector<2x32xf32>
    %814 = tpu.matmul %752, %813, %cst_154 {dimension_numbers = #tpu.dot_dimension_numbers<[1], [0], [0], [1], [0, 0, 1, 1], [], []>} : vector<2x32xf32>, vector<32x32xf32>, vector<2x32xf32> -> vector<2x32xf32>
    %815 = vector.extract_strided_slice %12 {offsets = [0, 0, 0], sizes = [1, 1, 32], strides = [1, 1, 1]} : vector<3x1x32xf32> to vector<1x1x32xf32>
    %816 = vector.shape_cast %815 : vector<1x1x32xf32> to vector<1x32xf32>
    %817 = vector.broadcast %816 : vector<1x32xf32> to vector<2x32xf32>
    %818 = arith.addf %814, %817 : vector<2x32xf32>
    %819 = vector.extract_strided_slice %10 {offsets = [1, 0, 0], sizes = [1, 32, 32], strides = [1, 1, 1]} : vector<3x32x32xf32> to vector<1x32x32xf32>
    %820 = vector.shape_cast %819 : vector<1x32x32xf32> to vector<32x32xf32>
    %cst_155 = arith.constant dense<0.000000e+00> : vector<2x32xf32>
    %821 = tpu.matmul %752, %820, %cst_155 {dimension_numbers = #tpu.dot_dimension_numbers<[1], [0], [0], [1], [0, 0, 1, 1], [], []>} : vector<2x32xf32>, vector<32x32xf32>, vector<2x32xf32> -> vector<2x32xf32>
    %822 = vector.extract_strided_slice %12 {offsets = [1, 0, 0], sizes = [1, 1, 32], strides = [1, 1, 1]} : vector<3x1x32xf32> to vector<1x1x32xf32>
    %823 = vector.shape_cast %822 : vector<1x1x32xf32> to vector<1x32xf32>
    %824 = vector.broadcast %823 : vector<1x32xf32> to vector<2x32xf32>
    %825 = arith.addf %821, %824 : vector<2x32xf32>
    %826 = vector.extract_strided_slice %10 {offsets = [2, 0, 0], sizes = [1, 32, 32], strides = [1, 1, 1]} : vector<3x32x32xf32> to vector<1x32x32xf32>
    %827 = vector.shape_cast %826 : vector<1x32x32xf32> to vector<32x32xf32>
    %cst_156 = arith.constant dense<0.000000e+00> : vector<2x32xf32>
    %828 = tpu.matmul %752, %827, %cst_156 {dimension_numbers = #tpu.dot_dimension_numbers<[1], [0], [0], [1], [0, 0, 1, 1], [], []>} : vector<2x32xf32>, vector<32x32xf32>, vector<2x32xf32> -> vector<2x32xf32>
    %829 = vector.extract_strided_slice %12 {offsets = [2, 0, 0], sizes = [1, 1, 32], strides = [1, 1, 1]} : vector<3x1x32xf32> to vector<1x1x32xf32>
    %830 = vector.shape_cast %829 : vector<1x1x32xf32> to vector<1x32xf32>
    %831 = vector.broadcast %830 : vector<1x32xf32> to vector<2x32xf32>
    %832 = arith.addf %828, %831 : vector<2x32xf32>
    %833 = arith.addf %797, %818 : vector<2x32xf32>
    %834 = arith.negf %833 : vector<2x32xf32>
    %835 = math.exp %834 : vector<2x32xf32>
    %cst_157 = arith.constant 1.000000e+00 : f32
    %836 = vector.broadcast %cst_157 : f32 to vector<2x32xf32>
    %837 = arith.addf %836, %835 : vector<2x32xf32>
    %838 = arith.divf %836, %837 : vector<2x32xf32>
    %839 = arith.addf %804, %825 : vector<2x32xf32>
    %840 = arith.negf %839 : vector<2x32xf32>
    %841 = math.exp %840 : vector<2x32xf32>
    %cst_158 = arith.constant 1.000000e+00 : f32
    %842 = vector.broadcast %cst_158 : f32 to vector<2x32xf32>
    %843 = arith.addf %842, %841 : vector<2x32xf32>
    %844 = arith.divf %842, %843 : vector<2x32xf32>
    %845 = arith.mulf %838, %832 : vector<2x32xf32>
    %846 = arith.addf %811, %845 : vector<2x32xf32>
    %847 = math.tanh %846 : vector<2x32xf32>
    %cst_159 = arith.constant 1.000000e+00 : f32
    %848 = vector.broadcast %cst_159 : f32 to vector<2x32xf32>
    %849 = arith.subf %848, %844 : vector<2x32xf32>
    %850 = arith.mulf %849, %847 : vector<2x32xf32>
    %851 = arith.mulf %844, %752 : vector<2x32xf32>
    %852 = arith.addf %850, %851 : vector<2x32xf32>
    %853 = tpu.concatenate %769, %852, %789 in 1 : vector<2x8xf32>, vector<2x32xf32>, vector<2x32xf32> -> vector<2x72xf32>
    %cst_160 = arith.constant dense<0.000000e+00> : vector<2x16xf32>
    %854 = tpu.matmul %853, %13, %cst_160 {dimension_numbers = #tpu.dot_dimension_numbers<[1], [0], [0], [1], [0, 0, 1, 1], [], []>} : vector<2x72xf32>, vector<72x16xf32>, vector<2x16xf32> -> vector<2x16xf32>
    %855 = vector.broadcast %14 : vector<1x16xf32> to vector<2x16xf32>
    %856 = arith.addf %854, %855 : vector<2x16xf32>
    %cst_161 = arith.constant dense<0xFF800000> : vector<2xf32>
    %857 = vector.multi_reduction <maximumf>, %856, %cst_161 [1] : vector<2x16xf32> to vector<2xf32>
    %858 = vector.shape_cast %857 : vector<2xf32> to vector<2x1xf32>
    %859 = vector.broadcast %858 : vector<2x1xf32> to vector<2x16xf32>
    %860 = arith.cmpf oge, %856, %859 : vector<2x16xf32>
    %cst_162 = arith.constant 1.600000e+01 : f32
    %861 = vector.broadcast %cst_162 : f32 to vector<2x16xf32>
    %862 = arith.select %860, %658, %861 : vector<2x16xi1>, vector<2x16xf32>
    %cst_163 = arith.constant dense<0x7F800000> : vector<2xf32>
    %863 = vector.multi_reduction <minimumf>, %862, %cst_163 [1] : vector<2x16xf32> to vector<2xf32>
    %864 = vector.shape_cast %863 : vector<2xf32> to vector<2x1xf32>
    %865 = vector.broadcast %864 : vector<2x1xf32> to vector<2x16xf32>
    %866 = arith.cmpf oeq, %658, %865 : vector<2x16xf32>
    %867 = arith.extui %866 : vector<2x16xi1> to vector<2x16xi32>
    %868 = arith.sitofp %867 : vector<2x16xi32> to vector<2x16xf32>
    %cst_164 = arith.constant dense<0.000000e+00> : vector<2x8xf32>
    %869 = tpu.matmul %868, %5, %cst_164 {dimension_numbers = #tpu.dot_dimension_numbers<[1], [0], [0], [1], [0, 0, 1, 1], [], []>} : vector<2x16xf32>, vector<16x8xf32>, vector<2x8xf32> -> vector<2x8xf32>
    %cst_165 = arith.constant dense<0.000000e+00> : vector<2x32xf32>
    %870 = tpu.matmul %852, %7, %cst_165 {dimension_numbers = #tpu.dot_dimension_numbers<[1], [0], [0], [1], [0, 0, 1, 1], [], []>} : vector<2x32xf32>, vector<32x32xf32>, vector<2x32xf32> -> vector<2x32xf32>
    %871 = vector.shape_cast %870 : vector<2x32xf32> to vector<2x1x32xf32>
    %872 = vector.broadcast %871 : vector<2x1x32xf32> to vector<2x8x32xf32>
    %873 = arith.addf %656, %872 : vector<2x8x32xf32>
    %874 = math.tanh %873 : vector<2x8x32xf32>
    %875 = vector.shape_cast %874 : vector<2x8x32xf32> to vector<16x32xf32>
    %cst_166 = arith.constant dense<0.000000e+00> : vector<16x1xf32>
    %876 = tpu.matmul %875, %8, %cst_166 {dimension_numbers = #tpu.dot_dimension_numbers<[1], [0], [0], [1], [0, 0, 1, 1], [], []>} : vector<16x32xf32>, vector<32x1xf32>, vector<16x1xf32> -> vector<16x1xf32>
    %877 = vector.shape_cast %876 : vector<16x1xf32> to vector<2x8x1xf32>
    %cst_167 = arith.constant dense<0xFF800000> : vector<2x1xf32>
    %878 = vector.multi_reduction <maximumf>, %877, %cst_167 [1] : vector<2x8x1xf32> to vector<2x1xf32>
    %879 = vector.shape_cast %878 : vector<2x1xf32> to vector<2x1x1xf32>
    %880 = vector.broadcast %879 : vector<2x1x1xf32> to vector<2x8x1xf32>
    %881 = arith.subf %877, %880 : vector<2x8x1xf32>
    %882 = math.exp %881 : vector<2x8x1xf32>
    %cst_168 = arith.constant dense<0.000000e+00> : vector<2x1xf32>
    %883 = vector.multi_reduction <add>, %882, %cst_168 [1] : vector<2x8x1xf32> to vector<2x1xf32>
    %884 = vector.shape_cast %883 : vector<2x1xf32> to vector<2x1x1xf32>
    %885 = vector.broadcast %884 : vector<2x1x1xf32> to vector<2x8x1xf32>
    %886 = arith.divf %882, %885 : vector<2x8x1xf32>
    %887 = vector.broadcast %886 : vector<2x8x1xf32> to vector<2x8x32xf32>
    %888 = arith.mulf %887, %653 : vector<2x8x32xf32>
    %cst_169 = arith.constant dense<0.000000e+00> : vector<2x32xf32>
    %889 = vector.multi_reduction <add>, %888, %cst_169 [1] : vector<2x8x32xf32> to vector<2x32xf32>
    %890 = tpu.concatenate %889, %869 in 1 : vector<2x32xf32>, vector<2x8xf32> -> vector<2x40xf32>
    %891 = vector.extract_strided_slice %9 {offsets = [0, 0, 0], sizes = [1, 40, 32], strides = [1, 1, 1]} : vector<3x40x32xf32> to vector<1x40x32xf32>
    %892 = vector.shape_cast %891 : vector<1x40x32xf32> to vector<40x32xf32>
    %cst_170 = arith.constant dense<0.000000e+00> : vector<2x32xf32>
    %893 = tpu.matmul %890, %892, %cst_170 {dimension_numbers = #tpu.dot_dimension_numbers<[1], [0], [0], [1], [0, 0, 1, 1], [], []>} : vector<2x40xf32>, vector<40x32xf32>, vector<2x32xf32> -> vector<2x32xf32>
    %894 = vector.extract_strided_slice %11 {offsets = [0, 0, 0], sizes = [1, 1, 32], strides = [1, 1, 1]} : vector<3x1x32xf32> to vector<1x1x32xf32>
    %895 = vector.shape_cast %894 : vector<1x1x32xf32> to vector<1x32xf32>
    %896 = vector.broadcast %895 : vector<1x32xf32> to vector<2x32xf32>
    %897 = arith.addf %893, %896 : vector<2x32xf32>
    %898 = vector.extract_strided_slice %9 {offsets = [1, 0, 0], sizes = [1, 40, 32], strides = [1, 1, 1]} : vector<3x40x32xf32> to vector<1x40x32xf32>
    %899 = vector.shape_cast %898 : vector<1x40x32xf32> to vector<40x32xf32>
    %cst_171 = arith.constant dense<0.000000e+00> : vector<2x32xf32>
    %900 = tpu.matmul %890, %899, %cst_171 {dimension_numbers = #tpu.dot_dimension_numbers<[1], [0], [0], [1], [0, 0, 1, 1], [], []>} : vector<2x40xf32>, vector<40x32xf32>, vector<2x32xf32> -> vector<2x32xf32>
    %901 = vector.extract_strided_slice %11 {offsets = [1, 0, 0], sizes = [1, 1, 32], strides = [1, 1, 1]} : vector<3x1x32xf32> to vector<1x1x32xf32>
    %902 = vector.shape_cast %901 : vector<1x1x32xf32> to vector<1x32xf32>
    %903 = vector.broadcast %902 : vector<1x32xf32> to vector<2x32xf32>
    %904 = arith.addf %900, %903 : vector<2x32xf32>
    %905 = vector.extract_strided_slice %9 {offsets = [2, 0, 0], sizes = [1, 40, 32], strides = [1, 1, 1]} : vector<3x40x32xf32> to vector<1x40x32xf32>
    %906 = vector.shape_cast %905 : vector<1x40x32xf32> to vector<40x32xf32>
    %cst_172 = arith.constant dense<0.000000e+00> : vector<2x32xf32>
    %907 = tpu.matmul %890, %906, %cst_172 {dimension_numbers = #tpu.dot_dimension_numbers<[1], [0], [0], [1], [0, 0, 1, 1], [], []>} : vector<2x40xf32>, vector<40x32xf32>, vector<2x32xf32> -> vector<2x32xf32>
    %908 = vector.extract_strided_slice %11 {offsets = [2, 0, 0], sizes = [1, 1, 32], strides = [1, 1, 1]} : vector<3x1x32xf32> to vector<1x1x32xf32>
    %909 = vector.shape_cast %908 : vector<1x1x32xf32> to vector<1x32xf32>
    %910 = vector.broadcast %909 : vector<1x32xf32> to vector<2x32xf32>
    %911 = arith.addf %907, %910 : vector<2x32xf32>
    %912 = vector.extract_strided_slice %10 {offsets = [0, 0, 0], sizes = [1, 32, 32], strides = [1, 1, 1]} : vector<3x32x32xf32> to vector<1x32x32xf32>
    %913 = vector.shape_cast %912 : vector<1x32x32xf32> to vector<32x32xf32>
    %cst_173 = arith.constant dense<0.000000e+00> : vector<2x32xf32>
    %914 = tpu.matmul %852, %913, %cst_173 {dimension_numbers = #tpu.dot_dimension_numbers<[1], [0], [0], [1], [0, 0, 1, 1], [], []>} : vector<2x32xf32>, vector<32x32xf32>, vector<2x32xf32> -> vector<2x32xf32>
    %915 = vector.extract_strided_slice %12 {offsets = [0, 0, 0], sizes = [1, 1, 32], strides = [1, 1, 1]} : vector<3x1x32xf32> to vector<1x1x32xf32>
    %916 = vector.shape_cast %915 : vector<1x1x32xf32> to vector<1x32xf32>
    %917 = vector.broadcast %916 : vector<1x32xf32> to vector<2x32xf32>
    %918 = arith.addf %914, %917 : vector<2x32xf32>
    %919 = vector.extract_strided_slice %10 {offsets = [1, 0, 0], sizes = [1, 32, 32], strides = [1, 1, 1]} : vector<3x32x32xf32> to vector<1x32x32xf32>
    %920 = vector.shape_cast %919 : vector<1x32x32xf32> to vector<32x32xf32>
    %cst_174 = arith.constant dense<0.000000e+00> : vector<2x32xf32>
    %921 = tpu.matmul %852, %920, %cst_174 {dimension_numbers = #tpu.dot_dimension_numbers<[1], [0], [0], [1], [0, 0, 1, 1], [], []>} : vector<2x32xf32>, vector<32x32xf32>, vector<2x32xf32> -> vector<2x32xf32>
    %922 = vector.extract_strided_slice %12 {offsets = [1, 0, 0], sizes = [1, 1, 32], strides = [1, 1, 1]} : vector<3x1x32xf32> to vector<1x1x32xf32>
    %923 = vector.shape_cast %922 : vector<1x1x32xf32> to vector<1x32xf32>
    %924 = vector.broadcast %923 : vector<1x32xf32> to vector<2x32xf32>
    %925 = arith.addf %921, %924 : vector<2x32xf32>
    %926 = vector.extract_strided_slice %10 {offsets = [2, 0, 0], sizes = [1, 32, 32], strides = [1, 1, 1]} : vector<3x32x32xf32> to vector<1x32x32xf32>
    %927 = vector.shape_cast %926 : vector<1x32x32xf32> to vector<32x32xf32>
    %cst_175 = arith.constant dense<0.000000e+00> : vector<2x32xf32>
    %928 = tpu.matmul %852, %927, %cst_175 {dimension_numbers = #tpu.dot_dimension_numbers<[1], [0], [0], [1], [0, 0, 1, 1], [], []>} : vector<2x32xf32>, vector<32x32xf32>, vector<2x32xf32> -> vector<2x32xf32>
    %929 = vector.extract_strided_slice %12 {offsets = [2, 0, 0], sizes = [1, 1, 32], strides = [1, 1, 1]} : vector<3x1x32xf32> to vector<1x1x32xf32>
    %930 = vector.shape_cast %929 : vector<1x1x32xf32> to vector<1x32xf32>
    %931 = vector.broadcast %930 : vector<1x32xf32> to vector<2x32xf32>
    %932 = arith.addf %928, %931 : vector<2x32xf32>
    %933 = arith.addf %897, %918 : vector<2x32xf32>
    %934 = arith.negf %933 : vector<2x32xf32>
    %935 = math.exp %934 : vector<2x32xf32>
    %cst_176 = arith.constant 1.000000e+00 : f32
    %936 = vector.broadcast %cst_176 : f32 to vector<2x32xf32>
    %937 = arith.addf %936, %935 : vector<2x32xf32>
    %938 = arith.divf %936, %937 : vector<2x32xf32>
    %939 = arith.addf %904, %925 : vector<2x32xf32>
    %940 = arith.negf %939 : vector<2x32xf32>
    %941 = math.exp %940 : vector<2x32xf32>
    %cst_177 = arith.constant 1.000000e+00 : f32
    %942 = vector.broadcast %cst_177 : f32 to vector<2x32xf32>
    %943 = arith.addf %942, %941 : vector<2x32xf32>
    %944 = arith.divf %942, %943 : vector<2x32xf32>
    %945 = arith.mulf %938, %932 : vector<2x32xf32>
    %946 = arith.addf %911, %945 : vector<2x32xf32>
    %947 = math.tanh %946 : vector<2x32xf32>
    %cst_178 = arith.constant 1.000000e+00 : f32
    %948 = vector.broadcast %cst_178 : f32 to vector<2x32xf32>
    %949 = arith.subf %948, %944 : vector<2x32xf32>
    %950 = arith.mulf %949, %947 : vector<2x32xf32>
    %951 = arith.mulf %944, %852 : vector<2x32xf32>
    %952 = arith.addf %950, %951 : vector<2x32xf32>
    %953 = tpu.concatenate %869, %952, %889 in 1 : vector<2x8xf32>, vector<2x32xf32>, vector<2x32xf32> -> vector<2x72xf32>
    %cst_179 = arith.constant dense<0.000000e+00> : vector<2x16xf32>
    %954 = tpu.matmul %953, %13, %cst_179 {dimension_numbers = #tpu.dot_dimension_numbers<[1], [0], [0], [1], [0, 0, 1, 1], [], []>} : vector<2x72xf32>, vector<72x16xf32>, vector<2x16xf32> -> vector<2x16xf32>
    %955 = vector.broadcast %14 : vector<1x16xf32> to vector<2x16xf32>
    %956 = arith.addf %954, %955 : vector<2x16xf32>
    %cst_180 = arith.constant dense<0xFF800000> : vector<2xf32>
    %957 = vector.multi_reduction <maximumf>, %956, %cst_180 [1] : vector<2x16xf32> to vector<2xf32>
    %958 = vector.shape_cast %957 : vector<2xf32> to vector<2x1xf32>
    %959 = vector.broadcast %958 : vector<2x1xf32> to vector<2x16xf32>
    %960 = arith.cmpf oge, %956, %959 : vector<2x16xf32>
    %cst_181 = arith.constant 1.600000e+01 : f32
    %961 = vector.broadcast %cst_181 : f32 to vector<2x16xf32>
    %962 = arith.select %960, %658, %961 : vector<2x16xi1>, vector<2x16xf32>
    %cst_182 = arith.constant dense<0x7F800000> : vector<2xf32>
    %963 = vector.multi_reduction <minimumf>, %962, %cst_182 [1] : vector<2x16xf32> to vector<2xf32>
    %964 = vector.shape_cast %963 : vector<2xf32> to vector<2x1xf32>
    %965 = vector.broadcast %964 : vector<2x1xf32> to vector<2x16xf32>
    %966 = arith.cmpf oeq, %658, %965 : vector<2x16xf32>
    %967 = arith.extui %966 : vector<2x16xi1> to vector<2x16xi32>
    %968 = arith.sitofp %967 : vector<2x16xi32> to vector<2x16xf32>
    %cst_183 = arith.constant dense<0.000000e+00> : vector<2x8xf32>
    %969 = tpu.matmul %968, %5, %cst_183 {dimension_numbers = #tpu.dot_dimension_numbers<[1], [0], [0], [1], [0, 0, 1, 1], [], []>} : vector<2x16xf32>, vector<16x8xf32>, vector<2x8xf32> -> vector<2x8xf32>
    %cst_184 = arith.constant dense<0.000000e+00> : vector<2x32xf32>
    %970 = tpu.matmul %952, %7, %cst_184 {dimension_numbers = #tpu.dot_dimension_numbers<[1], [0], [0], [1], [0, 0, 1, 1], [], []>} : vector<2x32xf32>, vector<32x32xf32>, vector<2x32xf32> -> vector<2x32xf32>
    %971 = vector.shape_cast %970 : vector<2x32xf32> to vector<2x1x32xf32>
    %972 = vector.broadcast %971 : vector<2x1x32xf32> to vector<2x8x32xf32>
    %973 = arith.addf %656, %972 : vector<2x8x32xf32>
    %974 = math.tanh %973 : vector<2x8x32xf32>
    %975 = vector.shape_cast %974 : vector<2x8x32xf32> to vector<16x32xf32>
    %cst_185 = arith.constant dense<0.000000e+00> : vector<16x1xf32>
    %976 = tpu.matmul %975, %8, %cst_185 {dimension_numbers = #tpu.dot_dimension_numbers<[1], [0], [0], [1], [0, 0, 1, 1], [], []>} : vector<16x32xf32>, vector<32x1xf32>, vector<16x1xf32> -> vector<16x1xf32>
    %977 = vector.shape_cast %976 : vector<16x1xf32> to vector<2x8x1xf32>
    %cst_186 = arith.constant dense<0xFF800000> : vector<2x1xf32>
    %978 = vector.multi_reduction <maximumf>, %977, %cst_186 [1] : vector<2x8x1xf32> to vector<2x1xf32>
    %979 = vector.shape_cast %978 : vector<2x1xf32> to vector<2x1x1xf32>
    %980 = vector.broadcast %979 : vector<2x1x1xf32> to vector<2x8x1xf32>
    %981 = arith.subf %977, %980 : vector<2x8x1xf32>
    %982 = math.exp %981 : vector<2x8x1xf32>
    %cst_187 = arith.constant dense<0.000000e+00> : vector<2x1xf32>
    %983 = vector.multi_reduction <add>, %982, %cst_187 [1] : vector<2x8x1xf32> to vector<2x1xf32>
    %984 = vector.shape_cast %983 : vector<2x1xf32> to vector<2x1x1xf32>
    %985 = vector.broadcast %984 : vector<2x1x1xf32> to vector<2x8x1xf32>
    %986 = arith.divf %982, %985 : vector<2x8x1xf32>
    %987 = vector.broadcast %986 : vector<2x8x1xf32> to vector<2x8x32xf32>
    %988 = arith.mulf %987, %653 : vector<2x8x32xf32>
    %cst_188 = arith.constant dense<0.000000e+00> : vector<2x32xf32>
    %989 = vector.multi_reduction <add>, %988, %cst_188 [1] : vector<2x8x32xf32> to vector<2x32xf32>
    %990 = tpu.concatenate %989, %969 in 1 : vector<2x32xf32>, vector<2x8xf32> -> vector<2x40xf32>
    %991 = vector.extract_strided_slice %9 {offsets = [0, 0, 0], sizes = [1, 40, 32], strides = [1, 1, 1]} : vector<3x40x32xf32> to vector<1x40x32xf32>
    %992 = vector.shape_cast %991 : vector<1x40x32xf32> to vector<40x32xf32>
    %cst_189 = arith.constant dense<0.000000e+00> : vector<2x32xf32>
    %993 = tpu.matmul %990, %992, %cst_189 {dimension_numbers = #tpu.dot_dimension_numbers<[1], [0], [0], [1], [0, 0, 1, 1], [], []>} : vector<2x40xf32>, vector<40x32xf32>, vector<2x32xf32> -> vector<2x32xf32>
    %994 = vector.extract_strided_slice %11 {offsets = [0, 0, 0], sizes = [1, 1, 32], strides = [1, 1, 1]} : vector<3x1x32xf32> to vector<1x1x32xf32>
    %995 = vector.shape_cast %994 : vector<1x1x32xf32> to vector<1x32xf32>
    %996 = vector.broadcast %995 : vector<1x32xf32> to vector<2x32xf32>
    %997 = arith.addf %993, %996 : vector<2x32xf32>
    %998 = vector.extract_strided_slice %9 {offsets = [1, 0, 0], sizes = [1, 40, 32], strides = [1, 1, 1]} : vector<3x40x32xf32> to vector<1x40x32xf32>
    %999 = vector.shape_cast %998 : vector<1x40x32xf32> to vector<40x32xf32>
    %cst_190 = arith.constant dense<0.000000e+00> : vector<2x32xf32>
    %1000 = tpu.matmul %990, %999, %cst_190 {dimension_numbers = #tpu.dot_dimension_numbers<[1], [0], [0], [1], [0, 0, 1, 1], [], []>} : vector<2x40xf32>, vector<40x32xf32>, vector<2x32xf32> -> vector<2x32xf32>
    %1001 = vector.extract_strided_slice %11 {offsets = [1, 0, 0], sizes = [1, 1, 32], strides = [1, 1, 1]} : vector<3x1x32xf32> to vector<1x1x32xf32>
    %1002 = vector.shape_cast %1001 : vector<1x1x32xf32> to vector<1x32xf32>
    %1003 = vector.broadcast %1002 : vector<1x32xf32> to vector<2x32xf32>
    %1004 = arith.addf %1000, %1003 : vector<2x32xf32>
    %1005 = vector.extract_strided_slice %9 {offsets = [2, 0, 0], sizes = [1, 40, 32], strides = [1, 1, 1]} : vector<3x40x32xf32> to vector<1x40x32xf32>
    %1006 = vector.shape_cast %1005 : vector<1x40x32xf32> to vector<40x32xf32>
    %cst_191 = arith.constant dense<0.000000e+00> : vector<2x32xf32>
    %1007 = tpu.matmul %990, %1006, %cst_191 {dimension_numbers = #tpu.dot_dimension_numbers<[1], [0], [0], [1], [0, 0, 1, 1], [], []>} : vector<2x40xf32>, vector<40x32xf32>, vector<2x32xf32> -> vector<2x32xf32>
    %1008 = vector.extract_strided_slice %11 {offsets = [2, 0, 0], sizes = [1, 1, 32], strides = [1, 1, 1]} : vector<3x1x32xf32> to vector<1x1x32xf32>
    %1009 = vector.shape_cast %1008 : vector<1x1x32xf32> to vector<1x32xf32>
    %1010 = vector.broadcast %1009 : vector<1x32xf32> to vector<2x32xf32>
    %1011 = arith.addf %1007, %1010 : vector<2x32xf32>
    %1012 = vector.extract_strided_slice %10 {offsets = [0, 0, 0], sizes = [1, 32, 32], strides = [1, 1, 1]} : vector<3x32x32xf32> to vector<1x32x32xf32>
    %1013 = vector.shape_cast %1012 : vector<1x32x32xf32> to vector<32x32xf32>
    %cst_192 = arith.constant dense<0.000000e+00> : vector<2x32xf32>
    %1014 = tpu.matmul %952, %1013, %cst_192 {dimension_numbers = #tpu.dot_dimension_numbers<[1], [0], [0], [1], [0, 0, 1, 1], [], []>} : vector<2x32xf32>, vector<32x32xf32>, vector<2x32xf32> -> vector<2x32xf32>
    %1015 = vector.extract_strided_slice %12 {offsets = [0, 0, 0], sizes = [1, 1, 32], strides = [1, 1, 1]} : vector<3x1x32xf32> to vector<1x1x32xf32>
    %1016 = vector.shape_cast %1015 : vector<1x1x32xf32> to vector<1x32xf32>
    %1017 = vector.broadcast %1016 : vector<1x32xf32> to vector<2x32xf32>
    %1018 = arith.addf %1014, %1017 : vector<2x32xf32>
    %1019 = vector.extract_strided_slice %10 {offsets = [1, 0, 0], sizes = [1, 32, 32], strides = [1, 1, 1]} : vector<3x32x32xf32> to vector<1x32x32xf32>
    %1020 = vector.shape_cast %1019 : vector<1x32x32xf32> to vector<32x32xf32>
    %cst_193 = arith.constant dense<0.000000e+00> : vector<2x32xf32>
    %1021 = tpu.matmul %952, %1020, %cst_193 {dimension_numbers = #tpu.dot_dimension_numbers<[1], [0], [0], [1], [0, 0, 1, 1], [], []>} : vector<2x32xf32>, vector<32x32xf32>, vector<2x32xf32> -> vector<2x32xf32>
    %1022 = vector.extract_strided_slice %12 {offsets = [1, 0, 0], sizes = [1, 1, 32], strides = [1, 1, 1]} : vector<3x1x32xf32> to vector<1x1x32xf32>
    %1023 = vector.shape_cast %1022 : vector<1x1x32xf32> to vector<1x32xf32>
    %1024 = vector.broadcast %1023 : vector<1x32xf32> to vector<2x32xf32>
    %1025 = arith.addf %1021, %1024 : vector<2x32xf32>
    %1026 = vector.extract_strided_slice %10 {offsets = [2, 0, 0], sizes = [1, 32, 32], strides = [1, 1, 1]} : vector<3x32x32xf32> to vector<1x32x32xf32>
    %1027 = vector.shape_cast %1026 : vector<1x32x32xf32> to vector<32x32xf32>
    %cst_194 = arith.constant dense<0.000000e+00> : vector<2x32xf32>
    %1028 = tpu.matmul %952, %1027, %cst_194 {dimension_numbers = #tpu.dot_dimension_numbers<[1], [0], [0], [1], [0, 0, 1, 1], [], []>} : vector<2x32xf32>, vector<32x32xf32>, vector<2x32xf32> -> vector<2x32xf32>
    %1029 = vector.extract_strided_slice %12 {offsets = [2, 0, 0], sizes = [1, 1, 32], strides = [1, 1, 1]} : vector<3x1x32xf32> to vector<1x1x32xf32>
    %1030 = vector.shape_cast %1029 : vector<1x1x32xf32> to vector<1x32xf32>
    %1031 = vector.broadcast %1030 : vector<1x32xf32> to vector<2x32xf32>
    %1032 = arith.addf %1028, %1031 : vector<2x32xf32>
    %1033 = arith.addf %997, %1018 : vector<2x32xf32>
    %1034 = arith.negf %1033 : vector<2x32xf32>
    %1035 = math.exp %1034 : vector<2x32xf32>
    %cst_195 = arith.constant 1.000000e+00 : f32
    %1036 = vector.broadcast %cst_195 : f32 to vector<2x32xf32>
    %1037 = arith.addf %1036, %1035 : vector<2x32xf32>
    %1038 = arith.divf %1036, %1037 : vector<2x32xf32>
    %1039 = arith.addf %1004, %1025 : vector<2x32xf32>
    %1040 = arith.negf %1039 : vector<2x32xf32>
    %1041 = math.exp %1040 : vector<2x32xf32>
    %cst_196 = arith.constant 1.000000e+00 : f32
    %1042 = vector.broadcast %cst_196 : f32 to vector<2x32xf32>
    %1043 = arith.addf %1042, %1041 : vector<2x32xf32>
    %1044 = arith.divf %1042, %1043 : vector<2x32xf32>
    %1045 = arith.mulf %1038, %1032 : vector<2x32xf32>
    %1046 = arith.addf %1011, %1045 : vector<2x32xf32>
    %1047 = math.tanh %1046 : vector<2x32xf32>
    %cst_197 = arith.constant 1.000000e+00 : f32
    %1048 = vector.broadcast %cst_197 : f32 to vector<2x32xf32>
    %1049 = arith.subf %1048, %1044 : vector<2x32xf32>
    %1050 = arith.mulf %1049, %1047 : vector<2x32xf32>
    %1051 = arith.mulf %1044, %952 : vector<2x32xf32>
    %1052 = arith.addf %1050, %1051 : vector<2x32xf32>
    %1053 = tpu.concatenate %969, %1052, %989 in 1 : vector<2x8xf32>, vector<2x32xf32>, vector<2x32xf32> -> vector<2x72xf32>
    %cst_198 = arith.constant dense<0.000000e+00> : vector<2x16xf32>
    %1054 = tpu.matmul %1053, %13, %cst_198 {dimension_numbers = #tpu.dot_dimension_numbers<[1], [0], [0], [1], [0, 0, 1, 1], [], []>} : vector<2x72xf32>, vector<72x16xf32>, vector<2x16xf32> -> vector<2x16xf32>
    %1055 = vector.broadcast %14 : vector<1x16xf32> to vector<2x16xf32>
    %1056 = arith.addf %1054, %1055 : vector<2x16xf32>
    %cst_199 = arith.constant dense<0xFF800000> : vector<2xf32>
    %1057 = vector.multi_reduction <maximumf>, %1056, %cst_199 [1] : vector<2x16xf32> to vector<2xf32>
    %1058 = vector.shape_cast %1057 : vector<2xf32> to vector<2x1xf32>
    %1059 = vector.broadcast %1058 : vector<2x1xf32> to vector<2x16xf32>
    %1060 = arith.cmpf oge, %1056, %1059 : vector<2x16xf32>
    %cst_200 = arith.constant 1.600000e+01 : f32
    %1061 = vector.broadcast %cst_200 : f32 to vector<2x16xf32>
    %1062 = arith.select %1060, %658, %1061 : vector<2x16xi1>, vector<2x16xf32>
    %cst_201 = arith.constant dense<0x7F800000> : vector<2xf32>
    %1063 = vector.multi_reduction <minimumf>, %1062, %cst_201 [1] : vector<2x16xf32> to vector<2xf32>
    %1064 = vector.shape_cast %1063 : vector<2xf32> to vector<2x1xf32>
    %1065 = vector.broadcast %1064 : vector<2x1xf32> to vector<2x16xf32>
    %1066 = arith.cmpf oeq, %658, %1065 : vector<2x16xf32>
    %1067 = arith.extui %1066 : vector<2x16xi1> to vector<2x16xi32>
    %1068 = arith.sitofp %1067 : vector<2x16xi32> to vector<2x16xf32>
    %cst_202 = arith.constant dense<0.000000e+00> : vector<2x8xf32>
    %1069 = tpu.matmul %1068, %5, %cst_202 {dimension_numbers = #tpu.dot_dimension_numbers<[1], [0], [0], [1], [0, 0, 1, 1], [], []>} : vector<2x16xf32>, vector<16x8xf32>, vector<2x8xf32> -> vector<2x8xf32>
    %cst_203 = arith.constant dense<0.000000e+00> : vector<2x32xf32>
    %1070 = tpu.matmul %1052, %7, %cst_203 {dimension_numbers = #tpu.dot_dimension_numbers<[1], [0], [0], [1], [0, 0, 1, 1], [], []>} : vector<2x32xf32>, vector<32x32xf32>, vector<2x32xf32> -> vector<2x32xf32>
    %1071 = vector.shape_cast %1070 : vector<2x32xf32> to vector<2x1x32xf32>
    %1072 = vector.broadcast %1071 : vector<2x1x32xf32> to vector<2x8x32xf32>
    %1073 = arith.addf %656, %1072 : vector<2x8x32xf32>
    %1074 = math.tanh %1073 : vector<2x8x32xf32>
    %1075 = vector.shape_cast %1074 : vector<2x8x32xf32> to vector<16x32xf32>
    %cst_204 = arith.constant dense<0.000000e+00> : vector<16x1xf32>
    %1076 = tpu.matmul %1075, %8, %cst_204 {dimension_numbers = #tpu.dot_dimension_numbers<[1], [0], [0], [1], [0, 0, 1, 1], [], []>} : vector<16x32xf32>, vector<32x1xf32>, vector<16x1xf32> -> vector<16x1xf32>
    %1077 = vector.shape_cast %1076 : vector<16x1xf32> to vector<2x8x1xf32>
    %cst_205 = arith.constant dense<0xFF800000> : vector<2x1xf32>
    %1078 = vector.multi_reduction <maximumf>, %1077, %cst_205 [1] : vector<2x8x1xf32> to vector<2x1xf32>
    %1079 = vector.shape_cast %1078 : vector<2x1xf32> to vector<2x1x1xf32>
    %1080 = vector.broadcast %1079 : vector<2x1x1xf32> to vector<2x8x1xf32>
    %1081 = arith.subf %1077, %1080 : vector<2x8x1xf32>
    %1082 = math.exp %1081 : vector<2x8x1xf32>
    %cst_206 = arith.constant dense<0.000000e+00> : vector<2x1xf32>
    %1083 = vector.multi_reduction <add>, %1082, %cst_206 [1] : vector<2x8x1xf32> to vector<2x1xf32>
    %1084 = vector.shape_cast %1083 : vector<2x1xf32> to vector<2x1x1xf32>
    %1085 = vector.broadcast %1084 : vector<2x1x1xf32> to vector<2x8x1xf32>
    %1086 = arith.divf %1082, %1085 : vector<2x8x1xf32>
    %1087 = vector.broadcast %1086 : vector<2x8x1xf32> to vector<2x8x32xf32>
    %1088 = arith.mulf %1087, %653 : vector<2x8x32xf32>
    %cst_207 = arith.constant dense<0.000000e+00> : vector<2x32xf32>
    %1089 = vector.multi_reduction <add>, %1088, %cst_207 [1] : vector<2x8x32xf32> to vector<2x32xf32>
    %1090 = tpu.concatenate %1089, %1069 in 1 : vector<2x32xf32>, vector<2x8xf32> -> vector<2x40xf32>
    %1091 = vector.extract_strided_slice %9 {offsets = [0, 0, 0], sizes = [1, 40, 32], strides = [1, 1, 1]} : vector<3x40x32xf32> to vector<1x40x32xf32>
    %1092 = vector.shape_cast %1091 : vector<1x40x32xf32> to vector<40x32xf32>
    %cst_208 = arith.constant dense<0.000000e+00> : vector<2x32xf32>
    %1093 = tpu.matmul %1090, %1092, %cst_208 {dimension_numbers = #tpu.dot_dimension_numbers<[1], [0], [0], [1], [0, 0, 1, 1], [], []>} : vector<2x40xf32>, vector<40x32xf32>, vector<2x32xf32> -> vector<2x32xf32>
    %1094 = vector.extract_strided_slice %11 {offsets = [0, 0, 0], sizes = [1, 1, 32], strides = [1, 1, 1]} : vector<3x1x32xf32> to vector<1x1x32xf32>
    %1095 = vector.shape_cast %1094 : vector<1x1x32xf32> to vector<1x32xf32>
    %1096 = vector.broadcast %1095 : vector<1x32xf32> to vector<2x32xf32>
    %1097 = arith.addf %1093, %1096 : vector<2x32xf32>
    %1098 = vector.extract_strided_slice %9 {offsets = [1, 0, 0], sizes = [1, 40, 32], strides = [1, 1, 1]} : vector<3x40x32xf32> to vector<1x40x32xf32>
    %1099 = vector.shape_cast %1098 : vector<1x40x32xf32> to vector<40x32xf32>
    %cst_209 = arith.constant dense<0.000000e+00> : vector<2x32xf32>
    %1100 = tpu.matmul %1090, %1099, %cst_209 {dimension_numbers = #tpu.dot_dimension_numbers<[1], [0], [0], [1], [0, 0, 1, 1], [], []>} : vector<2x40xf32>, vector<40x32xf32>, vector<2x32xf32> -> vector<2x32xf32>
    %1101 = vector.extract_strided_slice %11 {offsets = [1, 0, 0], sizes = [1, 1, 32], strides = [1, 1, 1]} : vector<3x1x32xf32> to vector<1x1x32xf32>
    %1102 = vector.shape_cast %1101 : vector<1x1x32xf32> to vector<1x32xf32>
    %1103 = vector.broadcast %1102 : vector<1x32xf32> to vector<2x32xf32>
    %1104 = arith.addf %1100, %1103 : vector<2x32xf32>
    %1105 = vector.extract_strided_slice %9 {offsets = [2, 0, 0], sizes = [1, 40, 32], strides = [1, 1, 1]} : vector<3x40x32xf32> to vector<1x40x32xf32>
    %1106 = vector.shape_cast %1105 : vector<1x40x32xf32> to vector<40x32xf32>
    %cst_210 = arith.constant dense<0.000000e+00> : vector<2x32xf32>
    %1107 = tpu.matmul %1090, %1106, %cst_210 {dimension_numbers = #tpu.dot_dimension_numbers<[1], [0], [0], [1], [0, 0, 1, 1], [], []>} : vector<2x40xf32>, vector<40x32xf32>, vector<2x32xf32> -> vector<2x32xf32>
    %1108 = vector.extract_strided_slice %11 {offsets = [2, 0, 0], sizes = [1, 1, 32], strides = [1, 1, 1]} : vector<3x1x32xf32> to vector<1x1x32xf32>
    %1109 = vector.shape_cast %1108 : vector<1x1x32xf32> to vector<1x32xf32>
    %1110 = vector.broadcast %1109 : vector<1x32xf32> to vector<2x32xf32>
    %1111 = arith.addf %1107, %1110 : vector<2x32xf32>
    %1112 = vector.extract_strided_slice %10 {offsets = [0, 0, 0], sizes = [1, 32, 32], strides = [1, 1, 1]} : vector<3x32x32xf32> to vector<1x32x32xf32>
    %1113 = vector.shape_cast %1112 : vector<1x32x32xf32> to vector<32x32xf32>
    %cst_211 = arith.constant dense<0.000000e+00> : vector<2x32xf32>
    %1114 = tpu.matmul %1052, %1113, %cst_211 {dimension_numbers = #tpu.dot_dimension_numbers<[1], [0], [0], [1], [0, 0, 1, 1], [], []>} : vector<2x32xf32>, vector<32x32xf32>, vector<2x32xf32> -> vector<2x32xf32>
    %1115 = vector.extract_strided_slice %12 {offsets = [0, 0, 0], sizes = [1, 1, 32], strides = [1, 1, 1]} : vector<3x1x32xf32> to vector<1x1x32xf32>
    %1116 = vector.shape_cast %1115 : vector<1x1x32xf32> to vector<1x32xf32>
    %1117 = vector.broadcast %1116 : vector<1x32xf32> to vector<2x32xf32>
    %1118 = arith.addf %1114, %1117 : vector<2x32xf32>
    %1119 = vector.extract_strided_slice %10 {offsets = [1, 0, 0], sizes = [1, 32, 32], strides = [1, 1, 1]} : vector<3x32x32xf32> to vector<1x32x32xf32>
    %1120 = vector.shape_cast %1119 : vector<1x32x32xf32> to vector<32x32xf32>
    %cst_212 = arith.constant dense<0.000000e+00> : vector<2x32xf32>
    %1121 = tpu.matmul %1052, %1120, %cst_212 {dimension_numbers = #tpu.dot_dimension_numbers<[1], [0], [0], [1], [0, 0, 1, 1], [], []>} : vector<2x32xf32>, vector<32x32xf32>, vector<2x32xf32> -> vector<2x32xf32>
    %1122 = vector.extract_strided_slice %12 {offsets = [1, 0, 0], sizes = [1, 1, 32], strides = [1, 1, 1]} : vector<3x1x32xf32> to vector<1x1x32xf32>
    %1123 = vector.shape_cast %1122 : vector<1x1x32xf32> to vector<1x32xf32>
    %1124 = vector.broadcast %1123 : vector<1x32xf32> to vector<2x32xf32>
    %1125 = arith.addf %1121, %1124 : vector<2x32xf32>
    %1126 = vector.extract_strided_slice %10 {offsets = [2, 0, 0], sizes = [1, 32, 32], strides = [1, 1, 1]} : vector<3x32x32xf32> to vector<1x32x32xf32>
    %1127 = vector.shape_cast %1126 : vector<1x32x32xf32> to vector<32x32xf32>
    %cst_213 = arith.constant dense<0.000000e+00> : vector<2x32xf32>
    %1128 = tpu.matmul %1052, %1127, %cst_213 {dimension_numbers = #tpu.dot_dimension_numbers<[1], [0], [0], [1], [0, 0, 1, 1], [], []>} : vector<2x32xf32>, vector<32x32xf32>, vector<2x32xf32> -> vector<2x32xf32>
    %1129 = vector.extract_strided_slice %12 {offsets = [2, 0, 0], sizes = [1, 1, 32], strides = [1, 1, 1]} : vector<3x1x32xf32> to vector<1x1x32xf32>
    %1130 = vector.shape_cast %1129 : vector<1x1x32xf32> to vector<1x32xf32>
    %1131 = vector.broadcast %1130 : vector<1x32xf32> to vector<2x32xf32>
    %1132 = arith.addf %1128, %1131 : vector<2x32xf32>
    %1133 = arith.addf %1097, %1118 : vector<2x32xf32>
    %1134 = arith.negf %1133 : vector<2x32xf32>
    %1135 = math.exp %1134 : vector<2x32xf32>
    %cst_214 = arith.constant 1.000000e+00 : f32
    %1136 = vector.broadcast %cst_214 : f32 to vector<2x32xf32>
    %1137 = arith.addf %1136, %1135 : vector<2x32xf32>
    %1138 = arith.divf %1136, %1137 : vector<2x32xf32>
    %1139 = arith.addf %1104, %1125 : vector<2x32xf32>
    %1140 = arith.negf %1139 : vector<2x32xf32>
    %1141 = math.exp %1140 : vector<2x32xf32>
    %cst_215 = arith.constant 1.000000e+00 : f32
    %1142 = vector.broadcast %cst_215 : f32 to vector<2x32xf32>
    %1143 = arith.addf %1142, %1141 : vector<2x32xf32>
    %1144 = arith.divf %1142, %1143 : vector<2x32xf32>
    %1145 = arith.mulf %1138, %1132 : vector<2x32xf32>
    %1146 = arith.addf %1111, %1145 : vector<2x32xf32>
    %1147 = math.tanh %1146 : vector<2x32xf32>
    %cst_216 = arith.constant 1.000000e+00 : f32
    %1148 = vector.broadcast %cst_216 : f32 to vector<2x32xf32>
    %1149 = arith.subf %1148, %1144 : vector<2x32xf32>
    %1150 = arith.mulf %1149, %1147 : vector<2x32xf32>
    %1151 = arith.mulf %1144, %1052 : vector<2x32xf32>
    %1152 = arith.addf %1150, %1151 : vector<2x32xf32>
    %1153 = tpu.concatenate %1069, %1152, %1089 in 1 : vector<2x8xf32>, vector<2x32xf32>, vector<2x32xf32> -> vector<2x72xf32>
    %cst_217 = arith.constant dense<0.000000e+00> : vector<2x16xf32>
    %1154 = tpu.matmul %1153, %13, %cst_217 {dimension_numbers = #tpu.dot_dimension_numbers<[1], [0], [0], [1], [0, 0, 1, 1], [], []>} : vector<2x72xf32>, vector<72x16xf32>, vector<2x16xf32> -> vector<2x16xf32>
    %1155 = vector.broadcast %14 : vector<1x16xf32> to vector<2x16xf32>
    %1156 = arith.addf %1154, %1155 : vector<2x16xf32>
    %cst_218 = arith.constant dense<0xFF800000> : vector<2xf32>
    %1157 = vector.multi_reduction <maximumf>, %1156, %cst_218 [1] : vector<2x16xf32> to vector<2xf32>
    %1158 = vector.shape_cast %1157 : vector<2xf32> to vector<2x1xf32>
    %1159 = vector.broadcast %1158 : vector<2x1xf32> to vector<2x16xf32>
    %1160 = arith.cmpf oge, %1156, %1159 : vector<2x16xf32>
    %cst_219 = arith.constant 1.600000e+01 : f32
    %1161 = vector.broadcast %cst_219 : f32 to vector<2x16xf32>
    %1162 = arith.select %1160, %658, %1161 : vector<2x16xi1>, vector<2x16xf32>
    %cst_220 = arith.constant dense<0x7F800000> : vector<2xf32>
    %1163 = vector.multi_reduction <minimumf>, %1162, %cst_220 [1] : vector<2x16xf32> to vector<2xf32>
    %1164 = vector.shape_cast %1163 : vector<2xf32> to vector<2x1xf32>
    %1165 = vector.broadcast %1164 : vector<2x1xf32> to vector<2x16xf32>
    %1166 = arith.cmpf oeq, %658, %1165 : vector<2x16xf32>
    %1167 = arith.extui %1166 : vector<2x16xi1> to vector<2x16xi32>
    %1168 = arith.sitofp %1167 : vector<2x16xi32> to vector<2x16xf32>
    %cst_221 = arith.constant dense<0.000000e+00> : vector<2x8xf32>
    %1169 = tpu.matmul %1168, %5, %cst_221 {dimension_numbers = #tpu.dot_dimension_numbers<[1], [0], [0], [1], [0, 0, 1, 1], [], []>} : vector<2x16xf32>, vector<16x8xf32>, vector<2x8xf32> -> vector<2x8xf32>
    %cst_222 = arith.constant dense<0.000000e+00> : vector<2x32xf32>
    %1170 = tpu.matmul %1152, %7, %cst_222 {dimension_numbers = #tpu.dot_dimension_numbers<[1], [0], [0], [1], [0, 0, 1, 1], [], []>} : vector<2x32xf32>, vector<32x32xf32>, vector<2x32xf32> -> vector<2x32xf32>
    %1171 = vector.shape_cast %1170 : vector<2x32xf32> to vector<2x1x32xf32>
    %1172 = vector.broadcast %1171 : vector<2x1x32xf32> to vector<2x8x32xf32>
    %1173 = arith.addf %656, %1172 : vector<2x8x32xf32>
    %1174 = math.tanh %1173 : vector<2x8x32xf32>
    %1175 = vector.shape_cast %1174 : vector<2x8x32xf32> to vector<16x32xf32>
    %cst_223 = arith.constant dense<0.000000e+00> : vector<16x1xf32>
    %1176 = tpu.matmul %1175, %8, %cst_223 {dimension_numbers = #tpu.dot_dimension_numbers<[1], [0], [0], [1], [0, 0, 1, 1], [], []>} : vector<16x32xf32>, vector<32x1xf32>, vector<16x1xf32> -> vector<16x1xf32>
    %1177 = vector.shape_cast %1176 : vector<16x1xf32> to vector<2x8x1xf32>
    %cst_224 = arith.constant dense<0xFF800000> : vector<2x1xf32>
    %1178 = vector.multi_reduction <maximumf>, %1177, %cst_224 [1] : vector<2x8x1xf32> to vector<2x1xf32>
    %1179 = vector.shape_cast %1178 : vector<2x1xf32> to vector<2x1x1xf32>
    %1180 = vector.broadcast %1179 : vector<2x1x1xf32> to vector<2x8x1xf32>
    %1181 = arith.subf %1177, %1180 : vector<2x8x1xf32>
    %1182 = math.exp %1181 : vector<2x8x1xf32>
    %cst_225 = arith.constant dense<0.000000e+00> : vector<2x1xf32>
    %1183 = vector.multi_reduction <add>, %1182, %cst_225 [1] : vector<2x8x1xf32> to vector<2x1xf32>
    %1184 = vector.shape_cast %1183 : vector<2x1xf32> to vector<2x1x1xf32>
    %1185 = vector.broadcast %1184 : vector<2x1x1xf32> to vector<2x8x1xf32>
    %1186 = arith.divf %1182, %1185 : vector<2x8x1xf32>
    %1187 = vector.broadcast %1186 : vector<2x8x1xf32> to vector<2x8x32xf32>
    %1188 = arith.mulf %1187, %653 : vector<2x8x32xf32>
    %cst_226 = arith.constant dense<0.000000e+00> : vector<2x32xf32>
    %1189 = vector.multi_reduction <add>, %1188, %cst_226 [1] : vector<2x8x32xf32> to vector<2x32xf32>
    %1190 = tpu.concatenate %1189, %1169 in 1 : vector<2x32xf32>, vector<2x8xf32> -> vector<2x40xf32>
    %1191 = vector.extract_strided_slice %9 {offsets = [0, 0, 0], sizes = [1, 40, 32], strides = [1, 1, 1]} : vector<3x40x32xf32> to vector<1x40x32xf32>
    %1192 = vector.shape_cast %1191 : vector<1x40x32xf32> to vector<40x32xf32>
    %cst_227 = arith.constant dense<0.000000e+00> : vector<2x32xf32>
    %1193 = tpu.matmul %1190, %1192, %cst_227 {dimension_numbers = #tpu.dot_dimension_numbers<[1], [0], [0], [1], [0, 0, 1, 1], [], []>} : vector<2x40xf32>, vector<40x32xf32>, vector<2x32xf32> -> vector<2x32xf32>
    %1194 = vector.extract_strided_slice %11 {offsets = [0, 0, 0], sizes = [1, 1, 32], strides = [1, 1, 1]} : vector<3x1x32xf32> to vector<1x1x32xf32>
    %1195 = vector.shape_cast %1194 : vector<1x1x32xf32> to vector<1x32xf32>
    %1196 = vector.broadcast %1195 : vector<1x32xf32> to vector<2x32xf32>
    %1197 = arith.addf %1193, %1196 : vector<2x32xf32>
    %1198 = vector.extract_strided_slice %9 {offsets = [1, 0, 0], sizes = [1, 40, 32], strides = [1, 1, 1]} : vector<3x40x32xf32> to vector<1x40x32xf32>
    %1199 = vector.shape_cast %1198 : vector<1x40x32xf32> to vector<40x32xf32>
    %cst_228 = arith.constant dense<0.000000e+00> : vector<2x32xf32>
    %1200 = tpu.matmul %1190, %1199, %cst_228 {dimension_numbers = #tpu.dot_dimension_numbers<[1], [0], [0], [1], [0, 0, 1, 1], [], []>} : vector<2x40xf32>, vector<40x32xf32>, vector<2x32xf32> -> vector<2x32xf32>
    %1201 = vector.extract_strided_slice %11 {offsets = [1, 0, 0], sizes = [1, 1, 32], strides = [1, 1, 1]} : vector<3x1x32xf32> to vector<1x1x32xf32>
    %1202 = vector.shape_cast %1201 : vector<1x1x32xf32> to vector<1x32xf32>
    %1203 = vector.broadcast %1202 : vector<1x32xf32> to vector<2x32xf32>
    %1204 = arith.addf %1200, %1203 : vector<2x32xf32>
    %1205 = vector.extract_strided_slice %9 {offsets = [2, 0, 0], sizes = [1, 40, 32], strides = [1, 1, 1]} : vector<3x40x32xf32> to vector<1x40x32xf32>
    %1206 = vector.shape_cast %1205 : vector<1x40x32xf32> to vector<40x32xf32>
    %cst_229 = arith.constant dense<0.000000e+00> : vector<2x32xf32>
    %1207 = tpu.matmul %1190, %1206, %cst_229 {dimension_numbers = #tpu.dot_dimension_numbers<[1], [0], [0], [1], [0, 0, 1, 1], [], []>} : vector<2x40xf32>, vector<40x32xf32>, vector<2x32xf32> -> vector<2x32xf32>
    %1208 = vector.extract_strided_slice %11 {offsets = [2, 0, 0], sizes = [1, 1, 32], strides = [1, 1, 1]} : vector<3x1x32xf32> to vector<1x1x32xf32>
    %1209 = vector.shape_cast %1208 : vector<1x1x32xf32> to vector<1x32xf32>
    %1210 = vector.broadcast %1209 : vector<1x32xf32> to vector<2x32xf32>
    %1211 = arith.addf %1207, %1210 : vector<2x32xf32>
    %1212 = vector.extract_strided_slice %10 {offsets = [0, 0, 0], sizes = [1, 32, 32], strides = [1, 1, 1]} : vector<3x32x32xf32> to vector<1x32x32xf32>
    %1213 = vector.shape_cast %1212 : vector<1x32x32xf32> to vector<32x32xf32>
    %cst_230 = arith.constant dense<0.000000e+00> : vector<2x32xf32>
    %1214 = tpu.matmul %1152, %1213, %cst_230 {dimension_numbers = #tpu.dot_dimension_numbers<[1], [0], [0], [1], [0, 0, 1, 1], [], []>} : vector<2x32xf32>, vector<32x32xf32>, vector<2x32xf32> -> vector<2x32xf32>
    %1215 = vector.extract_strided_slice %12 {offsets = [0, 0, 0], sizes = [1, 1, 32], strides = [1, 1, 1]} : vector<3x1x32xf32> to vector<1x1x32xf32>
    %1216 = vector.shape_cast %1215 : vector<1x1x32xf32> to vector<1x32xf32>
    %1217 = vector.broadcast %1216 : vector<1x32xf32> to vector<2x32xf32>
    %1218 = arith.addf %1214, %1217 : vector<2x32xf32>
    %1219 = vector.extract_strided_slice %10 {offsets = [1, 0, 0], sizes = [1, 32, 32], strides = [1, 1, 1]} : vector<3x32x32xf32> to vector<1x32x32xf32>
    %1220 = vector.shape_cast %1219 : vector<1x32x32xf32> to vector<32x32xf32>
    %cst_231 = arith.constant dense<0.000000e+00> : vector<2x32xf32>
    %1221 = tpu.matmul %1152, %1220, %cst_231 {dimension_numbers = #tpu.dot_dimension_numbers<[1], [0], [0], [1], [0, 0, 1, 1], [], []>} : vector<2x32xf32>, vector<32x32xf32>, vector<2x32xf32> -> vector<2x32xf32>
    %1222 = vector.extract_strided_slice %12 {offsets = [1, 0, 0], sizes = [1, 1, 32], strides = [1, 1, 1]} : vector<3x1x32xf32> to vector<1x1x32xf32>
    %1223 = vector.shape_cast %1222 : vector<1x1x32xf32> to vector<1x32xf32>
    %1224 = vector.broadcast %1223 : vector<1x32xf32> to vector<2x32xf32>
    %1225 = arith.addf %1221, %1224 : vector<2x32xf32>
    %1226 = vector.extract_strided_slice %10 {offsets = [2, 0, 0], sizes = [1, 32, 32], strides = [1, 1, 1]} : vector<3x32x32xf32> to vector<1x32x32xf32>
    %1227 = vector.shape_cast %1226 : vector<1x32x32xf32> to vector<32x32xf32>
    %cst_232 = arith.constant dense<0.000000e+00> : vector<2x32xf32>
    %1228 = tpu.matmul %1152, %1227, %cst_232 {dimension_numbers = #tpu.dot_dimension_numbers<[1], [0], [0], [1], [0, 0, 1, 1], [], []>} : vector<2x32xf32>, vector<32x32xf32>, vector<2x32xf32> -> vector<2x32xf32>
    %1229 = vector.extract_strided_slice %12 {offsets = [2, 0, 0], sizes = [1, 1, 32], strides = [1, 1, 1]} : vector<3x1x32xf32> to vector<1x1x32xf32>
    %1230 = vector.shape_cast %1229 : vector<1x1x32xf32> to vector<1x32xf32>
    %1231 = vector.broadcast %1230 : vector<1x32xf32> to vector<2x32xf32>
    %1232 = arith.addf %1228, %1231 : vector<2x32xf32>
    %1233 = arith.addf %1197, %1218 : vector<2x32xf32>
    %1234 = arith.negf %1233 : vector<2x32xf32>
    %1235 = math.exp %1234 : vector<2x32xf32>
    %cst_233 = arith.constant 1.000000e+00 : f32
    %1236 = vector.broadcast %cst_233 : f32 to vector<2x32xf32>
    %1237 = arith.addf %1236, %1235 : vector<2x32xf32>
    %1238 = arith.divf %1236, %1237 : vector<2x32xf32>
    %1239 = arith.addf %1204, %1225 : vector<2x32xf32>
    %1240 = arith.negf %1239 : vector<2x32xf32>
    %1241 = math.exp %1240 : vector<2x32xf32>
    %cst_234 = arith.constant 1.000000e+00 : f32
    %1242 = vector.broadcast %cst_234 : f32 to vector<2x32xf32>
    %1243 = arith.addf %1242, %1241 : vector<2x32xf32>
    %1244 = arith.divf %1242, %1243 : vector<2x32xf32>
    %1245 = arith.mulf %1238, %1232 : vector<2x32xf32>
    %1246 = arith.addf %1211, %1245 : vector<2x32xf32>
    %1247 = math.tanh %1246 : vector<2x32xf32>
    %cst_235 = arith.constant 1.000000e+00 : f32
    %1248 = vector.broadcast %cst_235 : f32 to vector<2x32xf32>
    %1249 = arith.subf %1248, %1244 : vector<2x32xf32>
    %1250 = arith.mulf %1249, %1247 : vector<2x32xf32>
    %1251 = arith.mulf %1244, %1152 : vector<2x32xf32>
    %1252 = arith.addf %1250, %1251 : vector<2x32xf32>
    %1253 = tpu.concatenate %1169, %1252, %1189 in 1 : vector<2x8xf32>, vector<2x32xf32>, vector<2x32xf32> -> vector<2x72xf32>
    %cst_236 = arith.constant dense<0.000000e+00> : vector<2x16xf32>
    %1254 = tpu.matmul %1253, %13, %cst_236 {dimension_numbers = #tpu.dot_dimension_numbers<[1], [0], [0], [1], [0, 0, 1, 1], [], []>} : vector<2x72xf32>, vector<72x16xf32>, vector<2x16xf32> -> vector<2x16xf32>
    %1255 = vector.broadcast %14 : vector<1x16xf32> to vector<2x16xf32>
    %1256 = arith.addf %1254, %1255 : vector<2x16xf32>
    %cst_237 = arith.constant dense<0xFF800000> : vector<2xf32>
    %1257 = vector.multi_reduction <maximumf>, %1256, %cst_237 [1] : vector<2x16xf32> to vector<2xf32>
    %1258 = vector.shape_cast %1257 : vector<2xf32> to vector<2x1xf32>
    %1259 = vector.broadcast %1258 : vector<2x1xf32> to vector<2x16xf32>
    %1260 = arith.cmpf oge, %1256, %1259 : vector<2x16xf32>
    %cst_238 = arith.constant 1.600000e+01 : f32
    %1261 = vector.broadcast %cst_238 : f32 to vector<2x16xf32>
    %1262 = arith.select %1260, %658, %1261 : vector<2x16xi1>, vector<2x16xf32>
    %cst_239 = arith.constant dense<0x7F800000> : vector<2xf32>
    %1263 = vector.multi_reduction <minimumf>, %1262, %cst_239 [1] : vector<2x16xf32> to vector<2xf32>
    %1264 = vector.shape_cast %1263 : vector<2xf32> to vector<2x1xf32>
    %1265 = vector.broadcast %1264 : vector<2x1xf32> to vector<2x16xf32>
    %1266 = arith.cmpf oeq, %658, %1265 : vector<2x16xf32>
    %1267 = arith.extui %1266 : vector<2x16xi1> to vector<2x16xi32>
    %1268 = arith.sitofp %1267 : vector<2x16xi32> to vector<2x16xf32>
    %cst_240 = arith.constant dense<0.000000e+00> : vector<2x8xf32>
    %1269 = tpu.matmul %1268, %5, %cst_240 {dimension_numbers = #tpu.dot_dimension_numbers<[1], [0], [0], [1], [0, 0, 1, 1], [], []>} : vector<2x16xf32>, vector<16x8xf32>, vector<2x8xf32> -> vector<2x8xf32>
    %cst_241 = arith.constant dense<0.000000e+00> : vector<2x32xf32>
    %1270 = tpu.matmul %1252, %7, %cst_241 {dimension_numbers = #tpu.dot_dimension_numbers<[1], [0], [0], [1], [0, 0, 1, 1], [], []>} : vector<2x32xf32>, vector<32x32xf32>, vector<2x32xf32> -> vector<2x32xf32>
    %1271 = vector.shape_cast %1270 : vector<2x32xf32> to vector<2x1x32xf32>
    %1272 = vector.broadcast %1271 : vector<2x1x32xf32> to vector<2x8x32xf32>
    %1273 = arith.addf %656, %1272 : vector<2x8x32xf32>
    %1274 = math.tanh %1273 : vector<2x8x32xf32>
    %1275 = vector.shape_cast %1274 : vector<2x8x32xf32> to vector<16x32xf32>
    %cst_242 = arith.constant dense<0.000000e+00> : vector<16x1xf32>
    %1276 = tpu.matmul %1275, %8, %cst_242 {dimension_numbers = #tpu.dot_dimension_numbers<[1], [0], [0], [1], [0, 0, 1, 1], [], []>} : vector<16x32xf32>, vector<32x1xf32>, vector<16x1xf32> -> vector<16x1xf32>
    %1277 = vector.shape_cast %1276 : vector<16x1xf32> to vector<2x8x1xf32>
    %cst_243 = arith.constant dense<0xFF800000> : vector<2x1xf32>
    %1278 = vector.multi_reduction <maximumf>, %1277, %cst_243 [1] : vector<2x8x1xf32> to vector<2x1xf32>
    %1279 = vector.shape_cast %1278 : vector<2x1xf32> to vector<2x1x1xf32>
    %1280 = vector.broadcast %1279 : vector<2x1x1xf32> to vector<2x8x1xf32>
    %1281 = arith.subf %1277, %1280 : vector<2x8x1xf32>
    %1282 = math.exp %1281 : vector<2x8x1xf32>
    %cst_244 = arith.constant dense<0.000000e+00> : vector<2x1xf32>
    %1283 = vector.multi_reduction <add>, %1282, %cst_244 [1] : vector<2x8x1xf32> to vector<2x1xf32>
    %1284 = vector.shape_cast %1283 : vector<2x1xf32> to vector<2x1x1xf32>
    %1285 = vector.broadcast %1284 : vector<2x1x1xf32> to vector<2x8x1xf32>
    %1286 = arith.divf %1282, %1285 : vector<2x8x1xf32>
    %1287 = vector.broadcast %1286 : vector<2x8x1xf32> to vector<2x8x32xf32>
    %1288 = arith.mulf %1287, %653 : vector<2x8x32xf32>
    %cst_245 = arith.constant dense<0.000000e+00> : vector<2x32xf32>
    %1289 = vector.multi_reduction <add>, %1288, %cst_245 [1] : vector<2x8x32xf32> to vector<2x32xf32>
    %1290 = tpu.concatenate %1289, %1269 in 1 : vector<2x32xf32>, vector<2x8xf32> -> vector<2x40xf32>
    %1291 = vector.extract_strided_slice %9 {offsets = [0, 0, 0], sizes = [1, 40, 32], strides = [1, 1, 1]} : vector<3x40x32xf32> to vector<1x40x32xf32>
    %1292 = vector.shape_cast %1291 : vector<1x40x32xf32> to vector<40x32xf32>
    %cst_246 = arith.constant dense<0.000000e+00> : vector<2x32xf32>
    %1293 = tpu.matmul %1290, %1292, %cst_246 {dimension_numbers = #tpu.dot_dimension_numbers<[1], [0], [0], [1], [0, 0, 1, 1], [], []>} : vector<2x40xf32>, vector<40x32xf32>, vector<2x32xf32> -> vector<2x32xf32>
    %1294 = vector.extract_strided_slice %11 {offsets = [0, 0, 0], sizes = [1, 1, 32], strides = [1, 1, 1]} : vector<3x1x32xf32> to vector<1x1x32xf32>
    %1295 = vector.shape_cast %1294 : vector<1x1x32xf32> to vector<1x32xf32>
    %1296 = vector.broadcast %1295 : vector<1x32xf32> to vector<2x32xf32>
    %1297 = arith.addf %1293, %1296 : vector<2x32xf32>
    %1298 = vector.extract_strided_slice %9 {offsets = [1, 0, 0], sizes = [1, 40, 32], strides = [1, 1, 1]} : vector<3x40x32xf32> to vector<1x40x32xf32>
    %1299 = vector.shape_cast %1298 : vector<1x40x32xf32> to vector<40x32xf32>
    %cst_247 = arith.constant dense<0.000000e+00> : vector<2x32xf32>
    %1300 = tpu.matmul %1290, %1299, %cst_247 {dimension_numbers = #tpu.dot_dimension_numbers<[1], [0], [0], [1], [0, 0, 1, 1], [], []>} : vector<2x40xf32>, vector<40x32xf32>, vector<2x32xf32> -> vector<2x32xf32>
    %1301 = vector.extract_strided_slice %11 {offsets = [1, 0, 0], sizes = [1, 1, 32], strides = [1, 1, 1]} : vector<3x1x32xf32> to vector<1x1x32xf32>
    %1302 = vector.shape_cast %1301 : vector<1x1x32xf32> to vector<1x32xf32>
    %1303 = vector.broadcast %1302 : vector<1x32xf32> to vector<2x32xf32>
    %1304 = arith.addf %1300, %1303 : vector<2x32xf32>
    %1305 = vector.extract_strided_slice %9 {offsets = [2, 0, 0], sizes = [1, 40, 32], strides = [1, 1, 1]} : vector<3x40x32xf32> to vector<1x40x32xf32>
    %1306 = vector.shape_cast %1305 : vector<1x40x32xf32> to vector<40x32xf32>
    %cst_248 = arith.constant dense<0.000000e+00> : vector<2x32xf32>
    %1307 = tpu.matmul %1290, %1306, %cst_248 {dimension_numbers = #tpu.dot_dimension_numbers<[1], [0], [0], [1], [0, 0, 1, 1], [], []>} : vector<2x40xf32>, vector<40x32xf32>, vector<2x32xf32> -> vector<2x32xf32>
    %1308 = vector.extract_strided_slice %11 {offsets = [2, 0, 0], sizes = [1, 1, 32], strides = [1, 1, 1]} : vector<3x1x32xf32> to vector<1x1x32xf32>
    %1309 = vector.shape_cast %1308 : vector<1x1x32xf32> to vector<1x32xf32>
    %1310 = vector.broadcast %1309 : vector<1x32xf32> to vector<2x32xf32>
    %1311 = arith.addf %1307, %1310 : vector<2x32xf32>
    %1312 = vector.extract_strided_slice %10 {offsets = [0, 0, 0], sizes = [1, 32, 32], strides = [1, 1, 1]} : vector<3x32x32xf32> to vector<1x32x32xf32>
    %1313 = vector.shape_cast %1312 : vector<1x32x32xf32> to vector<32x32xf32>
    %cst_249 = arith.constant dense<0.000000e+00> : vector<2x32xf32>
    %1314 = tpu.matmul %1252, %1313, %cst_249 {dimension_numbers = #tpu.dot_dimension_numbers<[1], [0], [0], [1], [0, 0, 1, 1], [], []>} : vector<2x32xf32>, vector<32x32xf32>, vector<2x32xf32> -> vector<2x32xf32>
    %1315 = vector.extract_strided_slice %12 {offsets = [0, 0, 0], sizes = [1, 1, 32], strides = [1, 1, 1]} : vector<3x1x32xf32> to vector<1x1x32xf32>
    %1316 = vector.shape_cast %1315 : vector<1x1x32xf32> to vector<1x32xf32>
    %1317 = vector.broadcast %1316 : vector<1x32xf32> to vector<2x32xf32>
    %1318 = arith.addf %1314, %1317 : vector<2x32xf32>
    %1319 = vector.extract_strided_slice %10 {offsets = [1, 0, 0], sizes = [1, 32, 32], strides = [1, 1, 1]} : vector<3x32x32xf32> to vector<1x32x32xf32>
    %1320 = vector.shape_cast %1319 : vector<1x32x32xf32> to vector<32x32xf32>
    %cst_250 = arith.constant dense<0.000000e+00> : vector<2x32xf32>
    %1321 = tpu.matmul %1252, %1320, %cst_250 {dimension_numbers = #tpu.dot_dimension_numbers<[1], [0], [0], [1], [0, 0, 1, 1], [], []>} : vector<2x32xf32>, vector<32x32xf32>, vector<2x32xf32> -> vector<2x32xf32>
    %1322 = vector.extract_strided_slice %12 {offsets = [1, 0, 0], sizes = [1, 1, 32], strides = [1, 1, 1]} : vector<3x1x32xf32> to vector<1x1x32xf32>
    %1323 = vector.shape_cast %1322 : vector<1x1x32xf32> to vector<1x32xf32>
    %1324 = vector.broadcast %1323 : vector<1x32xf32> to vector<2x32xf32>
    %1325 = arith.addf %1321, %1324 : vector<2x32xf32>
    %1326 = vector.extract_strided_slice %10 {offsets = [2, 0, 0], sizes = [1, 32, 32], strides = [1, 1, 1]} : vector<3x32x32xf32> to vector<1x32x32xf32>
    %1327 = vector.shape_cast %1326 : vector<1x32x32xf32> to vector<32x32xf32>
    %cst_251 = arith.constant dense<0.000000e+00> : vector<2x32xf32>
    %1328 = tpu.matmul %1252, %1327, %cst_251 {dimension_numbers = #tpu.dot_dimension_numbers<[1], [0], [0], [1], [0, 0, 1, 1], [], []>} : vector<2x32xf32>, vector<32x32xf32>, vector<2x32xf32> -> vector<2x32xf32>
    %1329 = vector.extract_strided_slice %12 {offsets = [2, 0, 0], sizes = [1, 1, 32], strides = [1, 1, 1]} : vector<3x1x32xf32> to vector<1x1x32xf32>
    %1330 = vector.shape_cast %1329 : vector<1x1x32xf32> to vector<1x32xf32>
    %1331 = vector.broadcast %1330 : vector<1x32xf32> to vector<2x32xf32>
    %1332 = arith.addf %1328, %1331 : vector<2x32xf32>
    %1333 = arith.addf %1297, %1318 : vector<2x32xf32>
    %1334 = arith.negf %1333 : vector<2x32xf32>
    %1335 = math.exp %1334 : vector<2x32xf32>
    %cst_252 = arith.constant 1.000000e+00 : f32
    %1336 = vector.broadcast %cst_252 : f32 to vector<2x32xf32>
    %1337 = arith.addf %1336, %1335 : vector<2x32xf32>
    %1338 = arith.divf %1336, %1337 : vector<2x32xf32>
    %1339 = arith.addf %1304, %1325 : vector<2x32xf32>
    %1340 = arith.negf %1339 : vector<2x32xf32>
    %1341 = math.exp %1340 : vector<2x32xf32>
    %cst_253 = arith.constant 1.000000e+00 : f32
    %1342 = vector.broadcast %cst_253 : f32 to vector<2x32xf32>
    %1343 = arith.addf %1342, %1341 : vector<2x32xf32>
    %1344 = arith.divf %1342, %1343 : vector<2x32xf32>
    %1345 = arith.mulf %1338, %1332 : vector<2x32xf32>
    %1346 = arith.addf %1311, %1345 : vector<2x32xf32>
    %1347 = math.tanh %1346 : vector<2x32xf32>
    %cst_254 = arith.constant 1.000000e+00 : f32
    %1348 = vector.broadcast %cst_254 : f32 to vector<2x32xf32>
    %1349 = arith.subf %1348, %1344 : vector<2x32xf32>
    %1350 = arith.mulf %1349, %1347 : vector<2x32xf32>
    %1351 = arith.mulf %1344, %1252 : vector<2x32xf32>
    %1352 = arith.addf %1350, %1351 : vector<2x32xf32>
    %1353 = tpu.concatenate %1269, %1352, %1289 in 1 : vector<2x8xf32>, vector<2x32xf32>, vector<2x32xf32> -> vector<2x72xf32>
    %cst_255 = arith.constant dense<0.000000e+00> : vector<2x16xf32>
    %1354 = tpu.matmul %1353, %13, %cst_255 {dimension_numbers = #tpu.dot_dimension_numbers<[1], [0], [0], [1], [0, 0, 1, 1], [], []>} : vector<2x72xf32>, vector<72x16xf32>, vector<2x16xf32> -> vector<2x16xf32>
    %1355 = vector.broadcast %14 : vector<1x16xf32> to vector<2x16xf32>
    %1356 = arith.addf %1354, %1355 : vector<2x16xf32>
    %1357 = vector.shape_cast %664 : vector<2x16xf32> to vector<2x1x16xf32>
    %1358 = vector.shape_cast %756 : vector<2x16xf32> to vector<2x1x16xf32>
    %1359 = vector.shape_cast %856 : vector<2x16xf32> to vector<2x1x16xf32>
    %1360 = vector.shape_cast %956 : vector<2x16xf32> to vector<2x1x16xf32>
    %1361 = vector.shape_cast %1056 : vector<2x16xf32> to vector<2x1x16xf32>
    %1362 = vector.shape_cast %1156 : vector<2x16xf32> to vector<2x1x16xf32>
    %1363 = vector.shape_cast %1256 : vector<2x16xf32> to vector<2x1x16xf32>
    %1364 = vector.shape_cast %1356 : vector<2x16xf32> to vector<2x1x16xf32>
    %1365 = tpu.concatenate %1357, %1358, %1359, %1360, %1361, %1362, %1363, %1364 in 1 : vector<2x1x16xf32>, vector<2x1x16xf32>, vector<2x1x16xf32>, vector<2x1x16xf32>, vector<2x1x16xf32>, vector<2x1x16xf32>, vector<2x1x16xf32>, vector<2x1x16xf32> -> vector<2x8x16xf32>
    %c0_256 = arith.constant 0 : index
    %c0_257 = arith.constant 0 : index
    %c0_258 = arith.constant 0 : index
    %1366 = vector.load %arg19[%c0_256, %c0_257, %c0_258] : memref<2x8x16xf32, #tpu.memory_space<vmem>>, vector<2x8x16xf32>
    tpu.vector_store %arg19[%c0_256, %c0_257, %c0_258], %1365 {strides = array<i32>} : memref<2x8x16xf32, #tpu.memory_space<vmem>>, vector<2x8x16xf32>,
    return
  }
  func.func @transform_0(%arg0: i32) -> (i32, i32) {
    %c0_i32 = arith.constant 0 : i32
    %c0_i32_0 = arith.constant 0 : i32
    %c0_i32_1 = arith.constant 0 : i32
    return %c0_i32, %c0_i32_0 : i32, i32
  }
  func.func @transform_1(%arg0: i32) -> (i32, i32) {
    %c0_i32 = arith.constant 0 : i32
    %c0_i32_0 = arith.constant 0 : i32
    %c0_i32_1 = arith.constant 0 : i32
    return %c0_i32, %c0_i32_0 : i32, i32
  }
  func.func @transform_2(%arg0: i32) -> (i32, i32) {
    %c0_i32 = arith.constant 0 : i32
    %c0_i32_0 = arith.constant 0 : i32
    %c0_i32_1 = arith.constant 0 : i32
    return %c0_i32, %c0_i32_0 : i32, i32
  }
  func.func @transform_3(%arg0: i32) -> (i32, i32) {
    %c0_i32 = arith.constant 0 : i32
    %c0_i32_0 = arith.constant 0 : i32
    %c0_i32_1 = arith.constant 0 : i32
    return %c0_i32, %c0_i32_0 : i32, i32
  }
  func.func @transform_4(%arg0: i32) -> (i32, i32, i32) {
    %c0_i32 = arith.constant 0 : i32
    %c0_i32_0 = arith.constant 0 : i32
    %c0_i32_1 = arith.constant 0 : i32
    %c0_i32_2 = arith.constant 0 : i32
    return %c0_i32, %c0_i32_0, %c0_i32_1 : i32, i32, i32
  }
  func.func @transform_5(%arg0: i32) -> (i32, i32, i32) {
    %c0_i32 = arith.constant 0 : i32
    %c0_i32_0 = arith.constant 0 : i32
    %c0_i32_1 = arith.constant 0 : i32
    %c0_i32_2 = arith.constant 0 : i32
    return %c0_i32, %c0_i32_0, %c0_i32_1 : i32, i32, i32
  }
  func.func @transform_6(%arg0: i32) -> (i32, i32, i32) {
    %c0_i32 = arith.constant 0 : i32
    %c0_i32_0 = arith.constant 0 : i32
    %c0_i32_1 = arith.constant 0 : i32
    %c0_i32_2 = arith.constant 0 : i32
    return %c0_i32, %c0_i32_0, %c0_i32_1 : i32, i32, i32
  }
  func.func @transform_7(%arg0: i32) -> (i32, i32, i32) {
    %c0_i32 = arith.constant 0 : i32
    %c0_i32_0 = arith.constant 0 : i32
    %c0_i32_1 = arith.constant 0 : i32
    %c0_i32_2 = arith.constant 0 : i32
    return %c0_i32, %c0_i32_0, %c0_i32_1 : i32, i32, i32
  }
  func.func @transform_8(%arg0: i32) -> (i32, i32) {
    %c0_i32 = arith.constant 0 : i32
    %c0_i32_0 = arith.constant 0 : i32
    %c0_i32_1 = arith.constant 0 : i32
    return %c0_i32, %c0_i32_0 : i32, i32
  }
  func.func @transform_9(%arg0: i32) -> (i32, i32) {
    %c0_i32 = arith.constant 0 : i32
    %c0_i32_0 = arith.constant 0 : i32
    %c0_i32_1 = arith.constant 0 : i32
    return %c0_i32, %c0_i32_0 : i32, i32
  }
  func.func @transform_10(%arg0: i32) -> (i32, i32) {
    %c0_i32 = arith.constant 0 : i32
    %c0_i32_0 = arith.constant 0 : i32
    %c0_i32_1 = arith.constant 0 : i32
    return %c0_i32, %c0_i32_0 : i32, i32
  }
  func.func @transform_11(%arg0: i32) -> (i32, i32) {
    %c0_i32 = arith.constant 0 : i32
    %c0_i32_0 = arith.constant 0 : i32
    %c0_i32_1 = arith.constant 0 : i32
    return %c0_i32, %c0_i32_0 : i32, i32
  }
  func.func @transform_12(%arg0: i32) -> (i32, i32, i32) {
    %c0_i32 = arith.constant 0 : i32
    %c0_i32_0 = arith.constant 0 : i32
    %c0_i32_1 = arith.constant 0 : i32
    %c0_i32_2 = arith.constant 0 : i32
    return %c0_i32, %c0_i32_0, %c0_i32_1 : i32, i32, i32
  }
  func.func @transform_13(%arg0: i32) -> (i32, i32, i32) {
    %c0_i32 = arith.constant 0 : i32
    %c0_i32_0 = arith.constant 0 : i32
    %c0_i32_1 = arith.constant 0 : i32
    %c0_i32_2 = arith.constant 0 : i32
    return %c0_i32, %c0_i32_0, %c0_i32_1 : i32, i32, i32
  }
  func.func @transform_14(%arg0: i32) -> (i32, i32, i32) {
    %c0_i32 = arith.constant 0 : i32
    %c0_i32_0 = arith.constant 0 : i32
    %c0_i32_1 = arith.constant 0 : i32
    %c0_i32_2 = arith.constant 0 : i32
    return %c0_i32, %c0_i32_0, %c0_i32_1 : i32, i32, i32
  }
  func.func @transform_15(%arg0: i32) -> (i32, i32, i32) {
    %c0_i32 = arith.constant 0 : i32
    %c0_i32_0 = arith.constant 0 : i32
    %c0_i32_1 = arith.constant 0 : i32
    %c0_i32_2 = arith.constant 0 : i32
    return %c0_i32, %c0_i32_0, %c0_i32_1 : i32, i32, i32
  }
  func.func @transform_16(%arg0: i32) -> (i32, i32) {
    %c0_i32 = arith.constant 0 : i32
    %c0_i32_0 = arith.constant 0 : i32
    %c0_i32_1 = arith.constant 0 : i32
    return %c0_i32, %c0_i32_0 : i32, i32
  }
  func.func @transform_17(%arg0: i32) -> (i32, i32) {
    %c0_i32 = arith.constant 0 : i32
    %c0_i32_0 = arith.constant 0 : i32
    %c0_i32_1 = arith.constant 0 : i32
    return %c0_i32, %c0_i32_0 : i32, i32
  }
  func.func @transform_18(%arg0: i32) -> (i32, i32, i32) {
    %c0_i32 = arith.constant 0 : i32
    %c0_i32_0 = arith.constant 0 : i32
    %c0_i32_1 = arith.constant 0 : i32
    %c0_i32_2 = arith.constant 0 : i32
    return %c0_i32, %c0_i32_0, %c0_i32_1 : i32, i32, i32
  }
}

</mosaic_0001>

<bundles_post_ra>
// kernel: _seq2seq_impl.1
= control target key start
LH: loop header
LB: loop body
LE: loop exit
PB: predicated region body
PF: predicated region fallthrough
CT: control target
= control target key end

     0   :  { %s15965_s0 = inlined_call_operand.vmem [shape: s32[2,8], index: 0, kind: input, shape index: {}]   ;;  %s15966_s1 = inlined_call_operand.vmem [shape: s32[2,1], index: 1, kind: input, shape index: {}]   ;;  %s15967_s2 = inlined_call_operand.vmem [shape: s32[2,1], index: 2, kind: input, shape index: {}]   ;;  %s15968_s3 = inlined_call_operand.vmem [shape: f32[16,8], index: 3, kind: input, shape index: {}]   ;;  %s15969_s4 = inlined_call_operand.vmem [shape: f32[3,8,32], index: 4, kind: input, shape index: {}]   ;;  %s15970_s5 = inlined_call_operand.vmem [shape: f32[3,32,32], index: 5, kind: input, shape index: {}]   ;;  %s15971_s6 = inlined_call_operand.vmem [shape: f32[3,1,32], index: 6, kind: input, shape index: {}]   ;;  %s15972_s7 = inlined_call_operand.vmem [shape: f32[3,1,32], index: 7, kind: input, shape index: {}]   ;;  %s15973_s8 = inlined_call_operand.vmem [shape: f32[16,8], index: 8, kind: input, shape index: {}]   ;;  %s15974_s9 = inlined_call_operand.vmem [shape: f32[32,32], index: 9, kind: input, shape index: {}]   ;;  %s15975_s10 = inlined_call_operand.vmem [shape: f32[32,32], index: 10, kind: input, shape index: {}]   ;;  %s15976_s11 = inlined_call_operand.vmem [shape: f32[32,1], index: 11, kind: input, shape index: {}]   ;;  %s15977_s12 = inlined_call_operand.vmem [shape: f32[3,40,32], index: 12, kind: input, shape index: {}]   ;;  %s15978_s13 = inlined_call_operand.vmem [shape: f32[3,32,32], index: 13, kind: input, shape index: {}]   ;;  %s15979_s14 = inlined_call_operand.hbm [shape: f32[3,1,32], index: 14, kind: input, shape index: {}]   ;;  %s15980_s15 = inlined_call_operand.hbm [shape: f32[3,1,32], index: 15, kind: input, shape index: {}]   ;;  %s15981_s16 = inlined_call_operand.vmem [shape: f32[72,16], index: 16, kind: input, shape index: {}]   ;;  %s15982_s17 = inlined_call_operand.vmem [shape: f32[1,16], index: 17, kind: input, shape index: {}]   ;;  %s15983_s18 = inlined_call_operand.hbm [shape: f32[2,8,16], index: 18, kind: output, shape index: {}]  }
   0x1   :  { %15993 = sst [smem:[#allocation14_spill]] %s15965_s0 }
   0x2   :  { %15994 = sst [smem:[#allocation15_spill]] %s15966_s1 }
   0x3   :  { %15995 = sst [smem:[#allocation16_spill]] %s15967_s2 }
   0x4   :  { %23 = vsyncpa [#allocation3], 0 }
   0x5   :  { %24 = vsyncpa [#allocation6], 0 }
   0x6   :  { %25 = vsyncpa [#allocation4], 0  ;;  %s13943_s27 = smov [#allocation2]   ;;  %s13871_s0 = scalar_lea.hbm %s15979_s14, 48 }
   0x7   :  { %s59_s28 = sshll.u32 %s13943_s27, 4  ;;  %p13872_p0 = scmp.ne.s32.totalorder %s15979_s14, %s13871_s0  ;;  %s60_s28 = int_to_ptr.vmem [resolvable:$true] %s59_s28 }
   0x8   :  { %p13875_p1 = scmp.lt.u32.totalorder %s13871_s0, %s15979_s14 }
   0xa   :  { %p13877_p2 = pnand %p13875_p1, %p13872_p0 }
   0xc   :  { %13880 = shalt.err (!%p13877_p2)
}
   0xd   :  { %s13881_s22 = scalar_lea.vmem %s60_s28, 48  ;;  %s13885_s2 = scalar_lea.vmem %s60_s28, 64 }
   0xe   :  { %p13882_p3 = scmp.ne.s32.totalorder %s60_s28, %s13881_s22  ;;  %p13886_p4 = scmp.lt.s32.totalorder %s60_s28, %s60_s28 }
   0xf   :  { %p13887_p5 = scmp.lt.s32.totalorder %s13885_s2, %s13881_s22 }
  0x11   :  { %p13888_p6 = por %p13887_p5, %p13886_p4 }
  0x13   :  { %p13889_p7 = pnand %p13888_p6, %p13882_p3 }
  0x15   :  { %13892 = shalt.err (!%p13889_p7)
}
  0x16   :  { %s13944_s23 = smov 16   ;;  %s13945_s24 = smov 1  }
  0x17   :  { %65 = dma.hbm_to_vmem [thread:$0]  %s15979_s14, 48, %s60_s28, [#allocation3], %s13944_s23, %s13944_s23, %s13945_s24  }
  0x18   :  { %s13946_s27 = smov [#allocation5]   ;;  %s13893_s19 = scalar_lea.hbm %s15980_s15, 48 }
  0x19   :  { %s71_s29 = sshll.u32 %s13946_s27, 4  ;;  %p13894_p8 = scmp.ne.s32.totalorder %s15980_s15, %s13893_s19  ;;  %s72_s29 = int_to_ptr.vmem [resolvable:$true] %s71_s29 }
  0x1a   :  { %p13897_p9 = scmp.lt.u32.totalorder %s13893_s19, %s15980_s15 }
  0x1c   :  { %p13899_p10 = pnand %p13897_p9, %p13894_p8 }
  0x1e   :  { %13902 = shalt.err (!%p13899_p10)
}
  0x1f   :  { %s13903_s2 = scalar_lea.vmem %s72_s29, 48  ;;  %s13907_s14 = scalar_lea.vmem %s72_s29, 64 }
  0x20   :  { %p13904_p11 = scmp.ne.s32.totalorder %s72_s29, %s13903_s2  ;;  %p13908_p12 = scmp.lt.s32.totalorder %s72_s29, %s72_s29 }
  0x21   :  { %p13909_p13 = scmp.lt.s32.totalorder %s13907_s14, %s13903_s2 }
  0x23   :  { %p13910_p0 = por %p13909_p13, %p13908_p12 }
  0x25   :  { %p13911_p1 = pnand %p13910_p0, %p13904_p11 }
  0x27   :  { %13914 = shalt.err (!%p13911_p1)
}
  0x28   :  { %77 = dma.hbm_to_vmem [thread:$0]  %s15980_s15, 48, %s72_s29, [#allocation6], %s13944_s23, %s13944_s23, %s13945_s24  }
  0x29   :  { %13937 = dma.done.wait [#allocation3], 48  }
  0x2a   :  { %13938 = vsyncadd [#allocation3], 4294967248 }
  0x2b   :  { %13939 = dma.done.wait [#allocation6], 48  }
  0x2c   :  { %13940 = vsyncadd [#allocation6], 4294967248  ;;  %v171_v0 = vlaneseq  ;;  %v15986_v1 = vmov 0.0   ;;  %s15996_s30 = sld [smem:[#allocation14_spill]]  ;;  %v88_v5 = vld [vmem:[%s15968_s3] sm:$0xff]  ;;  %v89_v6 = vld [vmem:[%s15968_s3 + $0x8] sm:$0xff] }
  0x2d   :  { %11622 = vmatprep.subr.mxu1 %v15986_v1  ;;  %v12871_v9 = vpack.c.bf16 %v89_v6, %v88_v5  ;;  %vm194_vm0 = vcmask 130048   ;;  %v14105_v18 = vld [vmem:[%s15969_s4] sm:$0xff]  ;;  %v14110_v19 = vld [vmem:[%s15969_s4 + $0x10] sm:$0xff]  ;;  %vm13948_vm3 = vmmov 0   ;;  %s15997_s22 = sld [smem:[#allocation15_spill]]  ;;  %v13949_v21 = vmov 0  }
  0x2e   :  { %v14077_v2 = vshrl.u32 %v171_v0, 7  ;;  %v172_v12 = vand.u32 127, %v171_v0  ;;  %11623 = vmatpush3.msra.mxu1 %v14105_v18  ;;  %11624 = vmatprep.mubr.msk.f32.mxu1 %vm13948_vm3, %v15986_v1  ;;  %s15998_s28 = sld [smem:[#allocation16_spill]]  ;;  %v93_v40 = vld [vmem:[%s15970_s5] sm:$0xff]  ;;  %v94_v41 = vld [vmem:[%s15970_s5 + $0x8] sm:$0xff]  ;;  %vm288_vm12 = vcmask 1041409  }
  0x2f   :  { %12872 = vmatprep.subr.bf16.mxu0 %v12871_v9  ;;  %11627 = vmatprep.subr.mxu1 %v15986_v1  ;;  %vm290_vm13 = vcmask 64512   ;;  %v14140_v43 = vpack.c.bf16 %v94_v41, %v93_v40  ;;  %v14145_v49 = vld [vmem:[%s15969_s4 + $0x8] sm:$0xff]  ;;  %v15988_v5 = vmov 0.0|0.0   ;;  %v95_v6 = vld [vmem:[%s15970_s5 + $0x10] sm:$0xff]  ;;  %vm521_vm14 = vcmask 261120   ;;  %s13953_s26 = smov 40  }
  0x30   :  { %v14080_v3 = vsub.s32 0, %v14077_v2  ;;  %v183_v8 = vsub.s32 1, %v14077_v2  ;;  %12874 = vmatpush3.bf16.msra.mxu0 %v12871_v9  ;;  %v14094_v13 = vcvt.s32.f32 %v172_v12  ;;  %13616 = vset.pattern.permute.xlu1 %v13949_v21  ;;  %v98_v12 = vld [vmem:[%s15970_s5 + $0x28] sm:$0xff]  ;;  %vm4299_vm15 = vcmask 1040384   ;;  %s13954_s24 = smov 8  }
  0x31   :  { %11632 = vmatprep.subr.mxu0 %v15986_v1  ;;  %13617 = vset.pattern.permute.xlu0 %v13949_v21  ;;  %v102_v21 = vld [vmem:[%s15970_s5 + $0x48] sm:$0xff] }
  0x32   :  { %v168_v4 = vld [vmem:[%s15996_s30] sm:$0x3] }
  0x33   :  { %v169_v7 = vcvt.s32.f32 %v168_v4  ;;  %v170_v20 = vld [vmem:[%s15997_s22] sm:$0x3] }
  0x34   :  { %vm276_vm4 = vcmp.gt.s32.totalorder %v170_v20, 0  ;;  %vm782_vm5 = vcmp.gt.s32.totalorder %v170_v20, 1  ;;  %vm1247_vm6 = vcmp.gt.s32.totalorder %v170_v20, 2  ;;  %vm1713_vm7 = vcmp.gt.s32.totalorder %v170_v20, 3  ;;  %v4401_v38 = vld [vmem:[%s15998_s28] sm:$0x3] }
  0x35   :  { %v177_v10 = vrot.slane %v169_v7, %v14080_v3  ;;  %v184_v11 = vrot.slane %v169_v7, %v183_v8  ;;  %v10855_v22 = vsel %vm276_vm4, 1.0, %v15986_v1  ;;  %v10867_v23 = vsel %vm782_vm5, 1.0, %v15986_v1  ;;  %v96_v7 = vld [vmem:[%s15970_s5 + $0x18] sm:$0xff] }
  0x36   :  { %v10876_v24 = vsel %vm1247_vm6, 1.0, %v15986_v1  ;;  %770 = vperm.xlu1 %13616, %v10855_v22   ;;  %v774_v25 = vsub.f32 1.0, %v10855_v22  ;;  %v10885_v27 = vsel %vm1713_vm7, 1.0, %v15986_v1  ;;  %v1239_v28 = vsub.f32 1.0, %v10867_v23 }
  0x37   :  { %179 = vbcast.lane.b32.xlu0 %v177_v10, 256  ;;  %v1705_v26 = vsub.f32 1.0, %v10876_v24  ;;  %v2171_v29 = vsub.f32 1.0, %v10885_v27  ;;  %vm2179_vm8 = vcmp.gt.s32.totalorder %v170_v20, 4  ;;  %vm2645_vm9 = vcmp.gt.s32.totalorder %v170_v20, 5 }
  0x38   :  { %v10894_v30 = vsel %vm2179_vm8, 1.0, %v15986_v1  ;;  %v10903_v32 = vsel %vm2645_vm9, 1.0, %v15986_v1  ;;  %vm3111_vm10 = vcmp.gt.s32.totalorder %v170_v20, 6  ;;  %vm3577_vm11 = vcmp.gt.s32.totalorder %v170_v20, 7  ;;  %v101_v20 = vld [vmem:[%s15970_s5 + $0x40] sm:$0xff] }
  0x39   :  { %v2637_v31 = vsub.f32 1.0, %v10894_v30  ;;  %v3103_v33 = vsub.f32 1.0, %v10903_v32  ;;  %v10912_v34 = vsel %vm3111_vm10, 1.0, %v15986_v1  ;;  %v10921_v36 = vsel %vm3577_vm11, 1.0, %v15986_v1 }
  0x3a   :  { %777 = vperm.xlu1 %13616, %v774_v25   ;;  %v3569_v35 = vsub.f32 1.0, %v10912_v34  ;;  %v4035_v37 = vsub.f32 1.0, %v10921_v36  ;;  %v4402_v39 = vcvt.s32.f32 %v4401_v38  ;;  %v14190_v10 = vpack.c.bf16 %v96_v7, %v95_v6 }
  0x3b   :  { %186 = vbcast.lane.b32.xlu0 %v184_v11, 256  ;;  %v97_v11 = vld [vmem:[%s15970_s5 + $0x20] sm:$0xff]  ;;  %v14236_v22 = vpack.c.bf16 %v102_v21, %v101_v20  ;;  %vm4308_vm4 = vcmask 1043456   ;;  %vm4311_vm5 = vcmask 1044480   ;;  %vm15985_vm6 = vcmask 1045504  }
  0x3c   :  { %vm15984_vm8 = vcmask 1046528   ;;  %vm4678_vm9 = vcmask 7168   ;;  %vm4758_vm10 = vcmask 326656   ;;  %vm5248_vm11 = vcmask 588800  }
  0x3e   :  { %1242 = vperm.xlu1 %13616, %v1239_v28   ;;  %v10856_v28 = vld [vmem:[%s15971_s6] ss:$0 sm:$0xff] }
  0x3f   :  { %1235 = vperm.xlu0 %13617, %v10867_v23   ;;  %v103_v23 = vld [vmem:[%s15970_s5 + $0x50] sm:$0xff] }
  0x42   :  { %1701 = vperm.xlu1 %13616, %v10876_v24   ;;  %v104_v24 = vld [vmem:[%s15970_s5 + $0x58] sm:$0xff] }
  0x43   :  { %1708 = vperm.xlu0 %13617, %v1705_v26   ;;  %v14247_v25 = vpack.c.bf16 %v104_v24, %v103_v23 }
  0x46   :  { %2167 = vperm.xlu1 %13616, %v10885_v27  }
  0x47   :  { %2174 = vperm.xlu0 %13617, %v2171_v29   ;;  %v10862_v29 = vld [vmem:[%s15972_s7] ss:$0 sm:$0xff] }
  0x4a   :  { %2633 = vperm.xlu1 %13616, %v10894_v30   ;;  %v14273_v30 = vadd.f32 %v10862_v29, %v10856_v28 }
  0x4b   :  { %2640 = vperm.xlu0 %13617, %v2637_v31  }
  0x4e   :  { %3099 = vperm.xlu1 %13616, %v10903_v32  }
  0x4f   :  { %3106 = vperm.xlu0 %13617, %v3103_v33  }
  0x52   :  { %3565 = vperm.xlu1 %13616, %v10912_v34   ;;  %v10858_v34 = vld [vmem:[%s15971_s6 + $0x1] ss:$0 sm:$0xff] }
  0x53   :  { %3572 = vperm.xlu0 %13617, %v3569_v35   ;;  %v10863_v35 = vld [vmem:[%s15972_s7 + $0x1] ss:$0 sm:$0xff] }
  0x56   :  { %4031 = vperm.xlu1 %13616, %v10921_v36  }
  0x57   :  { %4038 = vperm.xlu0 %13617, %v4035_v37   ;;  %v14282_v37 = vadd.f32 %v10863_v35, %v10858_v34 }
  0x5a   :  { %4408 = vperm.xlu1 %13616, %v4402_v39  }
  0xa9   :  { %v180_v14 = vpop.permute.xlu0 %179 }
  0xaa   :  { %vm188_vm1 = vcmp.eq.f32.partialorder %v14094_v13, %v180_v14  ;;  %v14207_v14 = vpack.c.bf16 %v98_v12, %v97_v11 }
  0xab   :  { %v10851_v15 = vsel %vm188_vm1, 1.0, %v15986_v1  ;;  %vm4302_vm1 = vcmask 1041408  }
  0xac   :  { %11619 = vmatprep.mubr.msk.f32.mxu0 %vm194_vm0, %v10851_v15  ;;  %v99_v15 = vld [vmem:[%s15970_s5 + $0x30] sm:$0xff] }
  0xad   :  { %v187_v16 = vpop.permute.xlu0 %186 }
  0xae   :  { %vm189_vm2 = vcmp.eq.f32.partialorder %v14094_v13, %v187_v16  ;;  %v100_v16 = vld [vmem:[%s15970_s5 + $0x38] sm:$0xff] }
  0xaf   :  { %v10852_v17 = vsel %vm189_vm2, 1.0, %v15986_v1  ;;  %vm4305_vm2 = vcmask 1042432  }
  0xb0   :  { %11620 = vmatmul.mubr.msk.f32.vlgmr.msra.gmra.mrb[0].mxu0 %vm194_vm0, %v10852_v17  ;;  %v14222_v17 = vpack.c.bf16 %v100_v16, %v99_v15 }
  0xb1   :  { %11633 = vmatpush3.msra.mxu0 %v14110_v19  ;;  %11634 = vmatprep.mubr.msk.f32.mxu0 %vm13948_vm3, %v15986_v1 }
  0xb2   :  { %11670 = vmatprep.subr.mxu0 %v15986_v1 }
 0x183   :  { %v11621_v42 = vpop.f32.mrb[0].mxu0 }
 0x184   :  { %v267_v44 = vpop.f32.mrb[1].mxu0  ;;  %v287_v45 = vrot.slane %v11621_v42, 7  ;;  %v1251_v46 = vrot.slane %v11621_v42, 1  ;;  %v1717_v47 = vrot.slane %v11621_v42, 2  ;;  %v2183_v48 = vrot.slane %v11621_v42, 3 }
 0x185   :  { %v785_v50 = vrot.slane %v267_v44, 1  ;;  %v1250_v51 = vrot.slane %v267_v44, 2  ;;  %v1716_v52 = vrot.slane %v267_v44, 3  ;;  %v2182_v53 = vrot.slane %v267_v44, 4 }
 0x186   :  { %v289_v54 = vsel %vm288_vm12, %v287_v45, %v267_v44  ;;  %v2648_v55 = vrot.slane %v267_v44, 5  ;;  %v2649_v56 = vrot.slane %v11621_v42, 4  ;;  %v3114_v57 = vrot.slane %v267_v44, 6 }
 0x187   :  { %11625 = vmatmul.mubr.msk.f32.vlgmr.msra.gmra.mrb[0].mxu1 %vm290_vm13, %v289_v54  ;;  %11635 = vmatmul.mubr.msk.f32.vlgmr.msra.gmra.mrb[2].mxu0 %vm290_vm13, %v289_v54  ;;  %v14151_v58 = vsel %vm288_vm12, %v11621_v42, %v785_v50  ;;  %v14154_v59 = vsel %vm288_vm12, %v1251_v46, %v1250_v51  ;;  %v14157_v60 = vsel %vm288_vm12, %v1717_v47, %v1716_v52  ;;  %v3115_v61 = vrot.slane %v11621_v42, 5  ;;  %v14290_v50 = vld [vmem:[%s15972_s7 + $0x2] ss:$0 sm:$0xff] }
 0x188   :  { %11628 = vmatpush3.msra.mxu1 %v14145_v49  ;;  %11629 = vmatprep.mubr.msk.f32.mxu1 %vm13948_vm3, %v15986_v1  ;;  %v14163_v62 = vsel %vm288_vm12, %v2183_v48, %v2182_v53  ;;  %v14166_v63 = vsel %vm288_vm12, %v2649_v56, %v2648_v55  ;;  %v3580_v0 = vrot.slane %v267_v44, 7  ;;  %v3581_v4 = vrot.slane %v11621_v42, 6 }
 0x189   :  { %12875 = vmatprep.subr.bf16.mxu1 %v15988_v5  ;;  %11671 = vmatpush3.msra.mxu0 %v14105_v18  ;;  %v14177_v8 = vsel %vm288_vm12, %v3115_v61, %v3114_v57 }
 0x18a   :  { %11672 = vmatprep.mubr.msk.f32.mxu0 %vm13948_vm3, %v15986_v1  ;;  %11675 = vmatprep.subr.mxu0 %v15986_v1  ;;  %v14183_v9 = vsel %vm288_vm12, %v3581_v4, %v3580_v0  ;;  %v771_v0 = vpop.permute.xlu1 %770 }
 0x18b   :  { %11630 = vmatmul.mubr.msk.f32.vlgmr.msra.gmra.mrb[2].mxu1 %vm290_vm13, %v289_v54  ;;  %11673 = vmatmul.mubr.msk.f32.vlgmr.msra.gmra.mrb[4].mxu0 %vm290_vm13, %v14151_v58  ;;  %v14296_v54 = vld [vmem:[%s15971_s6 + $0x2] ss:$0 sm:$0xff] }
 0x18c   :  { %12877 = vmatpush3.bf16.msra.mxu1 %v14140_v43  ;;  %11676 = vmatpush3.msra.mxu0 %v14145_v49 }
 0x18d   :  { %12878 = vmatprep.subr.bf16.mxu1 %v15988_v5  ;;  %11677 = vmatprep.mubr.msk.f32.mxu0 %vm13948_vm3, %v15986_v1 }
 0x18e   :  { %11645 = vmatprep.mubr.msk.f32.mxu1 %vm13948_vm3, %v15986_v1  ;;  %12893 = vmatprep.subr.bf16.mxu0 %v15988_v5  ;;  %v778_v15 = vpop.permute.xlu1 %777 }
 0x18f   :  { %11678 = vmatmul.mubr.msk.f32.vlgmr.msra.gmra.mrb[6].mxu0 %vm290_vm13, %v14151_v58  ;;  %v780_v16 = vmul.f32 0.0, %v778_v15 }
 0x190   :  { %12880 = vmatpush3.bf16.msra.mxu1 %v14190_v10  ;;  %12895 = vmatpush3.bf16.msra.mxu0 %v14140_v43 }
 0x191   :  { %12881 = vmatprep.subr.bf16.mxu1 %v15988_v5  ;;  %12896 = vmatprep.subr.bf16.mxu0 %v15988_v5 }
 0x192   :  { %11693 = vmatprep.mubr.msk.f32.mxu0 %vm13948_vm3, %v15986_v1 }
 0x193   :  { %11646 = vmatmul.mubr.f32.vlgmr.msra.gmra.mrb[0].mxu1 %v15986_v1 }
 0x194   :  { %12883 = vmatpush3.bf16.msra.mxu1 %v14207_v14  ;;  %11656 = vmatprep.mubr.msk.f32.mxu1 %vm13948_vm3, %v15986_v1 }
 0x195   :  { %12884 = vmatprep.subr.bf16.mxu1 %v15988_v5  ;;  %12898 = vmatpush3.bf16.msra.mxu0 %v14190_v10 }
 0x196   :  { %12899 = vmatprep.subr.bf16.mxu0 %v15988_v5 }
 0x198   :  { %12886 = vmatpush3.bf16.msra.mxu1 %v14222_v17 }
 0x199   :  { %12887 = vmatprep.subr.bf16.mxu1 %v15988_v5 }
 0x19b   :  { %11657 = vmatmul.mubr.f32.vlgmr.msra.gmra.mrb[2].mxu1 %v15986_v1 }
 0x19c   :  { %12889 = vmatpush3.bf16.msra.mxu1 %v14236_v22  ;;  %11667 = vmatprep.mubr.msk.f32.mxu1 %vm13948_vm3, %v15986_v1 }
 0x19d   :  { %12890 = vmatprep.subr.bf16.mxu1 %v15988_v5 }
 0x1a0   :  { %12892 = vmatpush3.bf16.msra.mxu1 %v14247_v25 }
 0x1a1   :  { %11680 = vmatprep.subr.mxu1 %v15986_v1 }
 0x1a3   :  { %11668 = vmatmul.mubr.f32.vlgmr.msra.gmra.mrb[4].mxu1 %v15986_v1 }
 0x1a4   :  { %11681 = vmatpush3.msra.mxu1 %v14110_v19  ;;  %11682 = vmatprep.mubr.msk.f32.mxu1 %vm13948_vm3, %v15986_v1 }
 0x1a5   :  { %12905 = vmatprep.subr.bf16.mxu1 %v15988_v5 }
 0x1a7   :  { %11683 = vmatmul.mubr.msk.f32.vlgmr.msra.gmra.mrb[6].mxu1 %vm290_vm13, %v14151_v58 }
 0x1a8   :  { %12907 = vmatpush3.bf16.msra.mxu1 %v14236_v22  ;;  %11715 = vmatprep.mubr.msk.f32.mxu1 %vm13948_vm3, %v15986_v1 }
 0x1a9   :  { %12908 = vmatprep.subr.bf16.mxu1 %v15988_v5 }
 0x1ac   :  { %12910 = vmatpush3.bf16.msra.mxu1 %v14247_v25 }
 0x1ad   :  { %11718 = vmatprep.subr.mxu1 %v15986_v1 }
 0x25a   :  { %v511_v26 = vpop.f32.mrb[2].mxu0 }
 0x25b   :  { %v11636_v27 = vpop.f32.mrb[3].mxu0  ;;  %v512_v56 = vadd.f32 %v14296_v54, %v511_v26 }
 0x266   :  { %v591_v31 = vpop.f32.mrb[0].mxu1 }
 0x267   :  { %v13483_v32 = vadd.f32 %v14273_v30, %v591_v31  ;;  %v11647_v33 = vpop.f32.mrb[1].mxu1 }
 0x269   :  { %v10865_v36 = vmul.f32 -1.442695, %v13483_v32 }
 0x26b   :  { %13618 = vpow2.f32 %v10865_v36 }
 0x26e   :  { %v667_v38 = vpop.f32.mrb[2].mxu1 }
 0x26f   :  { %v13485_v39 = vadd.f32 %v14282_v37, %v667_v38  ;;  %v11658_v40 = vpop.f32.mrb[3].mxu1 }
 0x271   :  { %v10866_v41 = vmul.f32 -1.442695, %v13485_v39 }
 0x273   :  { %13620 = vpow2.f32 %v10866_v41 }
 0x275   :  { %v13619_v42 = vpop.eup %13618 }
 0x276   :  { %v751_v44 = vadd.f32 1.0, %v13619_v42  ;;  %v743_v45 = vpop.f32.mrb[4].mxu1 }
 0x277   :  { %v11669_v46 = vpop.f32.mrb[5].mxu1  ;;  %v744_v53 = vadd.f32 %v14290_v50, %v743_v45 }
 0x278   :  { %13622 = vrcp.f32 %v751_v44 }
 0x27a   :  { %v14285_v47 = vpop.f32.mrb[6].mxu1 }
 0x27b   :  { %v11684_v48 = vpop.f32.mrb[7].mxu1  ;;  %v996_v44 = vadd.f32 %v14296_v54, %v14285_v47 }
 0x27c   :  { %v13951_v48 = vmov 1966171168  }
 0x27d   :  { %v13621_v51 = vpop.eup %13620 }
 0x27e   :  { %v758_v52 = vadd.f32 1.0, %v13621_v51  ;;  %v4045_v51 = vunpack.c.l.s4 %v13951_v48 }
 0x280   :  { %13624 = vrcp.f32 %v758_v52 }
 0x282   :  { %v13623_v55 = vpop.eup %13622 }
 0x283   :  { %v761_v57 = vmul.f32 %v13623_v55, %v744_v53  ;;  %v4046_v53 = vunpack.c.0.s8 %v4045_v51 }
 0x285   :  { %v762_v58 = vadd.f32 %v761_v57, %v512_v56  ;;  %v14354_v57 = vsub.s32 %v4046_v53, %v14077_v2 }
 0x287   :  { %13626 = vtanh.f32 %v762_v58 }
 0x28a   :  { %v13625_v61 = vpop.eup %13624 }
 0x28b   :  { %v764_v4 = vsub.f32 1.0, %v13625_v61  ;;  %v766_v7 = vmul.f32 0.0, %v13625_v61 }
 0x291   :  { %v13627_v6 = vpop.eup %13626 }
 0x292   :  { %v765_v11 = vmul.f32 %v13627_v6, %v764_v4  ;;  %v1243_v4 = vpop.permute.xlu1 %1242  ;;  %v1236_v6 = vpop.permute.xlu0 %1235 }
 0x294   :  { %v767_v12 = vadd.f32 %v766_v7, %v765_v11 }
 0x296   :  { %v14299_v20 = vmul.f32 %v771_v0, %v767_v12 }
 0x298   :  { %v14302_v21 = vadd.f32 %v780_v16, %v14299_v20  ;;  %v4050_v47 = vrot.slane %v14299_v20, %v14354_v57 }
 0x29a   :  { %11694 = vmatmul.mubr.msk.f32.vlgmr.msra.gmra.mrb[4].mxu0 %vm521_vm14, %v14302_v21  ;;  %11716 = vmatmul.mubr.msk.f32.vlgmr.msra.gmra.mrb[8].mxu1 %vm521_vm14, %v14302_v21  ;;  %v1245_v11 = vmul.f32 %v1243_v4, %v14302_v21  ;;  %v4051_v16 = vcombine.high %v4050_v47, %v4050_v47  ;;  %v4058_v20 = vrot.slane %v4050_v47, %v14354_v57 }
 0x29b   :  { %12901 = vmatpush3.bf16.msra.mxu0 %v14207_v14  ;;  %11719 = vmatpush3.msra.mxu1 %v14105_v18 }
 0x29c   :  { %12902 = vmatprep.subr.bf16.mxu0 %v15988_v5  ;;  %11720 = vmatprep.mubr.msk.f32.mxu1 %vm13948_vm3, %v15986_v1 }
 0x29d   :  { %11704 = vmatprep.mubr.msk.f32.mxu0 %vm13948_vm3, %v15986_v1  ;;  %11723 = vmatprep.subr.mxu1 %v15986_v1 }
 0x29e   :  { %11721 = vmatmul.mubr.msk.f32.vlgmr.msra.gmra.mrb[10].mxu1 %vm290_vm13, %v14154_v59 }
 0x29f   :  { %12904 = vmatpush3.bf16.msra.mxu0 %v14222_v17  ;;  %11724 = vmatpush3.msra.mxu1 %v14145_v49 }
 0x2a0   :  { %11725 = vmatprep.mubr.msk.f32.mxu1 %vm13948_vm3, %v15986_v1  ;;  %11728 = vmatprep.subr.mxu0 %v15986_v1 }
 0x2a1   :  { %12911 = vmatprep.subr.bf16.mxu1 %v15988_v5 }
 0x2a2   :  { %11705 = vmatmul.mubr.msk.f32.vlgmr.msra.gmra.mrb[6].mxu0 %vm521_vm14, %v14302_v21  ;;  %11726 = vmatmul.mubr.msk.f32.vlgmr.msra.gmra.mrb[12].mxu1 %vm290_vm13, %v14154_v59 }
 0x2a3   :  { %11729 = vmatpush3.msra.mxu0 %v14110_v19  ;;  %11730 = vmatprep.mubr.msk.f32.mxu0 %vm13948_vm3, %v15986_v1 }
 0x2a4   :  { %12913 = vmatpush3.bf16.msra.mxu1 %v14140_v43  ;;  %12923 = vmatprep.subr.bf16.mxu0 %v15988_v5 }
 0x2a5   :  { %12914 = vmatprep.subr.bf16.mxu1 %v15988_v5  ;;  %11741 = vmatprep.mubr.msk.f32.mxu1 %vm13948_vm3, %v15986_v1 }
 0x2a6   :  { %11731 = vmatmul.mubr.msk.f32.vlgmr.msra.gmra.mrb[8].mxu0 %vm290_vm13, %v14154_v59 }
 0x2a7   :  { %12925 = vmatpush3.bf16.msra.mxu0 %v14236_v22  ;;  %11763 = vmatprep.mubr.msk.f32.mxu0 %vm13948_vm3, %v15986_v1 }
 0x2a8   :  { %12916 = vmatpush3.bf16.msra.mxu1 %v14190_v10  ;;  %12926 = vmatprep.subr.bf16.mxu0 %v15988_v5 }
 0x2a9   :  { %12917 = vmatprep.subr.bf16.mxu1 %v15988_v5 }
 0x2ab   :  { %12928 = vmatpush3.bf16.msra.mxu0 %v14247_v25 }
 0x2ac   :  { %11766 = vmatprep.subr.mxu0 %v15986_v1 }
 0x36d   :  { %v1068_v23 = vpop.f32.mrb[4].mxu0  ;;  %v1208_v24 = vpop.f32.mrb[8].mxu1 }
 0x36e   :  { %v13487_v26 = vadd.f32 %v14273_v30, %v1068_v23  ;;  %v11695_v59 = vpop.f32.mrb[5].mxu0  ;;  %v11717_v27 = vpop.f32.mrb[9].mxu1  ;;  %v1209_v41 = vadd.f32 %v14290_v50, %v1208_v24 }
 0x370   :  { %v10874_v28 = vmul.f32 -1.442695, %v13487_v26  ;;  %v4065_v26 = vrot.slane %v4051_v16, %v14354_v57 }
 0x372   :  { %13628 = vpow2.f32 %v10874_v28 }
 0x375   :  { %v1138_v29 = vpop.f32.mrb[6].mxu0 }
 0x376   :  { %v13489_v31 = vadd.f32 %v14282_v37, %v1138_v29  ;;  %v11706_v32 = vpop.f32.mrb[7].mxu0 }
 0x378   :  { %v10875_v33 = vmul.f32 -1.442695, %v13489_v31 }
 0x379   :  { %v14348_v34 = vpop.f32.mrb[8].mxu0 }
 0x37a   :  { %13630 = vpow2.f32 %v10875_v33  ;;  %v11732_v35 = vpop.f32.mrb[9].mxu0  ;;  %v1462_v53 = vadd.f32 %v14296_v54, %v14348_v34 }
 0x37c   :  { %v13629_v36 = vpop.eup %13628 }
 0x37d   :  { %v1216_v38 = vadd.f32 1.0, %v13629_v36 }
 0x37f   :  { %13632 = vrcp.f32 %v1216_v38 }
 0x384   :  { %v13631_v39 = vpop.eup %13630 }
 0x385   :  { %v1223_v40 = vadd.f32 1.0, %v13631_v39 }
 0x387   :  { %13634 = vrcp.f32 %v1223_v40 }
 0x389   :  { %v13633_v42 = vpop.eup %13632 }
 0x38a   :  { %v1226_v45 = vmul.f32 %v13633_v42, %v1209_v41 }
 0x38c   :  { %v1227_v46 = vadd.f32 %v1226_v45, %v996_v44 }
 0x38e   :  { %13636 = vtanh.f32 %v1227_v46 }
 0x391   :  { %v13635_v52 = vpop.eup %13634 }
 0x392   :  { %v1229_v55 = vsub.f32 1.0, %v13635_v52  ;;  %v1231_v61 = vmul.f32 %v13635_v52, %v14302_v21 }
 0x398   :  { %v13637_v56 = vpop.eup %13636 }
 0x399   :  { %v1230_v58 = vmul.f32 %v13637_v56, %v1229_v55 }
 0x39b   :  { %v1232_v0 = vadd.f32 %v1231_v61, %v1230_v58 }
 0x39d   :  { %v1238_v7 = vmul.f32 %v1236_v6, %v1232_v0 }
 0x39f   :  { %v14360_v12 = vadd.f32 %v1245_v11, %v1238_v7  ;;  %v4075_v15 = vrot.slane %v1238_v7, %v14354_v57  ;;  %v1702_v7 = vpop.permute.xlu1 %1701  ;;  %v1709_v11 = vpop.permute.xlu0 %1708 }
 0x3a1   :  { %v4076_v23 = vcombine.high %v4075_v15, %v4075_v15  ;;  %v4083_v2 = vrot.slane %v4075_v15, %v14354_v57  ;;  %11742 = vmatmul.mubr.msk.f32.vlgmr.msra.gmra.mrb[10].mxu1 %vm521_vm14, %v14360_v12  ;;  %11764 = vmatmul.mubr.msk.f32.vlgmr.msra.gmra.mrb[10].mxu0 %vm521_vm14, %v14360_v12  ;;  %v1711_v15 = vmul.f32 %v1709_v11, %v14360_v12 }
 0x3a2   :  { %12919 = vmatpush3.bf16.msra.mxu1 %v14207_v14  ;;  %11767 = vmatpush3.msra.mxu0 %v14105_v18 }
 0x3a3   :  { %v4090_v21 = vrot.slane %v4076_v23, %v14354_v57  ;;  %v4232_v24 = vrot.slane %v4083_v2, %v14080_v3  ;;  %12920 = vmatprep.subr.bf16.mxu1 %v15988_v5  ;;  %11768 = vmatprep.mubr.msk.f32.mxu0 %vm13948_vm3, %v15986_v1 }
 0x3a4   :  { %11752 = vmatprep.mubr.msk.f32.mxu1 %vm13948_vm3, %v15986_v1  ;;  %11771 = vmatprep.subr.mxu0 %v15986_v1 }
 0x3a5   :  { %v4236_v59 = vrot.slane %v4090_v21, %v14080_v3  ;;  %v14382_v27 = vsel %vm4299_vm15, %v4058_v20, %v4232_v24  ;;  %11769 = vmatmul.mubr.msk.f32.vlgmr.msra.gmra.mrb[12].mxu0 %vm290_vm13, %v14157_v60 }
 0x3a6   :  { %12922 = vmatpush3.bf16.msra.mxu1 %v14222_v17  ;;  %11772 = vmatpush3.msra.mxu0 %v14145_v49 }
 0x3a7   :  { %v14389_v28 = vsel %vm4299_vm15, %v4065_v26, %v4236_v59  ;;  %11773 = vmatprep.mubr.msk.f32.mxu0 %vm13948_vm3, %v15986_v1  ;;  %11776 = vmatprep.subr.mxu1 %v15986_v1 }
 0x3a8   :  { %12929 = vmatprep.subr.bf16.mxu0 %v15988_v5 }
 0x3a9   :  { %11753 = vmatmul.mubr.msk.f32.vlgmr.msra.gmra.mrb[12].mxu1 %vm521_vm14, %v14360_v12  ;;  %11774 = vmatmul.mubr.msk.f32.vlgmr.msra.gmra.mrb[14].mxu0 %vm290_vm13, %v14157_v60 }
 0x3aa   :  { %11777 = vmatpush3.msra.mxu1 %v14110_v19  ;;  %11778 = vmatprep.mubr.msk.f32.mxu1 %vm13948_vm3, %v15986_v1 }
 0x3ab   :  { %12931 = vmatpush3.bf16.msra.mxu0 %v14140_v43  ;;  %12941 = vmatprep.subr.bf16.mxu1 %v15988_v5 }
 0x3ac   :  { %12932 = vmatprep.subr.bf16.mxu0 %v15988_v5  ;;  %11789 = vmatprep.mubr.msk.f32.mxu0 %vm13948_vm3, %v15986_v1 }
 0x3ad   :  { %11779 = vmatmul.mubr.msk.f32.vlgmr.msra.gmra.mrb[14].mxu1 %vm290_vm13, %v14157_v60 }
 0x3ae   :  { %12943 = vmatpush3.bf16.msra.mxu1 %v14236_v22  ;;  %11811 = vmatprep.mubr.msk.f32.mxu1 %vm13948_vm3, %v15986_v1 }
 0x3af   :  { %12934 = vmatpush3.bf16.msra.mxu0 %v14190_v10  ;;  %12944 = vmatprep.subr.bf16.mxu1 %v15988_v5 }
 0x3b0   :  { %12935 = vmatprep.subr.bf16.mxu0 %v15988_v5 }
 0x3b2   :  { %12946 = vmatpush3.bf16.msra.mxu1 %v14247_v25 }
 0x3b3   :  { %11814 = vmatprep.subr.mxu1 %v15986_v1 }
 0x474   :  { %v1534_v29 = vpop.f32.mrb[10].mxu1  ;;  %v1674_v31 = vpop.f32.mrb[10].mxu0 }
 0x475   :  { %v13491_v32 = vadd.f32 %v14273_v30, %v1534_v29  ;;  %v11743_v60 = vpop.f32.mrb[11].mxu1  ;;  %v11765_v33 = vpop.f32.mrb[11].mxu0  ;;  %v1675_v51 = vadd.f32 %v14290_v50, %v1674_v31 }
 0x477   :  { %v10883_v35 = vmul.f32 -1.442695, %v13491_v32 }
 0x479   :  { %13638 = vpow2.f32 %v10883_v35 }
 0x47c   :  { %v1604_v36 = vpop.f32.mrb[12].mxu1 }
 0x47d   :  { %v13493_v38 = vadd.f32 %v14282_v37, %v1604_v36  ;;  %v11754_v39 = vpop.f32.mrb[13].mxu1 }
 0x47f   :  { %v10884_v40 = vmul.f32 -1.442695, %v13493_v38 }
 0x480   :  { %v14419_v41 = vpop.f32.mrb[14].mxu1 }
 0x481   :  { %13640 = vpow2.f32 %v10884_v40  ;;  %v11780_v42 = vpop.f32.mrb[15].mxu1 }
 0x483   :  { %v13639_v44 = vpop.eup %13638 }
 0x484   :  { %v1682_v45 = vadd.f32 1.0, %v13639_v44 }
 0x486   :  { %13642 = vrcp.f32 %v1682_v45 }
 0x48b   :  { %v13641_v46 = vpop.eup %13640 }
 0x48c   :  { %v1689_v48 = vadd.f32 1.0, %v13641_v46 }
 0x48e   :  { %13644 = vrcp.f32 %v1689_v48 }
 0x490   :  { %v13643_v52 = vpop.eup %13642 }
 0x491   :  { %v1692_v55 = vmul.f32 %v13643_v52, %v1675_v51  ;;  %v1928_v51 = vadd.f32 %v14296_v54, %v14419_v41 }
 0x493   :  { %v1693_v56 = vadd.f32 %v1692_v55, %v1462_v53 }
 0x495   :  { %13646 = vtanh.f32 %v1693_v56 }
 0x498   :  { %v13645_v58 = vpop.eup %13644 }
 0x499   :  { %v1695_v61 = vsub.f32 1.0, %v13645_v58  ;;  %v1697_v6 = vmul.f32 %v13645_v58, %v14360_v12 }
 0x49f   :  { %v13647_v0 = vpop.eup %13646 }
 0x4a0   :  { %v1696_v4 = vmul.f32 %v13647_v0, %v1695_v61 }
 0x4a2   :  { %v1698_v47 = vadd.f32 %v1697_v6, %v1696_v4  ;;  %v2168_v6 = vpop.permute.xlu1 %2167 }
 0x4a4   :  { %v1704_v16 = vmul.f32 %v1702_v7, %v1698_v47  ;;  %v2175_v47 = vpop.permute.xlu0 %2174 }
 0x4a6   :  { %v14426_v23 = vadd.f32 %v1711_v15, %v1704_v16  ;;  %v4098_v34 = vrot.slane %v1704_v16, %v14354_v57 }
 0x4a8   :  { %11790 = vmatmul.mubr.msk.f32.vlgmr.msra.gmra.mrb[12].mxu0 %vm521_vm14, %v14426_v23  ;;  %v4099_v2 = vcombine.high %v4098_v34, %v4098_v34  ;;  %v4106_v20 = vrot.slane %v4098_v34, %v14354_v57  ;;  %11812 = vmatmul.mubr.msk.f32.vlgmr.msra.gmra.mrb[16].mxu1 %vm521_vm14, %v14426_v23  ;;  %v2177_v11 = vmul.f32 %v2175_v47, %v14426_v23 }
 0x4a9   :  { %12937 = vmatpush3.bf16.msra.mxu0 %v14207_v14  ;;  %11815 = vmatpush3.msra.mxu1 %v14105_v18 }
 0x4aa   :  { %v4113_v12 = vrot.slane %v4099_v2, %v14354_v57  ;;  %v4242_v21 = vrot.slane %v4106_v20, %v14080_v3  ;;  %12938 = vmatprep.subr.bf16.mxu0 %v15988_v5  ;;  %11816 = vmatprep.mubr.msk.f32.mxu1 %vm13948_vm3, %v15986_v1 }
 0x4ab   :  { %11800 = vmatprep.mubr.msk.f32.mxu0 %vm13948_vm3, %v15986_v1  ;;  %11819 = vmatprep.subr.mxu1 %v15986_v1 }
 0x4ac   :  { %v4246_v24 = vrot.slane %v4113_v12, %v14080_v3  ;;  %v14447_v26 = vsel %vm4302_vm1, %v14382_v27, %v4242_v21  ;;  %11817 = vmatmul.mubr.msk.f32.vlgmr.msra.gmra.mrb[18].mxu1 %vm290_vm13, %v14163_v62 }
 0x4ad   :  { %12940 = vmatpush3.bf16.msra.mxu0 %v14222_v17  ;;  %11820 = vmatpush3.msra.mxu1 %v14145_v49 }
 0x4ae   :  { %v14455_v59 = vsel %vm4302_vm1, %v14389_v28, %v4246_v24  ;;  %11821 = vmatprep.mubr.msk.f32.mxu1 %vm13948_vm3, %v15986_v1  ;;  %11824 = vmatprep.subr.mxu0 %v15986_v1 }
 0x4af   :  { %12947 = vmatprep.subr.bf16.mxu1 %v15988_v5 }
 0x4b0   :  { %11801 = vmatmul.mubr.msk.f32.vlgmr.msra.gmra.mrb[14].mxu0 %vm521_vm14, %v14426_v23  ;;  %11822 = vmatmul.mubr.msk.f32.vlgmr.msra.gmra.mrb[20].mxu1 %vm290_vm13, %v14163_v62 }
 0x4b1   :  { %11825 = vmatpush3.msra.mxu0 %v14110_v19  ;;  %11826 = vmatprep.mubr.msk.f32.mxu0 %vm13948_vm3, %v15986_v1 }
 0x4b2   :  { %12949 = vmatpush3.bf16.msra.mxu1 %v14140_v43  ;;  %12959 = vmatprep.subr.bf16.mxu0 %v15988_v5 }
 0x4b3   :  { %12950 = vmatprep.subr.bf16.mxu1 %v15988_v5  ;;  %11837 = vmatprep.mubr.msk.f32.mxu1 %vm13948_vm3, %v15986_v1 }
 0x4b4   :  { %11827 = vmatmul.mubr.msk.f32.vlgmr.msra.gmra.mrb[16].mxu0 %vm290_vm13, %v14163_v62 }
 0x4b5   :  { %12961 = vmatpush3.bf16.msra.mxu0 %v14236_v22  ;;  %11859 = vmatprep.mubr.msk.f32.mxu0 %vm13948_vm3, %v15986_v1 }
 0x4b6   :  { %12952 = vmatpush3.bf16.msra.mxu1 %v14190_v10  ;;  %12962 = vmatprep.subr.bf16.mxu0 %v15988_v5 }
 0x4b7   :  { %12953 = vmatprep.subr.bf16.mxu1 %v15988_v5 }
 0x4b9   :  { %12964 = vmatpush3.bf16.msra.mxu0 %v14247_v25 }
 0x4ba   :  { %11862 = vmatprep.subr.mxu0 %v15986_v1 }
 0x57b   :  { %v2000_v27 = vpop.f32.mrb[12].mxu0  ;;  %v2140_v28 = vpop.f32.mrb[16].mxu1 }
 0x57c   :  { %v13495_v29 = vadd.f32 %v14273_v30, %v2000_v27  ;;  %v11791_v62 = vpop.f32.mrb[13].mxu0  ;;  %v11813_v31 = vpop.f32.mrb[17].mxu1  ;;  %v2141_v46 = vadd.f32 %v14290_v50, %v2140_v28 }
 0x57e   :  { %v10892_v32 = vmul.f32 -1.442695, %v13495_v29 }
 0x580   :  { %13648 = vpow2.f32 %v10892_v32 }
 0x583   :  { %v2070_v60 = vpop.f32.mrb[14].mxu0 }
 0x584   :  { %v13497_v33 = vadd.f32 %v14282_v37, %v2070_v60  ;;  %v11802_v35 = vpop.f32.mrb[15].mxu0 }
 0x586   :  { %v10893_v36 = vmul.f32 -1.442695, %v13497_v33 }
 0x587   :  { %v14485_v38 = vpop.f32.mrb[16].mxu0 }
 0x588   :  { %13650 = vpow2.f32 %v10893_v36  ;;  %v11828_v39 = vpop.f32.mrb[17].mxu0 }
 0x58a   :  { %v13649_v40 = vpop.eup %13648 }
 0x58b   :  { %v2148_v42 = vadd.f32 1.0, %v13649_v40 }
 0x58d   :  { %13652 = vrcp.f32 %v2148_v42 }
 0x592   :  { %v13651_v44 = vpop.eup %13650 }
 0x593   :  { %v2155_v45 = vadd.f32 1.0, %v13651_v44  ;;  %v2394_v44 = vadd.f32 %v14296_v54, %v14485_v38 }
 0x595   :  { %13654 = vrcp.f32 %v2155_v45 }
 0x597   :  { %v13653_v48 = vpop.eup %13652 }
 0x598   :  { %v2158_v52 = vmul.f32 %v13653_v48, %v2141_v46 }
 0x59a   :  { %v2159_v53 = vadd.f32 %v2158_v52, %v1928_v51 }
 0x59c   :  { %13656 = vtanh.f32 %v2159_v53 }
 0x59f   :  { %v13655_v55 = vpop.eup %13654 }
 0x5a0   :  { %v2161_v56 = vsub.f32 1.0, %v13655_v55  ;;  %v2163_v0 = vmul.f32 %v13655_v55, %v14426_v23 }
 0x5a6   :  { %v13657_v58 = vpop.eup %13656 }
 0x5a7   :  { %v2162_v61 = vmul.f32 %v13657_v58, %v2161_v56  ;;  %v2634_v58 = vpop.permute.xlu1 %2633 }
 0x5a9   :  { %v2164_v4 = vadd.f32 %v2163_v0, %v2162_v61  ;;  %v2641_v61 = vpop.permute.xlu0 %2640 }
 0x5ab   :  { %v2170_v7 = vmul.f32 %v2168_v6, %v2164_v4 }
 0x5ad   :  { %v14492_v15 = vadd.f32 %v2177_v11, %v2170_v7  ;;  %v4121_v41 = vrot.slane %v2170_v7, %v14354_v57 }
 0x5af   :  { %11838 = vmatmul.mubr.msk.f32.vlgmr.msra.gmra.mrb[18].mxu1 %vm521_vm14, %v14492_v15  ;;  %v4122_v16 = vcombine.high %v4121_v41, %v4121_v41  ;;  %v4129_v34 = vrot.slane %v4121_v41, %v14354_v57  ;;  %11860 = vmatmul.mubr.msk.f32.vlgmr.msra.gmra.mrb[18].mxu0 %vm521_vm14, %v14492_v15  ;;  %v2643_v4 = vmul.f32 %v2641_v61, %v14492_v15  ;;  %v13853_v61 = vld [vmem:[%s15969_s4] sm:$0xff] }
 0x5b0   :  { %12955 = vmatpush3.bf16.msra.mxu1 %v14207_v14  ;;  %11863 = vmatpush3.msra.mxu0 %v14105_v18 }
 0x5b1   :  { %v4136_v23 = vrot.slane %v4122_v16, %v14354_v57  ;;  %v4252_v2 = vrot.slane %v4129_v34, %v14080_v3  ;;  %12956 = vmatprep.subr.bf16.mxu1 %v15988_v5  ;;  %11864 = vmatprep.mubr.msk.f32.mxu0 %vm13948_vm3, %v15986_v1 }
 0x5b2   :  { %11848 = vmatprep.mubr.msk.f32.mxu1 %vm13948_vm3, %v15986_v1  ;;  %11867 = vmatprep.subr.mxu0 %v15986_v1 }
 0x5b3   :  { %v4256_v20 = vrot.slane %v4136_v23, %v14080_v3  ;;  %11865 = vmatmul.mubr.msk.f32.vlgmr.msra.gmra.mrb[20].mxu0 %vm290_vm13, %v14166_v63  ;;  %v14515_v12 = vsel %vm4305_vm2, %v14447_v26, %v4252_v2 }
 0x5b4   :  { %12958 = vmatpush3.bf16.msra.mxu1 %v14222_v17  ;;  %11868 = vmatpush3.msra.mxu0 %v14145_v49 }
 0x5b5   :  { %11869 = vmatprep.mubr.msk.f32.mxu0 %vm13948_vm3, %v15986_v1  ;;  %11872 = vmatprep.subr.mxu1 %v15986_v1  ;;  %v14524_v21 = vsel %vm4305_vm2, %v14455_v59, %v4256_v20 }
 0x5b6   :  { %12965 = vmatprep.subr.bf16.mxu0 %v15988_v5 }
 0x5b7   :  { %11849 = vmatmul.mubr.msk.f32.vlgmr.msra.gmra.mrb[20].mxu1 %vm521_vm14, %v14492_v15  ;;  %11870 = vmatmul.mubr.msk.f32.vlgmr.msra.gmra.mrb[22].mxu0 %vm290_vm13, %v14166_v63 }
 0x5b8   :  { %11873 = vmatpush3.msra.mxu1 %v14110_v19  ;;  %11874 = vmatprep.mubr.msk.f32.mxu1 %vm13948_vm3, %v15986_v1 }
 0x5b9   :  { %12967 = vmatpush3.bf16.msra.mxu0 %v14140_v43  ;;  %12977 = vmatprep.subr.bf16.mxu1 %v15988_v5 }
 0x5ba   :  { %12968 = vmatprep.subr.bf16.mxu0 %v15988_v5  ;;  %11885 = vmatprep.mubr.msk.f32.mxu0 %vm13948_vm3, %v15986_v1 }
 0x5bb   :  { %11875 = vmatmul.mubr.msk.f32.vlgmr.msra.gmra.mrb[22].mxu1 %vm290_vm13, %v14166_v63 }
 0x5bc   :  { %12979 = vmatpush3.bf16.msra.mxu1 %v14236_v22  ;;  %11907 = vmatprep.mubr.msk.f32.mxu1 %vm13948_vm3, %v15986_v1 }
 0x5bd   :  { %12970 = vmatpush3.bf16.msra.mxu0 %v14190_v10  ;;  %12980 = vmatprep.subr.bf16.mxu1 %v15988_v5 }
 0x5be   :  { %12971 = vmatprep.subr.bf16.mxu0 %v15988_v5 }
 0x5c0   :  { %12982 = vmatpush3.bf16.msra.mxu1 %v14247_v25 }
 0x5c1   :  { %11910 = vmatprep.subr.mxu1 %v15986_v1 }
 0x682   :  { %v2466_v19 = vpop.f32.mrb[18].mxu1  ;;  %v2606_v24 = vpop.f32.mrb[18].mxu0 }
 0x683   :  { %v13499_v26 = vadd.f32 %v14273_v30, %v2466_v19  ;;  %v11839_v63 = vpop.f32.mrb[19].mxu1  ;;  %v11861_v59 = vpop.f32.mrb[19].mxu0  ;;  %v2607_v40 = vadd.f32 %v14290_v50, %v2606_v24 }
 0x685   :  { %v10901_v27 = vmul.f32 -1.442695, %v13499_v26 }
 0x687   :  { %13658 = vpow2.f32 %v10901_v27 }
 0x68a   :  { %v2536_v28 = vpop.f32.mrb[20].mxu1 }
 0x68b   :  { %v13501_v29 = vadd.f32 %v14282_v37, %v2536_v28  ;;  %v11850_v62 = vpop.f32.mrb[21].mxu1 }
 0x68d   :  { %v10902_v31 = vmul.f32 -1.442695, %v13501_v29 }
 0x68e   :  { %v14551_v32 = vpop.f32.mrb[22].mxu1 }
 0x68f   :  { %13660 = vpow2.f32 %v10902_v31  ;;  %v11876_v60 = vpop.f32.mrb[23].mxu1 }
 0x691   :  { %v13659_v33 = vpop.eup %13658 }
 0x692   :  { %v2614_v35 = vadd.f32 1.0, %v13659_v33  ;;  %v2860_v33 = vadd.f32 %v14296_v54, %v14551_v32 }
 0x694   :  { %13662 = vrcp.f32 %v2614_v35 }
 0x699   :  { %v13661_v36 = vpop.eup %13660 }
 0x69a   :  { %v2621_v39 = vadd.f32 1.0, %v13661_v36 }
 0x69c   :  { %13664 = vrcp.f32 %v2621_v39 }
 0x69e   :  { %v13663_v42 = vpop.eup %13662 }
 0x69f   :  { %v2624_v45 = vmul.f32 %v13663_v42, %v2607_v40 }
 0x6a1   :  { %v2625_v46 = vadd.f32 %v2624_v45, %v2394_v44 }
 0x6a3   :  { %13666 = vtanh.f32 %v2625_v46 }
 0x6a6   :  { %v13665_v48 = vpop.eup %13664 }
 0x6a7   :  { %v2627_v51 = vsub.f32 1.0, %v13665_v48  ;;  %v2629_v55 = vmul.f32 %v13665_v48, %v14492_v15  ;;  %v3100_v48 = vpop.permute.xlu1 %3099 }
 0x6ad   :  { %v13667_v52 = vpop.eup %13666 }
 0x6ae   :  { %v2628_v53 = vmul.f32 %v13667_v52, %v2627_v51  ;;  %v3107_v51 = vpop.permute.xlu0 %3106 }
 0x6b0   :  { %v2630_v56 = vadd.f32 %v2629_v55, %v2628_v53 }
 0x6b2   :  { %v2636_v0 = vmul.f32 %v2634_v58, %v2630_v56 }
 0x6b4   :  { %v14558_v6 = vadd.f32 %v2643_v4, %v2636_v0  ;;  %v4144_v38 = vrot.slane %v2636_v0, %v14354_v57 }
 0x6b6   :  { %11886 = vmatmul.mubr.msk.f32.vlgmr.msra.gmra.mrb[20].mxu0 %vm521_vm14, %v14558_v6  ;;  %v4145_v47 = vcombine.high %v4144_v38, %v4144_v38  ;;  %v4152_v7 = vrot.slane %v4144_v38, %v14354_v57  ;;  %11908 = vmatmul.mubr.msk.f32.vlgmr.msra.gmra.mrb[24].mxu1 %vm521_vm14, %v14558_v6  ;;  %v3109_v53 = vmul.f32 %v3107_v51, %v14558_v6 }
 0x6b7   :  { %12973 = vmatpush3.bf16.msra.mxu0 %v14207_v14  ;;  %11911 = vmatpush3.msra.mxu1 %v14105_v18 }
 0x6b8   :  { %v4159_v11 = vrot.slane %v4145_v47, %v14354_v57  ;;  %v4262_v15 = vrot.slane %v4152_v7, %v14080_v3  ;;  %12974 = vmatprep.subr.bf16.mxu0 %v15988_v5  ;;  %11912 = vmatprep.mubr.msk.f32.mxu1 %vm13948_vm3, %v15986_v1  ;;  %v13854_v47 = vld [vmem:[%s15969_s4 + $0x8] sm:$0xff] }
 0x6b9   :  { %11896 = vmatprep.mubr.msk.f32.mxu0 %vm13948_vm3, %v15986_v1  ;;  %11915 = vmatprep.subr.mxu1 %v15986_v1 }
 0x6ba   :  { %v4266_v41 = vrot.slane %v4159_v11, %v14080_v3  ;;  %11913 = vmatmul.mubr.msk.f32.vlgmr.msra.gmra.mrb[26].mxu1 %vm290_vm13, %v14177_v8  ;;  %v14581_v18 = vsel %vm4308_vm4, %v14515_v12, %v4262_v15 }
 0x6bb   :  { %12976 = vmatpush3.bf16.msra.mxu0 %v14222_v17  ;;  %11916 = vmatpush3.msra.mxu1 %v14145_v49  ;;  %v14600_v49 = vld [vmem:[%s15969_s4 + $0x10] sm:$0xff] }
 0x6bc   :  { %11917 = vmatprep.mubr.msk.f32.mxu1 %vm13948_vm3, %v15986_v1  ;;  %11920 = vmatprep.subr.mxu0 %v15986_v1  ;;  %v14590_v16 = vsel %vm4308_vm4, %v14524_v21, %v4266_v41 }
 0x6bd   :  { %12983 = vmatprep.subr.bf16.mxu1 %v15988_v5 }
 0x6be   :  { %11897 = vmatmul.mubr.msk.f32.vlgmr.msra.gmra.mrb[22].mxu0 %vm521_vm14, %v14558_v6  ;;  %11918 = vmatmul.mubr.msk.f32.vlgmr.msra.gmra.mrb[28].mxu1 %vm290_vm13, %v14177_v8 }
 0x6bf   :  { %11921 = vmatpush3.msra.mxu0 %v14600_v49  ;;  %11922 = vmatprep.mubr.msk.f32.mxu0 %vm13948_vm3, %v15986_v1 }
 0x6c0   :  { %12985 = vmatpush3.bf16.msra.mxu1 %v14140_v43  ;;  %12995 = vmatprep.subr.bf16.mxu0 %v15988_v5 }
 0x6c1   :  { %12986 = vmatprep.subr.bf16.mxu1 %v15988_v5  ;;  %11933 = vmatprep.mubr.msk.f32.mxu1 %vm13948_vm3, %v15986_v1 }
 0x6c2   :  { %11923 = vmatmul.mubr.msk.f32.vlgmr.msra.gmra.mrb[24].mxu0 %vm290_vm13, %v14177_v8 }
 0x6c3   :  { %12997 = vmatpush3.bf16.msra.mxu0 %v14236_v22  ;;  %11955 = vmatprep.mubr.msk.f32.mxu0 %vm13948_vm3, %v15986_v1 }
 0x6c4   :  { %12988 = vmatpush3.bf16.msra.mxu1 %v14190_v10  ;;  %12998 = vmatprep.subr.bf16.mxu0 %v15988_v5 }
 0x6c5   :  { %12989 = vmatprep.subr.bf16.mxu1 %v15988_v5 }
 0x6c7   :  { %13000 = vmatpush3.bf16.msra.mxu0 %v14247_v25 }
 0x6c8   :  { %11958 = vmatprep.subr.mxu0 %v15986_v1 }
 0x789   :  { %v2932_v34 = vpop.f32.mrb[20].mxu0  ;;  %v3072_v23 = vpop.f32.mrb[24].mxu1 }
 0x78a   :  { %v13503_v2 = vadd.f32 %v14273_v30, %v2932_v34  ;;  %v11887_v8 = vpop.f32.mrb[21].mxu0  ;;  %v11909_v20 = vpop.f32.mrb[25].mxu1  ;;  %v3073_v31 = vadd.f32 %v14290_v50, %v3072_v23 }
 0x78c   :  { %v10910_v12 = vmul.f32 -1.442695, %v13503_v2 }
 0x78e   :  { %13668 = vpow2.f32 %v10910_v12 }
 0x791   :  { %v3002_v21 = vpop.f32.mrb[22].mxu0 }
 0x792   :  { %v13505_v19 = vadd.f32 %v14282_v37, %v3002_v21  ;;  %v11898_v24 = vpop.f32.mrb[23].mxu0 }
 0x794   :  { %v10911_v26 = vmul.f32 -1.442695, %v13505_v19 }
 0x795   :  { %v14622_v63 = vpop.f32.mrb[24].mxu0 }
 0x796   :  { %13670 = vpow2.f32 %v10911_v26  ;;  %v11924_v59 = vpop.f32.mrb[25].mxu0  ;;  %v3326_v19 = vadd.f32 %v14296_v54, %v14622_v63 }
 0x798   :  { %v13669_v27 = vpop.eup %13668 }
 0x799   :  { %v3080_v28 = vadd.f32 1.0, %v13669_v27 }
 0x79b   :  { %13672 = vrcp.f32 %v3080_v28 }
 0x7a0   :  { %v13671_v29 = vpop.eup %13670 }
 0x7a1   :  { %v3087_v62 = vadd.f32 1.0, %v13671_v29 }
 0x7a3   :  { %13674 = vrcp.f32 %v3087_v62 }
 0x7a5   :  { %v13673_v60 = vpop.eup %13672 }
 0x7a6   :  { %v3090_v35 = vmul.f32 %v13673_v60, %v3073_v31  ;;  %v3566_v31 = vpop.permute.xlu1 %3565 }
 0x7a8   :  { %v3091_v36 = vadd.f32 %v3090_v35, %v2860_v33  ;;  %v3573_v33 = vpop.permute.xlu0 %3572 }
 0x7aa   :  { %13676 = vtanh.f32 %v3091_v36  ;;  %v14701_v63 = vpop.permute.xlu1 %4031 }
 0x7ad   :  { %v13675_v39 = vpop.eup %13674 }
 0x7ae   :  { %v3093_v40 = vsub.f32 1.0, %v13675_v39  ;;  %v3095_v45 = vmul.f32 %v13675_v39, %v14558_v6  ;;  %v4409_v51 = vpop.permute.xlu1 %4408 }
 0x7af   :  { %vm4411_vm7 = vcmp.eq.f32.partialorder %v14094_v13, %v4409_v51  ;;  %v123_v51 = vld [vmem:[%s15976_s11 + $0x10] sm:$0xff] }
 0x7b4   :  { %v13677_v42 = vpop.eup %13676 }
 0x7b5   :  { %v3094_v44 = vmul.f32 %v13677_v42, %v3093_v40 }
 0x7b7   :  { %v3096_v46 = vadd.f32 %v3095_v45, %v3094_v44  ;;  %v111_v45 = vld [vmem:[%s15973_s8] sm:$0xff] }
 0x7b9   :  { %v3102_v52 = vmul.f32 %v3100_v48, %v3096_v46  ;;  %v112_v46 = vld [vmem:[%s15973_s8 + $0x8] sm:$0xff] }
 0x7bb   :  { %v14629_v55 = vadd.f32 %v3109_v53, %v3102_v52  ;;  %v4167_v32 = vrot.slane %v3102_v52, %v14354_v57  ;;  %v14726_v52 = vpack.c.bf16 %v112_v46, %v111_v45  ;;  %v4039_v45 = vpop.permute.xlu0 %4038 }
 0x7bd   :  { %11934 = vmatmul.mubr.msk.f32.vlgmr.msra.gmra.mrb[26].mxu1 %vm521_vm14, %v14629_v55  ;;  %v4168_v56 = vcombine.high %v4167_v32, %v4167_v32  ;;  %v4175_v58 = vrot.slane %v4167_v32, %v14354_v57  ;;  %11956 = vmatmul.mubr.msk.f32.vlgmr.msra.gmra.mrb[26].mxu0 %vm521_vm14, %v14629_v55  ;;  %v114_v32 = vld [vmem:[%s15974_s9 + $0x8] sm:$0xff] }
 0x7be   :  { %12991 = vmatpush3.bf16.msra.mxu1 %v14207_v14  ;;  %11959 = vmatpush3.msra.mxu0 %v13853_v61  ;;  %v116_v61 = vld [vmem:[%s15974_s9 + $0x18] sm:$0xff] }
 0x7bf   :  { %v4182_v0 = vrot.slane %v4168_v56, %v14354_v57  ;;  %v4272_v4 = vrot.slane %v4175_v58, %v14080_v3  ;;  %12992 = vmatprep.subr.bf16.mxu1 %v15988_v5  ;;  %11960 = vmatprep.mubr.msk.f32.mxu0 %vm13948_vm3, %v15986_v1  ;;  %v115_v58 = vld [vmem:[%s15974_s9 + $0x10] sm:$0xff] }
 0x7c0   :  { %11944 = vmatprep.mubr.msk.f32.mxu1 %vm13948_vm3, %v15986_v1  ;;  %11963 = vmatprep.subr.mxu0 %v15986_v1 }
 0x7c1   :  { %v4276_v6 = vrot.slane %v4182_v0, %v14080_v3  ;;  %11961 = vmatmul.mubr.msk.f32.vlgmr.msra.gmra.mrb[28].mxu0 %vm290_vm13, %v14183_v9  ;;  %v14654_v38 = vsel %vm4311_vm5, %v14581_v18, %v4272_v4  ;;  %v13023_v0 = vpack.c.bf16 %v116_v61, %v115_v58 }
 0x7c2   :  { %12994 = vmatpush3.bf16.msra.mxu1 %v14222_v17  ;;  %11964 = vmatpush3.msra.mxu0 %v13854_v47 }
 0x7c3   :  { %11965 = vmatprep.mubr.msk.f32.mxu0 %vm13948_vm3, %v15986_v1  ;;  %11968 = vmatprep.subr.mxu1 %v15986_v1  ;;  %v14665_v7 = vsel %vm4311_vm5, %v14590_v16, %v4276_v6 }
 0x7c4   :  { %13001 = vmatprep.subr.bf16.mxu0 %v15988_v5 }
 0x7c5   :  { %11945 = vmatmul.mubr.msk.f32.vlgmr.msra.gmra.mrb[28].mxu1 %vm521_vm14, %v14629_v55  ;;  %11966 = vmatmul.mubr.msk.f32.vlgmr.msra.gmra.mrb[30].mxu0 %vm290_vm13, %v14183_v9 }
 0x7c6   :  { %11969 = vmatpush3.msra.mxu1 %v14600_v49  ;;  %11970 = vmatprep.mubr.msk.f32.mxu1 %vm13948_vm3, %v15986_v1 }
 0x7c7   :  { %13003 = vmatpush3.bf16.msra.mxu0 %v14140_v43  ;;  %13013 = vmatprep.subr.bf16.mxu1 %v15988_v5 }
 0x7c8   :  { %13004 = vmatprep.subr.bf16.mxu0 %v15988_v5  ;;  %11981 = vmatprep.mubr.msk.f32.mxu0 %vm13948_vm3, %v15986_v1 }
 0x7c9   :  { %11971 = vmatmul.mubr.msk.f32.vlgmr.msra.gmra.mrb[30].mxu1 %vm290_vm13, %v14183_v9 }
 0x7ca   :  { %13015 = vmatpush3.bf16.msra.mxu1 %v14236_v22  ;;  %12003 = vmatprep.mubr.msk.f32.mxu1 %vm13948_vm3, %v15986_v1 }
 0x7cb   :  { %13006 = vmatpush3.bf16.msra.mxu0 %v14190_v10  ;;  %13016 = vmatprep.subr.bf16.mxu1 %v15988_v5 }
 0x7cc   :  { %13007 = vmatprep.subr.bf16.mxu0 %v15988_v5 }
 0x7ce   :  { %13018 = vmatpush3.bf16.msra.mxu1 %v14247_v25 }
 0x890   :  { %v3398_v43 = vpop.f32.mrb[26].mxu1  ;;  %v3538_v11 = vpop.f32.mrb[26].mxu0 }
 0x891   :  { %v13507_v15 = vadd.f32 %v14273_v30, %v3398_v43  ;;  %v11935_v41 = vpop.f32.mrb[27].mxu1  ;;  %v11957_v18 = vpop.f32.mrb[27].mxu0  ;;  %v3539_v12 = vadd.f32 %v14290_v50, %v3538_v11  ;;  %v3575_v50 = vmul.f32 %v3573_v33, %v14629_v55 }
 0x893   :  { %v10919_v9 = vmul.f32 -1.442695, %v13507_v15 }
 0x895   :  { %13678 = vpow2.f32 %v10919_v9 }
 0x898   :  { %v3468_v22 = vpop.f32.mrb[28].mxu1 }
 0x899   :  { %v13509_v16 = vadd.f32 %v14282_v37, %v3468_v22  ;;  %v11946_v49 = vpop.f32.mrb[29].mxu1 }
 0x89b   :  { %v10920_v34 = vmul.f32 -1.442695, %v13509_v16 }
 0x89c   :  { %v14691_v10 = vpop.f32.mrb[30].mxu1 }
 0x89d   :  { %13680 = vpow2.f32 %v10920_v34  ;;  %v11972_v23 = vpop.f32.mrb[31].mxu1 }
 0x89f   :  { %v13679_v2 = vpop.eup %13678 }
 0x8a0   :  { %v3546_v8 = vadd.f32 1.0, %v13679_v2 }
 0x8a2   :  { %13682 = vrcp.f32 %v3546_v8 }
 0x8a7   :  { %v13681_v25 = vpop.eup %13680 }
 0x8a8   :  { %v3553_v20 = vadd.f32 1.0, %v13681_v25 }
 0x8aa   :  { %13684 = vrcp.f32 %v3553_v20 }
 0x8ac   :  { %v13683_v21 = vpop.eup %13682 }
 0x8ad   :  { %v3556_v24 = vmul.f32 %v13683_v21, %v3539_v12 }
 0x8af   :  { %v3557_v26 = vadd.f32 %v3556_v24, %v3326_v19 }
 0x8b1   :  { %13686 = vtanh.f32 %v3557_v26 }
 0x8b4   :  { %v13685_v59 = vpop.eup %13684 }
 0x8b5   :  { %v3559_v27 = vsub.f32 1.0, %v13685_v59  ;;  %v3561_v62 = vmul.f32 %v13685_v59, %v14629_v55  ;;  %v113_v55 = vld [vmem:[%s15974_s9] sm:$0xff] }
 0x8b6   :  { %v13019_v56 = vpack.c.bf16 %v114_v32, %v113_v55 }
 0x8b8   :  { %13020 = vmatprep.subr.bf16.mxu1 %v13019_v56 }
 0x8bb   :  { %v13687_v28 = vpop.eup %13686 }
 0x8bc   :  { %v3560_v29 = vmul.f32 %v13687_v28, %v3559_v27 }
 0x8be   :  { %v3562_v60 = vadd.f32 %v3561_v62, %v3560_v29 }
 0x8c0   :  { %v3568_v35 = vmul.f32 %v3566_v31, %v3562_v60  ;;  %v118_v60 = vld [vmem:[%s15975_s10 + $0x8] sm:$0xff] }
 0x8c2   :  { %v14698_v36 = vadd.f32 %v3575_v50, %v3568_v35  ;;  %v4190_v54 = vrot.slane %v3568_v35, %v14354_v57 }
 0x8c4   :  { %11982 = vmatmul.mubr.msk.f32.vlgmr.msra.gmra.mrb[28].mxu0 %vm521_vm14, %v14698_v36  ;;  %v4191_v39 = vcombine.high %v4190_v54, %v4190_v54  ;;  %v4198_v40 = vrot.slane %v4190_v54, %v14354_v57  ;;  %12004 = vmatmul.mubr.msk.f32.vlgmr.msra.gmra.mrb[32].mxu1 %vm521_vm14, %v14698_v36  ;;  %v4041_v46 = vmul.f32 %v4039_v45, %v14698_v36 }
 0x8c5   :  { %13009 = vmatpush3.bf16.msra.mxu0 %v14207_v14  ;;  %11992 = vmatprep.mubr.msk.f32.mxu0 %vm13948_vm3, %v15986_v1 }
 0x8c6   :  { %v4205_v42 = vrot.slane %v4191_v39, %v14354_v57  ;;  %v4282_v44 = vrot.slane %v4198_v40, %v14080_v3  ;;  %13010 = vmatprep.subr.bf16.mxu0 %v15988_v5  ;;  %13022 = vmatpush3.bf16.msra.mxu1 %v13019_v56  ;;  %v119_v39 = vld [vmem:[%s15975_s10 + $0x10] sm:$0xff]  ;;  %v120_v40 = vld [vmem:[%s15975_s10 + $0x18] sm:$0xff] }
 0x8c7   :  { %13024 = vmatprep.subr.bf16.mxu1 %v13023_v0 }
 0x8c8   :  { %v4286_v14 = vrot.slane %v4205_v42, %v14080_v3  ;;  %v14723_v48 = vsel %vm15985_vm6, %v14654_v38, %v4282_v44  ;;  %v14799_v44 = vpack.c.bf16 %v120_v40, %v119_v39 }
 0x8c9   :  { %13012 = vmatpush3.bf16.msra.mxu0 %v14222_v17  ;;  %v10933_v17 = vsel %vm4411_vm7, 1.0, %v15986_v1  ;;  %vm5322_vm7 = vcmask 123904  }
 0x8ca   :  { %13027 = vmatprep.subr.bf16.mxu0 %v15988_v5  ;;  %v14731_v53 = vsel %vm15985_vm6, %v14665_v7, %v4286_v14  ;;  %13026 = vmatpush3.bf16.msra.mxu1 %v13023_v0 }
 0x8cb   :  { %13030 = vmatprep.subr.bf16.mxu1 %v15988_v5 }
 0x8cc   :  { %11993 = vmatmul.mubr.msk.f32.vlgmr.msra.gmra.mrb[30].mxu0 %vm521_vm14, %v14698_v36 }
 0x8cd   :  { %13029 = vmatpush3.bf16.msra.mxu0 %v14726_v52  ;;  %12021 = vmatprep.mubr.msk.f32.mxu0 %vm13948_vm3, %v15986_v1 }
 0x8d0   :  { %12022 = vmatmul.mubr.msk.f32.vlgmr.msra.gmra.mrb[32].mxu0 %vm194_vm0, %v10933_v17  ;;  %v124_v17 = vld [vmem:[%s15976_s11 + $0x18] sm:$0xff] }
 0x8d1   :  { %v14827_v55 = vpack.c.bf16 %v124_v17, %v123_v51 }
 0x997   :  { %v3864_v4 = vpop.f32.mrb[28].mxu0  ;;  %v4004_v6 = vpop.f32.mrb[32].mxu1 }
 0x998   :  { %v13511_v38 = vadd.f32 %v14273_v30, %v3864_v4  ;;  %v11983_v47 = vpop.f32.mrb[29].mxu0  ;;  %v12005_v7 = vpop.f32.mrb[33].mxu1  ;;  %v13855_v30 = vld [vmem:[%s15972_s7 + $0x2] ss:$0 sm:$0xff] }
 0x999   :  { %v4005_v2 = vadd.f32 %v13855_v30, %v4004_v6 }
 0x99a   :  { %v10928_v43 = vmul.f32 -1.442695, %v13511_v38 }
 0x99c   :  { %13688 = vpow2.f32 %v10928_v43 }
 0x99f   :  { %v3934_v11 = vpop.f32.mrb[30].mxu0 }
 0x9a0   :  { %v13513_v15 = vadd.f32 %v14282_v37, %v3934_v11  ;;  %v11994_v41 = vpop.f32.mrb[31].mxu0  ;;  %v13856_v37 = vld [vmem:[%s15971_s6 + $0x2] ss:$0 sm:$0xff] }
 0x9a1   :  { %v3792_v25 = vadd.f32 %v13856_v37, %v14691_v10  ;;  %v117_v10 = vld [vmem:[%s15975_s10] sm:$0xff] }
 0x9a2   :  { %v10929_v18 = vmul.f32 -1.442695, %v13513_v15 }
 0x9a3   :  { %v14756_v9 = vpop.f32.mrb[32].mxu0 }
 0x9a4   :  { %13690 = vpow2.f32 %v10929_v18  ;;  %v12023_v22 = vpop.f32.mrb[33].mxu0 }
 0x9a6   :  { %v13689_v16 = vpop.eup %13688 }
 0x9a7   :  { %v4012_v49 = vadd.f32 1.0, %v13689_v16 }
 0x9a9   :  { %13692 = vrcp.f32 %v4012_v49 }
 0x9ae   :  { %v13691_v34 = vpop.eup %13690 }
 0x9af   :  { %v4019_v23 = vadd.f32 1.0, %v13691_v34 }
 0x9b1   :  { %13694 = vrcp.f32 %v4019_v23 }
 0x9b3   :  { %v13693_v8 = vpop.eup %13692 }
 0x9b4   :  { %v4022_v20 = vmul.f32 %v13693_v8, %v4005_v2 }
 0x9b6   :  { %v4023_v12 = vadd.f32 %v4022_v20, %v3792_v25 }
 0x9b8   :  { %13696 = vtanh.f32 %v4023_v12 }
 0x9bb   :  { %v13695_v21 = vpop.eup %13694 }
 0x9bc   :  { %v4025_v19 = vsub.f32 1.0, %v13695_v21  ;;  %v4027_v59 = vmul.f32 %v13695_v21, %v14698_v36  ;;  %v122_v36 = vld [vmem:[%s15976_s11 + $0x8] sm:$0xff] }
 0x9c2   :  { %v13697_v24 = vpop.eup %13696 }
 0x9c3   :  { %v4026_v26 = vmul.f32 %v13697_v24, %v4025_v19 }
 0x9c5   :  { %v4028_v27 = vadd.f32 %v4027_v59, %v4026_v26 }
 0x9c7   :  { %v4034_v28 = vmul.f32 %v14701_v63, %v4028_v27  ;;  %v14782_v63 = vpack.c.bf16 %v118_v60, %v117_v10 }
 0x9c9   :  { %v4213_v29 = vrot.slane %v4034_v28, %v14354_v57  ;;  %v14806_v14 = vadd.f32 %v4041_v46, %v4034_v28 }
 0x9cb   :  { %v4214_v62 = vcombine.high %v4213_v29, %v4213_v29  ;;  %v4221_v31 = vrot.slane %v4213_v29, %v14354_v57 }
 0x9cd   :  { %v4292_v33 = vrot.slane %v4221_v31, %v14080_v3  ;;  %v4228_v35 = vrot.slane %v4214_v62, %v14354_v57 }
 0x9cf   :  { %v14779_v50 = vsel %vm15984_vm8, %v14723_v48, %v4292_v33  ;;  %v4296_v54 = vrot.slane %v4228_v35, %v14080_v3  ;;  %v121_v48 = vld [vmem:[%s15976_s11] sm:$0xff]  ;;  %s13952_s11 = smov 32  }
 0x9d0   :  { %12014 = vmatprep.mubr.msk.f32.mxu1 %vm521_vm14, %v14779_v50 }
 0x9d1   :  { %v14794_v42 = vsel %vm15984_vm8, %v14731_v53, %v4296_v54  ;;  %v14822_v53 = vpack.c.bf16 %v122_v36, %v121_v48 }
 0x9d2   :  { %12015 = vmatmul.mubr.msk.f32.vlgmr.msra.gmra.mrb[34].mxu1 %vm521_vm14, %v14794_v42 }
 0x9d3   :  { %13032 = vmatpush3.bf16.msra.mxu1 %v14782_v63  ;;  %12032 = vmatprep.mubr.msk.f32.mxu1 %vm13948_vm3, %v15986_v1 }
 0x9d4   :  { %13033 = vmatprep.subr.bf16.mxu1 %v15988_v5  ;;  %13037 = vmatprep.subr.bf16.mxu0 %v14822_v53 }
 0x9d5   :  { %13039 = vmatpush3.bf16.msra.mxu0 %v14822_v53 }
 0x9d6   :  { %13041 = vmatprep.subr.bf16.mxu0 %v14827_v55 }
 0x9d7   :  { %13035 = vmatpush3.bf16.msra.mxu1 %v14799_v44 }
 0x9d8   :  { %13044 = vmatprep.subr.bf16.mxu1 %v15988_v5 }
 0x9d9   :  { %13043 = vmatpush3.bf16.msra.mxu0 %v14827_v55 }
 0x9da   :  { %12033 = vmatmul.mubr.msk.f32.vlgmr.msra.gmra.mrb[36].mxu1 %vm521_vm14, %v14806_v14  ;;  %13050 = vmatprep.subr.bf16.mxu0 %v15988_v5 }
 0x9db   :  { %12056 = vmatprep.mubr.msk.f32.mxu1 %vm13948_vm3, %v15986_v1 }
 0xaa5   :  { %v14834_v32 = vpop.f32.mrb[34].mxu1 }
 0xaa6   :  { %v14836_v56 = vpop.f32.mrb[35].mxu1 }
 0xaad   :  { %v4556_v58 = vpop.f32.mrb[36].mxu1 }
 0xaae   :  { %v4567_v61 = vrot.slane %v4556_v58, %v14354_v57  ;;  %v12034_v0 = vpop.f32.mrb[37].mxu1 }
 0xab0   :  { %v4568_v4 = vcombine.high %v4567_v61, %v4567_v61  ;;  %v4575_v6 = vrot.slane %v4567_v61, %v14354_v57 }
 0xab2   :  { %v4582_v38 = vrot.slane %v4568_v4, %v14354_v57  ;;  %v4586_v47 = vrot.slane %v4575_v6, %v14080_v3  ;;  %v125_v6 = vld [vmem:[%s15977_s12] sm:$0xff] }
 0xab4   :  { %v4590_v7 = vrot.slane %v4582_v38, %v14080_v3  ;;  %v4593_v43 = vadd.f32 %v4586_v47, %v14836_v56  ;;  %v126_v38 = vld [vmem:[%s15977_s12 + $0x8] sm:$0xff] }
 0xab5   :  { %v130_v47 = vld [vmem:[%s15977_s12 + $0x28] sm:$0xff] }
 0xab6   :  { %v4594_v11 = vadd.f32 %v14834_v32, %v4590_v7  ;;  %13698 = vtanh.f32 %v4593_v43  ;;  %v14864_v7 = vpack.c.bf16 %v126_v38, %v125_v6  ;;  %v131_v43 = vld [vmem:[%s15977_s12 + $0x30] sm:$0xff]  ;;  %v149_v6 = vld [vmem:[%s15978_s13 + $0x48] sm:$0xff]  ;;  %v140_v38 = vld [vmem:[%s15978_s13] sm:$0xff] }
 0xab8   :  { %13700 = vtanh.f32 %v4594_v11  ;;  %v14869_v11 = vpack.c.bf16 %v131_v43, %v130_v47  ;;  %13046 = vmatpush3.bf16.msra.mxu1 %v14864_v7  ;;  %v141_v47 = vld [vmem:[%s15978_s13 + $0x8] sm:$0xff] }
 0xab9   :  { %13047 = vmatprep.subr.bf16.mxu1 %v15988_v5 }
 0xac0   :  { %v13699_v15 = vpop.eup %13698 }
 0xac1   :  { %12043 = vmatprep.mubr.msk.f32.mxu0 %vm521_vm14, %v13699_v15  ;;  %v127_v15 = vld [vmem:[%s15977_s12 + $0x10] sm:$0xff] }
 0xac2   :  { %v13701_v41 = vpop.eup %13700 }
 0xac3   :  { %12044 = vmatmul.mubr.msk.f32.vlgmr.msra.gmra.mrb[34].mxu0 %vm521_vm14, %v13701_v41  ;;  %v128_v41 = vld [vmem:[%s15977_s12 + $0x18] sm:$0xff] }
 0xac4   :  { %12069 = vmatprep.mubr.msk.f32.mxu0 %vm13948_vm3, %v15986_v1  ;;  %13052 = vmatpush3.bf16.msra.mxu0 %v14869_v11 }
 0xac5   :  { %13053 = vmatprep.subr.bf16.mxu0 %v15988_v5 }
 0xb96   :  { %v12045_v18 = vpop.f32.mrb[34].mxu0 }
 0xb97   :  { %v4686_v22 = vsel %vm4678_vm9, %v12045_v18, -inf  ;;  %v4669_v16 = vpop.f32.mrb[35].mxu0 }
 0xb98   :  { %v4687_v49 = vrot.slane %v4686_v22, 4  ;;  %v4679_v34 = vsel %vm4678_vm9, %v4669_v16, -inf }
 0xb99   :  { %v4680_v23 = vrot.slane %v4679_v34, 4 }
 0xb9a   :  { %v4688_v30 = vmax.f32 %v4686_v22, %v4687_v49  ;;  %v14884_v22 = vpack.c.bf16 %v128_v41, %v127_v15  ;;  %v14979_v15 = vld [vmem:[%s15977_s12 + $0x70] sm:$0xff] }
 0xb9b   :  { %v4681_v2 = vmax.f32 %v4679_v34, %v4680_v23  ;;  %v14898_v34 = vld [vmem:[%s15977_s12 + $0x20] sm:$0xff]  ;;  %v14903_v23 = vld [vmem:[%s15977_s12 + $0x48] sm:$0xff]  ;;  %v150_v41 = vld [vmem:[%s15978_s13 + $0x50] sm:$0xff] }
 0xb9c   :  { %v4689_v8 = vrot.slane %v4688_v30, 2  ;;  %13049 = vmatpush3.bf16.msra.mxu1 %v14884_v22 }
 0xb9d   :  { %v4682_v37 = vrot.slane %v4681_v2, 2  ;;  %12054 = vmatprep.subr.mxu1 %v15986_v1 }
 0xb9e   :  { %v4690_v25 = vmax.f32 %v4688_v30, %v4689_v8 }
 0xb9f   :  { %v4683_v20 = vmax.f32 %v4681_v2, %v4682_v37 }
 0xba0   :  { %v4691_v12 = vrot.slane %v4690_v25, 1  ;;  %12055 = vmatpush3.msra.mxu1 %v14898_v34 }
 0xba1   :  { %v4684_v21 = vrot.slane %v4683_v20, 1  ;;  %13056 = vmatprep.subr.bf16.mxu1 %v15988_v5 }
 0xba2   :  { %v4692_v19 = vmax.f32 %v4690_v25, %v4691_v12 }
 0xba3   :  { %v4685_v24 = vmax.f32 %v4683_v20, %v4684_v21 }
 0xba4   :  { %v4694_v26 = vsub.f32 %v12045_v18, %v4692_v19  ;;  %v132_v18 = vld [vmem:[%s15977_s12 + $0x38] sm:$0xff] }
 0xba5   :  { %v4693_v59 = vsub.f32 %v4669_v16, %v4685_v24  ;;  %v133_v16 = vld [vmem:[%s15977_s12 + $0x40] sm:$0xff] }
 0xba6   :  { %v4697_v27 = vmul.f32 1.442695, %v4694_v26  ;;  %v14889_v49 = vpack.c.bf16 %v133_v16, %v132_v18  ;;  %v151_v18 = vld [vmem:[%s15978_s13 + $0x58] sm:$0xff]  ;;  %v14987_v16 = vpack.c.bf16 %v141_v47, %v140_v38 }
 0xba7   :  { %v4695_v28 = vmul.f32 1.442695, %v4693_v59 }
 0xba8   :  { %13702 = vpow2.f32 %v4697_v27  ;;  %13055 = vmatpush3.bf16.msra.mxu0 %v14889_v49 }
 0xba9   :  { %13704 = vpow2.f32 %v4695_v28  ;;  %12067 = vmatprep.subr.mxu0 %v15986_v1 }
 0xbac   :  { %12068 = vmatpush3.msra.mxu0 %v14903_v23 }
 0xbad   :  { %13068 = vmatprep.subr.bf16.mxu0 %v15988_v5 }
 0xbb2   :  { %v13703_v29 = vpop.eup %13702 }
 0xbb3   :  { %v13705_v62 = vpop.eup %13704  ;;  %v4706_v31 = vsel %vm4678_vm9, %v13703_v29, 0.0 }
 0xbb4   :  { %v4707_v10 = vrot.slane %v4706_v31, 4  ;;  %v4699_v60 = vsel %vm4678_vm9, %v13705_v62, 0.0 }
 0xbb5   :  { %v4700_v33 = vrot.slane %v4699_v60, 4 }
 0xbb6   :  { %v4708_v35 = vadd.f32 %v4707_v10, %v4706_v31  ;;  %v136_v10 = vld [vmem:[%s15977_s12 + $0x58] sm:$0xff] }
 0xbb7   :  { %v4701_v54 = vadd.f32 %v4700_v33, %v4699_v60  ;;  %v144_v60 = vld [vmem:[%s15978_s13 + $0x20] sm:$0xff]  ;;  %v145_v33 = vld [vmem:[%s15978_s13 + $0x28] sm:$0xff] }
 0xbb8   :  { %v4709_v39 = vrot.slane %v4708_v35, 2 }
 0xbb9   :  { %v4702_v40 = vrot.slane %v4701_v54, 2 }
 0xbba   :  { %v4710_v45 = vadd.f32 %v4709_v39, %v4708_v35 }
 0xbbb   :  { %v4703_v46 = vadd.f32 %v4702_v40, %v4701_v54  ;;  %v14927_v40 = vpack.c.bf16 %v145_v33, %v144_v60 }
 0xbbc   :  { %v4711_v48 = vrot.slane %v4710_v45, 1 }
 0xbbd   :  { %v4704_v36 = vrot.slane %v4703_v46, 1 }
 0xbbe   :  { %v4712_v51 = vadd.f32 %v4711_v48, %v4710_v45  ;;  %v137_v45 = vld [vmem:[%s15977_s12 + $0x60] sm:$0xff] }
 0xbbf   :  { %v4705_v17 = vadd.f32 %v4704_v36, %v4703_v46  ;;  %v138_v36 = vld [vmem:[%s15977_s12 + $0x68] sm:$0xff] }
 0xbc0   :  { %13706 = vrcp.f32 %v4712_v51  ;;  %v146_v51 = vld [vmem:[%s15978_s13 + $0x30] sm:$0xff] }
 0xbc1   :  { %13708 = vrcp.f32 %v4705_v17  ;;  %v147_v17 = vld [vmem:[%s15978_s13 + $0x38] sm:$0xff] }
 0xbca   :  { %v13707_v58 = vpop.eup %13706 }
 0xbcb   :  { %v13709_v61 = vpop.eup %13708  ;;  %v4716_v0 = vmul.f32 %v13707_v58, %v13703_v29 }
 0xbcc   :  { %v4714_v4 = vmul.f32 %v13709_v61, %v13705_v62  ;;  %v135_v62 = vld [vmem:[%s15977_s12 + $0x50] sm:$0xff]  ;;  %v14948_v61 = vpack.c.bf16 %v138_v36, %v137_v45  ;;  %v10940_v45 = vld [vmem:[#allocation2 + $0x1] ss:$0 sm:$0xff] }
 0xbcd   :  { %4724 = vperm.xlu1 %13616, %v4716_v0   ;;  %v14925_v39 = vpack.c.bf16 %v136_v10, %v135_v62  ;;  %v14950_v0 = vpack.c.bf16 %v147_v17, %v146_v51 }
 0xbce   :  { %4719 = vperm.xlu0 %13617, %v4714_v4   ;;  %v148_v4 = vld [vmem:[%s15978_s13 + $0x40] sm:$0xff] }
 0xbcf   :  { %v14972_v43 = vpack.c.bf16 %v149_v6, %v148_v4 }
 0xbd2   :  { %4748 = vrot.lane.b32.xlu0 %v14756_v9, %s13952_s11 }
 0xc4c   :  { %v4725_v30 = vpop.permute.xlu1 %4724 }
 0xc4d   :  { %v4728_v2 = vmul.f32 %v4725_v30, %v14794_v42  ;;  %v4720_v8 = vpop.permute.xlu0 %4719  ;;  %v142_v30 = vld [vmem:[%s15978_s13 + $0x10] sm:$0xff] }
 0xc4e   :  { %v4727_v37 = vmul.f32 %v4720_v8, %v14779_v50  ;;  %v14999_v8 = vpack.c.bf16 %v151_v18, %v150_v41 }
 0xc4f   :  { %v4736_v25 = vsel %vm521_vm14, %v4728_v2, 0.0  ;;  %v143_v2 = vld [vmem:[%s15978_s13 + $0x18] sm:$0xff] }
 0xc50   :  { %v4737_v20 = vrot.slane %v4736_v25, 4  ;;  %v4729_v12 = vsel %vm521_vm14, %v4727_v37, 0.0  ;;  %v15005_v37 = vpack.c.bf16 %v143_v2, %v142_v30 }
 0xc51   :  { %v4730_v21 = vrot.slane %v4729_v12, 4  ;;  %v4749_v48 = vpop.permute.xlu0 %4748 }
 0xc52   :  { %v4738_v19 = vadd.f32 %v4737_v20, %v4736_v25  ;;  %v158_v25 = vld [vmem:[%s15981_s16] sm:$0xff]  ;;  %v159_v20 = vld [vmem:[%s15981_s16 + $0x8] sm:$0xff] }
 0xc53   :  { %v4731_v24 = vadd.f32 %v4730_v21, %v4729_v12  ;;  %v160_v12 = vld [vmem:[%s15981_s16 + $0x10] sm:$0xff]  ;;  %v15035_v21 = vpack.c.bf16 %v159_v20, %v158_v25  ;;  %v15072_v25 = vld [vmem:[#allocation5 + $0x2] ss:$0 sm:$0xff] }
 0xc54   :  { %v4739_v26 = vrot.slane %v4738_v19, 2 }
 0xc55   :  { %v4732_v59 = vrot.slane %v4731_v24, 2 }
 0xc56   :  { %v4740_v27 = vadd.f32 %v4739_v26, %v4738_v19  ;;  %v161_v19 = vld [vmem:[%s15981_s16 + $0x18] sm:$0xff]  ;;  %v162_v26 = vld [vmem:[%s15981_s16 + $0x20] sm:$0xff] }
 0xc57   :  { %v4733_v28 = vadd.f32 %v4732_v59, %v4731_v24  ;;  %v15041_v24 = vpack.c.bf16 %v161_v19, %v160_v12  ;;  %v163_v59 = vld [vmem:[%s15981_s16 + $0x28] sm:$0xff]  ;;  %v15074_v12 = vld [vmem:[#allocation2 + $0x2] ss:$0 sm:$0xff] }
 0xc58   :  { %v4741_v29 = vrot.slane %v4740_v27, 1 }
 0xc59   :  { %v4734_v31 = vrot.slane %v4733_v28, 1 }
 0xc5a   :  { %v4742_v35 = vadd.f32 %v4741_v29, %v4740_v27  ;;  %v15051_v27 = vpack.c.bf16 %v163_v59, %v162_v26  ;;  %v165_v29 = vld [vmem:[%s15981_s16 + $0x38] sm:$0xff] }
 0xc5b   :  { %v4735_v54 = vadd.f32 %v4734_v31, %v4733_v28  ;;  %v164_v28 = vld [vmem:[%s15981_s16 + $0x30] sm:$0xff] }
 0xc5c   :  { %v15061_v62 = vpack.c.bf16 %v165_v29, %v164_v28 }
 0xc5d   :  { %v4745_v46 = vsel %vm288_vm12, %v4742_v35, %v4735_v54  ;;  %v10938_v35 = vld [vmem:[#allocation2] ss:$0 sm:$0xff]  ;;  %v10944_v54 = vld [vmem:[#allocation5] ss:$0 sm:$0xff] }
 0xc5e   :  { %v4751_v58 = vsel %vm521_vm14, %v4745_v46, %v4749_v48  ;;  %5237 = vrot.lane.b32.xlu0 %v4745_v46, %s13953_s26  ;;  %v10946_v46 = vld [vmem:[#allocation5 + $0x1] ss:$0 sm:$0xff]  ;;  %v15066_v48 = vadd.f32 %v10944_v54, %v10938_v35 }
 0xc5f   :  { %12057 = vmatmul.mubr.msk.f32.vlgmr.msra.gmra.mrb[38].mxu1 %vm4758_vm10, %v4751_v58  ;;  %12070 = vmatmul.mubr.msk.f32.vlgmr.msra.gmra.mrb[36].mxu0 %vm4758_vm10, %v4751_v58  ;;  %v15068_v17 = vadd.f32 %v10946_v46, %v10940_v45 }
 0xc60   :  { %13058 = vmatpush3.bf16.msra.mxu1 %v14925_v39  ;;  %13070 = vmatpush3.bf16.msra.mxu0 %v14927_v40 }
 0xc61   :  { %13059 = vmatprep.subr.bf16.mxu1 %v15988_v5  ;;  %13071 = vmatprep.subr.bf16.mxu0 %v15988_v5 }
 0xc62   :  { %12104 = vmatprep.mubr.msk.f32.mxu0 %vm13948_vm3, %v15986_v1  ;;  %12082 = vmatprep.mubr.msk.f32.mxu1 %vm13948_vm3, %v15986_v1 }
 0xc64   :  { %13061 = vmatpush3.bf16.msra.mxu1 %v14948_v61  ;;  %13073 = vmatpush3.bf16.msra.mxu0 %v14950_v0 }
 0xc65   :  { %12080 = vmatprep.subr.mxu1 %v15986_v1  ;;  %13074 = vmatprep.subr.bf16.mxu0 %v15988_v5 }
 0xc67   :  { %12105 = vmatmul.mubr.msk.f32.vlgmr.msra.gmra.mrb[36].mxu0 %vm521_vm14, %v14806_v14 }
 0xc68   :  { %12081 = vmatpush3.msra.mxu1 %v14979_v15  ;;  %13076 = vmatpush3.bf16.msra.mxu0 %v14972_v43 }
 0xc69   :  { %12083 = vmatmul.mubr.msk.f32.vlgmr.msra.gmra.mrb[40].mxu1 %vm4758_vm10, %v4751_v58  ;;  %13062 = vmatprep.subr.bf16.mxu1 %v15988_v5 }
 0xc6a   :  { %13064 = vmatpush3.bf16.msra.mxu1 %v14987_v16  ;;  %13077 = vmatprep.subr.bf16.mxu0 %v15988_v5 }
 0xc6b   :  { %13065 = vmatprep.subr.bf16.mxu1 %v15988_v5  ;;  %12115 = vmatprep.mubr.msk.f32.mxu0 %vm13948_vm3, %v15986_v1 }
 0xc6c   :  { %13079 = vmatpush3.bf16.msra.mxu0 %v14999_v8  ;;  %12093 = vmatprep.mubr.msk.f32.mxu1 %vm13948_vm3, %v15986_v1 }
 0xc6d   :  { %13080 = vmatprep.subr.bf16.mxu0 %v15988_v5 }
 0xc6e   :  { %13067 = vmatpush3.bf16.msra.mxu1 %v15005_v37 }
 0xc6f   :  { %12116 = vmatmul.mubr.msk.f32.vlgmr.msra.gmra.mrb[38].mxu0 %vm521_vm14, %v14806_v14  ;;  %13092 = vmatprep.subr.bf16.mxu1 %v15988_v5 }
 0xc70   :  { %12136 = vmatprep.mubr.msk.f32.mxu0 %vm13948_vm3, %v15986_v1  ;;  %13082 = vmatpush3.bf16.msra.mxu0 %v15035_v21 }
 0xc71   :  { %12094 = vmatmul.mubr.msk.f32.vlgmr.msra.gmra.mrb[38].mxu1 %vm521_vm14, %v14806_v14  ;;  %13083 = vmatprep.subr.bf16.mxu0 %v15988_v5 }
 0xc72   :  { %13094 = vmatpush3.bf16.msra.mxu1 %v14726_v52  ;;  %12143 = vmatprep.mubr.msk.f32.mxu1 %vm13948_vm3, %v15986_v1 }
 0xc73   :  { %13095 = vmatprep.subr.bf16.mxu1 %v15988_v5 }
 0xc74   :  { %13085 = vmatpush3.bf16.msra.mxu0 %v15041_v24 }
 0xc75   :  { %13086 = vmatprep.subr.bf16.mxu0 %v15988_v5 }
 0xc78   :  { %13088 = vmatpush3.bf16.msra.mxu0 %v15051_v27 }
 0xc79   :  { %13089 = vmatprep.subr.bf16.mxu0 %v15988_v5 }
 0xc7c   :  { %13091 = vmatpush3.bf16.msra.mxu0 %v15061_v62 }
 0xc7d   :  { %12134 = vmatprep.subr.mxu0 %v15986_v1 }
 0xd3a   :  { %v5132_v31 = vpop.f32.mrb[36].mxu0 }
 0xd3b   :  { %v12106_v10 = vpop.f32.mrb[37].mxu0  ;;  %v13517_v47 = vadd.f32 %v15068_v17, %v5132_v31  ;;  %v15081_v31 = vld [vmem:[%s15981_s16 + $0x40] sm:$0xff] }
 0xd3c   :  { %v4980_v60 = vpop.f32.mrb[40].mxu1  ;;  %12135 = vmatpush3.msra.mxu0 %v15081_v31 }
 0xd3d   :  { %v12084_v33 = vpop.f32.mrb[41].mxu1  ;;  %v10951_v41 = vmul.f32 -1.442695, %v13517_v47  ;;  %v4981_v59 = vadd.f32 %v15074_v12, %v4980_v60  ;;  %13109 = vmatprep.subr.bf16.mxu0 %v15988_v5 }
 0xd42   :  { %v5208_v36 = vpop.f32.mrb[38].mxu0 }
 0xd43   :  { %v12117_v51 = vpop.f32.mrb[39].mxu0  ;;  %v5209_v19 = vadd.f32 %v15072_v25, %v5208_v36  ;;  %v5238_v36 = vpop.permute.xlu0 %5237 }
 0xd44   :  { %v5056_v58 = vpop.f32.mrb[38].mxu1 }
 0xd45   :  { %v13515_v4 = vadd.f32 %v15066_v48, %v5056_v58  ;;  %v12095_v6 = vpop.f32.mrb[39].mxu1 }
 0xd47   :  { %v10950_v38 = vmul.f32 -1.442695, %v13515_v4 }
 0xd49   :  { %13710 = vpow2.f32 %v10950_v38 }
 0xd4a   :  { %13712 = vpow2.f32 %v10951_v41 }
 0xd53   :  { %v13711_v18 = vpop.eup %13710 }
 0xd54   :  { %v5216_v30 = vadd.f32 1.0, %v13711_v18  ;;  %v13713_v2 = vpop.eup %13712 }
 0xd55   :  { %v5223_v20 = vadd.f32 1.0, %v13713_v2 }
 0xd56   :  { %13714 = vrcp.f32 %v5216_v30 }
 0xd57   :  { %13716 = vrcp.f32 %v5223_v20 }
 0xd60   :  { %v13715_v26 = vpop.eup %13714 }
 0xd61   :  { %v5226_v28 = vmul.f32 %v13715_v26, %v5209_v19  ;;  %v13717_v10 = vpop.eup %13716 }
 0xd62   :  { %v5229_v33 = vsub.f32 1.0, %v13717_v10  ;;  %v5231_v54 = vmul.f32 %v13717_v10, %v14806_v14 }
 0xd63   :  { %v5227_v29 = vadd.f32 %v5226_v28, %v4981_v59 }
 0xd65   :  { %13718 = vtanh.f32 %v5227_v29 }
 0xd6f   :  { %v13719_v35 = vpop.eup %13718 }
 0xd70   :  { %v5230_v45 = vmul.f32 %v13719_v35, %v5229_v33 }
 0xd72   :  { %v15086_v46 = vadd.f32 %v5231_v54, %v5230_v45 }
 0xd74   :  { %5234 = vrot.lane.b32.xlu1 %v15086_v46, %s13954_s24 }
 0xde6   :  { %v5235_v60 = vpop.permute.xlu1 %5234 }
 0xde7   :  { %v5240_v51 = vsel %vm290_vm13, %v14756_v9, %v5235_v60  ;;  %v15105_v9 = vld [vmem:[%s15982_s17] ss:$0 sm:$0xff] }
 0xde8   :  { %v5241_v58 = vsel %vm4758_vm10, %v5240_v51, %v5238_v36 }
 0xde9   :  { %12137 = vmatmul.mubr.msk.f32.vlgmr.msra.gmra.mrb[40].mxu0 %vm5248_vm11, %v5241_v58 }
 0xdea   :  { %13111 = vmatpush3.bf16.msra.mxu0 %v14864_v7  ;;  %12178 = vmatprep.mubr.msk.f32.mxu0 %vm13948_vm3, %v15986_v1 }
 0xdeb   :  { %13112 = vmatprep.subr.bf16.mxu0 %v15988_v5 }
 0xdee   :  { %13114 = vmatpush3.bf16.msra.mxu0 %v14884_v22 }
 0xdef   :  { %12176 = vmatprep.subr.mxu0 %v15986_v1 }
 0xdf2   :  { %12177 = vmatpush3.msra.mxu0 %v14898_v34 }
 0xdf3   :  { %13121 = vmatprep.subr.bf16.mxu0 %v15988_v5 }
 0xebc   :  { %v5318_v14 = vpop.f32.mrb[40].mxu0 }
 0xebd   :  { %v15108_v4 = vadd.f32 %v15105_v9, %v5318_v14  ;;  %v12138_v6 = vpop.f32.mrb[41].mxu0 }
 0xebf   :  { %v5323_v38 = vsel %vm5322_vm7, %v15108_v4, -inf }
 0xec0   :  { %5324 = vmax.xlane.f32.xlu1 %v5323_v38 }
 0xf4d   :  { %v5325_v47 = vpop.xlane.xlu1 %5324 }
 0xf4e   :  { %vm5326_vm8 = vcmp.ge.f32.partialorder %v15108_v4, %v5325_v47 }
 0xf4f   :  { %v5327_v41 = vsel %vm5326_vm8, %v14094_v13, 16.0 }
 0xf50   :  { %v5328_v18 = vsel %vm5322_vm7, %v5327_v41, inf }
 0xf51   :  { %5329 = vmin.xlane.f32.xlu0 %v5328_v18 }
 0xfde   :  { %v5330_v30 = vpop.xlane.xlu0 %5329 }
 0xfdf   :  { %vm5331_vm6 = vcmp.eq.f32.partialorder %v14094_v13, %v5330_v30 }
 0xfe0   :  { %v10954_v2 = vsel %vm5331_vm6, 1.0, %v15986_v1 }
 0xfe1   :  { %12144 = vmatmul.mubr.msk.f32.vlgmr.msra.gmra.mrb[42].mxu1 %vm194_vm0, %v10954_v2 }
 0xfe2   :  { %13097 = vmatpush3.bf16.msra.mxu1 %v14782_v63  ;;  %12154 = vmatprep.mubr.msk.f32.mxu1 %vm13948_vm3, %v15986_v1 }
 0xfe3   :  { %13098 = vmatprep.subr.bf16.mxu1 %v15988_v5 }
 0xfe6   :  { %13100 = vmatpush3.bf16.msra.mxu1 %v14799_v44 }
 0xfe7   :  { %13102 = vmatprep.subr.bf16.mxu1 %v14822_v53 }
 0xfe9   :  { %12155 = vmatmul.mubr.msk.f32.vlgmr.msra.gmra.mrb[44].mxu1 %vm521_vm14, %v15086_v46 }
 0xfea   :  { %13104 = vmatpush3.bf16.msra.mxu1 %v14822_v53 }
 0xfeb   :  { %13106 = vmatprep.subr.bf16.mxu1 %v14827_v55 }
 0xfee   :  { %13108 = vmatpush3.bf16.msra.mxu1 %v14827_v55 }
 0xfef   :  { %13115 = vmatprep.subr.bf16.mxu1 %v15988_v5 }
0x10b4   :  { %v15130_v20 = vpop.f32.mrb[42].mxu1 }
0x10b5   :  { %v12145_v19 = vpop.f32.mrb[43].mxu1 }
0x10bc   :  { %v5475_v26 = vpop.f32.mrb[44].mxu1 }
0x10bd   :  { %v5486_v59 = vrot.slane %v5475_v26, %v14354_v57  ;;  %v12156_v28 = vpop.f32.mrb[45].mxu1 }
0x10bf   :  { %v5487_v29 = vcombine.high %v5486_v59, %v5486_v59  ;;  %v5494_v10 = vrot.slane %v5486_v59, %v14354_v57 }
0x10c1   :  { %v5501_v33 = vrot.slane %v5487_v29, %v14354_v57  ;;  %v5505_v35 = vrot.slane %v5494_v10, %v14080_v3 }
0x10c3   :  { %v5509_v54 = vrot.slane %v5501_v33, %v14080_v3  ;;  %v5512_v45 = vadd.f32 %v5505_v35, %v14836_v56 }
0x10c5   :  { %v5513_v60 = vadd.f32 %v14834_v32, %v5509_v54  ;;  %13720 = vtanh.f32 %v5512_v45 }
0x10c7   :  { %13722 = vtanh.f32 %v5513_v60 }
0x10cf   :  { %v13721_v36 = vpop.eup %13720 }
0x10d0   :  { %12165 = vmatprep.mubr.msk.f32.mxu1 %vm521_vm14, %v13721_v36 }
0x10d1   :  { %v13723_v51 = vpop.eup %13722 }
0x10d2   :  { %12166 = vmatmul.mubr.msk.f32.vlgmr.msra.gmra.mrb[46].mxu1 %vm521_vm14, %v13723_v51 }
0x10d3   :  { %13117 = vmatpush3.bf16.msra.mxu1 %v14869_v11  ;;  %12191 = vmatprep.mubr.msk.f32.mxu1 %vm13948_vm3, %v15986_v1 }
0x10d4   :  { %13118 = vmatprep.subr.bf16.mxu1 %v15988_v5 }
0x10d7   :  { %13120 = vmatpush3.bf16.msra.mxu1 %v14889_v49 }
0x10d8   :  { %12189 = vmatprep.subr.mxu1 %v15986_v1 }
0x10db   :  { %12190 = vmatpush3.msra.mxu1 %v14903_v23 }
0x10dc   :  { %13133 = vmatprep.subr.bf16.mxu1 %v15988_v5 }
0x11a5   :  { %v12167_v58 = vpop.f32.mrb[46].mxu1 }
0x11a6   :  { %v5604_v14 = vsel %vm4678_vm9, %v12167_v58, -inf  ;;  %v5588_v6 = vpop.f32.mrb[47].mxu1 }
0x11a7   :  { %v5605_v38 = vrot.slane %v5604_v14, 4  ;;  %v5597_v47 = vsel %vm4678_vm9, %v5588_v6, -inf }
0x11a8   :  { %v5598_v41 = vrot.slane %v5597_v47, 4 }
0x11a9   :  { %v5606_v18 = vmax.f32 %v5604_v14, %v5605_v38 }
0x11aa   :  { %v5599_v30 = vmax.f32 %v5597_v47, %v5598_v41 }
0x11ab   :  { %v5607_v2 = vrot.slane %v5606_v18, 2 }
0x11ac   :  { %v5600_v19 = vrot.slane %v5599_v30, 2 }
0x11ad   :  { %v5608_v26 = vmax.f32 %v5606_v18, %v5607_v2 }
0x11ae   :  { %v5601_v59 = vmax.f32 %v5599_v30, %v5600_v19 }
0x11af   :  { %v5609_v28 = vrot.slane %v5608_v26, 1 }
0x11b0   :  { %v5602_v29 = vrot.slane %v5601_v59, 1 }
0x11b1   :  { %v5610_v10 = vmax.f32 %v5608_v26, %v5609_v28 }
0x11b2   :  { %v5603_v33 = vmax.f32 %v5601_v59, %v5602_v29 }
0x11b3   :  { %v5612_v35 = vsub.f32 %v12167_v58, %v5610_v10 }
0x11b4   :  { %v5611_v54 = vsub.f32 %v5588_v6, %v5603_v33 }
0x11b5   :  { %v5615_v45 = vmul.f32 1.442695, %v5612_v35 }
0x11b6   :  { %v5613_v60 = vmul.f32 1.442695, %v5611_v54 }
0x11b7   :  { %13724 = vpow2.f32 %v5615_v45 }
0x11b8   :  { %13726 = vpow2.f32 %v5613_v60 }
0x11c1   :  { %v13725_v36 = vpop.eup %13724 }
0x11c2   :  { %v13727_v51 = vpop.eup %13726  ;;  %v5624_v1 = vsel %vm4678_vm9, %v13725_v36, 0.0 }
0x11c3   :  { %v5625_v14 = vrot.slane %v5624_v1, 4  ;;  %v5617_v38 = vsel %vm4678_vm9, %v13727_v51, 0.0 }
0x11c4   :  { %v5618_v47 = vrot.slane %v5617_v38, 4 }
0x11c5   :  { %v5626_v41 = vadd.f32 %v5625_v14, %v5624_v1 }
0x11c6   :  { %v5619_v18 = vadd.f32 %v5618_v47, %v5617_v38 }
0x11c7   :  { %v5627_v30 = vrot.slane %v5626_v41, 2 }
0x11c8   :  { %v5620_v2 = vrot.slane %v5619_v18, 2 }
0x11c9   :  { %v5628_v19 = vadd.f32 %v5627_v30, %v5626_v41 }
0x11ca   :  { %v5621_v26 = vadd.f32 %v5620_v2, %v5619_v18 }
0x11cb   :  { %v5629_v58 = vrot.slane %v5628_v19, 1 }
0x11cc   :  { %v5622_v6 = vrot.slane %v5621_v26, 1 }
0x11cd   :  { %v5630_v59 = vadd.f32 %v5629_v58, %v5628_v19 }
0x11ce   :  { %v5623_v28 = vadd.f32 %v5622_v6, %v5621_v26 }
0x11cf   :  { %13728 = vrcp.f32 %v5630_v59 }
0x11d0   :  { %13730 = vrcp.f32 %v5623_v28 }
0x11d9   :  { %v13729_v29 = vpop.eup %13728 }
0x11da   :  { %v13731_v10 = vpop.eup %13730  ;;  %v5634_v33 = vmul.f32 %v13729_v29, %v13725_v36 }
0x11db   :  { %v5632_v35 = vmul.f32 %v13731_v10, %v13727_v51 }
0x11dc   :  { %5642 = vperm.xlu1 %13616, %v5634_v33   ;;  %v15999_v33 = vmov 0.0  }
0x11dd   :  { %5637 = vperm.xlu0 %13617, %v5632_v35  }
0x11e0   :  { %5666 = vrot.lane.b32.xlu1 %v15130_v20, %s13952_s11 }
0x125b   :  { %v5643_v1 = vpop.permute.xlu1 %5642 }
0x125c   :  { %v5646_v54 = vmul.f32 %v5643_v1, %v14794_v42  ;;  %v5638_v45 = vpop.permute.xlu0 %5637 }
0x125d   :  { %v5645_v60 = vmul.f32 %v5638_v45, %v14779_v50 }
0x125e   :  { %v5654_v14 = vsel %vm521_vm14, %v5646_v54, 0.0 }
0x125f   :  { %v5655_v38 = vrot.slane %v5654_v14, 4  ;;  %v5647_v47 = vsel %vm521_vm14, %v5645_v60, 0.0  ;;  %v5667_v28 = vpop.permute.xlu1 %5666 }
0x1260   :  { %v5648_v41 = vrot.slane %v5647_v47, 4 }
0x1261   :  { %v5656_v18 = vadd.f32 %v5655_v38, %v5654_v14 }
0x1262   :  { %v5649_v36 = vadd.f32 %v5648_v41, %v5647_v47 }
0x1263   :  { %v5657_v51 = vrot.slane %v5656_v18, 2 }
0x1264   :  { %v5650_v30 = vrot.slane %v5649_v36, 2 }
0x1265   :  { %v5658_v2 = vadd.f32 %v5657_v51, %v5656_v18 }
0x1266   :  { %v5651_v19 = vadd.f32 %v5650_v30, %v5649_v36 }
0x1267   :  { %v5659_v26 = vrot.slane %v5658_v2, 1 }
0x1268   :  { %v5652_v58 = vrot.slane %v5651_v19, 1 }
0x1269   :  { %v5660_v6 = vadd.f32 %v5659_v26, %v5658_v2 }
0x126a   :  { %v5653_v59 = vadd.f32 %v5652_v58, %v5651_v19 }
0x126c   :  { %v5663_v29 = vsel %vm288_vm12, %v5660_v6, %v5653_v59 }
0x126d   :  { %v5669_v10 = vsel %vm521_vm14, %v5663_v29, %v5667_v28  ;;  %6118 = vrot.lane.b32.xlu1 %v5663_v29, %s13953_s26 }
0x126e   :  { %12179 = vmatmul.mubr.msk.f32.vlgmr.msra.gmra.mrb[42].mxu0 %vm4758_vm10, %v5669_v10  ;;  %12192 = vmatmul.mubr.msk.f32.vlgmr.msra.gmra.mrb[48].mxu1 %vm4758_vm10, %v5669_v10 }
0x126f   :  { %13123 = vmatpush3.bf16.msra.mxu0 %v14925_v39  ;;  %13135 = vmatpush3.bf16.msra.mxu1 %v14927_v40 }
0x1270   :  { %13124 = vmatprep.subr.bf16.mxu0 %v15988_v5  ;;  %13136 = vmatprep.subr.bf16.mxu1 %v15988_v5 }
0x1271   :  { %12226 = vmatprep.mubr.msk.f32.mxu1 %vm13948_vm3, %v15999_v33  ;;  %12204 = vmatprep.mubr.msk.f32.mxu0 %vm13948_vm3, %v15999_v33 }
0x1273   :  { %13126 = vmatpush3.bf16.msra.mxu0 %v14948_v61  ;;  %13138 = vmatpush3.bf16.msra.mxu1 %v14950_v0 }
0x1274   :  { %12202 = vmatprep.subr.mxu0 %v15999_v33  ;;  %13139 = vmatprep.subr.bf16.mxu1 %v15988_v5 }
0x1276   :  { %12227 = vmatmul.mubr.msk.f32.vlgmr.msra.gmra.mrb[48].mxu1 %vm521_vm14, %v15086_v46 }
0x1277   :  { %12203 = vmatpush3.msra.mxu0 %v14979_v15  ;;  %13141 = vmatpush3.bf16.msra.mxu1 %v14972_v43 }
0x1278   :  { %12205 = vmatmul.mubr.msk.f32.vlgmr.msra.gmra.mrb[44].mxu0 %vm4758_vm10, %v5669_v10  ;;  %13127 = vmatprep.subr.bf16.mxu0 %v15988_v5 }
0x1279   :  { %13129 = vmatpush3.bf16.msra.mxu0 %v14987_v16  ;;  %13142 = vmatprep.subr.bf16.mxu1 %v15988_v5 }
0x127a   :  { %13130 = vmatprep.subr.bf16.mxu0 %v15988_v5  ;;  %12237 = vmatprep.mubr.msk.f32.mxu1 %vm13948_vm3, %v15999_v33 }
0x127b   :  { %13144 = vmatpush3.bf16.msra.mxu1 %v14999_v8  ;;  %12215 = vmatprep.mubr.msk.f32.mxu0 %vm13948_vm3, %v15999_v33 }
0x127c   :  { %13157 = vmatprep.subr.bf16.mxu1 %v15988_v5 }
0x127d   :  { %13132 = vmatpush3.bf16.msra.mxu0 %v15005_v37 }
0x127e   :  { %12238 = vmatmul.mubr.msk.f32.vlgmr.msra.gmra.mrb[50].mxu1 %vm521_vm14, %v15086_v46  ;;  %13145 = vmatprep.subr.bf16.mxu0 %v15988_v5 }
0x127f   :  { %13159 = vmatpush3.bf16.msra.mxu1 %v14726_v52  ;;  %12265 = vmatprep.mubr.msk.f32.mxu1 %vm13948_vm3, %v15999_v33 }
0x1280   :  { %12216 = vmatmul.mubr.msk.f32.vlgmr.msra.gmra.mrb[42].mxu0 %vm521_vm14, %v15086_v46  ;;  %13160 = vmatprep.subr.bf16.mxu1 %v15988_v5 }
0x1281   :  { %13147 = vmatpush3.bf16.msra.mxu0 %v15035_v21  ;;  %12258 = vmatprep.mubr.msk.f32.mxu0 %vm13948_vm3, %v15999_v33 }
0x1282   :  { %13148 = vmatprep.subr.bf16.mxu0 %v15988_v5 }
0x1285   :  { %13150 = vmatpush3.bf16.msra.mxu0 %v15041_v24 }
0x1286   :  { %13151 = vmatprep.subr.bf16.mxu0 %v15988_v5 }
0x1289   :  { %13153 = vmatpush3.bf16.msra.mxu0 %v15051_v27 }
0x128a   :  { %13154 = vmatprep.subr.bf16.mxu0 %v15988_v5 }
0x128d   :  { %13156 = vmatpush3.bf16.msra.mxu0 %v15061_v62 }
0x128e   :  { %12256 = vmatprep.subr.mxu0 %v15999_v33 }
0x1291   :  { %12257 = vmatpush3.msra.mxu0 %v15081_v31 }
0x1292   :  { %13174 = vmatprep.subr.bf16.mxu0 %v15988_v5 }
0x1349   :  { %v6019_v35 = vpop.f32.mrb[48].mxu1 }
0x134a   :  { %v12228_v1 = vpop.f32.mrb[49].mxu1  ;;  %v13521_v36 = vadd.f32 %v15068_v17, %v6019_v35 }
0x134b   :  { %v5879_v54 = vpop.f32.mrb[44].mxu0 }
0x134c   :  { %v12206_v45 = vpop.f32.mrb[45].mxu0  ;;  %v10966_v51 = vmul.f32 -1.442695, %v13521_v36  ;;  %v5880_v59 = vadd.f32 %v15074_v12, %v5879_v54 }
0x1351   :  { %v6089_v60 = vpop.f32.mrb[50].mxu1 }
0x1352   :  { %v12239_v14 = vpop.f32.mrb[51].mxu1  ;;  %v6090_v58 = vadd.f32 %v15072_v25, %v6089_v60  ;;  %v6119_v60 = vpop.permute.xlu1 %6118 }
0x1353   :  { %v5949_v38 = vpop.f32.mrb[42].mxu0 }
0x1354   :  { %v13519_v47 = vadd.f32 %v15066_v48, %v5949_v38  ;;  %v12217_v41 = vpop.f32.mrb[43].mxu0 }
0x1356   :  { %v10965_v18 = vmul.f32 -1.442695, %v13519_v47 }
0x1358   :  { %13732 = vpow2.f32 %v10965_v18 }
0x1359   :  { %13734 = vpow2.f32 %v10966_v51 }
0x1362   :  { %v13733_v30 = vpop.eup %13732 }
0x1363   :  { %v6097_v2 = vadd.f32 1.0, %v13733_v30  ;;  %v13735_v19 = vpop.eup %13734 }
0x1364   :  { %v6104_v26 = vadd.f32 1.0, %v13735_v19 }
0x1365   :  { %13736 = vrcp.f32 %v6097_v2 }
0x1366   :  { %13738 = vrcp.f32 %v6104_v26 }
0x136f   :  { %v13737_v6 = vpop.eup %13736 }
0x1370   :  { %v6107_v28 = vmul.f32 %v13737_v6, %v6090_v58  ;;  %v13739_v10 = vpop.eup %13738 }
0x1371   :  { %v6110_v1 = vsub.f32 1.0, %v13739_v10  ;;  %v6112_v45 = vmul.f32 %v13739_v10, %v15086_v46 }
0x1372   :  { %v6108_v29 = vadd.f32 %v6107_v28, %v5880_v59 }
0x1374   :  { %13740 = vtanh.f32 %v6108_v29 }
0x137e   :  { %v13741_v35 = vpop.eup %13740 }
0x137f   :  { %v6111_v14 = vmul.f32 %v13741_v35, %v6110_v1 }
0x1381   :  { %v15218_v38 = vadd.f32 %v6112_v45, %v6111_v14 }
0x1383   :  { %6115 = vrot.lane.b32.xlu0 %v15218_v38, %s13954_s24 }
0x13f5   :  { %v6116_v47 = vpop.permute.xlu0 %6115 }
0x13f6   :  { %v6121_v41 = vsel %vm290_vm13, %v15130_v20, %v6116_v47 }
0x13f7   :  { %v6122_v54 = vsel %vm4758_vm10, %v6121_v41, %v6119_v60 }
0x13f8   :  { %12259 = vmatmul.mubr.msk.f32.vlgmr.msra.gmra.mrb[46].mxu0 %vm5248_vm11, %v6122_v54 }
0x13f9   :  { %13176 = vmatpush3.bf16.msra.mxu0 %v14864_v7  ;;  %12300 = vmatprep.mubr.msk.f32.mxu0 %vm13948_vm3, %v15999_v33 }
0x13fa   :  { %13177 = vmatprep.subr.bf16.mxu0 %v15988_v5 }
0x13fd   :  { %13179 = vmatpush3.bf16.msra.mxu0 %v14884_v22 }
0x13fe   :  { %12298 = vmatprep.subr.mxu0 %v15999_v33 }
0x1401   :  { %12299 = vmatpush3.msra.mxu0 %v14898_v34 }
0x1402   :  { %13186 = vmatprep.subr.bf16.mxu0 %v15988_v5 }
0x14cb   :  { %v6192_v46 = vpop.f32.mrb[46].mxu0 }
0x14cc   :  { %v15235_v20 = vadd.f32 %v15105_v9, %v6192_v46  ;;  %v12260_v18 = vpop.f32.mrb[47].mxu0 }
0x14ce   :  { %16000 = vst [vmem:[#allocation11_spill] sm:$0xff] %v15235_v20  ;;  %v6196_v36 = vsel %vm5322_vm7, %v15235_v20, -inf }
0x14cf   :  { %6197 = vmax.xlane.f32.xlu0 %v6196_v36 }
0x155c   :  { %v6198_v51 = vpop.xlane.xlu0 %6197 }
0x155d   :  { %vm6199_vm6 = vcmp.ge.f32.partialorder %v15235_v20, %v6198_v51 }
0x155e   :  { %v6200_v30 = vsel %vm6199_vm6, %v14094_v13, 16.0 }
0x155f   :  { %v6201_v2 = vsel %vm5322_vm7, %v6200_v30, inf }
0x1560   :  { %6202 = vmin.xlane.f32.xlu1 %v6201_v2 }
0x15ed   :  { %v6203_v34 = vpop.xlane.xlu1 %6202 }
0x15ee   :  { %vm6204_vm8 = vcmp.eq.f32.partialorder %v14094_v13, %v6203_v34 }
0x15ef   :  { %v10968_v19 = vsel %vm6204_vm8, 1.0, %v15999_v33 }
0x15f0   :  { %12266 = vmatmul.mubr.msk.f32.vlgmr.msra.gmra.mrb[52].mxu1 %vm194_vm0, %v10968_v19 }
0x15f1   :  { %13162 = vmatpush3.bf16.msra.mxu1 %v14782_v63  ;;  %12276 = vmatprep.mubr.msk.f32.mxu1 %vm13948_vm3, %v15999_v33 }
0x15f2   :  { %13163 = vmatprep.subr.bf16.mxu1 %v15988_v5 }
0x15f5   :  { %13165 = vmatpush3.bf16.msra.mxu1 %v14799_v44 }
0x15f6   :  { %13167 = vmatprep.subr.bf16.mxu1 %v14822_v53 }
0x15f8   :  { %12277 = vmatmul.mubr.msk.f32.vlgmr.msra.gmra.mrb[54].mxu1 %vm521_vm14, %v15218_v38 }
0x15f9   :  { %13169 = vmatpush3.bf16.msra.mxu1 %v14822_v53 }
0x15fa   :  { %13171 = vmatprep.subr.bf16.mxu1 %v14827_v55 }
0x15fd   :  { %13173 = vmatpush3.bf16.msra.mxu1 %v14827_v55 }
0x15fe   :  { %13180 = vmatprep.subr.bf16.mxu1 %v15988_v5 }
0x16c3   :  { %v15257_v26 = vpop.f32.mrb[52].mxu1 }
0x16c4   :  { %v12267_v58 = vpop.f32.mrb[53].mxu1 }
0x16cb   :  { %v6348_v6 = vpop.f32.mrb[54].mxu1 }
0x16cc   :  { %v6359_v59 = vrot.slane %v6348_v6, %v14354_v57  ;;  %v12278_v28 = vpop.f32.mrb[55].mxu1 }
0x16ce   :  { %v6360_v29 = vcombine.high %v6359_v59, %v6359_v59  ;;  %v6367_v10 = vrot.slane %v6359_v59, %v14354_v57 }
0x16d0   :  { %v6374_v1 = vrot.slane %v6360_v29, %v14354_v57  ;;  %v6378_v35 = vrot.slane %v6367_v10, %v14080_v3 }
0x16d2   :  { %v6382_v45 = vrot.slane %v6374_v1, %v14080_v3  ;;  %v6385_v14 = vadd.f32 %v6378_v35, %v14836_v56 }
0x16d4   :  { %v6386_v47 = vadd.f32 %v14834_v32, %v6382_v45  ;;  %13742 = vtanh.f32 %v6385_v14 }
0x16d6   :  { %13744 = vtanh.f32 %v6386_v47 }
0x16de   :  { %v13743_v60 = vpop.eup %13742 }
0x16df   :  { %12287 = vmatprep.mubr.msk.f32.mxu1 %vm521_vm14, %v13743_v60 }
0x16e0   :  { %v13745_v41 = vpop.eup %13744 }
0x16e1   :  { %12288 = vmatmul.mubr.msk.f32.vlgmr.msra.gmra.mrb[56].mxu1 %vm521_vm14, %v13745_v41 }
0x16e2   :  { %13182 = vmatpush3.bf16.msra.mxu1 %v14869_v11  ;;  %12313 = vmatprep.mubr.msk.f32.mxu1 %vm13948_vm3, %v15999_v33 }
0x16e3   :  { %13183 = vmatprep.subr.bf16.mxu1 %v15988_v5 }
0x16e6   :  { %13185 = vmatpush3.bf16.msra.mxu1 %v14889_v49 }
0x16e7   :  { %12311 = vmatprep.subr.mxu1 %v15999_v33 }
0x16ea   :  { %12312 = vmatpush3.msra.mxu1 %v14903_v23 }
0x16eb   :  { %13198 = vmatprep.subr.bf16.mxu1 %v15988_v5 }
0x17b4   :  { %v12289_v54 = vpop.f32.mrb[56].mxu1 }
0x17b5   :  { %v6477_v46 = vsel %vm4678_vm9, %v12289_v54, -inf  ;;  %v6461_v18 = vpop.f32.mrb[57].mxu1 }
0x17b6   :  { %v6478_v36 = vrot.slane %v6477_v46, 4  ;;  %v6470_v51 = vsel %vm4678_vm9, %v6461_v18, -inf }
0x17b7   :  { %v6471_v30 = vrot.slane %v6470_v51, 4 }
0x17b8   :  { %v6479_v2 = vmax.f32 %v6477_v46, %v6478_v36 }
0x17b9   :  { %v6472_v34 = vmax.f32 %v6470_v51, %v6471_v30 }
0x17ba   :  { %v6480_v19 = vrot.slane %v6479_v2, 2 }
0x17bb   :  { %v6473_v58 = vrot.slane %v6472_v34, 2 }
0x17bc   :  { %v6481_v6 = vmax.f32 %v6479_v2, %v6480_v19 }
0x17bd   :  { %v6474_v59 = vmax.f32 %v6472_v34, %v6473_v58 }
0x17be   :  { %v6482_v28 = vrot.slane %v6481_v6, 1 }
0x17bf   :  { %v6475_v29 = vrot.slane %v6474_v59, 1 }
0x17c0   :  { %v6483_v10 = vmax.f32 %v6481_v6, %v6482_v28 }
0x17c1   :  { %v6476_v23 = vmax.f32 %v6474_v59, %v6475_v29 }
0x17c2   :  { %v6485_v1 = vsub.f32 %v12289_v54, %v6483_v10 }
0x17c3   :  { %v6484_v35 = vsub.f32 %v6461_v18, %v6476_v23 }
0x17c4   :  { %v6488_v45 = vmul.f32 1.442695, %v6485_v1 }
0x17c5   :  { %v6486_v14 = vmul.f32 1.442695, %v6484_v35 }
0x17c6   :  { %13746 = vpow2.f32 %v6488_v45 }
0x17c7   :  { %13748 = vpow2.f32 %v6486_v14 }
0x17d0   :  { %v13747_v47 = vpop.eup %13746 }
0x17d1   :  { %v13749_v60 = vpop.eup %13748  ;;  %v6497_v41 = vsel %vm4678_vm9, %v13747_v47, 0.0 }
0x17d2   :  { %v6498_v46 = vrot.slane %v6497_v41, 4  ;;  %v6490_v36 = vsel %vm4678_vm9, %v13749_v60, 0.0 }
0x17d3   :  { %v6491_v51 = vrot.slane %v6490_v36, 4 }
0x17d4   :  { %v6499_v30 = vadd.f32 %v6498_v46, %v6497_v41 }
0x17d5   :  { %v6492_v2 = vadd.f32 %v6491_v51, %v6490_v36 }
0x17d6   :  { %v6500_v34 = vrot.slane %v6499_v30, 2 }
0x17d7   :  { %v6493_v19 = vrot.slane %v6492_v2, 2 }
0x17d8   :  { %v6501_v58 = vadd.f32 %v6500_v34, %v6499_v30 }
0x17d9   :  { %v6494_v6 = vadd.f32 %v6493_v19, %v6492_v2 }
0x17da   :  { %v6502_v54 = vrot.slane %v6501_v58, 1 }
0x17db   :  { %v6495_v18 = vrot.slane %v6494_v6, 1 }
0x17dc   :  { %v6503_v59 = vadd.f32 %v6502_v54, %v6501_v58 }
0x17dd   :  { %v6496_v28 = vadd.f32 %v6495_v18, %v6494_v6 }
0x17de   :  { %13750 = vrcp.f32 %v6503_v59 }
0x17df   :  { %13752 = vrcp.f32 %v6496_v28 }
0x17e8   :  { %v13751_v29 = vpop.eup %13750 }
0x17e9   :  { %v13753_v10 = vpop.eup %13752  ;;  %v6507_v23 = vmul.f32 %v13751_v29, %v13747_v47 }
0x17ea   :  { %v6505_v1 = vmul.f32 %v13753_v10, %v13749_v60 }
0x17eb   :  { %6515 = vperm.xlu1 %13616, %v6507_v23  }
0x17ec   :  { %6510 = vperm.xlu0 %13617, %v6505_v1  }
0x17f0   :  { %6539 = vrot.lane.b32.xlu0 %v15257_v26, %s13952_s11 }
0x186a   :  { %v6516_v35 = vpop.permute.xlu1 %6515 }
0x186b   :  { %v6519_v45 = vmul.f32 %v6516_v35, %v14794_v42  ;;  %v6511_v14 = vpop.permute.xlu0 %6510 }
0x186c   :  { %v6518_v41 = vmul.f32 %v6511_v14, %v14779_v50 }
0x186d   :  { %v6527_v46 = vsel %vm521_vm14, %v6519_v45, 0.0 }
0x186e   :  { %v6528_v36 = vrot.slane %v6527_v46, 4  ;;  %v6520_v51 = vsel %vm521_vm14, %v6518_v41, 0.0 }
0x186f   :  { %v6521_v30 = vrot.slane %v6520_v51, 4  ;;  %v6540_v29 = vpop.permute.xlu0 %6539 }
0x1870   :  { %v6529_v2 = vadd.f32 %v6528_v36, %v6527_v46 }
0x1871   :  { %v6522_v47 = vadd.f32 %v6521_v30, %v6520_v51 }
0x1872   :  { %v6530_v60 = vrot.slane %v6529_v2, 2 }
0x1873   :  { %v6523_v34 = vrot.slane %v6522_v47, 2 }
0x1874   :  { %v6531_v19 = vadd.f32 %v6530_v60, %v6529_v2 }
0x1875   :  { %v6524_v58 = vadd.f32 %v6523_v34, %v6522_v47 }
0x1876   :  { %v6532_v6 = vrot.slane %v6531_v19, 1 }
0x1877   :  { %v6525_v54 = vrot.slane %v6524_v58, 1 }
0x1878   :  { %v6533_v18 = vadd.f32 %v6532_v6, %v6531_v19 }
0x1879   :  { %v6526_v59 = vadd.f32 %v6525_v54, %v6524_v58 }
0x187b   :  { %v6536_v28 = vsel %vm288_vm12, %v6533_v18, %v6526_v59 }
0x187c   :  { %v6542_v10 = vsel %vm521_vm14, %v6536_v28, %v6540_v29  ;;  %6991 = vrot.lane.b32.xlu0 %v6536_v28, %s13953_s26 }
0x187d   :  { %12301 = vmatmul.mubr.msk.f32.vlgmr.msra.gmra.mrb[48].mxu0 %vm4758_vm10, %v6542_v10  ;;  %12314 = vmatmul.mubr.msk.f32.vlgmr.msra.gmra.mrb[58].mxu1 %vm4758_vm10, %v6542_v10 }
0x187e   :  { %13188 = vmatpush3.bf16.msra.mxu0 %v14925_v39  ;;  %13200 = vmatpush3.bf16.msra.mxu1 %v14927_v40 }
0x187f   :  { %13189 = vmatprep.subr.bf16.mxu0 %v15988_v5  ;;  %13201 = vmatprep.subr.bf16.mxu1 %v15988_v5 }
0x1880   :  { %12348 = vmatprep.mubr.msk.f32.mxu1 %vm13948_vm3, %v15999_v33  ;;  %12326 = vmatprep.mubr.msk.f32.mxu0 %vm13948_vm3, %v15999_v33 }
0x1882   :  { %13191 = vmatpush3.bf16.msra.mxu0 %v14948_v61  ;;  %13203 = vmatpush3.bf16.msra.mxu1 %v14950_v0 }
0x1883   :  { %12324 = vmatprep.subr.mxu0 %v15999_v33  ;;  %13204 = vmatprep.subr.bf16.mxu1 %v15988_v5 }
0x1885   :  { %12349 = vmatmul.mubr.msk.f32.vlgmr.msra.gmra.mrb[58].mxu1 %vm521_vm14, %v15218_v38 }
0x1886   :  { %12325 = vmatpush3.msra.mxu0 %v14979_v15  ;;  %13206 = vmatpush3.bf16.msra.mxu1 %v14972_v43 }
0x1887   :  { %12327 = vmatmul.mubr.msk.f32.vlgmr.msra.gmra.mrb[50].mxu0 %vm4758_vm10, %v6542_v10  ;;  %13192 = vmatprep.subr.bf16.mxu0 %v15988_v5 }
0x1888   :  { %13194 = vmatpush3.bf16.msra.mxu0 %v14987_v16  ;;  %13207 = vmatprep.subr.bf16.mxu1 %v15988_v5 }
0x1889   :  { %13195 = vmatprep.subr.bf16.mxu0 %v15988_v5  ;;  %12359 = vmatprep.mubr.msk.f32.mxu1 %vm13948_vm3, %v15999_v33 }
0x188a   :  { %13209 = vmatpush3.bf16.msra.mxu1 %v14999_v8  ;;  %12337 = vmatprep.mubr.msk.f32.mxu0 %vm13948_vm3, %v15999_v33 }
0x188b   :  { %13222 = vmatprep.subr.bf16.mxu1 %v15988_v5 }
0x188c   :  { %13197 = vmatpush3.bf16.msra.mxu0 %v15005_v37 }
0x188d   :  { %12360 = vmatmul.mubr.msk.f32.vlgmr.msra.gmra.mrb[60].mxu1 %vm521_vm14, %v15218_v38  ;;  %13210 = vmatprep.subr.bf16.mxu0 %v15988_v5 }
0x188e   :  { %13224 = vmatpush3.bf16.msra.mxu1 %v14726_v52  ;;  %12387 = vmatprep.mubr.msk.f32.mxu1 %vm13948_vm3, %v15999_v33 }
0x188f   :  { %12338 = vmatmul.mubr.msk.f32.vlgmr.msra.gmra.mrb[48].mxu0 %vm521_vm14, %v15218_v38  ;;  %13225 = vmatprep.subr.bf16.mxu1 %v15988_v5 }
0x1890   :  { %13212 = vmatpush3.bf16.msra.mxu0 %v15035_v21  ;;  %12380 = vmatprep.mubr.msk.f32.mxu0 %vm13948_vm3, %v15999_v33 }
0x1891   :  { %13213 = vmatprep.subr.bf16.mxu0 %v15988_v5 }
0x1894   :  { %13215 = vmatpush3.bf16.msra.mxu0 %v15041_v24 }
0x1895   :  { %13216 = vmatprep.subr.bf16.mxu0 %v15988_v5 }
0x1898   :  { %13218 = vmatpush3.bf16.msra.mxu0 %v15051_v27 }
0x1899   :  { %13219 = vmatprep.subr.bf16.mxu0 %v15988_v5 }
0x189c   :  { %13221 = vmatpush3.bf16.msra.mxu0 %v15061_v62 }
0x189d   :  { %12378 = vmatprep.subr.mxu0 %v15999_v33 }
0x18a0   :  { %12379 = vmatpush3.msra.mxu0 %v15081_v31 }
0x18a1   :  { %13239 = vmatprep.subr.bf16.mxu0 %v15988_v5 }
0x1958   :  { %v6892_v15 = vpop.f32.mrb[58].mxu1 }
0x1959   :  { %v12350_v23 = vpop.f32.mrb[59].mxu1  ;;  %v13525_v30 = vadd.f32 %v15068_v17, %v6892_v15 }
0x195a   :  { %v6752_v1 = vpop.f32.mrb[50].mxu0 }
0x195b   :  { %v12328_v35 = vpop.f32.mrb[51].mxu0  ;;  %v10980_v2 = vmul.f32 -1.442695, %v13525_v30  ;;  %v6753_v6 = vadd.f32 %v15074_v12, %v6752_v1 }
0x1960   :  { %v6962_v45 = vpop.f32.mrb[60].mxu1 }
0x1961   :  { %v12361_v14 = vpop.f32.mrb[61].mxu1  ;;  %v6963_v19 = vadd.f32 %v15072_v25, %v6962_v45  ;;  %v6992_v25 = vpop.permute.xlu0 %6991 }
0x1962   :  { %v6822_v41 = vpop.f32.mrb[48].mxu0 }
0x1963   :  { %v13523_v46 = vadd.f32 %v15066_v48, %v6822_v41  ;;  %v12339_v36 = vpop.f32.mrb[49].mxu0 }
0x1965   :  { %v10979_v51 = vmul.f32 -1.442695, %v13523_v46 }
0x1967   :  { %13754 = vpow2.f32 %v10979_v51 }
0x1968   :  { %13756 = vpow2.f32 %v10980_v2 }
0x1971   :  { %v13755_v47 = vpop.eup %13754 }
0x1972   :  { %v6970_v31 = vadd.f32 1.0, %v13755_v47  ;;  %v13757_v60 = vpop.eup %13756 }
0x1973   :  { %v6977_v34 = vadd.f32 1.0, %v13757_v60 }
0x1974   :  { %13758 = vrcp.f32 %v6970_v31 }
0x1975   :  { %13760 = vrcp.f32 %v6977_v34 }
0x197e   :  { %v13759_v58 = vpop.eup %13758 }
0x197f   :  { %v6980_v54 = vmul.f32 %v13759_v58, %v6963_v19  ;;  %v13761_v59 = vpop.eup %13760 }
0x1980   :  { %v6983_v28 = vsub.f32 1.0, %v13761_v59  ;;  %v6985_v10 = vmul.f32 %v13761_v59, %v15218_v38  ;;  %v15362_v38 = vld [vmem:[%s15977_s12 + $0x20] sm:$0xff] }
0x1981   :  { %v6981_v18 = vadd.f32 %v6980_v54, %v6753_v6 }
0x1983   :  { %13762 = vtanh.f32 %v6981_v18 }
0x198d   :  { %v13763_v29 = vpop.eup %13762 }
0x198e   :  { %v6984_v15 = vmul.f32 %v13763_v29, %v6983_v28 }
0x1990   :  { %v15345_v23 = vadd.f32 %v6985_v10, %v6984_v15  ;;  %v15409_v15 = vld [vmem:[%s15977_s12 + $0x48] sm:$0xff] }
0x1992   :  { %6988 = vrot.lane.b32.xlu1 %v15345_v23, %s13954_s24 }
0x1a04   :  { %v6989_v35 = vpop.permute.xlu1 %6988 }
0x1a05   :  { %v6994_v45 = vsel %vm290_vm13, %v15257_v26, %v6989_v35 }
0x1a06   :  { %v6995_v12 = vsel %vm4758_vm10, %v6994_v45, %v6992_v25 }
0x1a07   :  { %12381 = vmatmul.mubr.msk.f32.vlgmr.msra.gmra.mrb[52].mxu0 %vm5248_vm11, %v6995_v12 }
0x1a08   :  { %13241 = vmatpush3.bf16.msra.mxu0 %v14864_v7  ;;  %12422 = vmatprep.mubr.msk.f32.mxu0 %vm13948_vm3, %v15999_v33 }
0x1a09   :  { %13242 = vmatprep.subr.bf16.mxu0 %v15988_v5 }
0x1a0c   :  { %13244 = vmatpush3.bf16.msra.mxu0 %v14884_v22 }
0x1a0d   :  { %12420 = vmatprep.subr.mxu0 %v15999_v33 }
0x1a10   :  { %12421 = vmatpush3.msra.mxu0 %v15362_v38 }
0x1a11   :  { %13251 = vmatprep.subr.bf16.mxu0 %v15988_v5 }
0x1ada   :  { %v7065_v26 = vpop.f32.mrb[52].mxu0 }
0x1adb   :  { %v15367_v1 = vadd.f32 %v15105_v9, %v7065_v26  ;;  %v12382_v14 = vpop.f32.mrb[53].mxu0 }
0x1add   :  { %16001 = vst [vmem:[#allocation12_spill] sm:$0xff] %v15367_v1  ;;  %v7069_v41 = vsel %vm5322_vm7, %v15367_v1, -inf }
0x1ade   :  { %7070 = vmax.xlane.f32.xlu1 %v7069_v41 }
0x1b6b   :  { %v7071_v46 = vpop.xlane.xlu1 %7070 }
0x1b6c   :  { %vm7072_vm6 = vcmp.ge.f32.partialorder %v15367_v1, %v7071_v46 }
0x1b6d   :  { %v7073_v36 = vsel %vm7072_vm6, %v14094_v13, 16.0 }
0x1b6e   :  { %v7074_v51 = vsel %vm5322_vm7, %v7073_v36, inf }
0x1b6f   :  { %7075 = vmin.xlane.f32.xlu0 %v7074_v51 }
0x1bfc   :  { %v7076_v30 = vpop.xlane.xlu0 %7075 }
0x1bfd   :  { %vm7077_vm8 = vcmp.eq.f32.partialorder %v14094_v13, %v7076_v30 }
0x1bfe   :  { %v10982_v2 = vsel %vm7077_vm8, 1.0, %v15999_v33 }
0x1bff   :  { %12388 = vmatmul.mubr.msk.f32.vlgmr.msra.gmra.mrb[62].mxu1 %vm194_vm0, %v10982_v2 }
0x1c00   :  { %13227 = vmatpush3.bf16.msra.mxu1 %v14782_v63  ;;  %12398 = vmatprep.mubr.msk.f32.mxu1 %vm13948_vm3, %v15999_v33 }
0x1c01   :  { %13228 = vmatprep.subr.bf16.mxu1 %v15988_v5 }
0x1c04   :  { %13230 = vmatpush3.bf16.msra.mxu1 %v14799_v44 }
0x1c05   :  { %13232 = vmatprep.subr.bf16.mxu1 %v14822_v53 }
0x1c07   :  { %12399 = vmatmul.mubr.msk.f32.vlgmr.msra.gmra.mrb[64].mxu1 %vm521_vm14, %v15345_v23 }
0x1c08   :  { %13234 = vmatpush3.bf16.msra.mxu1 %v14822_v53 }
0x1c09   :  { %13236 = vmatprep.subr.bf16.mxu1 %v14827_v55 }
0x1c0c   :  { %13238 = vmatpush3.bf16.msra.mxu1 %v14827_v55 }
0x1c0d   :  { %13245 = vmatprep.subr.bf16.mxu1 %v15988_v5 }
0x1cd2   :  { %v15389_v9 = vpop.f32.mrb[62].mxu1 }
0x1cd3   :  { %v12389_v47 = vpop.f32.mrb[63].mxu1 }
0x1cda   :  { %v7221_v31 = vpop.f32.mrb[64].mxu1 }
0x1cdb   :  { %v7232_v60 = vrot.slane %v7221_v31, %v14354_v57  ;;  %v12400_v34 = vpop.f32.mrb[65].mxu1 }
0x1cdd   :  { %v7233_v19 = vcombine.high %v7232_v60, %v7232_v60  ;;  %v7240_v58 = vrot.slane %v7232_v60, %v14354_v57 }
0x1cdf   :  { %v7247_v6 = vrot.slane %v7233_v19, %v14354_v57  ;;  %v7251_v54 = vrot.slane %v7240_v58, %v14080_v3 }
0x1ce1   :  { %v7255_v18 = vrot.slane %v7247_v6, %v14080_v3  ;;  %v7258_v59 = vadd.f32 %v7251_v54, %v14836_v56 }
0x1ce3   :  { %v7259_v28 = vadd.f32 %v14834_v32, %v7255_v18  ;;  %13764 = vtanh.f32 %v7258_v59 }
0x1ce5   :  { %13766 = vtanh.f32 %v7259_v28 }
0x1ced   :  { %v13765_v29 = vpop.eup %13764 }
0x1cee   :  { %12409 = vmatprep.mubr.msk.f32.mxu1 %vm521_vm14, %v13765_v29 }
0x1cef   :  { %v13767_v10 = vpop.eup %13766 }
0x1cf0   :  { %12410 = vmatmul.mubr.msk.f32.vlgmr.msra.gmra.mrb[66].mxu1 %vm521_vm14, %v13767_v10 }
0x1cf1   :  { %13247 = vmatpush3.bf16.msra.mxu1 %v14869_v11  ;;  %12435 = vmatprep.mubr.msk.f32.mxu1 %vm13948_vm3, %v15999_v33 }
0x1cf2   :  { %13248 = vmatprep.subr.bf16.mxu1 %v15988_v5 }
0x1cf5   :  { %13250 = vmatpush3.bf16.msra.mxu1 %v14889_v49 }
0x1cf6   :  { %12433 = vmatprep.subr.mxu1 %v15999_v33 }
0x1cf9   :  { %12434 = vmatpush3.msra.mxu1 %v15409_v15 }
0x1cfa   :  { %13263 = vmatprep.subr.bf16.mxu1 %v15988_v5 }
0x1dc3   :  { %v12411_v35 = vpop.f32.mrb[66].mxu1 }
0x1dc4   :  { %v7350_v25 = vsel %vm4678_vm9, %v12411_v35, -inf  ;;  %v7334_v45 = vpop.f32.mrb[67].mxu1 }
0x1dc5   :  { %v7351_v12 = vrot.slane %v7350_v25, 4  ;;  %v7343_v26 = vsel %vm4678_vm9, %v7334_v45, -inf }
0x1dc6   :  { %v7344_v14 = vrot.slane %v7343_v26, 4 }
0x1dc7   :  { %v7352_v41 = vmax.f32 %v7350_v25, %v7351_v12 }
0x1dc8   :  { %v7345_v46 = vmax.f32 %v7343_v26, %v7344_v14 }
0x1dc9   :  { %v7353_v36 = vrot.slane %v7352_v41, 2 }
0x1dca   :  { %v7346_v51 = vrot.slane %v7345_v46, 2 }
0x1dcb   :  { %v7354_v30 = vmax.f32 %v7352_v41, %v7353_v36 }
0x1dcc   :  { %v7347_v2 = vmax.f32 %v7345_v46, %v7346_v51 }
0x1dcd   :  { %v7355_v47 = vrot.slane %v7354_v30, 1 }
0x1dce   :  { %v7348_v31 = vrot.slane %v7347_v2, 1 }
0x1dcf   :  { %v7356_v60 = vmax.f32 %v7354_v30, %v7355_v47 }
0x1dd0   :  { %v7349_v34 = vmax.f32 %v7347_v2, %v7348_v31 }
0x1dd1   :  { %v7358_v19 = vsub.f32 %v12411_v35, %v7356_v60 }
0x1dd2   :  { %v7357_v58 = vsub.f32 %v7334_v45, %v7349_v34 }
0x1dd3   :  { %v7361_v6 = vmul.f32 1.442695, %v7358_v19 }
0x1dd4   :  { %v7359_v54 = vmul.f32 1.442695, %v7357_v58 }
0x1dd5   :  { %13768 = vpow2.f32 %v7361_v6 }
0x1dd6   :  { %13770 = vpow2.f32 %v7359_v54 }
0x1ddf   :  { %v13769_v18 = vpop.eup %13768 }
0x1de0   :  { %v13771_v59 = vpop.eup %13770  ;;  %v7370_v28 = vsel %vm4678_vm9, %v13769_v18, 0.0 }
0x1de1   :  { %v7371_v29 = vrot.slane %v7370_v28, 4  ;;  %v7363_v10 = vsel %vm4678_vm9, %v13771_v59, 0.0 }
0x1de2   :  { %v7364_v25 = vrot.slane %v7363_v10, 4 }
0x1de3   :  { %v7372_v12 = vadd.f32 %v7371_v29, %v7370_v28 }
0x1de4   :  { %v7365_v26 = vadd.f32 %v7364_v25, %v7363_v10 }
0x1de5   :  { %v7373_v14 = vrot.slane %v7372_v12, 2 }
0x1de6   :  { %v7366_v41 = vrot.slane %v7365_v26, 2 }
0x1de7   :  { %v7374_v46 = vadd.f32 %v7373_v14, %v7372_v12 }
0x1de8   :  { %v7367_v36 = vadd.f32 %v7366_v41, %v7365_v26 }
0x1de9   :  { %v7375_v35 = vrot.slane %v7374_v46, 1 }
0x1dea   :  { %v7368_v45 = vrot.slane %v7367_v36, 1 }
0x1deb   :  { %v7376_v51 = vadd.f32 %v7375_v35, %v7374_v46 }
0x1dec   :  { %v7369_v30 = vadd.f32 %v7368_v45, %v7367_v36 }
0x1ded   :  { %13772 = vrcp.f32 %v7376_v51 }
0x1dee   :  { %13774 = vrcp.f32 %v7369_v30 }
0x1df7   :  { %v13773_v2 = vpop.eup %13772 }
0x1df8   :  { %v13775_v47 = vpop.eup %13774  ;;  %v7380_v31 = vmul.f32 %v13773_v2, %v13769_v18  ;;  %v15445_v2 = vld [vmem:[%s15977_s12 + $0x70] sm:$0xff] }
0x1df9   :  { %v7378_v60 = vmul.f32 %v13775_v47, %v13771_v59  ;;  %v15483_v47 = vld [vmem:[%s15981_s16 + $0x40] sm:$0xff] }
0x1dfa   :  { %7388 = vperm.xlu1 %13616, %v7380_v31  }
0x1dfb   :  { %7383 = vperm.xlu0 %13617, %v7378_v60  }
0x1dfe   :  { %7412 = vrot.lane.b32.xlu1 %v15389_v9, %s13952_s11 }
0x1e79   :  { %v7389_v34 = vpop.permute.xlu1 %7388 }
0x1e7a   :  { %v7392_v19 = vmul.f32 %v7389_v34, %v14794_v42  ;;  %v7384_v58 = vpop.permute.xlu0 %7383 }
0x1e7b   :  { %v7391_v6 = vmul.f32 %v7384_v58, %v14779_v50 }
0x1e7c   :  { %v7400_v54 = vsel %vm521_vm14, %v7392_v19, 0.0 }
0x1e7d   :  { %v7401_v28 = vrot.slane %v7400_v54, 4  ;;  %v7393_v29 = vsel %vm521_vm14, %v7391_v6, 0.0  ;;  %v7413_v45 = vpop.permute.xlu1 %7412 }
0x1e7e   :  { %v7394_v10 = vrot.slane %v7393_v29, 4 }
0x1e7f   :  { %v7402_v25 = vadd.f32 %v7401_v28, %v7400_v54 }
0x1e80   :  { %v7395_v18 = vadd.f32 %v7394_v10, %v7393_v29 }
0x1e81   :  { %v7403_v59 = vrot.slane %v7402_v25, 2 }
0x1e82   :  { %v7396_v12 = vrot.slane %v7395_v18, 2 }
0x1e83   :  { %v7404_v26 = vadd.f32 %v7403_v59, %v7402_v25 }
0x1e84   :  { %v7397_v14 = vadd.f32 %v7396_v12, %v7395_v18 }
0x1e85   :  { %v7405_v41 = vrot.slane %v7404_v26, 1 }
0x1e86   :  { %v7398_v46 = vrot.slane %v7397_v14, 1 }
0x1e87   :  { %v7406_v36 = vadd.f32 %v7405_v41, %v7404_v26  ;;  %v15489_v41 = vld [vmem:[#allocation5 + $0x2] ss:$0 sm:$0xff] }
0x1e88   :  { %v7399_v35 = vadd.f32 %v7398_v46, %v7397_v14 }
0x1e8a   :  { %v7409_v51 = vsel %vm288_vm12, %v7406_v36, %v7399_v35  ;;  %v15492_v35 = vld [vmem:[#allocation2 + $0x2] ss:$0 sm:$0xff] }
0x1e8b   :  { %v7415_v30 = vsel %vm521_vm14, %v7409_v51, %v7413_v45  ;;  %7864 = vrot.lane.b32.xlu1 %v7409_v51, %s13953_s26 }
0x1e8c   :  { %12423 = vmatmul.mubr.msk.f32.vlgmr.msra.gmra.mrb[54].mxu0 %vm4758_vm10, %v7415_v30  ;;  %12436 = vmatmul.mubr.msk.f32.vlgmr.msra.gmra.mrb[68].mxu1 %vm4758_vm10, %v7415_v30 }
0x1e8d   :  { %13253 = vmatpush3.bf16.msra.mxu0 %v14925_v39  ;;  %13265 = vmatpush3.bf16.msra.mxu1 %v14927_v40 }
0x1e8e   :  { %13254 = vmatprep.subr.bf16.mxu0 %v15988_v5  ;;  %13266 = vmatprep.subr.bf16.mxu1 %v15988_v5 }
0x1e8f   :  { %12470 = vmatprep.mubr.msk.f32.mxu1 %vm13948_vm3, %v15999_v33  ;;  %12448 = vmatprep.mubr.msk.f32.mxu0 %vm13948_vm3, %v15999_v33 }
0x1e91   :  { %13256 = vmatpush3.bf16.msra.mxu0 %v14948_v61  ;;  %13268 = vmatpush3.bf16.msra.mxu1 %v14950_v0 }
0x1e92   :  { %12446 = vmatprep.subr.mxu0 %v15999_v33  ;;  %13269 = vmatprep.subr.bf16.mxu1 %v15988_v5 }
0x1e94   :  { %12471 = vmatmul.mubr.msk.f32.vlgmr.msra.gmra.mrb[68].mxu1 %vm521_vm14, %v15345_v23 }
0x1e95   :  { %12447 = vmatpush3.msra.mxu0 %v15445_v2  ;;  %13271 = vmatpush3.bf16.msra.mxu1 %v14972_v43 }
0x1e96   :  { %12449 = vmatmul.mubr.msk.f32.vlgmr.msra.gmra.mrb[56].mxu0 %vm4758_vm10, %v7415_v30  ;;  %13257 = vmatprep.subr.bf16.mxu0 %v15988_v5 }
0x1e97   :  { %13259 = vmatpush3.bf16.msra.mxu0 %v14987_v16  ;;  %13272 = vmatprep.subr.bf16.mxu1 %v15988_v5 }
0x1e98   :  { %13260 = vmatprep.subr.bf16.mxu0 %v15988_v5  ;;  %12481 = vmatprep.mubr.msk.f32.mxu1 %vm13948_vm3, %v15999_v33 }
0x1e99   :  { %13274 = vmatpush3.bf16.msra.mxu1 %v14999_v8  ;;  %12459 = vmatprep.mubr.msk.f32.mxu0 %vm13948_vm3, %v15999_v33 }
0x1e9a   :  { %13287 = vmatprep.subr.bf16.mxu1 %v15988_v5 }
0x1e9b   :  { %13262 = vmatpush3.bf16.msra.mxu0 %v15005_v37 }
0x1e9c   :  { %12482 = vmatmul.mubr.msk.f32.vlgmr.msra.gmra.mrb[70].mxu1 %vm521_vm14, %v15345_v23  ;;  %13275 = vmatprep.subr.bf16.mxu0 %v15988_v5 }
0x1e9d   :  { %13289 = vmatpush3.bf16.msra.mxu1 %v14726_v52  ;;  %12509 = vmatprep.mubr.msk.f32.mxu1 %vm13948_vm3, %v15999_v33 }
0x1e9e   :  { %12460 = vmatmul.mubr.msk.f32.vlgmr.msra.gmra.mrb[54].mxu0 %vm521_vm14, %v15345_v23  ;;  %13290 = vmatprep.subr.bf16.mxu1 %v15988_v5 }
0x1e9f   :  { %13277 = vmatpush3.bf16.msra.mxu0 %v15035_v21  ;;  %12502 = vmatprep.mubr.msk.f32.mxu0 %vm13948_vm3, %v15999_v33 }
0x1ea0   :  { %13278 = vmatprep.subr.bf16.mxu0 %v15988_v5 }
0x1ea3   :  { %13280 = vmatpush3.bf16.msra.mxu0 %v15041_v24 }
0x1ea4   :  { %13281 = vmatprep.subr.bf16.mxu0 %v15988_v5 }
0x1ea7   :  { %13283 = vmatpush3.bf16.msra.mxu0 %v15051_v27 }
0x1ea8   :  { %13284 = vmatprep.subr.bf16.mxu0 %v15988_v5 }
0x1eab   :  { %13286 = vmatpush3.bf16.msra.mxu0 %v15061_v62 }
0x1eac   :  { %12500 = vmatprep.subr.mxu0 %v15999_v33 }
0x1eaf   :  { %12501 = vmatpush3.msra.mxu0 %v15483_v47 }
0x1eb0   :  { %13304 = vmatprep.subr.bf16.mxu0 %v15988_v5 }
0x1f67   :  { %v7765_v31 = vpop.f32.mrb[68].mxu1 }
0x1f68   :  { %v12472_v60 = vpop.f32.mrb[69].mxu1  ;;  %v13529_v25 = vadd.f32 %v15068_v17, %v7765_v31 }
0x1f69   :  { %v7625_v34 = vpop.f32.mrb[56].mxu0 }
0x1f6a   :  { %v12450_v19 = vpop.f32.mrb[57].mxu0  ;;  %v10994_v18 = vmul.f32 -1.442695, %v13529_v25  ;;  %v7626_v45 = vadd.f32 %v15492_v35, %v7625_v34 }
0x1f6f   :  { %v7835_v58 = vpop.f32.mrb[70].mxu1 }
0x1f70   :  { %v12483_v6 = vpop.f32.mrb[71].mxu1  ;;  %v7836_v46 = vadd.f32 %v15489_v41, %v7835_v58 }
0x1f71   :  { %v7695_v54 = vpop.f32.mrb[54].mxu0 }
0x1f72   :  { %v13527_v28 = vadd.f32 %v15066_v48, %v7695_v54  ;;  %v12461_v29 = vpop.f32.mrb[55].mxu0 }
0x1f73   :  { %v7865_v29 = vpop.permute.xlu1 %7864 }
0x1f74   :  { %v10993_v10 = vmul.f32 -1.442695, %v13527_v28 }
0x1f76   :  { %13776 = vpow2.f32 %v10993_v10 }
0x1f77   :  { %13778 = vpow2.f32 %v10994_v18 }
0x1f80   :  { %v13777_v59 = vpop.eup %13776 }
0x1f81   :  { %v7843_v12 = vadd.f32 1.0, %v13777_v59  ;;  %v13779_v26 = vpop.eup %13778 }
0x1f82   :  { %v7850_v14 = vadd.f32 1.0, %v13779_v26 }
0x1f83   :  { %13780 = vrcp.f32 %v7843_v12 }
0x1f84   :  { %13782 = vrcp.f32 %v7850_v14 }
0x1f8d   :  { %v13781_v36 = vpop.eup %13780 }
0x1f8e   :  { %v7853_v51 = vmul.f32 %v13781_v36, %v7836_v46  ;;  %v13783_v31 = vpop.eup %13782 }
0x1f8f   :  { %v7856_v60 = vsub.f32 1.0, %v13783_v31  ;;  %v7858_v6 = vmul.f32 %v13783_v31, %v15345_v23 }
0x1f90   :  { %v7854_v30 = vadd.f32 %v7853_v51, %v7626_v45 }
0x1f92   :  { %13784 = vtanh.f32 %v7854_v30 }
0x1f9c   :  { %v13785_v19 = vpop.eup %13784 }
0x1f9d   :  { %v7857_v54 = vmul.f32 %v13785_v19, %v7856_v60 }
0x1f9f   :  { %v15496_v28 = vadd.f32 %v7858_v6, %v7857_v54 }
0x1fa1   :  { %7861 = vrot.lane.b32.xlu0 %v15496_v28, %s13954_s24 }
0x2013   :  { %v7862_v58 = vpop.permute.xlu0 %7861 }
0x2014   :  { %v7867_v10 = vsel %vm290_vm13, %v15389_v9, %v7862_v58  ;;  %v15515_v9 = vld [vmem:[%s15982_s17] ss:$0 sm:$0xff] }
0x2015   :  { %v7868_v34 = vsel %vm4758_vm10, %v7867_v10, %v7865_v29 }
0x2016   :  { %12503 = vmatmul.mubr.msk.f32.vlgmr.msra.gmra.mrb[58].mxu0 %vm5248_vm11, %v7868_v34 }
0x2017   :  { %13306 = vmatpush3.bf16.msra.mxu0 %v14864_v7  ;;  %12544 = vmatprep.mubr.msk.f32.mxu0 %vm13948_vm3, %v15999_v33 }
0x2018   :  { %13307 = vmatprep.subr.bf16.mxu0 %v15988_v5 }
0x201b   :  { %13309 = vmatpush3.bf16.msra.mxu0 %v14884_v22 }
0x201c   :  { %12542 = vmatprep.subr.mxu0 %v15999_v33 }
0x201f   :  { %12543 = vmatpush3.msra.mxu0 %v15362_v38 }
0x2020   :  { %13316 = vmatprep.subr.bf16.mxu0 %v15988_v5 }
0x20e9   :  { %v7938_v23 = vpop.f32.mrb[58].mxu0 }
0x20ea   :  { %v15518_v25 = vadd.f32 %v15515_v9, %v7938_v23  ;;  %v12504_v18 = vpop.f32.mrb[59].mxu0 }
0x20ec   :  { %16002 = vst [vmem:[#allocation13_spill] sm:$0xff] %v15518_v25  ;;  %v7942_v59 = vsel %vm5322_vm7, %v15518_v25, -inf }
0x20ed   :  { %7943 = vmax.xlane.f32.xlu0 %v7942_v59 }
0x217a   :  { %v7944_v12 = vpop.xlane.xlu0 %7943 }
0x217b   :  { %vm7945_vm6 = vcmp.ge.f32.partialorder %v15518_v25, %v7944_v12 }
0x217c   :  { %v7946_v26 = vsel %vm7945_vm6, %v14094_v13, 16.0 }
0x217d   :  { %v7947_v14 = vsel %vm5322_vm7, %v7946_v26, inf }
0x217e   :  { %7948 = vmin.xlane.f32.xlu1 %v7947_v14 }
0x220b   :  { %v7949_v46 = vpop.xlane.xlu1 %7948 }
0x220c   :  { %vm7950_vm8 = vcmp.eq.f32.partialorder %v14094_v13, %v7949_v46 }
0x220d   :  { %v10996_v36 = vsel %vm7950_vm8, 1.0, %v15999_v33 }
0x220e   :  { %12510 = vmatmul.mubr.msk.f32.vlgmr.msra.gmra.mrb[72].mxu1 %vm194_vm0, %v10996_v36 }
0x220f   :  { %13292 = vmatpush3.bf16.msra.mxu1 %v14782_v63  ;;  %12520 = vmatprep.mubr.msk.f32.mxu1 %vm13948_vm3, %v15999_v33 }
0x2210   :  { %13293 = vmatprep.subr.bf16.mxu1 %v15988_v5 }
0x2213   :  { %13295 = vmatpush3.bf16.msra.mxu1 %v14799_v44 }
0x2214   :  { %13297 = vmatprep.subr.bf16.mxu1 %v14822_v53 }
0x2216   :  { %12521 = vmatmul.mubr.msk.f32.vlgmr.msra.gmra.mrb[74].mxu1 %vm521_vm14, %v15496_v28 }
0x2217   :  { %13299 = vmatpush3.bf16.msra.mxu1 %v14822_v53 }
0x2218   :  { %13301 = vmatprep.subr.bf16.mxu1 %v14827_v55 }
0x221b   :  { %13303 = vmatpush3.bf16.msra.mxu1 %v14827_v55 }
0x221c   :  { %13310 = vmatprep.subr.bf16.mxu1 %v15988_v5 }
0x22e1   :  { %v15540_v45 = vpop.f32.mrb[72].mxu1 }
0x22e2   :  { %v12511_v51 = vpop.f32.mrb[73].mxu1 }
0x22e9   :  { %v8094_v30 = vpop.f32.mrb[74].mxu1 }
0x22ea   :  { %v8105_v31 = vrot.slane %v8094_v30, %v14354_v57  ;;  %v12522_v60 = vpop.f32.mrb[75].mxu1 }
0x22ec   :  { %v8106_v19 = vcombine.high %v8105_v31, %v8105_v31  ;;  %v8113_v6 = vrot.slane %v8105_v31, %v14354_v57 }
0x22ee   :  { %v8120_v54 = vrot.slane %v8106_v19, %v14354_v57  ;;  %v8124_v58 = vrot.slane %v8113_v6, %v14080_v3 }
0x22f0   :  { %v8128_v29 = vrot.slane %v8120_v54, %v14080_v3  ;;  %v8131_v10 = vadd.f32 %v8124_v58, %v14836_v56 }
0x22f2   :  { %v8132_v34 = vadd.f32 %v14834_v32, %v8128_v29  ;;  %13786 = vtanh.f32 %v8131_v10 }
0x22f4   :  { %13788 = vtanh.f32 %v8132_v34 }
0x22fc   :  { %v13787_v23 = vpop.eup %13786 }
0x22fd   :  { %12531 = vmatprep.mubr.msk.f32.mxu1 %vm521_vm14, %v13787_v23 }
0x22fe   :  { %v13789_v18 = vpop.eup %13788 }
0x22ff   :  { %12532 = vmatmul.mubr.msk.f32.vlgmr.msra.gmra.mrb[76].mxu1 %vm521_vm14, %v13789_v18 }
0x2300   :  { %13312 = vmatpush3.bf16.msra.mxu1 %v14869_v11  ;;  %12557 = vmatprep.mubr.msk.f32.mxu1 %vm13948_vm3, %v15999_v33 }
0x2301   :  { %13313 = vmatprep.subr.bf16.mxu1 %v15988_v5 }
0x2304   :  { %13315 = vmatpush3.bf16.msra.mxu1 %v14889_v49 }
0x2305   :  { %12555 = vmatprep.subr.mxu1 %v15999_v33 }
0x2308   :  { %12556 = vmatpush3.msra.mxu1 %v15409_v15 }
0x2309   :  { %13328 = vmatprep.subr.bf16.mxu1 %v15988_v5 }
0x23d2   :  { %v12533_v59 = vpop.f32.mrb[76].mxu1 }
0x23d3   :  { %v8223_v12 = vsel %vm4678_vm9, %v12533_v59, -inf  ;;  %v8207_v26 = vpop.f32.mrb[77].mxu1 }
0x23d4   :  { %v8224_v14 = vrot.slane %v8223_v12, 4  ;;  %v8216_v46 = vsel %vm4678_vm9, %v8207_v26, -inf }
0x23d5   :  { %v8217_v36 = vrot.slane %v8216_v46, 4 }
0x23d6   :  { %v8225_v51 = vmax.f32 %v8223_v12, %v8224_v14 }
0x23d7   :  { %v8218_v30 = vmax.f32 %v8216_v46, %v8217_v36 }
0x23d8   :  { %v8226_v31 = vrot.slane %v8225_v51, 2 }
0x23d9   :  { %v8219_v60 = vrot.slane %v8218_v30, 2 }
0x23da   :  { %v8227_v19 = vmax.f32 %v8225_v51, %v8226_v31 }
0x23db   :  { %v8220_v6 = vmax.f32 %v8218_v30, %v8219_v60 }
0x23dc   :  { %v8228_v54 = vrot.slane %v8227_v19, 1 }
0x23dd   :  { %v8221_v58 = vrot.slane %v8220_v6, 1 }
0x23de   :  { %v8229_v29 = vmax.f32 %v8227_v19, %v8228_v54 }
0x23df   :  { %v8222_v10 = vmax.f32 %v8220_v6, %v8221_v58 }
0x23e0   :  { %v8231_v34 = vsub.f32 %v12533_v59, %v8229_v29 }
0x23e1   :  { %v8230_v23 = vsub.f32 %v8207_v26, %v8222_v10 }
0x23e2   :  { %v8234_v18 = vmul.f32 1.442695, %v8231_v34 }
0x23e3   :  { %v8232_v5 = vmul.f32 1.442695, %v8230_v23 }
0x23e4   :  { %13790 = vpow2.f32 %v8234_v18 }
0x23e5   :  { %13792 = vpow2.f32 %v8232_v5 }
0x23ee   :  { %v13791_v25 = vpop.eup %13790 }
0x23ef   :  { %v13793_v1 = vpop.eup %13792  ;;  %v8243_v20 = vsel %vm4678_vm9, %v13791_v25, 0.0 }
0x23f0   :  { %v8244_v12 = vrot.slane %v8243_v20, 4  ;;  %v8236_v14 = vsel %vm4678_vm9, %v13793_v1, 0.0 }
0x23f1   :  { %v8237_v46 = vrot.slane %v8236_v14, 4 }
0x23f2   :  { %v8245_v36 = vadd.f32 %v8244_v12, %v8243_v20 }
0x23f3   :  { %v8238_v51 = vadd.f32 %v8237_v46, %v8236_v14 }
0x23f4   :  { %v8246_v30 = vrot.slane %v8245_v36, 2 }
0x23f5   :  { %v8239_v31 = vrot.slane %v8238_v51, 2 }
0x23f6   :  { %v8247_v60 = vadd.f32 %v8246_v30, %v8245_v36 }
0x23f7   :  { %v8240_v19 = vadd.f32 %v8239_v31, %v8238_v51 }
0x23f8   :  { %v8248_v59 = vrot.slane %v8247_v60, 1 }
0x23f9   :  { %v8241_v26 = vrot.slane %v8240_v19, 1 }
0x23fa   :  { %v8249_v6 = vadd.f32 %v8248_v59, %v8247_v60 }
0x23fb   :  { %v8242_v54 = vadd.f32 %v8241_v26, %v8240_v19 }
0x23fc   :  { %13794 = vrcp.f32 %v8249_v6 }
0x23fd   :  { %13796 = vrcp.f32 %v8242_v54 }
0x2406   :  { %v13795_v5 = vpop.eup %13794 }
0x2407   :  { %v13797_v58 = vpop.eup %13796  ;;  %v8253_v29 = vmul.f32 %v13795_v5, %v13791_v25 }
0x2408   :  { %v8251_v10 = vmul.f32 %v13797_v58, %v13793_v1 }
0x2409   :  { %8261 = vperm.xlu1 %13616, %v8253_v29   ;;  %v16003_v29 = vmov 0.0|0.0  }
0x240a   :  { %8256 = vperm.xlu0 %13617, %v8251_v10  }
0x240e   :  { %8285 = vrot.lane.b32.xlu0 %v15540_v45, %s13952_s11 }
0x2488   :  { %v8262_v20 = vpop.permute.xlu1 %8261 }
0x2489   :  { %v8265_v34 = vmul.f32 %v8262_v20, %v14794_v42  ;;  %v8257_v23 = vpop.permute.xlu0 %8256 }
0x248a   :  { %v8264_v18 = vmul.f32 %v8257_v23, %v14779_v50 }
0x248b   :  { %v8273_v12 = vsel %vm521_vm14, %v8265_v34, 0.0 }
0x248c   :  { %v8274_v14 = vrot.slane %v8273_v12, 4  ;;  %v8266_v46 = vsel %vm521_vm14, %v8264_v18, 0.0 }
0x248d   :  { %v8267_v36 = vrot.slane %v8266_v46, 4  ;;  %v8286_v5 = vpop.permute.xlu0 %8285 }
0x248e   :  { %v8275_v51 = vadd.f32 %v8274_v14, %v8273_v12 }
0x248f   :  { %v8268_v25 = vadd.f32 %v8267_v36, %v8266_v46 }
0x2490   :  { %v8276_v1 = vrot.slane %v8275_v51, 2 }
0x2491   :  { %v8269_v30 = vrot.slane %v8268_v25, 2 }
0x2492   :  { %v8277_v31 = vadd.f32 %v8276_v1, %v8275_v51 }
0x2493   :  { %v8270_v60 = vadd.f32 %v8269_v30, %v8268_v25 }
0x2494   :  { %v8278_v19 = vrot.slane %v8277_v31, 1 }
0x2495   :  { %v8271_v59 = vrot.slane %v8270_v60, 1 }
0x2496   :  { %v8279_v26 = vadd.f32 %v8278_v19, %v8277_v31 }
0x2497   :  { %v8272_v6 = vadd.f32 %v8271_v59, %v8270_v60 }
0x2499   :  { %v8282_v54 = vsel %vm288_vm12, %v8279_v26, %v8272_v6 }
0x249a   :  { %v8288_v58 = vsel %vm521_vm14, %v8282_v54, %v8286_v5  ;;  %8737 = vrot.lane.b32.xlu0 %v8282_v54, %s13953_s26 }
0x249b   :  { %12545 = vmatmul.mubr.msk.f32.vlgmr.msra.gmra.mrb[60].mxu0 %vm4758_vm10, %v8288_v58  ;;  %12558 = vmatmul.mubr.msk.f32.vlgmr.msra.gmra.mrb[78].mxu1 %vm4758_vm10, %v8288_v58 }
0x249c   :  { %13318 = vmatpush3.bf16.msra.mxu0 %v14925_v39  ;;  %13330 = vmatpush3.bf16.msra.mxu1 %v14927_v40 }
0x249d   :  { %13319 = vmatprep.subr.bf16.mxu0 %v16003_v29  ;;  %13331 = vmatprep.subr.bf16.mxu1 %v16003_v29 }
0x249e   :  { %12592 = vmatprep.mubr.msk.f32.mxu1 %vm13948_vm3, %v15999_v33  ;;  %12570 = vmatprep.mubr.msk.f32.mxu0 %vm13948_vm3, %v15999_v33 }
0x24a0   :  { %13321 = vmatpush3.bf16.msra.mxu0 %v14948_v61  ;;  %13333 = vmatpush3.bf16.msra.mxu1 %v14950_v0 }
0x24a1   :  { %12568 = vmatprep.subr.mxu0 %v15999_v33  ;;  %13334 = vmatprep.subr.bf16.mxu1 %v16003_v29 }
0x24a3   :  { %12593 = vmatmul.mubr.msk.f32.vlgmr.msra.gmra.mrb[78].mxu1 %vm521_vm14, %v15496_v28 }
0x24a4   :  { %12569 = vmatpush3.msra.mxu0 %v15445_v2  ;;  %13336 = vmatpush3.bf16.msra.mxu1 %v14972_v43 }
0x24a5   :  { %12571 = vmatmul.mubr.msk.f32.vlgmr.msra.gmra.mrb[62].mxu0 %vm4758_vm10, %v8288_v58  ;;  %13322 = vmatprep.subr.bf16.mxu0 %v16003_v29 }
0x24a6   :  { %13324 = vmatpush3.bf16.msra.mxu0 %v14987_v16  ;;  %13337 = vmatprep.subr.bf16.mxu1 %v16003_v29 }
0x24a7   :  { %13325 = vmatprep.subr.bf16.mxu0 %v16003_v29  ;;  %12603 = vmatprep.mubr.msk.f32.mxu1 %vm13948_vm3, %v15999_v33 }
0x24a8   :  { %13339 = vmatpush3.bf16.msra.mxu1 %v14999_v8  ;;  %12581 = vmatprep.mubr.msk.f32.mxu0 %vm13948_vm3, %v15999_v33 }
0x24a9   :  { %13352 = vmatprep.subr.bf16.mxu1 %v16003_v29 }
0x24aa   :  { %13327 = vmatpush3.bf16.msra.mxu0 %v15005_v37 }
0x24ab   :  { %12604 = vmatmul.mubr.msk.f32.vlgmr.msra.gmra.mrb[80].mxu1 %vm521_vm14, %v15496_v28  ;;  %13340 = vmatprep.subr.bf16.mxu0 %v16003_v29 }
0x24ac   :  { %13354 = vmatpush3.bf16.msra.mxu1 %v14726_v52  ;;  %12631 = vmatprep.mubr.msk.f32.mxu1 %vm13948_vm3, %v15999_v33 }
0x24ad   :  { %12582 = vmatmul.mubr.msk.f32.vlgmr.msra.gmra.mrb[60].mxu0 %vm521_vm14, %v15496_v28  ;;  %13355 = vmatprep.subr.bf16.mxu1 %v16003_v29 }
0x24ae   :  { %13342 = vmatpush3.bf16.msra.mxu0 %v15035_v21  ;;  %12624 = vmatprep.mubr.msk.f32.mxu0 %vm13948_vm3, %v15999_v33 }
0x24af   :  { %13343 = vmatprep.subr.bf16.mxu0 %v16003_v29 }
0x24b2   :  { %13345 = vmatpush3.bf16.msra.mxu0 %v15041_v24 }
0x24b3   :  { %13346 = vmatprep.subr.bf16.mxu0 %v16003_v29 }
0x24b6   :  { %13348 = vmatpush3.bf16.msra.mxu0 %v15051_v27 }
0x24b7   :  { %13349 = vmatprep.subr.bf16.mxu0 %v16003_v29 }
0x24ba   :  { %13351 = vmatpush3.bf16.msra.mxu0 %v15061_v62 }
0x24bb   :  { %12622 = vmatprep.subr.mxu0 %v15999_v33 }
0x24be   :  { %12623 = vmatpush3.msra.mxu0 %v15483_v47 }
0x24bf   :  { %13369 = vmatprep.subr.bf16.mxu0 %v16003_v29 }
0x2576   :  { %v8638_v10 = vpop.f32.mrb[78].mxu1 }
0x2577   :  { %v12594_v20 = vpop.f32.mrb[79].mxu1  ;;  %v13533_v25 = vadd.f32 %v15068_v17, %v8638_v10 }
0x2578   :  { %v8498_v34 = vpop.f32.mrb[62].mxu0 }
0x2579   :  { %v12572_v23 = vpop.f32.mrb[63].mxu0  ;;  %v11008_v1 = vmul.f32 -1.442695, %v13533_v25  ;;  %v8499_v6 = vadd.f32 %v15492_v35, %v8498_v34 }
0x257e   :  { %v8708_v18 = vpop.f32.mrb[80].mxu1 }
0x257f   :  { %v12605_v12 = vpop.f32.mrb[81].mxu1  ;;  %v8709_v59 = vadd.f32 %v15489_v41, %v8708_v18  ;;  %v8738_v18 = vpop.permute.xlu0 %8737 }
0x2580   :  { %v8568_v14 = vpop.f32.mrb[60].mxu0 }
0x2581   :  { %v13531_v46 = vadd.f32 %v15066_v48, %v8568_v14  ;;  %v12583_v36 = vpop.f32.mrb[61].mxu0 }
0x2583   :  { %v11007_v51 = vmul.f32 -1.442695, %v13531_v46 }
0x2585   :  { %13798 = vpow2.f32 %v11007_v51 }
0x2586   :  { %13800 = vpow2.f32 %v11008_v1 }
0x258f   :  { %v13799_v30 = vpop.eup %13798 }
0x2590   :  { %v8716_v31 = vadd.f32 1.0, %v13799_v30  ;;  %v13801_v60 = vpop.eup %13800 }
0x2591   :  { %v8723_v19 = vadd.f32 1.0, %v13801_v60 }
0x2592   :  { %13802 = vrcp.f32 %v8716_v31 }
0x2593   :  { %13804 = vrcp.f32 %v8723_v19 }
0x259c   :  { %v13803_v26 = vpop.eup %13802 }
0x259d   :  { %v8726_v54 = vmul.f32 %v13803_v26, %v8709_v59  ;;  %v13805_v58 = vpop.eup %13804 }
0x259e   :  { %v8729_v20 = vsub.f32 1.0, %v13805_v58  ;;  %v8731_v23 = vmul.f32 %v13805_v58, %v15496_v28 }
0x259f   :  { %v8727_v5 = vadd.f32 %v8726_v54, %v8499_v6 }
0x25a1   :  { %13806 = vtanh.f32 %v8727_v5 }
0x25ab   :  { %v13807_v10 = vpop.eup %13806 }
0x25ac   :  { %v8730_v12 = vmul.f32 %v13807_v10, %v8729_v20 }
0x25ae   :  { %v15628_v14 = vadd.f32 %v8731_v23, %v8730_v12 }
0x25b0   :  { %8734 = vrot.lane.b32.xlu1 %v15628_v14, %s13954_s24 }
0x2622   :  { %v8735_v46 = vpop.permute.xlu1 %8734 }
0x2623   :  { %v8740_v36 = vsel %vm290_vm13, %v15540_v45, %v8735_v46 }
0x2624   :  { %v8741_v34 = vsel %vm4758_vm10, %v8740_v36, %v8738_v18 }
0x2625   :  { %12625 = vmatmul.mubr.msk.f32.vlgmr.msra.gmra.mrb[64].mxu0 %vm5248_vm11, %v8741_v34 }
0x2626   :  { %13371 = vmatpush3.bf16.msra.mxu0 %v14864_v7  ;;  %12666 = vmatprep.mubr.msk.f32.mxu0 %vm13948_vm3, %v15999_v33 }
0x2627   :  { %13372 = vmatprep.subr.bf16.mxu0 %v16003_v29 }
0x262a   :  { %13374 = vmatpush3.bf16.msra.mxu0 %v14884_v22 }
0x262b   :  { %12664 = vmatprep.subr.mxu0 %v15999_v33 }
0x262e   :  { %12665 = vmatpush3.msra.mxu0 %v15362_v38 }
0x262f   :  { %13381 = vmatprep.subr.bf16.mxu0 %v16003_v29 }
0x26f8   :  { %v8811_v28 = vpop.f32.mrb[64].mxu0 }
0x26f9   :  { %v15645_v45 = vadd.f32 %v15515_v9, %v8811_v28  ;;  %v12626_v51 = vpop.f32.mrb[65].mxu0 }
0x26fb   :  { %v8815_v25 = vsel %vm5322_vm7, %v15645_v45, -inf }
0x26fc   :  { %8816 = vmax.xlane.f32.xlu1 %v8815_v25 }
0x2789   :  { %v8817_v1 = vpop.xlane.xlu1 %8816 }
0x278a   :  { %vm8818_vm6 = vcmp.ge.f32.partialorder %v15645_v45, %v8817_v1 }
0x278b   :  { %v8819_v30 = vsel %vm8818_vm6, %v14094_v13, 16.0 }
0x278c   :  { %v8820_v31 = vsel %vm5322_vm7, %v8819_v30, inf }
0x278d   :  { %8821 = vmin.xlane.f32.xlu0 %v8820_v31 }
0x281a   :  { %v8822_v38 = vpop.xlane.xlu0 %8821 }
0x281b   :  { %vm8823_vm8 = vcmp.eq.f32.partialorder %v14094_v13, %v8822_v38 }
0x281c   :  { %v11010_v60 = vsel %vm8823_vm8, 1.0, %v15999_v33 }
0x281d   :  { %12632 = vmatmul.mubr.msk.f32.vlgmr.msra.gmra.mrb[82].mxu1 %vm194_vm0, %v11010_v60 }
0x281e   :  { %13357 = vmatpush3.bf16.msra.mxu1 %v14782_v63  ;;  %12642 = vmatprep.mubr.msk.f32.mxu1 %vm13948_vm3, %v15999_v33 }
0x281f   :  { %13358 = vmatprep.subr.bf16.mxu1 %v16003_v29 }
0x2822   :  { %13360 = vmatpush3.bf16.msra.mxu1 %v14799_v44 }
0x2823   :  { %13362 = vmatprep.subr.bf16.mxu1 %v14822_v53 }
0x2825   :  { %12643 = vmatmul.mubr.msk.f32.vlgmr.msra.gmra.mrb[84].mxu1 %vm521_vm14, %v15628_v14 }
0x2826   :  { %13364 = vmatpush3.bf16.msra.mxu1 %v14822_v53 }
0x2827   :  { %13366 = vmatprep.subr.bf16.mxu1 %v14827_v55 }
0x282a   :  { %13368 = vmatpush3.bf16.msra.mxu1 %v14827_v55 }
0x282b   :  { %13375 = vmatprep.subr.bf16.mxu1 %v16003_v29 }
0x28f0   :  { %v15667_v19 = vpop.f32.mrb[82].mxu1 }
0x28f1   :  { %v12633_v59 = vpop.f32.mrb[83].mxu1 }
0x28f8   :  { %v8967_v26 = vpop.f32.mrb[84].mxu1 }
0x28f9   :  { %v8978_v6 = vrot.slane %v8967_v26, %v14354_v57  ;;  %v12644_v54 = vpop.f32.mrb[85].mxu1 }
0x28fb   :  { %v8979_v5 = vcombine.high %v8978_v6, %v8978_v6  ;;  %v8986_v58 = vrot.slane %v8978_v6, %v14354_v57 }
0x28fd   :  { %v8993_v20 = vrot.slane %v8979_v5, %v14354_v57  ;;  %v8997_v10 = vrot.slane %v8986_v58, %v14080_v3 }
0x28ff   :  { %v9001_v23 = vrot.slane %v8993_v20, %v14080_v3  ;;  %v9004_v12 = vadd.f32 %v8997_v10, %v14836_v56 }
0x2901   :  { %v9005_v46 = vadd.f32 %v14834_v32, %v9001_v23  ;;  %13808 = vtanh.f32 %v9004_v12 }
0x2903   :  { %13810 = vtanh.f32 %v9005_v46 }
0x290b   :  { %v13809_v18 = vpop.eup %13808 }
0x290c   :  { %12653 = vmatprep.mubr.msk.f32.mxu1 %vm521_vm14, %v13809_v18 }
0x290d   :  { %v13811_v36 = vpop.eup %13810 }
0x290e   :  { %12654 = vmatmul.mubr.msk.f32.vlgmr.msra.gmra.mrb[86].mxu1 %vm521_vm14, %v13811_v36 }
0x290f   :  { %13377 = vmatpush3.bf16.msra.mxu1 %v14869_v11  ;;  %12679 = vmatprep.mubr.msk.f32.mxu1 %vm13948_vm3, %v15999_v33 }
0x2910   :  { %13378 = vmatprep.subr.bf16.mxu1 %v16003_v29 }
0x2913   :  { %13380 = vmatpush3.bf16.msra.mxu1 %v14889_v49 }
0x2914   :  { %12677 = vmatprep.subr.mxu1 %v15999_v33 }
0x2917   :  { %12678 = vmatpush3.msra.mxu1 %v15409_v15 }
0x2918   :  { %13393 = vmatprep.subr.bf16.mxu1 %v16003_v29 }
0x29e1   :  { %v12655_v34 = vpop.f32.mrb[86].mxu1 }
0x29e2   :  { %v9096_v28 = vsel %vm4678_vm9, %v12655_v34, -inf  ;;  %v9080_v51 = vpop.f32.mrb[87].mxu1 }
0x29e3   :  { %v9097_v25 = vrot.slane %v9096_v28, 4  ;;  %v9089_v1 = vsel %vm4678_vm9, %v9080_v51, -inf }
0x29e4   :  { %v9090_v30 = vrot.slane %v9089_v1, 4 }
0x29e5   :  { %v9098_v31 = vmax.f32 %v9096_v28, %v9097_v25 }
0x29e6   :  { %v9091_v38 = vmax.f32 %v9089_v1, %v9090_v30 }
0x29e7   :  { %v9099_v60 = vrot.slane %v9098_v31, 2 }
0x29e8   :  { %v9092_v59 = vrot.slane %v9091_v38, 2 }
0x29e9   :  { %v9100_v26 = vmax.f32 %v9098_v31, %v9099_v60 }
0x29ea   :  { %v9093_v6 = vmax.f32 %v9091_v38, %v9092_v59 }
0x29eb   :  { %v9101_v54 = vrot.slane %v9100_v26, 1 }
0x29ec   :  { %v9094_v5 = vrot.slane %v9093_v6, 1 }
0x29ed   :  { %v9102_v58 = vmax.f32 %v9100_v26, %v9101_v54 }
0x29ee   :  { %v9095_v15 = vmax.f32 %v9093_v6, %v9094_v5 }
0x29ef   :  { %v9104_v20 = vsub.f32 %v12655_v34, %v9102_v58 }
0x29f0   :  { %v9103_v10 = vsub.f32 %v9080_v51, %v9095_v15 }
0x29f1   :  { %v9107_v23 = vmul.f32 1.442695, %v9104_v20 }
0x29f2   :  { %v9105_v12 = vmul.f32 1.442695, %v9103_v10 }
0x29f3   :  { %13812 = vpow2.f32 %v9107_v23 }
0x29f4   :  { %13814 = vpow2.f32 %v9105_v12 }
0x29fd   :  { %v13813_v46 = vpop.eup %13812 }
0x29fe   :  { %v13815_v18 = vpop.eup %13814  ;;  %v9116_v36 = vsel %vm4678_vm9, %v13813_v46, 0.0 }
0x29ff   :  { %v9117_v28 = vrot.slane %v9116_v36, 4  ;;  %v9109_v25 = vsel %vm4678_vm9, %v13815_v18, 0.0 }
0x2a00   :  { %v9110_v1 = vrot.slane %v9109_v25, 4 }
0x2a01   :  { %v9118_v30 = vadd.f32 %v9117_v28, %v9116_v36 }
0x2a02   :  { %v9111_v31 = vadd.f32 %v9110_v1, %v9109_v25 }
0x2a03   :  { %v9119_v38 = vrot.slane %v9118_v30, 2 }
0x2a04   :  { %v9112_v60 = vrot.slane %v9111_v31, 2 }
0x2a05   :  { %v9120_v59 = vadd.f32 %v9119_v38, %v9118_v30 }
0x2a06   :  { %v9113_v26 = vadd.f32 %v9112_v60, %v9111_v31 }
0x2a07   :  { %v9121_v34 = vrot.slane %v9120_v59, 1 }
0x2a08   :  { %v9114_v51 = vrot.slane %v9113_v26, 1 }
0x2a09   :  { %v9122_v6 = vadd.f32 %v9121_v34, %v9120_v59 }
0x2a0a   :  { %v9115_v54 = vadd.f32 %v9114_v51, %v9113_v26 }
0x2a0b   :  { %13816 = vrcp.f32 %v9122_v6 }
0x2a0c   :  { %13818 = vrcp.f32 %v9115_v54 }
0x2a15   :  { %v13817_v5 = vpop.eup %13816 }
0x2a16   :  { %v13819_v58 = vpop.eup %13818  ;;  %v9126_v15 = vmul.f32 %v13817_v5, %v13813_v46 }
0x2a17   :  { %v9124_v20 = vmul.f32 %v13819_v58, %v13815_v18 }
0x2a18   :  { %9134 = vperm.xlu1 %13616, %v9126_v15  }
0x2a19   :  { %9129 = vperm.xlu0 %13617, %v9124_v20  }
0x2a1c   :  { %9158 = vrot.lane.b32.xlu1 %v15667_v19, %s13952_s11 }
0x2a97   :  { %v9135_v10 = vpop.permute.xlu1 %9134 }
0x2a98   :  { %v9138_v23 = vmul.f32 %v9135_v10, %v14794_v42  ;;  %v9130_v12 = vpop.permute.xlu0 %9129 }
0x2a99   :  { %v9137_v36 = vmul.f32 %v9130_v12, %v14779_v50 }
0x2a9a   :  { %v9146_v28 = vsel %vm521_vm14, %v9138_v23, 0.0 }
0x2a9b   :  { %v9147_v25 = vrot.slane %v9146_v28, 4  ;;  %v9139_v1 = vsel %vm521_vm14, %v9137_v36, 0.0  ;;  %v9159_v54 = vpop.permute.xlu1 %9158 }
0x2a9c   :  { %v9140_v30 = vrot.slane %v9139_v1, 4 }
0x2a9d   :  { %v9148_v31 = vadd.f32 %v9147_v25, %v9146_v28 }
0x2a9e   :  { %v9141_v46 = vadd.f32 %v9140_v30, %v9139_v1 }
0x2a9f   :  { %v9149_v18 = vrot.slane %v9148_v31, 2 }
0x2aa0   :  { %v9142_v38 = vrot.slane %v9141_v46, 2 }
0x2aa1   :  { %v9150_v60 = vadd.f32 %v9149_v18, %v9148_v31 }
0x2aa2   :  { %v9143_v59 = vadd.f32 %v9142_v38, %v9141_v46 }
0x2aa3   :  { %v9151_v26 = vrot.slane %v9150_v60, 1 }
0x2aa4   :  { %v9144_v34 = vrot.slane %v9143_v59, 1 }
0x2aa5   :  { %v9152_v51 = vadd.f32 %v9151_v26, %v9150_v60 }
0x2aa6   :  { %v9145_v6 = vadd.f32 %v9144_v34, %v9143_v59 }
0x2aa8   :  { %v9155_v5 = vsel %vm288_vm12, %v9152_v51, %v9145_v6 }
0x2aa9   :  { %v9161_v58 = vsel %vm521_vm14, %v9155_v5, %v9159_v54  ;;  %9610 = vrot.lane.b32.xlu1 %v9155_v5, %s13953_s26 }
0x2aaa   :  { %12667 = vmatmul.mubr.msk.f32.vlgmr.msra.gmra.mrb[66].mxu0 %vm4758_vm10, %v9161_v58  ;;  %12680 = vmatmul.mubr.msk.f32.vlgmr.msra.gmra.mrb[88].mxu1 %vm4758_vm10, %v9161_v58 }
0x2aab   :  { %13383 = vmatpush3.bf16.msra.mxu0 %v14925_v39  ;;  %13395 = vmatpush3.bf16.msra.mxu1 %v14927_v40 }
0x2aac   :  { %13384 = vmatprep.subr.bf16.mxu0 %v16003_v29  ;;  %13396 = vmatprep.subr.bf16.mxu1 %v16003_v29 }
0x2aad   :  { %12714 = vmatprep.mubr.msk.f32.mxu1 %vm13948_vm3, %v15999_v33  ;;  %12692 = vmatprep.mubr.msk.f32.mxu0 %vm13948_vm3, %v15999_v33 }
0x2aaf   :  { %13386 = vmatpush3.bf16.msra.mxu0 %v14948_v61  ;;  %13398 = vmatpush3.bf16.msra.mxu1 %v14950_v0 }
0x2ab0   :  { %12690 = vmatprep.subr.mxu0 %v15999_v33  ;;  %13399 = vmatprep.subr.bf16.mxu1 %v16003_v29 }
0x2ab2   :  { %12715 = vmatmul.mubr.msk.f32.vlgmr.msra.gmra.mrb[88].mxu1 %vm521_vm14, %v15628_v14 }
0x2ab3   :  { %12691 = vmatpush3.msra.mxu0 %v15445_v2  ;;  %13401 = vmatpush3.bf16.msra.mxu1 %v14972_v43 }
0x2ab4   :  { %12693 = vmatmul.mubr.msk.f32.vlgmr.msra.gmra.mrb[68].mxu0 %vm4758_vm10, %v9161_v58  ;;  %13387 = vmatprep.subr.bf16.mxu0 %v16003_v29 }
0x2ab5   :  { %13389 = vmatpush3.bf16.msra.mxu0 %v14987_v16  ;;  %13402 = vmatprep.subr.bf16.mxu1 %v16003_v29 }
0x2ab6   :  { %13390 = vmatprep.subr.bf16.mxu0 %v16003_v29  ;;  %12725 = vmatprep.mubr.msk.f32.mxu1 %vm13948_vm3, %v15999_v33 }
0x2ab7   :  { %13404 = vmatpush3.bf16.msra.mxu1 %v14999_v8  ;;  %12703 = vmatprep.mubr.msk.f32.mxu0 %vm13948_vm3, %v15999_v33 }
0x2ab8   :  { %13417 = vmatprep.subr.bf16.mxu1 %v16003_v29 }
0x2ab9   :  { %13392 = vmatpush3.bf16.msra.mxu0 %v15005_v37 }
0x2aba   :  { %12726 = vmatmul.mubr.msk.f32.vlgmr.msra.gmra.mrb[90].mxu1 %vm521_vm14, %v15628_v14  ;;  %13405 = vmatprep.subr.bf16.mxu0 %v16003_v29 }
0x2abb   :  { %13419 = vmatpush3.bf16.msra.mxu1 %v14726_v52  ;;  %12753 = vmatprep.mubr.msk.f32.mxu1 %vm13948_vm3, %v15999_v33 }
0x2abc   :  { %12704 = vmatmul.mubr.msk.f32.vlgmr.msra.gmra.mrb[66].mxu0 %vm521_vm14, %v15628_v14  ;;  %13420 = vmatprep.subr.bf16.mxu1 %v16003_v29 }
0x2abd   :  { %13407 = vmatpush3.bf16.msra.mxu0 %v15035_v21  ;;  %12746 = vmatprep.mubr.msk.f32.mxu0 %vm13948_vm3, %v15999_v33 }
0x2abe   :  { %13408 = vmatprep.subr.bf16.mxu0 %v16003_v29 }
0x2ac1   :  { %13410 = vmatpush3.bf16.msra.mxu0 %v15041_v24 }
0x2ac2   :  { %13411 = vmatprep.subr.bf16.mxu0 %v16003_v29 }
0x2ac5   :  { %13413 = vmatpush3.bf16.msra.mxu0 %v15051_v27 }
0x2ac6   :  { %13414 = vmatprep.subr.bf16.mxu0 %v16003_v29 }
0x2ac9   :  { %13416 = vmatpush3.bf16.msra.mxu0 %v15061_v62 }
0x2aca   :  { %12744 = vmatprep.subr.mxu0 %v15999_v33 }
0x2acd   :  { %12745 = vmatpush3.msra.mxu0 %v15483_v47 }
0x2ace   :  { %13434 = vmatprep.subr.bf16.mxu0 %v16003_v29 }
0x2b85   :  { %v9511_v52 = vpop.f32.mrb[88].mxu1 }
0x2b86   :  { %v12716_v2 = vpop.f32.mrb[89].mxu1  ;;  %v13537_v1 = vadd.f32 %v15068_v17, %v9511_v52 }
0x2b87   :  { %v9371_v15 = vpop.f32.mrb[68].mxu0 }
0x2b88   :  { %v12694_v20 = vpop.f32.mrb[69].mxu0  ;;  %v11022_v30 = vmul.f32 -1.442695, %v13537_v1  ;;  %v9372_v59 = vadd.f32 %v15492_v35, %v9371_v15 }
0x2b8d   :  { %v9581_v10 = vpop.f32.mrb[90].mxu1 }
0x2b8e   :  { %v12727_v23 = vpop.f32.mrb[91].mxu1  ;;  %v9582_v38 = vadd.f32 %v15489_v41, %v9581_v10  ;;  %v9611_v41 = vpop.permute.xlu1 %9610 }
0x2b8f   :  { %v9441_v12 = vpop.f32.mrb[66].mxu0 }
0x2b90   :  { %v13535_v36 = vadd.f32 %v15066_v48, %v9441_v12  ;;  %v12705_v28 = vpop.f32.mrb[67].mxu0 }
0x2b92   :  { %v11021_v25 = vmul.f32 -1.442695, %v13535_v36 }
0x2b94   :  { %13820 = vpow2.f32 %v11021_v25 }
0x2b95   :  { %13822 = vpow2.f32 %v11022_v30 }
0x2b9e   :  { %v13821_v31 = vpop.eup %13820 }
0x2b9f   :  { %v9589_v47 = vadd.f32 1.0, %v13821_v31  ;;  %v13823_v46 = vpop.eup %13822 }
0x2ba0   :  { %v9596_v18 = vadd.f32 1.0, %v13823_v46 }
0x2ba1   :  { %13824 = vrcp.f32 %v9589_v47 }
0x2ba2   :  { %13826 = vrcp.f32 %v9596_v18 }
0x2bab   :  { %v13825_v60 = vpop.eup %13824 }
0x2bac   :  { %v9599_v26 = vmul.f32 %v13825_v60, %v9582_v38  ;;  %v13827_v51 = vpop.eup %13826 }
0x2bad   :  { %v9602_v6 = vsub.f32 1.0, %v13827_v51  ;;  %v9604_v5 = vmul.f32 %v13827_v51, %v15628_v14  ;;  %v13864_v14 = vld [vmem:[%s15977_s12 + $0x20] sm:$0xff] }
0x2bae   :  { %v9600_v34 = vadd.f32 %v9599_v26, %v9372_v59 }
0x2bb0   :  { %13828 = vtanh.f32 %v9600_v34 }
0x2bba   :  { %v13829_v54 = vpop.eup %13828 }
0x2bbb   :  { %v9603_v58 = vmul.f32 %v13829_v54, %v9602_v6 }
0x2bbd   :  { %v15755_v52 = vadd.f32 %v9604_v5, %v9603_v58 }
0x2bbf   :  { %9607 = vrot.lane.b32.xlu0 %v15755_v52, %s13954_s24 }
0x2c31   :  { %v9608_v2 = vpop.permute.xlu0 %9607 }
0x2c32   :  { %v9613_v20 = vsel %vm290_vm13, %v15667_v19, %v9608_v2 }
0x2c33   :  { %v9614_v35 = vsel %vm4758_vm10, %v9613_v20, %v9611_v41 }
0x2c34   :  { %12747 = vmatmul.mubr.msk.f32.vlgmr.msra.gmra.mrb[70].mxu0 %vm5248_vm11, %v9614_v35 }
0x2c35   :  { %13436 = vmatpush3.bf16.msra.mxu0 %v14864_v7  ;;  %12788 = vmatprep.mubr.msk.f32.mxu0 %vm13948_vm3, %v15999_v33 }
0x2c36   :  { %13437 = vmatprep.subr.bf16.mxu0 %v16003_v29 }
0x2c39   :  { %13439 = vmatpush3.bf16.msra.mxu0 %v14884_v22 }
0x2c3a   :  { %12786 = vmatprep.subr.mxu0 %v15999_v33 }
0x2c3d   :  { %12787 = vmatpush3.msra.mxu0 %v13864_v14 }
0x2c3e   :  { %13446 = vmatprep.subr.bf16.mxu0 %v16003_v29 }
0x2d07   :  { %v9684_v19 = vpop.f32.mrb[70].mxu0 }
0x2d08   :  { %v15774_v15 = vadd.f32 %v15515_v9, %v9684_v19  ;;  %v12748_v7 = vpop.f32.mrb[71].mxu0 }
0x2d0a   :  { %v9688_v10 = vsel %vm5322_vm7, %v15774_v15, -inf }
0x2d0b   :  { %9689 = vmax.xlane.f32.xlu0 %v9688_v10 }
0x2d98   :  { %v9690_v23 = vpop.xlane.xlu0 %9689 }
0x2d99   :  { %vm9691_vm6 = vcmp.ge.f32.partialorder %v15774_v15, %v9690_v23 }
0x2d9a   :  { %v9692_v22 = vsel %vm9691_vm6, %v14094_v13, 16.0 }
0x2d9b   :  { %v9693_v12 = vsel %vm5322_vm7, %v9692_v22, inf }
0x2d9c   :  { %9694 = vmin.xlane.f32.xlu1 %v9693_v12 }
0x2e29   :  { %v9695_v36 = vpop.xlane.xlu1 %9694 }
0x2e2a   :  { %vm9696_vm8 = vcmp.eq.f32.partialorder %v14094_v13, %v9695_v36 }
0x2e2b   :  { %v11024_v28 = vsel %vm9696_vm8, 1.0, %v15999_v33 }
0x2e2c   :  { %12754 = vmatmul.mubr.msk.f32.vlgmr.msra.gmra.mrb[92].mxu1 %vm194_vm0, %v11024_v28 }
0x2e2d   :  { %13422 = vmatpush3.bf16.msra.mxu1 %v14782_v63  ;;  %12764 = vmatprep.mubr.msk.f32.mxu1 %vm13948_vm3, %v15999_v33 }
0x2e2e   :  { %13423 = vmatprep.subr.bf16.mxu1 %v16003_v29 }
0x2e31   :  { %13425 = vmatpush3.bf16.msra.mxu1 %v14799_v44 }
0x2e32   :  { %13427 = vmatprep.subr.bf16.mxu1 %v14822_v53 }
0x2e34   :  { %12765 = vmatmul.mubr.msk.f32.vlgmr.msra.gmra.mrb[94].mxu1 %vm521_vm14, %v15755_v52 }
0x2e35   :  { %13429 = vmatpush3.bf16.msra.mxu1 %v14822_v53 }
0x2e36   :  { %13431 = vmatprep.subr.bf16.mxu1 %v14827_v55 }
0x2e39   :  { %13433 = vmatpush3.bf16.msra.mxu1 %v14827_v55 }
0x2e3a   :  { %13440 = vmatprep.subr.bf16.mxu1 %v16003_v29 }
0x2eff   :  { %v15796_v63 = vpop.f32.mrb[92].mxu1 }
0x2f00   :  { %v12755_v9 = vpop.f32.mrb[93].mxu1 }
0x2f07   :  { %v9840_v25 = vpop.f32.mrb[94].mxu1 }
0x2f08   :  { %v9851_v1 = vrot.slane %v9840_v25, %v14354_v57  ;;  %v12766_v44 = vpop.f32.mrb[95].mxu1 }
0x2f0a   :  { %v9852_v30 = vcombine.high %v9851_v1, %v9851_v1  ;;  %v9859_v31 = vrot.slane %v9851_v1, %v14354_v57 }
0x2f0c   :  { %v9866_v47 = vrot.slane %v9852_v30, %v14354_v57  ;;  %v9870_v53 = vrot.slane %v9859_v31, %v14080_v3 }
0x2f0e   :  { %v9874_v46 = vrot.slane %v9866_v47, %v14080_v3  ;;  %v9877_v55 = vadd.f32 %v9870_v53, %v14836_v56 }
0x2f10   :  { %v9878_v18 = vadd.f32 %v14834_v32, %v9874_v46  ;;  %13830 = vtanh.f32 %v9877_v55  ;;  %v13865_v32 = vld [vmem:[%s15977_s12 + $0x48] sm:$0xff] }
0x2f12   :  { %13832 = vtanh.f32 %v9878_v18 }
0x2f1a   :  { %v13831_v38 = vpop.eup %13830 }
0x2f1b   :  { %12775 = vmatprep.mubr.msk.f32.mxu1 %vm521_vm14, %v13831_v38 }
0x2f1c   :  { %v13833_v60 = vpop.eup %13832 }
0x2f1d   :  { %12776 = vmatmul.mubr.msk.f32.vlgmr.msra.gmra.mrb[96].mxu1 %vm521_vm14, %v13833_v60 }
0x2f1e   :  { %13442 = vmatpush3.bf16.msra.mxu1 %v14869_v11  ;;  %12801 = vmatprep.mubr.msk.f32.mxu1 %vm13948_vm3, %v15999_v33 }
0x2f1f   :  { %13443 = vmatprep.subr.bf16.mxu1 %v16003_v29 }
0x2f22   :  { %13445 = vmatpush3.bf16.msra.mxu1 %v14889_v49 }
0x2f23   :  { %12799 = vmatprep.subr.mxu1 %v15999_v33 }
0x2f26   :  { %12800 = vmatpush3.msra.mxu1 %v13865_v32 }
0x2f27   :  { %13458 = vmatprep.subr.bf16.mxu1 %v16003_v29 }
0x2ff0   :  { %v12777_v56 = vpop.f32.mrb[96].mxu1 }
0x2ff1   :  { %v9969_v59 = vsel %vm4678_vm9, %v12777_v56, -inf  ;;  %v9953_v11 = vpop.f32.mrb[97].mxu1 }
0x2ff2   :  { %v9970_v26 = vrot.slane %v9969_v59, 4  ;;  %v9962_v34 = vsel %vm4678_vm9, %v9953_v11, -inf }
0x2ff3   :  { %v9963_v51 = vrot.slane %v9962_v34, 4 }
0x2ff4   :  { %v9971_v6 = vmax.f32 %v9969_v59, %v9970_v26 }
0x2ff5   :  { %v9964_v54 = vmax.f32 %v9962_v34, %v9963_v51 }
0x2ff6   :  { %v9972_v49 = vrot.slane %v9971_v6, 2 }
0x2ff7   :  { %v9965_v5 = vrot.slane %v9964_v54, 2 }
0x2ff8   :  { %v9973_v58 = vmax.f32 %v9971_v6, %v9972_v49 }
0x2ff9   :  { %v9966_v2 = vmax.f32 %v9964_v54, %v9965_v5 }
0x2ffa   :  { %v9974_v41 = vrot.slane %v9973_v58, 1 }
0x2ffb   :  { %v9967_v20 = vrot.slane %v9966_v2, 1 }
0x2ffc   :  { %v9975_v35 = vmax.f32 %v9973_v58, %v9974_v41 }
0x2ffd   :  { %v9968_v14 = vmax.f32 %v9966_v2, %v9967_v20 }
0x2ffe   :  { %v9977_v19 = vsub.f32 %v12777_v56, %v9975_v35 }
0x2fff   :  { %v9976_v7 = vsub.f32 %v9953_v11, %v9968_v14 }
0x3000   :  { %v9980_v10 = vmul.f32 1.442695, %v9977_v19 }
0x3001   :  { %v9978_v23 = vmul.f32 1.442695, %v9976_v7 }
0x3002   :  { %13834 = vpow2.f32 %v9980_v10 }
0x3003   :  { %13836 = vpow2.f32 %v9978_v23 }
0x300c   :  { %v13835_v22 = vpop.eup %13834 }
0x300d   :  { %v13837_v12 = vpop.eup %13836  ;;  %v9989_v36 = vsel %vm4678_vm9, %v13835_v22, 0.0 }
0x300e   :  { %v9990_v28 = vrot.slane %v9989_v36, 4  ;;  %v9982_v9 = vsel %vm4678_vm9, %v13837_v12, 0.0 }
0x300f   :  { %v9983_v25 = vrot.slane %v9982_v9, 4 }
0x3010   :  { %v9991_v1 = vadd.f32 %v9990_v28, %v9989_v36 }
0x3011   :  { %v9984_v44 = vadd.f32 %v9983_v25, %v9982_v9 }
0x3012   :  { %v9992_v30 = vrot.slane %v9991_v1, 2 }
0x3013   :  { %v9985_v31 = vrot.slane %v9984_v44, 2 }
0x3014   :  { %v9993_v47 = vadd.f32 %v9992_v30, %v9991_v1  ;;  %v13868_v1 = vld [vmem:[#allocation5 + $0x2] ss:$0 sm:$0xff] }
0x3015   :  { %v9986_v53 = vadd.f32 %v9985_v31, %v9984_v44  ;;  %v13869_v31 = vld [vmem:[#allocation2 + $0x2] ss:$0 sm:$0xff] }
0x3016   :  { %v9994_v46 = vrot.slane %v9993_v47, 1 }
0x3017   :  { %v9987_v55 = vrot.slane %v9986_v53, 1 }
0x3018   :  { %v9995_v18 = vadd.f32 %v9994_v46, %v9993_v47 }
0x3019   :  { %v9988_v38 = vadd.f32 %v9987_v55, %v9986_v53 }
0x301a   :  { %13838 = vrcp.f32 %v9995_v18 }
0x301b   :  { %13840 = vrcp.f32 %v9988_v38 }
0x3024   :  { %v13839_v60 = vpop.eup %13838 }
0x3025   :  { %v13841_v32 = vpop.eup %13840  ;;  %v9999_v56 = vmul.f32 %v13839_v60, %v13835_v22 }
0x3026   :  { %v9997_v59 = vmul.f32 %v13841_v32, %v13837_v12 }
0x3027   :  { %10007 = vperm.xlu1 %13616, %v9999_v56  }
0x3028   :  { %10002 = vperm.xlu0 %13617, %v9997_v59  }
0x302c   :  { %10031 = vrot.lane.b32.xlu0 %v15796_v63, %s13952_s11 }
0x30a6   :  { %v10008_v11 = vpop.permute.xlu1 %10007 }
0x30a7   :  { %v10011_v26 = vmul.f32 %v10008_v11, %v14794_v42  ;;  %v10003_v34 = vpop.permute.xlu0 %10002 }
0x30a8   :  { %v10010_v51 = vmul.f32 %v10003_v34, %v14779_v50  ;;  %v10593_v34 = vrot.slane %v15108_v4, %v14354_v57 }
0x30a9   :  { %v10019_v6 = vsel %vm521_vm14, %v10011_v26, 0.0 }
0x30aa   :  { %v10020_v54 = vrot.slane %v10019_v6, 4  ;;  %v10012_v49 = vsel %vm521_vm14, %v10010_v51, 0.0 }
0x30ab   :  { %v10013_v5 = vrot.slane %v10012_v49, 4  ;;  %v10032_v22 = vpop.permute.xlu0 %10031 }
0x30ac   :  { %v10021_v58 = vadd.f32 %v10020_v54, %v10019_v6  ;;  %v16005_v54 = vld [vmem:[#allocation12_spill] sm:$0xff] }
0x30ad   :  { %v10014_v2 = vadd.f32 %v10013_v5, %v10012_v49  ;;  %v10639_v49 = vrot.slane %v16005_v54, %v14354_v57  ;;  %v16006_v5 = vld [vmem:[#allocation13_spill] sm:$0xff] }
0x30ae   :  { %v10022_v41 = vrot.slane %v10021_v58, 2 }
0x30af   :  { %v10015_v20 = vrot.slane %v10014_v2, 2 }
0x30b0   :  { %v10023_v35 = vadd.f32 %v10022_v41, %v10021_v58  ;;  %v10662_v58 = vrot.slane %v16006_v5, %v14354_v57  ;;  %v10601_v41 = vrot.slane %v10593_v34, %v14354_v57 }
0x30b1   :  { %v10016_v14 = vadd.f32 %v10015_v20, %v10014_v2  ;;  %v10640_v20 = vcombine.high %v10639_v49, %v10639_v49 }
0x30b2   :  { %v10024_v19 = vrot.slane %v10023_v35, 1 }
0x30b3   :  { %v10017_v7 = vrot.slane %v10016_v14, 1 }
0x30b4   :  { %v10025_v10 = vadd.f32 %v10024_v19, %v10023_v35  ;;  %v10663_v19 = vcombine.high %v10662_v58, %v10662_v58 }
0x30b5   :  { %v10018_v23 = vadd.f32 %v10017_v7, %v10016_v14  ;;  %v10647_v7 = vrot.slane %v10639_v49, %v14354_v57 }
0x30b7   :  { %v10028_v42 = vsel %vm288_vm12, %v10025_v10, %v10018_v23  ;;  %vm16007_vm12 = vcmask 1045504  }
0x30b8   :  { %v10034_v50 = vsel %vm521_vm14, %v10028_v42, %v10032_v22  ;;  %10483 = vrot.lane.b32.xlu0 %v10028_v42, %s13953_s26  ;;  %v10670_v42 = vrot.slane %v10662_v58, %v14354_v57 }
0x30b9   :  { %12789 = vmatmul.mubr.msk.f32.vlgmr.msra.gmra.mrb[72].mxu0 %vm4758_vm10, %v10034_v50  ;;  %12802 = vmatmul.mubr.msk.f32.vlgmr.msra.gmra.mrb[98].mxu1 %vm4758_vm10, %v10034_v50 }
0x30ba   :  { %13448 = vmatpush3.bf16.msra.mxu0 %v14925_v39  ;;  %13460 = vmatpush3.bf16.msra.mxu1 %v14927_v40  ;;  %v13866_v39 = vld [vmem:[%s15977_s12 + $0x70] sm:$0xff]  ;;  %v13867_v40 = vld [vmem:[%s15981_s16 + $0x40] sm:$0xff] }
0x30bb   :  { %13449 = vmatprep.subr.bf16.mxu0 %v16003_v29  ;;  %13461 = vmatprep.subr.bf16.mxu1 %v16003_v29 }
0x30bc   :  { %12836 = vmatprep.mubr.msk.f32.mxu1 %vm13948_vm3, %v15999_v33  ;;  %12814 = vmatprep.mubr.msk.f32.mxu0 %vm13948_vm3, %v15999_v33 }
0x30be   :  { %13451 = vmatpush3.bf16.msra.mxu0 %v14948_v61  ;;  %13463 = vmatpush3.bf16.msra.mxu1 %v14950_v0 }
0x30bf   :  { %12812 = vmatprep.subr.mxu0 %v15999_v33  ;;  %13464 = vmatprep.subr.bf16.mxu1 %v16003_v29 }
0x30c1   :  { %12837 = vmatmul.mubr.msk.f32.vlgmr.msra.gmra.mrb[98].mxu1 %vm521_vm14, %v15755_v52 }
0x30c2   :  { %12813 = vmatpush3.msra.mxu0 %v13866_v39  ;;  %13466 = vmatpush3.bf16.msra.mxu1 %v14972_v43  ;;  %v10654_v39 = vrot.slane %v10640_v20, %v14354_v57 }
0x30c3   :  { %12815 = vmatmul.mubr.msk.f32.vlgmr.msra.gmra.mrb[74].mxu0 %vm4758_vm10, %v10034_v50  ;;  %13452 = vmatprep.subr.bf16.mxu0 %v16003_v29  ;;  %v10750_v50 = vrot.slane %v10601_v41, %v14080_v3 }
0x30c4   :  { %13454 = vmatpush3.bf16.msra.mxu0 %v14987_v16  ;;  %13467 = vmatprep.subr.bf16.mxu1 %v16003_v29 }
0x30c5   :  { %13455 = vmatprep.subr.bf16.mxu0 %v16003_v29  ;;  %12847 = vmatprep.mubr.msk.f32.mxu1 %vm13948_vm3, %v15999_v33 }
0x30c6   :  { %13469 = vmatpush3.bf16.msra.mxu1 %v14999_v8  ;;  %12825 = vmatprep.mubr.msk.f32.mxu0 %vm13948_vm3, %v15999_v33 }
0x30c8   :  { %13457 = vmatpush3.bf16.msra.mxu0 %v15005_v37 }
0x30c9   :  { %12848 = vmatmul.mubr.msk.f32.vlgmr.msra.gmra.mrb[100].mxu1 %vm521_vm14, %v15755_v52  ;;  %13470 = vmatprep.subr.bf16.mxu0 %v16003_v29 }
0x30cb   :  { %12826 = vmatmul.mubr.msk.f32.vlgmr.msra.gmra.mrb[72].mxu0 %vm521_vm14, %v15755_v52  ;;  %vm16009_vm14 = vmmov %vm16007_vm12 }
0x30cc   :  { %13472 = vmatpush3.bf16.msra.mxu0 %v15035_v21  ;;  %12868 = vmatprep.mubr.msk.f32.mxu0 %vm13948_vm3, %v15999_v33  ;;  %vm4403_vm3 = vcmp.eq.f32.partialorder %v14094_v13, 1.0  ;;  %v10685_v13 = vrot.slane %v15645_v45, %v14354_v57 }
0x30cd   :  { %13473 = vmatprep.subr.bf16.mxu0 %v16003_v29  ;;  %v10932_v26 = vsel %vm4403_vm3, 1.0, %v15999_v33 }
0x30ce   :  { %v10568_v6 = vrot.slane %v10932_v26, %v14354_v57  ;;  %v10686_v10 = vcombine.high %v10685_v13, %v10685_v13 }
0x30d0   :  { %13475 = vmatpush3.bf16.msra.mxu0 %v15041_v24  ;;  %v10569_v4 = vcombine.high %v10568_v6, %v10568_v6  ;;  %v10576_v23 = vrot.slane %v10568_v6, %v14354_v57 }
0x30d1   :  { %13476 = vmatprep.subr.bf16.mxu0 %v16003_v29 }
0x30d4   :  { %13478 = vmatpush3.bf16.msra.mxu0 %v15051_v27 }
0x30d5   :  { %13479 = vmatprep.subr.bf16.mxu0 %v16003_v29 }
0x30d8   :  { %13481 = vmatpush3.bf16.msra.mxu0 %v15061_v62 }
0x30d9   :  { %12866 = vmatprep.subr.mxu0 %v15999_v33  ;;  %v10708_v33 = vrot.slane %v15774_v15, %v14354_v57  ;;  %v10583_v15 = vrot.slane %v10569_v4, %v14354_v57 }
0x30db   :  { %v10709_v22 = vcombine.high %v10708_v33, %v10708_v33 }
0x30dc   :  { %12867 = vmatpush3.msra.mxu0 %v13867_v40  ;;  %v10693_v40 = vrot.slane %v10685_v13, %v14354_v57 }
0x312a   :  { %v10484_v56 = vpop.permute.xlu0 %10483 }
0x3194   :  { %v10384_v61 = vpop.f32.mrb[98].mxu1 }
0x3195   :  { %v12838_v0 = vpop.f32.mrb[99].mxu1  ;;  %v13541_v62 = vadd.f32 %v15068_v17, %v10384_v61 }
0x3196   :  { %v10244_v43 = vpop.f32.mrb[74].mxu0 }
0x3197   :  { %v12816_v16 = vpop.f32.mrb[75].mxu0  ;;  %v11036_v12 = vmul.f32 -1.442695, %v13541_v62  ;;  %v10245_v47 = vadd.f32 %v13869_v31, %v10244_v43  ;;  %v10677_v43 = vrot.slane %v10663_v19, %v14354_v57 }
0x3198   :  { %v10716_v16 = vrot.slane %v10708_v33, %v14354_v57 }
0x3199   :  { %v10784_v31 = vrot.slane %v10677_v43, %v14080_v3 }
0x319c   :  { %v10454_v8 = vpop.f32.mrb[100].mxu1 }
0x319d   :  { %v12849_v37 = vpop.f32.mrb[101].mxu1  ;;  %v10455_v44 = vadd.f32 %v13868_v1, %v10454_v8 }
0x319e   :  { %v10314_v21 = vpop.f32.mrb[72].mxu0  ;;  %v10770_v37 = vrot.slane %v10647_v7, %v14080_v3 }
0x319f   :  { %v13539_v24 = vadd.f32 %v15066_v48, %v10314_v21  ;;  %v12827_v27 = vpop.f32.mrb[73].mxu0  ;;  %v10700_v21 = vrot.slane %v10686_v10, %v14354_v57 }
0x31a1   :  { %v11035_v29 = vmul.f32 -1.442695, %v13539_v24  ;;  %v13870_v24 = vld [vmem:[%s15982_s17] ss:$0 sm:$0xff]  ;;  %s13955_s17 = smov [#allocation7]  }
0x31a2   :  { %s10838_s10 = sshll.u32 %s13955_s17, 4  ;;  %s10839_s10 = int_to_ptr.vmem [resolvable:$true] %s10838_s10 }
0x31a3   :  { %13842 = vpow2.f32 %v11035_v29  ;;  %s13915_s4 = scalar_lea.vmem %s10839_s10, 256  ;;  %p13920_p3 = scmp.lt.s32.totalorder %s10839_s10, %s10839_s10 }
0x31a4   :  { %13844 = vpow2.f32 %v11036_v12  ;;  %v10780_v12 = vrot.slane %v10670_v42, %v14080_v3  ;;  %p13916_p2 = scmp.ne.s32.totalorder %s10839_s10, %s13915_s4  ;;  %p13921_p4 = scmp.lt.s32.totalorder %s13915_s4, %s13915_s4 }
0x31a6   :  { %p13922_p5 = por %p13921_p4, %p13920_p3 }
0x31a8   :  { %p13923_p6 = pnand %p13922_p5, %p13916_p2 }
0x31ad   :  { %v13843_v36 = vpop.eup %13842 }
0x31ae   :  { %v10462_v28 = vadd.f32 1.0, %v13843_v36  ;;  %v13845_v9 = vpop.eup %13844  ;;  %v10723_v36 = vrot.slane %v10709_v22, %v14354_v57 }
0x31af   :  { %v10469_v25 = vadd.f32 1.0, %v13845_v9  ;;  %v10774_v9 = vrot.slane %v10654_v39, %v14080_v3 }
0x31b0   :  { %13846 = vrcp.f32 %v10462_v28  ;;  %v10817_v28 = vsel %vm4299_vm15, %v10576_v23, %v10750_v50 }
0x31b1   :  { %13848 = vrcp.f32 %v10469_v25  ;;  %v10790_v25 = vrot.slane %v10693_v40, %v14080_v3 }
0x31ba   :  { %v13847_v30 = vpop.eup %13846 }
0x31bb   :  { %v10472_v53 = vmul.f32 %v13847_v30, %v10455_v44  ;;  %v13849_v46 = vpop.eup %13848 }
0x31bc   :  { %v10475_v55 = vsub.f32 1.0, %v13849_v46  ;;  %v10477_v38 = vmul.f32 %v13849_v46, %v15755_v52  ;;  %v16004_v52 = vld [vmem:[#allocation11_spill] sm:$0xff] }
0x31bd   :  { %v10473_v48 = vadd.f32 %v10472_v53, %v10245_v47  ;;  %v10616_v51 = vrot.slane %v16004_v52, %v14354_v57  ;;  %v10800_v47 = vrot.slane %v10716_v16, %v14080_v3 }
0x31bf   :  { %13850 = vtanh.f32 %v10473_v48  ;;  %v10617_v2 = vcombine.high %v10616_v51, %v10616_v51  ;;  %v10624_v14 = vrot.slane %v10616_v51, %v14354_v57  ;;  %v10794_v48 = vrot.slane %v10700_v21, %v14080_v3 }
0x31c1   :  { %v10631_v45 = vrot.slane %v10617_v2, %v14354_v57  ;;  %v10760_v0 = vrot.slane %v10624_v14, %v14080_v3 }
0x31c3   :  { %v10764_v62 = vrot.slane %v10631_v45, %v14080_v3  ;;  %v10819_v30 = vsel %vm4302_vm1, %v10817_v28, %v10760_v0 }
0x31c4   :  { %v10821_v53 = vsel %vm4305_vm2, %v10819_v30, %v10770_v37 }
0x31c9   :  { %v13851_v17 = vpop.eup %13850 }
0x31ca   :  { %v10476_v18 = vmul.f32 %v13851_v17, %v10475_v55 }
0x31cc   :  { %v10478_v60 = vadd.f32 %v10477_v38, %v10476_v18  ;;  %v10823_v18 = vsel %vm4308_vm4, %v10821_v53, %v10780_v12  ;;  %v10804_v38 = vrot.slane %v10723_v36, %v14080_v3 }
0x31ce   :  { %10480 = vrot.lane.b32.xlu1 %v10478_v60, %s13954_s24 }
0x3240   :  { %v10481_v32 = vpop.permute.xlu1 %10480 }
0x3241   :  { %v10486_v59 = vsel %vm290_vm13, %v15796_v63, %v10481_v32  ;;  %v10594_v63 = vcombine.high %v10593_v34, %v10593_v34  ;;  %v10825_v32 = vsel %vm4311_vm5, %v10823_v18, %v10790_v25  ;;  %vm16008_vm13 = vcmask 1046528  }
0x3242   :  { %v10487_v11 = vsel %vm4758_vm10, %v10486_v59, %v10484_v56  ;;  %v10827_v26 = vsel %vm16007_vm12, %v10825_v32, %v10800_v47 }
0x3243   :  { %12869 = vmatmul.mubr.msk.f32.vlgmr.msra.gmra.mrb[76].mxu0 %vm5248_vm11, %v10487_v11  ;;  %v10608_v35 = vrot.slane %v10594_v63, %v14354_v57 }
0x3245   :  { %v10754_v61 = vrot.slane %v10608_v35, %v14080_v3 }
0x3247   :  { %v10818_v44 = vsel %vm4299_vm15, %v10583_v15, %v10754_v61  ;;  %vm16010_vm15 = vmmov %vm16008_vm13 }
0x3248   :  { %v10820_v17 = vsel %vm4302_vm1, %v10818_v44, %v10764_v62 }
0x3249   :  { %v10822_v60 = vsel %vm4305_vm2, %v10820_v17, %v10774_v9 }
0x324a   :  { %v10824_v11 = vsel %vm4308_vm4, %v10822_v60, %v10784_v31 }
0x324b   :  { %v10826_v52 = vsel %vm4311_vm5, %v10824_v11, %v10794_v48 }
0x324c   :  { %v10828_v6 = vsel %vm16009_vm14, %v10826_v52, %v10804_v38 }
0x3316   :  { %v10557_v8 = vpop.f32.mrb[76].mxu0 }
0x3317   :  { %v10558_v27 = vadd.f32 %v13870_v24, %v10557_v8  ;;  %v12870_v29 = vpop.f32.mrb[77].mxu0 }
0x3319   :  { %v10731_v1 = vrot.slane %v10558_v27, %v14354_v57 }
0x331b   :  { %v10732_v46 = vcombine.high %v10731_v1, %v10731_v1  ;;  %v10739_v55 = vrot.slane %v10731_v1, %v14354_v57 }
0x331d   :  { %v10746_v56 = vrot.slane %v10732_v46, %v14354_v57  ;;  %v10810_v59 = vrot.slane %v10739_v55, %v14080_v3 }
0x331f   :  { %v10814_v34 = vrot.slane %v10746_v56, %v14080_v3  ;;  %v10829_v51 = vsel %vm16008_vm13, %v10827_v26, %v10810_v59 }
0x3320   :  { %10831 = vst.msk [vmem:[#allocation7] sm:$0xff] %vm194_vm0, %v10829_v51 }
0x3321   :  { %v10830_v57 = vsel %vm16010_vm15, %v10828_v6, %v10814_v34 }
0x3322   :  { %10832 = vst.msk [vmem:[#allocation7 + $0x8] sm:$0xff] %vm194_vm0, %v10830_v57 }
0x3323   :  { %13926 = shalt.err (!%p13923_p6)
}
0x3324   :  { %s13927_s3 = scalar_lea.hbm %s15983_s18, 256 }
0x3325   :  { %p13928_p7 = scmp.ne.s32.totalorder %s15983_s18, %s13927_s3  ;;  %p13931_p8 = scmp.lt.u32.totalorder %s13927_s3, %s15983_s18 }
0x3327   :  { %p13933_p9 = pnand %p13931_p8, %p13928_p7 }
0x3329   :  { %13936 = shalt.err (!%p13933_p9)
}
0x332a   :  { %s13956_s21 = smov 128  }
0x332b   :  { %10844 = dma.vmem_to_hbm [thread:$0]  %s10839_s10, 256, %s15983_s18, [#allocation4], %s13956_s21, %s13956_s21, %s13954_s24  }
0x332c   :  { %13941 = dma.done.wait [#allocation4], 256  }
0x332d   :  { %13942 = vsyncadd [#allocation4], 4294967040 }
0x332e   :  { %10848 = vsyncpa [#allocation3], 1 }
0x332f   :  { %10849 = vsyncpa [#allocation6], 1 }
0x3330   :  { %10850 = vsyncpa [#allocation4], 1 }

</bundles_post_ra>
